<compile_context>
chip_gen: v5e
topology: v5e:2x2
jax: 0.10.0
libtpu: 0.0.40
codegen_flags: <defaults>
</compile_context>

<pallas_src>
import jax
import jax.numpy as jnp
import numpy as np
from jax.experimental import pallas as pl
from jax.experimental.pallas import tpu as pltpu

EPS = 1e-5  # PyTorch BatchNorm2d default eps

_VMEM = pl.BlockSpec(memory_space=pltpu.MemorySpace.VMEM)


def _default_vmem_limit():
    """Generation-dependent scoped-VMEM limit (~3/4 of physical, capped)."""
    try:
        cap = int(pltpu.get_tpu_info().vmem_capacity_bytes)
        return max(32 << 20, min(3 * cap // 4, 96 << 20))
    except Exception:
        return 32 << 20


_VMEM_LIMIT = _default_vmem_limit()


# ----------------------------------------------------------------------------
# In-kernel helpers
# ----------------------------------------------------------------------------
def _bn_scale_shift(valid_parts, n_valid, gamma, beta):
    """Train-mode BatchNorm affine (scale, shift) from one-pass stats over the
    valid sub-views only.  Returns (1,1,1,128) f32 tensors."""
    s1 = None
    s2 = None
    for zp in valid_parts:
        p1 = jnp.sum(zp, axis=(0, 1, 2), keepdims=True)
        p2 = jnp.sum(zp * zp, axis=(0, 1, 2), keepdims=True)
        s1 = p1 if s1 is None else s1 + p1
        s2 = p2 if s2 is None else s2 + p2
    inv_n = 1.0 / float(n_valid)
    mean = s1 * inv_n
    var = jnp.maximum(s2 * inv_n - mean * mean, 0.0)
    inv = jax.lax.rsqrt(var + EPS)
    g = gamma.reshape(1, 1, 1, gamma.shape[-1])
    b = beta.reshape(1, 1, 1, beta.shape[-1])
    scale = inv * g
    shift = b - mean * scale
    return scale, shift


# ----------------------------------------------------------------------------
# Single fused kernel:
#   conv1+BN1+ReLU -> conv2+BN2+ReLU -> conv3+BN3+ReLU -> flatten
#   -> fc1+ReLU -> fc2 -> gather(action)
# ----------------------------------------------------------------------------
def _fused_kernel(x_ref, w1_ref, g1_ref, be1_ref, w2_ref, g2_ref, be2_ref,
                  w3_ref, g3_ref, be3_ref, fw1_ref, fb1_ref, fw2_ref, fb2_ref,
                  a_ref, o_ref):
    f32 = jnp.float32
    bf16 = jnp.bfloat16
    B = x_ref.shape[0]
    k1 = x_ref.shape[3]                    # 32*C (two horizontal cells paired in lanes)

    # ---- conv1: 8x8 stride 4 == 2 row taps of K=32C on the prepped input.
    # x columns are laid out "v-major": pos = v*8 + q  <->  output col 3q+v.
    def tap1(a1):
        t = x_ref[:, a1:a1 + 21, :, :]                       # (B,21,24,32C) bf16
        return t.reshape(B * 21 * 24, k1)

    z1 = jnp.dot(tap1(0), w1_ref[0], preferred_element_type=f32)
    z1 = z1 + jnp.dot(tap1(1), w1_ref[1], preferred_element_type=f32)
    z1 = z1.reshape(B, 21, 24, 128)                          # rows 0..20, colpos v*8+q

    # BN1 over the 21x21 valid outputs (colpos q==7 in each v-group is junk).
    valid1 = [z1[:, :, 8 * v:8 * v + 7, :] for v in range(3)]
    sc1, sh1 = _bn_scale_shift(valid1, B * 21 * 21, g1_ref[...], be1_ref[...])
    y1 = jnp.maximum(z1[:, :, :, :32] * sc1[:, :, :, :32] + sh1[:, :, :, :32], 0.0)
    y1 = y1.astype(bf16)                                     # (B,21,24,32)

    # ---- conv2: 4x4 stride 3.  The 4 kw taps are packed into lanes (K=128);
    # kw=0,1,2 are the three v-groups, kw=3 is the v=0 group shifted one cell.
    y1cat = jnp.concatenate(
        [y1[:, :, 0:8, :], y1[:, :, 8:16, :], y1[:, :, 16:24, :], y1[:, :, 1:9, :]],
        axis=-1)                                             # (B,21,8,128)
    y1cat = y1cat.reshape(B, 7, 3, 8, 128)                   # spatial row = 3*rp + ru
    z2 = None
    for i in range(4):                                       # kh tap: row = 3*(r+a)+u
        a, u = divmod(i, 3)
        t = y1cat[:, a:a + 6, u, :, :].reshape(B * 6 * 8, 128)
        d = jnp.dot(t, w2_ref[i], preferred_element_type=f32)
        z2 = d if z2 is None else z2 + d
    z2 = z2.reshape(B, 6, 8, 128)                            # valid cols 0..5

    sc2, sh2 = _bn_scale_shift([z2[:, :, :6, :]], B * 36, g2_ref[...], be2_ref[...])
    y2 = jnp.maximum(z2[:, :, :, :64] * sc2[:, :, :, :64] + sh2[:, :, :, :64], 0.0)
    y2 = y2.astype(bf16)                                     # (B,6,8,64)

    # ---- conv3: 3x3 stride 1.  The 3 kw taps are packed into lanes (K=192);
    # packed columns >= 6 are junk and only feed invalid output columns.
    y2e = jnp.concatenate([y2, y2], axis=2)                  # (B,6,16,64)
    y2cat = jnp.concatenate([y2e[:, :, j:j + 8, :] for j in range(3)], axis=-1)
    z3 = None
    for i in range(3):
        t = y2cat[:, i:i + 4, :, :].reshape(B * 4 * 8, 192)
        d = jnp.dot(t, w3_ref[i], preferred_element_type=f32)
        z3 = d if z3 is None else z3 + d
    z3 = z3.reshape(B, 4, 8, 128)                            # valid cols 0..3

    sc3, sh3 = _bn_scale_shift([z3[:, :, :4, :]], B * 16, g3_ref[...], be3_ref[...])
    y3 = jnp.maximum(z3[:, :, :, :64] * sc3[:, :, :, :64] + sh3[:, :, :, :64], 0.0)
    y3 = y3.astype(bf16)                                     # (B,4,8,64)

    # ---- flatten (NHWC order; fw1 rows pre-permuted) -> fc1 -> ReLU -> fc2
    flat = jnp.concatenate(
        [y3[:, p, q, :] for p in range(4) for q in range(4)], axis=-1)  # (B,1024)
    h = jnp.dot(flat, fw1_ref[...], preferred_element_type=f32) + fb1_ref[...]
    h = jnp.maximum(h, 0.0).astype(bf16)
    qv = jnp.dot(h, fw2_ref[...], preferred_element_type=f32) + fb2_ref[...]

    # ---- q.gather(-1, action)
    nb, na = qv.shape
    cols = jax.lax.broadcasted_iota(jnp.int32, (nb, na), 1)
    onehot = cols == a_ref[...]
    o_ref[...] = jnp.sum(jnp.where(onehot, qv, 0.0), axis=-1, keepdims=True)


# ----------------------------------------------------------------------------
# Input preparation (XLA side, cheap, one-time per forward)
# ----------------------------------------------------------------------------
def _prep_input(state):
    """Pad, space-to-depth(4), pair the two horizontal conv1 cells into lanes
    and reorder columns v-major  ->  (B, 22, 24, 32*C) bf16."""
    B, C, H, W = state.shape
    x = state.astype(jnp.bfloat16)                    # cast before data movement
    x = jnp.pad(x, ((0, 0), (0, 0), (2, 2), (2, 2)))  # (B,C,88,88)
    x = x.reshape(B, C, 22, 4, 22, 4).transpose(0, 2, 4, 3, 5, 1)
    x = x.reshape(B, 22, 22, 16 * C)                  # s2d(4), channel-last
    x = jnp.pad(x, ((0, 0), (0, 0), (0, 3), (0, 0)))  # cells 22 -> 25 (zeros)
    pieces = []
    for b1 in (0, 1):                                 # the two horizontal cells
        xs = x[:, :, b1:b1 + 24, :]                   # (B,22,24,16C)
        xs = xs.reshape(B, 22, 8, 3, 16 * C).transpose(0, 1, 3, 2, 4)
        pieces.append(xs.reshape(B, 22, 24, 16 * C))  # col pos = v*8 + q
    return jnp.concatenate(pieces, axis=-1)           # (B,22,24,32C)


# ----------------------------------------------------------------------------
# Forward pass (jittable)
# ----------------------------------------------------------------------------
def primary_forward(pp, state, action):
    """state: (B, d_in, 84, 84) f32 NCHW;  action: (B, 1) int  ->  (B,) f32."""
    B, C, H, W = state.shape
    assert H == 84 and W == 84, "flatten==1024 requires 84x84 input"
    x = _prep_input(state)

    k1 = pp["w1g"].shape[1]
    dpad = pp["fw1"].shape[1]
    flops = 2 * B * (2 * 504 * k1 * 128 + 4 * 48 * 128 * 128
                     + 3 * 32 * 192 * 128 + 1024 * dpad + dpad * 128)
    bytes_acc = int(np.prod(x.shape)) * 2 + 2 * B * 4
    for key in ("w1g", "g1", "be1", "w2g", "g2", "be2", "w3g", "g3", "be3",
                "fw1", "fb1", "fw2", "fb2"):
        a = pp[key]
        bytes_acc += int(np.prod(a.shape)) * np.dtype(a.dtype).itemsize

    out = pl.pallas_call(
        _fused_kernel,
        out_shape=jax.ShapeDtypeStruct((B, 1), jnp.float32),
        in_specs=[_VMEM] * 15,
        out_specs=_VMEM,
        compiler_params=pltpu.CompilerParams(vmem_limit_bytes=_VMEM_LIMIT),
        cost_estimate=pl.CostEstimate(flops=int(flops), transcendentals=512,
                                      bytes_accessed=int(bytes_acc)),
    )(x, pp["w1g"], pp["g1"], pp["be1"], pp["w2g"], pp["g2"], pp["be2"],
      pp["w3g"], pp["g3"], pp["be3"], pp["fw1"], pp["fb1"], pp["fw2"],
      pp["fb2"], action.astype(jnp.int32))
    return out[:, 0]                                   # .squeeze(-1)


# ----------------------------------------------------------------------------
# One-time parameter preparation (weight reordering / padding / bf16 cast)
# ----------------------------------------------------------------------------
def prepare_params(p, d_in):
    C = d_in
    f32, bf16 = jnp.float32, jnp.bfloat16

    def pad_vec(v, n=128):
        return jnp.pad(v, (0, n - v.shape[0])).reshape(1, n).astype(f32)

    # conv1 (32, C, 8, 8), stride 4: 2 row taps; the 2 horizontal cells are
    # paired into lanes -> (2, 32C, 128);  lane = b1*16C + (rh*4 + rw)*C + ch.
    w = jnp.transpose(p["cw1"], (2, 3, 1, 0))                       # (kh,kw,C,32)
    w = w.reshape(2, 4, 2, 4, C, 32).transpose(0, 2, 1, 3, 4, 5)    # (a1,b1,rh,rw,C,32)
    w = w.reshape(2, 32 * C, 32)
    w1g = jnp.pad(w, ((0, 0), (0, 0), (0, 96))).astype(bf16)

    # conv2 (64, 32, 4, 4), stride 3: 4 row taps; kw packed into lanes
    # -> (4, 128, 128);  lane = kw*32 + ic.
    w = jnp.transpose(p["cw2"], (2, 3, 1, 0))                       # (4,4,32,64)
    w = w.reshape(4, 128, 64)
    w2g = jnp.pad(w, ((0, 0), (0, 0), (0, 64))).astype(bf16)

    # conv3 (64, 64, 3, 3), stride 1: 3 row taps; kw packed into lanes
    # -> (3, 192, 128);  lane = kw*64 + ic.
    w = jnp.transpose(p["cw3"], (2, 3, 1, 0))                       # (3,3,64,64)
    w = w.reshape(3, 192, 64)
    w3g = jnp.pad(w, ((0, 0), (0, 0), (0, 64))).astype(bf16)

    # fc1: permute rows from torch NCHW-flatten order (c*16+p*4+q) to the
    # kernel's NHWC-flatten order ((p*4+q)*64+c); pad d_hid to a lane multiple.
    d_hid = p["fw1"].shape[1]
    d_out = p["fw2"].shape[1]
    assert d_out <= 128, "d_out > 128 not supported by the single-tile fc2"
    dpad = ((d_hid + 127) // 128) * 128
    fw1 = p["fw1"].reshape(64, 4, 4, d_hid).transpose(1, 2, 0, 3).reshape(1024, d_hid)
    fw1 = jnp.pad(fw1, ((0, 0), (0, dpad - d_hid))).astype(bf16)
    fb1 = jnp.pad(p["fb1"], (0, dpad - d_hid)).reshape(1, dpad).astype(f32)
    fw2 = jnp.pad(p["fw2"], ((0, dpad - d_hid), (0, 128 - d_out))).astype(bf16)
    fb2 = jnp.pad(p["fb2"], (0, 128 - d_out)).reshape(1, 128).astype(f32)

    # NOTE: conv biases cb1/cb2/cb3 are intentionally dropped - a per-channel
    # constant bias cancels exactly under train-mode BatchNorm (z - mean(z)).
    return {
        "w1g": w1g, "g1": pad_vec(p["g1"]), "be1": pad_vec(p["be1"]),
        "w2g": w2g, "g2": pad_vec(p["g2"]), "be2": pad_vec(p["be2"]),
        "w3g": w3g, "g3": pad_vec(p["g3"]), "be3": pad_vec(p["be3"]),
        "fw1": fw1, "fb1": fb1, "fw2": fw2, "fb2": fb2,
    }


# ----------------------------------------------------------------------------
# Pure-JAX reference (correctness check only)
# ----------------------------------------------------------------------------
def reference_forward(params, state, action):
    hi = jax.lax.Precision.HIGHEST

    def block(x, w, b, g, beta, stride, pad):
        z = jax.lax.conv_general_dilated(
            x, w, (stride, stride), [(pad, pad), (pad, pad)],
            dimension_numbers=("NCHW", "OIHW", "NCHW"), precision=hi)
        z = z + b[None, :, None, None]
        mean = z.mean(axis=(0, 2, 3), keepdims=True)
        var = jnp.square(z - mean).mean(axis=(0, 2, 3), keepdims=True)
        y = (z - mean) * jax.lax.rsqrt(var + EPS) * g[None, :, None, None] + beta[None, :, None, None]
        return jnp.maximum(y, 0.0)

    x = block(state, params["cw1"], params["cb1"], params["g1"], params["be1"], 4, 2)
    x = block(x, params["cw2"], params["cb2"], params["g2"], params["be2"], 3, 0)
    x = block(x, params["cw3"], params["cb3"], params["g3"], params["be3"], 1, 0)
    flat = x.reshape(x.shape[0], -1)
    h = jnp.maximum(jnp.dot(flat, params["fw1"], precision=hi) + params["fb1"], 0.0)
    q = jnp.dot(h, params["fw2"], precision=hi) + params["fb2"]
    return jnp.take_along_axis(q, action, axis=-1)[:, 0]


# ----------------------------------------------------------------------------
# Deterministic parameter init + run
# ----------------------------------------------------------------------------
def init_params(key, d_in, d_hid, d_out):
    ks = jax.random.split(key, 10)

    def lin_init(k, shape, fan_in):
        return (jax.random.normal(k, shape, jnp.float32) / np.sqrt(fan_in)).astype(jnp.float32)

    return {
        "cw1": lin_init(ks[0], (32, d_in, 8, 8), d_in * 64),
        "cb1": 0.01 * jax.random.normal(ks[1], (32,), jnp.float32),
        "g1": jnp.ones((32,), jnp.float32), "be1": jnp.zeros((32,), jnp.float32),
        "cw2": lin_init(ks[2], (64, 32, 4, 4), 32 * 16),
        "cb2": 0.01 * jax.random.normal(ks[3], (64,), jnp.float32),
        "g2": jnp.ones((64,), jnp.float32), "be2": jnp.zeros((64,), jnp.float32),
        "cw3": lin_init(ks[4], (64, 64, 3, 3), 64 * 9),
        "cb3": 0.01 * jax.random.normal(ks[5], (64,), jnp.float32),
        "g3": jnp.ones((64,), jnp.float32), "be3": jnp.zeros((64,), jnp.float32),
        "fw1": lin_init(ks[6], (1024, d_hid), 1024),
        "fb1": 0.01 * jax.random.normal(ks[7], (d_hid,), jnp.float32),
        "fw2": lin_init(ks[8], (d_hid, d_out), d_hid),
        "fb2": 0.01 * jax.random.normal(ks[9], (d_out,), jnp.float32),
    }


if __name__ == "__main__":
    B, D_IN, S, D_HID, D_OUT = 2, 4, 84, 128, 6  # 84x84 so flatten == 1024

    root = jax.random.PRNGKey(0)
    kp, kx, ka = jax.random.split(root, 3)
    params = init_params(kp, D_IN, D_HID, D_OUT)
    state = jax.random.normal(kx, (B, D_IN, S, S), jnp.float32)    # replay_memory.state
    action = jax.random.randint(ka, (B, 1), 0, D_OUT, jnp.int32)   # replay_memory.action

    pp = prepare_params(params, D_IN)
    fwd = jax.jit(primary_forward)
    out = jax.block_until_ready(fwd(pp, state, action))
    assert out.shape == (B,) and out.dtype == jnp.float32

    ref = jax.block_until_ready(reference_forward(params, state, action))
    np.testing.assert_allclose(np.asarray(out), np.asarray(ref), rtol=5e-2, atol=5e-2)

    print("KERNEL_OK")
</pallas_src>

<mosaic_0001>
module attributes {stable_mosaic.version = 11 : i64} {
  func.func @_fused_kernel(%arg0: memref<2x22x24x128xbf16, #tpu.memory_space<vmem>>, %arg1: memref<2x128x128xbf16, #tpu.memory_space<vmem>>, %arg2: memref<1x128xf32, #tpu.memory_space<vmem>>, %arg3: memref<1x128xf32, #tpu.memory_space<vmem>>, %arg4: memref<4x128x128xbf16, #tpu.memory_space<vmem>>, %arg5: memref<1x128xf32, #tpu.memory_space<vmem>>, %arg6: memref<1x128xf32, #tpu.memory_space<vmem>>, %arg7: memref<3x192x128xbf16, #tpu.memory_space<vmem>>, %arg8: memref<1x128xf32, #tpu.memory_space<vmem>>, %arg9: memref<1x128xf32, #tpu.memory_space<vmem>>, %arg10: memref<1024x128xbf16, #tpu.memory_space<vmem>>, %arg11: memref<1x128xf32, #tpu.memory_space<vmem>>, %arg12: memref<128x128xbf16, #tpu.memory_space<vmem>>, %arg13: memref<1x128xf32, #tpu.memory_space<vmem>>, %arg14: memref<2x1xi32, #tpu.memory_space<vmem>>, %arg15: memref<2x1xf32, #tpu.memory_space<vmem>>) attributes {dimension_semantics = [], scalar_prefetch = 0 : i64, scratch_operands = 0 : i64, tpu.core_type = #tpu.core_type<tc>} {
    %c0 = arith.constant 0 : index
    %c0_0 = arith.constant 0 : index
    %c0_1 = arith.constant 0 : index
    %c0_2 = arith.constant 0 : index
    %0 = vector.load %arg0[%c0, %c0_0, %c0_1, %c0_2] : memref<2x22x24x128xbf16, #tpu.memory_space<vmem>>, vector<2x21x24x128xbf16>
    %1 = vector.shape_cast %0 : vector<2x21x24x128xbf16> to vector<1008x128xbf16>
    %c0_3 = arith.constant 0 : index
    %c0_4 = arith.constant 0 : index
    %c0_5 = arith.constant 0 : index
    %2 = vector.load %arg1[%c0_3, %c0_4, %c0_5] : memref<2x128x128xbf16, #tpu.memory_space<vmem>>, vector<1x128x128xbf16>
    %3 = vector.shape_cast %2 : vector<1x128x128xbf16> to vector<128x128xbf16>
    %cst = arith.constant dense<0.000000e+00> : vector<1008x128xf32>
    %4 = tpu.matmul %1, %3, %cst {dimension_numbers = #tpu.dot_dimension_numbers<[1], [0], [0], [1], [0, 0, 1, 1], [], []>} : vector<1008x128xbf16>, vector<128x128xbf16>, vector<1008x128xf32> -> vector<1008x128xf32>
    %c0_6 = arith.constant 0 : index
    %c1 = arith.constant 1 : index
    %c0_7 = arith.constant 0 : index
    %c0_8 = arith.constant 0 : index
    %5 = vector.load %arg0[%c0_6, %c1, %c0_7, %c0_8] : memref<2x22x24x128xbf16, #tpu.memory_space<vmem>>, vector<2x21x24x128xbf16>
    %6 = vector.shape_cast %5 : vector<2x21x24x128xbf16> to vector<1008x128xbf16>
    %c1_9 = arith.constant 1 : index
    %c0_10 = arith.constant 0 : index
    %c0_11 = arith.constant 0 : index
    %7 = vector.load %arg1[%c1_9, %c0_10, %c0_11] : memref<2x128x128xbf16, #tpu.memory_space<vmem>>, vector<1x128x128xbf16>
    %8 = vector.shape_cast %7 : vector<1x128x128xbf16> to vector<128x128xbf16>
    %cst_12 = arith.constant dense<0.000000e+00> : vector<1008x128xf32>
    %9 = tpu.matmul %6, %8, %cst_12 {dimension_numbers = #tpu.dot_dimension_numbers<[1], [0], [0], [1], [0, 0, 1, 1], [], []>} : vector<1008x128xbf16>, vector<128x128xbf16>, vector<1008x128xf32> -> vector<1008x128xf32>
    %10 = arith.addf %4, %9 : vector<1008x128xf32>
    %11 = vector.shape_cast %10 : vector<1008x128xf32> to vector<2x21x24x128xf32>
    %12 = vector.extract_strided_slice %11 {offsets = [0, 0, 0, 0], sizes = [2, 21, 7, 128], strides = [1, 1, 1, 1]} : vector<2x21x24x128xf32> to vector<2x21x7x128xf32>
    %13 = vector.extract_strided_slice %11 {offsets = [0, 0, 8, 0], sizes = [2, 21, 7, 128], strides = [1, 1, 1, 1]} : vector<2x21x24x128xf32> to vector<2x21x7x128xf32>
    %14 = vector.extract_strided_slice %11 {offsets = [0, 0, 16, 0], sizes = [2, 21, 7, 128], strides = [1, 1, 1, 1]} : vector<2x21x24x128xf32> to vector<2x21x7x128xf32>
    %c0_13 = arith.constant 0 : index
    %c0_14 = arith.constant 0 : index
    %15 = vector.load %arg2[%c0_13, %c0_14] : memref<1x128xf32, #tpu.memory_space<vmem>>, vector<1x128xf32>
    %c0_15 = arith.constant 0 : index
    %c0_16 = arith.constant 0 : index
    %16 = vector.load %arg3[%c0_15, %c0_16] : memref<1x128xf32, #tpu.memory_space<vmem>>, vector<1x128xf32>
    %cst_17 = arith.constant dense<0.000000e+00> : vector<128xf32>
    %17 = vector.multi_reduction <add>, %12, %cst_17 [0, 1, 2] : vector<2x21x7x128xf32> to vector<128xf32>
    %18 = vector.shape_cast %17 : vector<128xf32> to vector<1x1x1x128xf32>
    %19 = arith.mulf %12, %12 : vector<2x21x7x128xf32>
    %cst_18 = arith.constant dense<0.000000e+00> : vector<128xf32>
    %20 = vector.multi_reduction <add>, %19, %cst_18 [0, 1, 2] : vector<2x21x7x128xf32> to vector<128xf32>
    %21 = vector.shape_cast %20 : vector<128xf32> to vector<1x1x1x128xf32>
    %cst_19 = arith.constant dense<0.000000e+00> : vector<128xf32>
    %22 = vector.multi_reduction <add>, %13, %cst_19 [0, 1, 2] : vector<2x21x7x128xf32> to vector<128xf32>
    %23 = vector.shape_cast %22 : vector<128xf32> to vector<1x1x1x128xf32>
    %24 = arith.mulf %13, %13 : vector<2x21x7x128xf32>
    %cst_20 = arith.constant dense<0.000000e+00> : vector<128xf32>
    %25 = vector.multi_reduction <add>, %24, %cst_20 [0, 1, 2] : vector<2x21x7x128xf32> to vector<128xf32>
    %26 = vector.shape_cast %25 : vector<128xf32> to vector<1x1x1x128xf32>
    %27 = arith.addf %18, %23 : vector<1x1x1x128xf32>
    %28 = arith.addf %21, %26 : vector<1x1x1x128xf32>
    %cst_21 = arith.constant dense<0.000000e+00> : vector<128xf32>
    %29 = vector.multi_reduction <add>, %14, %cst_21 [0, 1, 2] : vector<2x21x7x128xf32> to vector<128xf32>
    %30 = vector.shape_cast %29 : vector<128xf32> to vector<1x1x1x128xf32>
    %31 = arith.mulf %14, %14 : vector<2x21x7x128xf32>
    %cst_22 = arith.constant dense<0.000000e+00> : vector<128xf32>
    %32 = vector.multi_reduction <add>, %31, %cst_22 [0, 1, 2] : vector<2x21x7x128xf32> to vector<128xf32>
    %33 = vector.shape_cast %32 : vector<128xf32> to vector<1x1x1x128xf32>
    %34 = arith.addf %27, %30 : vector<1x1x1x128xf32>
    %35 = arith.addf %28, %33 : vector<1x1x1x128xf32>
    %cst_23 = arith.constant 0.00113378686 : f32
    %36 = vector.broadcast %cst_23 : f32 to vector<1x1x1x128xf32>
    %37 = arith.mulf %34, %36 : vector<1x1x1x128xf32>
    %cst_24 = arith.constant 0.00113378686 : f32
    %38 = vector.broadcast %cst_24 : f32 to vector<1x1x1x128xf32>
    %39 = arith.mulf %35, %38 : vector<1x1x1x128xf32>
    %40 = arith.mulf %37, %37 : vector<1x1x1x128xf32>
    %41 = arith.subf %39, %40 : vector<1x1x1x128xf32>
    %cst_25 = arith.constant 0.000000e+00 : f32
    %42 = vector.broadcast %cst_25 : f32 to vector<1x1x1x128xf32>
    %43 = arith.maximumf %41, %42 : vector<1x1x1x128xf32>
    %cst_26 = arith.constant 9.99999974E-6 : f32
    %44 = vector.broadcast %cst_26 : f32 to vector<1x1x1x128xf32>
    %45 = arith.addf %43, %44 : vector<1x1x1x128xf32>
    %46 = math.rsqrt %45 : vector<1x1x1x128xf32>
    %47 = vector.shape_cast %15 : vector<1x128xf32> to vector<1x1x1x128xf32>
    %48 = vector.shape_cast %16 : vector<1x128xf32> to vector<1x1x1x128xf32>
    %49 = arith.mulf %46, %47 : vector<1x1x1x128xf32>
    %50 = arith.mulf %37, %49 : vector<1x1x1x128xf32>
    %51 = arith.subf %48, %50 : vector<1x1x1x128xf32>
    %52 = vector.extract_strided_slice %11 {offsets = [0, 0, 0, 0], sizes = [2, 21, 24, 32], strides = [1, 1, 1, 1]} : vector<2x21x24x128xf32> to vector<2x21x24x32xf32>
    %53 = vector.extract_strided_slice %49 {offsets = [0, 0, 0, 0], sizes = [1, 1, 1, 32], strides = [1, 1, 1, 1]} : vector<1x1x1x128xf32> to vector<1x1x1x32xf32>
    %54 = vector.broadcast %53 : vector<1x1x1x32xf32> to vector<2x21x24x32xf32>
    %55 = arith.mulf %52, %54 : vector<2x21x24x32xf32>
    %56 = vector.extract_strided_slice %51 {offsets = [0, 0, 0, 0], sizes = [1, 1, 1, 32], strides = [1, 1, 1, 1]} : vector<1x1x1x128xf32> to vector<1x1x1x32xf32>
    %57 = vector.broadcast %56 : vector<1x1x1x32xf32> to vector<2x21x24x32xf32>
    %58 = arith.addf %55, %57 : vector<2x21x24x32xf32>
    %cst_27 = arith.constant 0.000000e+00 : f32
    %59 = vector.broadcast %cst_27 : f32 to vector<2x21x24x32xf32>
    %60 = arith.maximumf %58, %59 : vector<2x21x24x32xf32>
    %61 = arith.truncf %60 : vector<2x21x24x32xf32> to vector<2x21x24x32xbf16>
    %62 = vector.extract_strided_slice %61 {offsets = [0, 0, 0, 0], sizes = [2, 21, 8, 32], strides = [1, 1, 1, 1]} : vector<2x21x24x32xbf16> to vector<2x21x8x32xbf16>
    %63 = vector.extract_strided_slice %61 {offsets = [0, 0, 8, 0], sizes = [2, 21, 8, 32], strides = [1, 1, 1, 1]} : vector<2x21x24x32xbf16> to vector<2x21x8x32xbf16>
    %64 = vector.extract_strided_slice %61 {offsets = [0, 0, 16, 0], sizes = [2, 21, 8, 32], strides = [1, 1, 1, 1]} : vector<2x21x24x32xbf16> to vector<2x21x8x32xbf16>
    %65 = vector.extract_strided_slice %61 {offsets = [0, 0, 1, 0], sizes = [2, 21, 8, 32], strides = [1, 1, 1, 1]} : vector<2x21x24x32xbf16> to vector<2x21x8x32xbf16>
    %66 = tpu.concatenate %62, %63, %64, %65 in 3 : vector<2x21x8x32xbf16>, vector<2x21x8x32xbf16>, vector<2x21x8x32xbf16>, vector<2x21x8x32xbf16> -> vector<2x21x8x128xbf16>
    %67 = vector.shape_cast %66 : vector<2x21x8x128xbf16> to vector<2x7x3x8x128xbf16>
    %68 = vector.extract_strided_slice %67 {offsets = [0, 0, 0, 0, 0], sizes = [2, 6, 1, 8, 128], strides = [1, 1, 1, 1, 1]} : vector<2x7x3x8x128xbf16> to vector<2x6x1x8x128xbf16>
    %69 = vector.shape_cast %68 : vector<2x6x1x8x128xbf16> to vector<2x6x8x128xbf16>
    %70 = vector.shape_cast %69 : vector<2x6x8x128xbf16> to vector<96x128xbf16>
    %c0_28 = arith.constant 0 : index
    %c0_29 = arith.constant 0 : index
    %c0_30 = arith.constant 0 : index
    %71 = vector.load %arg4[%c0_28, %c0_29, %c0_30] : memref<4x128x128xbf16, #tpu.memory_space<vmem>>, vector<1x128x128xbf16>
    %72 = vector.shape_cast %71 : vector<1x128x128xbf16> to vector<128x128xbf16>
    %cst_31 = arith.constant dense<0.000000e+00> : vector<96x128xf32>
    %73 = tpu.matmul %70, %72, %cst_31 {dimension_numbers = #tpu.dot_dimension_numbers<[1], [0], [0], [1], [0, 0, 1, 1], [], []>} : vector<96x128xbf16>, vector<128x128xbf16>, vector<96x128xf32> -> vector<96x128xf32>
    %74 = vector.extract_strided_slice %67 {offsets = [0, 0, 1, 0, 0], sizes = [2, 6, 1, 8, 128], strides = [1, 1, 1, 1, 1]} : vector<2x7x3x8x128xbf16> to vector<2x6x1x8x128xbf16>
    %75 = vector.shape_cast %74 : vector<2x6x1x8x128xbf16> to vector<2x6x8x128xbf16>
    %76 = vector.shape_cast %75 : vector<2x6x8x128xbf16> to vector<96x128xbf16>
    %c1_32 = arith.constant 1 : index
    %c0_33 = arith.constant 0 : index
    %c0_34 = arith.constant 0 : index
    %77 = vector.load %arg4[%c1_32, %c0_33, %c0_34] : memref<4x128x128xbf16, #tpu.memory_space<vmem>>, vector<1x128x128xbf16>
    %78 = vector.shape_cast %77 : vector<1x128x128xbf16> to vector<128x128xbf16>
    %cst_35 = arith.constant dense<0.000000e+00> : vector<96x128xf32>
    %79 = tpu.matmul %76, %78, %cst_35 {dimension_numbers = #tpu.dot_dimension_numbers<[1], [0], [0], [1], [0, 0, 1, 1], [], []>} : vector<96x128xbf16>, vector<128x128xbf16>, vector<96x128xf32> -> vector<96x128xf32>
    %80 = arith.addf %73, %79 : vector<96x128xf32>
    %81 = vector.extract_strided_slice %67 {offsets = [0, 0, 2, 0, 0], sizes = [2, 6, 1, 8, 128], strides = [1, 1, 1, 1, 1]} : vector<2x7x3x8x128xbf16> to vector<2x6x1x8x128xbf16>
    %82 = vector.shape_cast %81 : vector<2x6x1x8x128xbf16> to vector<2x6x8x128xbf16>
    %83 = vector.shape_cast %82 : vector<2x6x8x128xbf16> to vector<96x128xbf16>
    %c2 = arith.constant 2 : index
    %c0_36 = arith.constant 0 : index
    %c0_37 = arith.constant 0 : index
    %84 = vector.load %arg4[%c2, %c0_36, %c0_37] : memref<4x128x128xbf16, #tpu.memory_space<vmem>>, vector<1x128x128xbf16>
    %85 = vector.shape_cast %84 : vector<1x128x128xbf16> to vector<128x128xbf16>
    %cst_38 = arith.constant dense<0.000000e+00> : vector<96x128xf32>
    %86 = tpu.matmul %83, %85, %cst_38 {dimension_numbers = #tpu.dot_dimension_numbers<[1], [0], [0], [1], [0, 0, 1, 1], [], []>} : vector<96x128xbf16>, vector<128x128xbf16>, vector<96x128xf32> -> vector<96x128xf32>
    %87 = arith.addf %80, %86 : vector<96x128xf32>
    %88 = vector.extract_strided_slice %67 {offsets = [0, 1, 0, 0, 0], sizes = [2, 6, 1, 8, 128], strides = [1, 1, 1, 1, 1]} : vector<2x7x3x8x128xbf16> to vector<2x6x1x8x128xbf16>
    %89 = vector.shape_cast %88 : vector<2x6x1x8x128xbf16> to vector<2x6x8x128xbf16>
    %90 = vector.shape_cast %89 : vector<2x6x8x128xbf16> to vector<96x128xbf16>
    %c3 = arith.constant 3 : index
    %c0_39 = arith.constant 0 : index
    %c0_40 = arith.constant 0 : index
    %91 = vector.load %arg4[%c3, %c0_39, %c0_40] : memref<4x128x128xbf16, #tpu.memory_space<vmem>>, vector<1x128x128xbf16>
    %92 = vector.shape_cast %91 : vector<1x128x128xbf16> to vector<128x128xbf16>
    %cst_41 = arith.constant dense<0.000000e+00> : vector<96x128xf32>
    %93 = tpu.matmul %90, %92, %cst_41 {dimension_numbers = #tpu.dot_dimension_numbers<[1], [0], [0], [1], [0, 0, 1, 1], [], []>} : vector<96x128xbf16>, vector<128x128xbf16>, vector<96x128xf32> -> vector<96x128xf32>
    %94 = arith.addf %87, %93 : vector<96x128xf32>
    %95 = vector.shape_cast %94 : vector<96x128xf32> to vector<2x6x8x128xf32>
    %96 = vector.extract_strided_slice %95 {offsets = [0, 0, 0, 0], sizes = [2, 6, 6, 128], strides = [1, 1, 1, 1]} : vector<2x6x8x128xf32> to vector<2x6x6x128xf32>
    %c0_42 = arith.constant 0 : index
    %c0_43 = arith.constant 0 : index
    %97 = vector.load %arg5[%c0_42, %c0_43] : memref<1x128xf32, #tpu.memory_space<vmem>>, vector<1x128xf32>
    %c0_44 = arith.constant 0 : index
    %c0_45 = arith.constant 0 : index
    %98 = vector.load %arg6[%c0_44, %c0_45] : memref<1x128xf32, #tpu.memory_space<vmem>>, vector<1x128xf32>
    %cst_46 = arith.constant dense<0.000000e+00> : vector<128xf32>
    %99 = vector.multi_reduction <add>, %96, %cst_46 [0, 1, 2] : vector<2x6x6x128xf32> to vector<128xf32>
    %100 = vector.shape_cast %99 : vector<128xf32> to vector<1x1x1x128xf32>
    %101 = arith.mulf %96, %96 : vector<2x6x6x128xf32>
    %cst_47 = arith.constant dense<0.000000e+00> : vector<128xf32>
    %102 = vector.multi_reduction <add>, %101, %cst_47 [0, 1, 2] : vector<2x6x6x128xf32> to vector<128xf32>
    %103 = vector.shape_cast %102 : vector<128xf32> to vector<1x1x1x128xf32>
    %cst_48 = arith.constant 0.013888889 : f32
    %104 = vector.broadcast %cst_48 : f32 to vector<1x1x1x128xf32>
    %105 = arith.mulf %100, %104 : vector<1x1x1x128xf32>
    %cst_49 = arith.constant 0.013888889 : f32
    %106 = vector.broadcast %cst_49 : f32 to vector<1x1x1x128xf32>
    %107 = arith.mulf %103, %106 : vector<1x1x1x128xf32>
    %108 = arith.mulf %105, %105 : vector<1x1x1x128xf32>
    %109 = arith.subf %107, %108 : vector<1x1x1x128xf32>
    %cst_50 = arith.constant 0.000000e+00 : f32
    %110 = vector.broadcast %cst_50 : f32 to vector<1x1x1x128xf32>
    %111 = arith.maximumf %109, %110 : vector<1x1x1x128xf32>
    %cst_51 = arith.constant 9.99999974E-6 : f32
    %112 = vector.broadcast %cst_51 : f32 to vector<1x1x1x128xf32>
    %113 = arith.addf %111, %112 : vector<1x1x1x128xf32>
    %114 = math.rsqrt %113 : vector<1x1x1x128xf32>
    %115 = vector.shape_cast %97 : vector<1x128xf32> to vector<1x1x1x128xf32>
    %116 = vector.shape_cast %98 : vector<1x128xf32> to vector<1x1x1x128xf32>
    %117 = arith.mulf %114, %115 : vector<1x1x1x128xf32>
    %118 = arith.mulf %105, %117 : vector<1x1x1x128xf32>
    %119 = arith.subf %116, %118 : vector<1x1x1x128xf32>
    %120 = vector.extract_strided_slice %95 {offsets = [0, 0, 0, 0], sizes = [2, 6, 8, 64], strides = [1, 1, 1, 1]} : vector<2x6x8x128xf32> to vector<2x6x8x64xf32>
    %121 = vector.extract_strided_slice %117 {offsets = [0, 0, 0, 0], sizes = [1, 1, 1, 64], strides = [1, 1, 1, 1]} : vector<1x1x1x128xf32> to vector<1x1x1x64xf32>
    %122 = vector.broadcast %121 : vector<1x1x1x64xf32> to vector<2x6x8x64xf32>
    %123 = arith.mulf %120, %122 : vector<2x6x8x64xf32>
    %124 = vector.extract_strided_slice %119 {offsets = [0, 0, 0, 0], sizes = [1, 1, 1, 64], strides = [1, 1, 1, 1]} : vector<1x1x1x128xf32> to vector<1x1x1x64xf32>
    %125 = vector.broadcast %124 : vector<1x1x1x64xf32> to vector<2x6x8x64xf32>
    %126 = arith.addf %123, %125 : vector<2x6x8x64xf32>
    %cst_52 = arith.constant 0.000000e+00 : f32
    %127 = vector.broadcast %cst_52 : f32 to vector<2x6x8x64xf32>
    %128 = arith.maximumf %126, %127 : vector<2x6x8x64xf32>
    %129 = arith.truncf %128 : vector<2x6x8x64xf32> to vector<2x6x8x64xbf16>
    %130 = tpu.concatenate %129, %129 in 2 : vector<2x6x8x64xbf16>, vector<2x6x8x64xbf16> -> vector<2x6x16x64xbf16>
    %131 = vector.extract_strided_slice %130 {offsets = [0, 0, 0, 0], sizes = [2, 6, 8, 64], strides = [1, 1, 1, 1]} : vector<2x6x16x64xbf16> to vector<2x6x8x64xbf16>
    %132 = vector.extract_strided_slice %130 {offsets = [0, 0, 1, 0], sizes = [2, 6, 8, 64], strides = [1, 1, 1, 1]} : vector<2x6x16x64xbf16> to vector<2x6x8x64xbf16>
    %133 = vector.extract_strided_slice %130 {offsets = [0, 0, 2, 0], sizes = [2, 6, 8, 64], strides = [1, 1, 1, 1]} : vector<2x6x16x64xbf16> to vector<2x6x8x64xbf16>
    %134 = tpu.concatenate %131, %132, %133 in 3 : vector<2x6x8x64xbf16>, vector<2x6x8x64xbf16>, vector<2x6x8x64xbf16> -> vector<2x6x8x192xbf16>
    %135 = vector.extract_strided_slice %134 {offsets = [0, 0, 0, 0], sizes = [2, 4, 8, 192], strides = [1, 1, 1, 1]} : vector<2x6x8x192xbf16> to vector<2x4x8x192xbf16>
    %136 = vector.shape_cast %135 : vector<2x4x8x192xbf16> to vector<64x192xbf16>
    %c0_53 = arith.constant 0 : index
    %c0_54 = arith.constant 0 : index
    %c0_55 = arith.constant 0 : index
    %137 = vector.load %arg7[%c0_53, %c0_54, %c0_55] : memref<3x192x128xbf16, #tpu.memory_space<vmem>>, vector<1x192x128xbf16>
    %138 = vector.shape_cast %137 : vector<1x192x128xbf16> to vector<192x128xbf16>
    %cst_56 = arith.constant dense<0.000000e+00> : vector<64x128xf32>
    %139 = tpu.matmul %136, %138, %cst_56 {dimension_numbers = #tpu.dot_dimension_numbers<[1], [0], [0], [1], [0, 0, 1, 1], [], []>} : vector<64x192xbf16>, vector<192x128xbf16>, vector<64x128xf32> -> vector<64x128xf32>
    %140 = vector.extract_strided_slice %134 {offsets = [0, 1, 0, 0], sizes = [2, 4, 8, 192], strides = [1, 1, 1, 1]} : vector<2x6x8x192xbf16> to vector<2x4x8x192xbf16>
    %141 = vector.shape_cast %140 : vector<2x4x8x192xbf16> to vector<64x192xbf16>
    %c1_57 = arith.constant 1 : index
    %c0_58 = arith.constant 0 : index
    %c0_59 = arith.constant 0 : index
    %142 = vector.load %arg7[%c1_57, %c0_58, %c0_59] : memref<3x192x128xbf16, #tpu.memory_space<vmem>>, vector<1x192x128xbf16>
    %143 = vector.shape_cast %142 : vector<1x192x128xbf16> to vector<192x128xbf16>
    %cst_60 = arith.constant dense<0.000000e+00> : vector<64x128xf32>
    %144 = tpu.matmul %141, %143, %cst_60 {dimension_numbers = #tpu.dot_dimension_numbers<[1], [0], [0], [1], [0, 0, 1, 1], [], []>} : vector<64x192xbf16>, vector<192x128xbf16>, vector<64x128xf32> -> vector<64x128xf32>
    %145 = arith.addf %139, %144 : vector<64x128xf32>
    %146 = vector.extract_strided_slice %134 {offsets = [0, 2, 0, 0], sizes = [2, 4, 8, 192], strides = [1, 1, 1, 1]} : vector<2x6x8x192xbf16> to vector<2x4x8x192xbf16>
    %147 = vector.shape_cast %146 : vector<2x4x8x192xbf16> to vector<64x192xbf16>
    %c2_61 = arith.constant 2 : index
    %c0_62 = arith.constant 0 : index
    %c0_63 = arith.constant 0 : index
    %148 = vector.load %arg7[%c2_61, %c0_62, %c0_63] : memref<3x192x128xbf16, #tpu.memory_space<vmem>>, vector<1x192x128xbf16>
    %149 = vector.shape_cast %148 : vector<1x192x128xbf16> to vector<192x128xbf16>
    %cst_64 = arith.constant dense<0.000000e+00> : vector<64x128xf32>
    %150 = tpu.matmul %147, %149, %cst_64 {dimension_numbers = #tpu.dot_dimension_numbers<[1], [0], [0], [1], [0, 0, 1, 1], [], []>} : vector<64x192xbf16>, vector<192x128xbf16>, vector<64x128xf32> -> vector<64x128xf32>
    %151 = arith.addf %145, %150 : vector<64x128xf32>
    %152 = vector.shape_cast %151 : vector<64x128xf32> to vector<2x4x8x128xf32>
    %153 = vector.extract_strided_slice %152 {offsets = [0, 0, 0, 0], sizes = [2, 4, 4, 128], strides = [1, 1, 1, 1]} : vector<2x4x8x128xf32> to vector<2x4x4x128xf32>
    %c0_65 = arith.constant 0 : index
    %c0_66 = arith.constant 0 : index
    %154 = vector.load %arg8[%c0_65, %c0_66] : memref<1x128xf32, #tpu.memory_space<vmem>>, vector<1x128xf32>
    %c0_67 = arith.constant 0 : index
    %c0_68 = arith.constant 0 : index
    %155 = vector.load %arg9[%c0_67, %c0_68] : memref<1x128xf32, #tpu.memory_space<vmem>>, vector<1x128xf32>
    %cst_69 = arith.constant dense<0.000000e+00> : vector<128xf32>
    %156 = vector.multi_reduction <add>, %153, %cst_69 [0, 1, 2] : vector<2x4x4x128xf32> to vector<128xf32>
    %157 = vector.shape_cast %156 : vector<128xf32> to vector<1x1x1x128xf32>
    %158 = arith.mulf %153, %153 : vector<2x4x4x128xf32>
    %cst_70 = arith.constant dense<0.000000e+00> : vector<128xf32>
    %159 = vector.multi_reduction <add>, %158, %cst_70 [0, 1, 2] : vector<2x4x4x128xf32> to vector<128xf32>
    %160 = vector.shape_cast %159 : vector<128xf32> to vector<1x1x1x128xf32>
    %cst_71 = arith.constant 3.125000e-02 : f32
    %161 = vector.broadcast %cst_71 : f32 to vector<1x1x1x128xf32>
    %162 = arith.mulf %157, %161 : vector<1x1x1x128xf32>
    %cst_72 = arith.constant 3.125000e-02 : f32
    %163 = vector.broadcast %cst_72 : f32 to vector<1x1x1x128xf32>
    %164 = arith.mulf %160, %163 : vector<1x1x1x128xf32>
    %165 = arith.mulf %162, %162 : vector<1x1x1x128xf32>
    %166 = arith.subf %164, %165 : vector<1x1x1x128xf32>
    %cst_73 = arith.constant 0.000000e+00 : f32
    %167 = vector.broadcast %cst_73 : f32 to vector<1x1x1x128xf32>
    %168 = arith.maximumf %166, %167 : vector<1x1x1x128xf32>
    %cst_74 = arith.constant 9.99999974E-6 : f32
    %169 = vector.broadcast %cst_74 : f32 to vector<1x1x1x128xf32>
    %170 = arith.addf %168, %169 : vector<1x1x1x128xf32>
    %171 = math.rsqrt %170 : vector<1x1x1x128xf32>
    %172 = vector.shape_cast %154 : vector<1x128xf32> to vector<1x1x1x128xf32>
    %173 = vector.shape_cast %155 : vector<1x128xf32> to vector<1x1x1x128xf32>
    %174 = arith.mulf %171, %172 : vector<1x1x1x128xf32>
    %175 = arith.mulf %162, %174 : vector<1x1x1x128xf32>
    %176 = arith.subf %173, %175 : vector<1x1x1x128xf32>
    %177 = vector.extract_strided_slice %152 {offsets = [0, 0, 0, 0], sizes = [2, 4, 8, 64], strides = [1, 1, 1, 1]} : vector<2x4x8x128xf32> to vector<2x4x8x64xf32>
    %178 = vector.extract_strided_slice %174 {offsets = [0, 0, 0, 0], sizes = [1, 1, 1, 64], strides = [1, 1, 1, 1]} : vector<1x1x1x128xf32> to vector<1x1x1x64xf32>
    %179 = vector.broadcast %178 : vector<1x1x1x64xf32> to vector<2x4x8x64xf32>
    %180 = arith.mulf %177, %179 : vector<2x4x8x64xf32>
    %181 = vector.extract_strided_slice %176 {offsets = [0, 0, 0, 0], sizes = [1, 1, 1, 64], strides = [1, 1, 1, 1]} : vector<1x1x1x128xf32> to vector<1x1x1x64xf32>
    %182 = vector.broadcast %181 : vector<1x1x1x64xf32> to vector<2x4x8x64xf32>
    %183 = arith.addf %180, %182 : vector<2x4x8x64xf32>
    %cst_75 = arith.constant 0.000000e+00 : f32
    %184 = vector.broadcast %cst_75 : f32 to vector<2x4x8x64xf32>
    %185 = arith.maximumf %183, %184 : vector<2x4x8x64xf32>
    %186 = arith.truncf %185 : vector<2x4x8x64xf32> to vector<2x4x8x64xbf16>
    %187 = vector.extract_strided_slice %186 {offsets = [0, 0, 0, 0], sizes = [2, 1, 1, 64], strides = [1, 1, 1, 1]} : vector<2x4x8x64xbf16> to vector<2x1x1x64xbf16>
    %188 = vector.shape_cast %187 : vector<2x1x1x64xbf16> to vector<2x64xbf16>
    %189 = vector.extract_strided_slice %186 {offsets = [0, 0, 1, 0], sizes = [2, 1, 1, 64], strides = [1, 1, 1, 1]} : vector<2x4x8x64xbf16> to vector<2x1x1x64xbf16>
    %190 = vector.shape_cast %189 : vector<2x1x1x64xbf16> to vector<2x64xbf16>
    %191 = vector.extract_strided_slice %186 {offsets = [0, 0, 2, 0], sizes = [2, 1, 1, 64], strides = [1, 1, 1, 1]} : vector<2x4x8x64xbf16> to vector<2x1x1x64xbf16>
    %192 = vector.shape_cast %191 : vector<2x1x1x64xbf16> to vector<2x64xbf16>
    %193 = vector.extract_strided_slice %186 {offsets = [0, 0, 3, 0], sizes = [2, 1, 1, 64], strides = [1, 1, 1, 1]} : vector<2x4x8x64xbf16> to vector<2x1x1x64xbf16>
    %194 = vector.shape_cast %193 : vector<2x1x1x64xbf16> to vector<2x64xbf16>
    %195 = vector.extract_strided_slice %186 {offsets = [0, 1, 0, 0], sizes = [2, 1, 1, 64], strides = [1, 1, 1, 1]} : vector<2x4x8x64xbf16> to vector<2x1x1x64xbf16>
    %196 = vector.shape_cast %195 : vector<2x1x1x64xbf16> to vector<2x64xbf16>
    %197 = vector.extract_strided_slice %186 {offsets = [0, 1, 1, 0], sizes = [2, 1, 1, 64], strides = [1, 1, 1, 1]} : vector<2x4x8x64xbf16> to vector<2x1x1x64xbf16>
    %198 = vector.shape_cast %197 : vector<2x1x1x64xbf16> to vector<2x64xbf16>
    %199 = vector.extract_strided_slice %186 {offsets = [0, 1, 2, 0], sizes = [2, 1, 1, 64], strides = [1, 1, 1, 1]} : vector<2x4x8x64xbf16> to vector<2x1x1x64xbf16>
    %200 = vector.shape_cast %199 : vector<2x1x1x64xbf16> to vector<2x64xbf16>
    %201 = vector.extract_strided_slice %186 {offsets = [0, 1, 3, 0], sizes = [2, 1, 1, 64], strides = [1, 1, 1, 1]} : vector<2x4x8x64xbf16> to vector<2x1x1x64xbf16>
    %202 = vector.shape_cast %201 : vector<2x1x1x64xbf16> to vector<2x64xbf16>
    %203 = vector.extract_strided_slice %186 {offsets = [0, 2, 0, 0], sizes = [2, 1, 1, 64], strides = [1, 1, 1, 1]} : vector<2x4x8x64xbf16> to vector<2x1x1x64xbf16>
    %204 = vector.shape_cast %203 : vector<2x1x1x64xbf16> to vector<2x64xbf16>
    %205 = vector.extract_strided_slice %186 {offsets = [0, 2, 1, 0], sizes = [2, 1, 1, 64], strides = [1, 1, 1, 1]} : vector<2x4x8x64xbf16> to vector<2x1x1x64xbf16>
    %206 = vector.shape_cast %205 : vector<2x1x1x64xbf16> to vector<2x64xbf16>
    %207 = vector.extract_strided_slice %186 {offsets = [0, 2, 2, 0], sizes = [2, 1, 1, 64], strides = [1, 1, 1, 1]} : vector<2x4x8x64xbf16> to vector<2x1x1x64xbf16>
    %208 = vector.shape_cast %207 : vector<2x1x1x64xbf16> to vector<2x64xbf16>
    %209 = vector.extract_strided_slice %186 {offsets = [0, 2, 3, 0], sizes = [2, 1, 1, 64], strides = [1, 1, 1, 1]} : vector<2x4x8x64xbf16> to vector<2x1x1x64xbf16>
    %210 = vector.shape_cast %209 : vector<2x1x1x64xbf16> to vector<2x64xbf16>
    %211 = vector.extract_strided_slice %186 {offsets = [0, 3, 0, 0], sizes = [2, 1, 1, 64], strides = [1, 1, 1, 1]} : vector<2x4x8x64xbf16> to vector<2x1x1x64xbf16>
    %212 = vector.shape_cast %211 : vector<2x1x1x64xbf16> to vector<2x64xbf16>
    %213 = vector.extract_strided_slice %186 {offsets = [0, 3, 1, 0], sizes = [2, 1, 1, 64], strides = [1, 1, 1, 1]} : vector<2x4x8x64xbf16> to vector<2x1x1x64xbf16>
    %214 = vector.shape_cast %213 : vector<2x1x1x64xbf16> to vector<2x64xbf16>
    %215 = vector.extract_strided_slice %186 {offsets = [0, 3, 2, 0], sizes = [2, 1, 1, 64], strides = [1, 1, 1, 1]} : vector<2x4x8x64xbf16> to vector<2x1x1x64xbf16>
    %216 = vector.shape_cast %215 : vector<2x1x1x64xbf16> to vector<2x64xbf16>
    %217 = vector.extract_strided_slice %186 {offsets = [0, 3, 3, 0], sizes = [2, 1, 1, 64], strides = [1, 1, 1, 1]} : vector<2x4x8x64xbf16> to vector<2x1x1x64xbf16>
    %218 = vector.shape_cast %217 : vector<2x1x1x64xbf16> to vector<2x64xbf16>
    %219 = tpu.concatenate %188, %190, %192, %194, %196, %198, %200, %202, %204, %206, %208, %210, %212, %214, %216, %218 in 1 : vector<2x64xbf16>, vector<2x64xbf16>, vector<2x64xbf16>, vector<2x64xbf16>, vector<2x64xbf16>, vector<2x64xbf16>, vector<2x64xbf16>, vector<2x64xbf16>, vector<2x64xbf16>, vector<2x64xbf16>, vector<2x64xbf16>, vector<2x64xbf16>, vector<2x64xbf16>, vector<2x64xbf16>, vector<2x64xbf16>, vector<2x64xbf16> -> vector<2x1024xbf16>
    %c0_76 = arith.constant 0 : index
    %c0_77 = arith.constant 0 : index
    %220 = vector.load %arg10[%c0_76, %c0_77] : memref<1024x128xbf16, #tpu.memory_space<vmem>>, vector<1024x128xbf16>
    %cst_78 = arith.constant dense<0.000000e+00> : vector<2x128xf32>
    %221 = tpu.matmul %219, %220, %cst_78 {dimension_numbers = #tpu.dot_dimension_numbers<[1], [0], [0], [1], [0, 0, 1, 1], [], []>} : vector<2x1024xbf16>, vector<1024x128xbf16>, vector<2x128xf32> -> vector<2x128xf32>
    %c0_79 = arith.constant 0 : index
    %c0_80 = arith.constant 0 : index
    %222 = vector.load %arg11[%c0_79, %c0_80] : memref<1x128xf32, #tpu.memory_space<vmem>>, vector<1x128xf32>
    %223 = vector.broadcast %222 : vector<1x128xf32> to vector<2x128xf32>
    %224 = arith.addf %221, %223 : vector<2x128xf32>
    %cst_81 = arith.constant 0.000000e+00 : f32
    %225 = vector.broadcast %cst_81 : f32 to vector<2x128xf32>
    %226 = arith.maximumf %224, %225 : vector<2x128xf32>
    %227 = arith.truncf %226 : vector<2x128xf32> to vector<2x128xbf16>
    %c0_82 = arith.constant 0 : index
    %c0_83 = arith.constant 0 : index
    %228 = vector.load %arg12[%c0_82, %c0_83] : memref<128x128xbf16, #tpu.memory_space<vmem>>, vector<128x128xbf16>
    %cst_84 = arith.constant dense<0.000000e+00> : vector<2x128xf32>
    %229 = tpu.matmul %227, %228, %cst_84 {dimension_numbers = #tpu.dot_dimension_numbers<[1], [0], [0], [1], [0, 0, 1, 1], [], []>} : vector<2x128xbf16>, vector<128x128xbf16>, vector<2x128xf32> -> vector<2x128xf32>
    %c0_85 = arith.constant 0 : index
    %c0_86 = arith.constant 0 : index
    %230 = vector.load %arg13[%c0_85, %c0_86] : memref<1x128xf32, #tpu.memory_space<vmem>>, vector<1x128xf32>
    %231 = vector.broadcast %230 : vector<1x128xf32> to vector<2x128xf32>
    %232 = arith.addf %229, %231 : vector<2x128xf32>
    %233 = tpu.iota {dimensions = array<i32: 1>} : vector<2x128xi32>
    %c0_87 = arith.constant 0 : index
    %c0_88 = arith.constant 0 : index
    %234 = vector.load %arg14[%c0_87, %c0_88] : memref<2x1xi32, #tpu.memory_space<vmem>>, vector<2x1xi32>
    %235 = vector.broadcast %234 : vector<2x1xi32> to vector<2x128xi32>
    %236 = arith.cmpi eq, %233, %235 : vector<2x128xi32>
    %cst_89 = arith.constant 0.000000e+00 : f32
    %237 = vector.broadcast %cst_89 : f32 to vector<2x128xf32>
    %238 = arith.select %236, %232, %237 : vector<2x128xi1>, vector<2x128xf32>
    %cst_90 = arith.constant dense<0.000000e+00> : vector<2xf32>
    %239 = vector.multi_reduction <add>, %238, %cst_90 [1] : vector<2x128xf32> to vector<2xf32>
    %240 = vector.shape_cast %239 : vector<2xf32> to vector<2x1xf32>
    %c0_91 = arith.constant 0 : index
    %c0_92 = arith.constant 0 : index
    %241 = vector.load %arg15[%c0_91, %c0_92] : memref<2x1xf32, #tpu.memory_space<vmem>>, vector<2x1xf32>
    tpu.vector_store %arg15[%c0_91, %c0_92], %240 {strides = array<i32>} : memref<2x1xf32, #tpu.memory_space<vmem>>, vector<2x1xf32>,
    return
  }
}

</mosaic_0001>

<bundles_post_ra>
// kernel: primary_forward.1
= control target key start
LH: loop header
LB: loop body
LE: loop exit
PB: predicated region body
PF: predicated region fallthrough
CT: control target
= control target key end

     0   :  { %vm1839_vm0 = vcmask 1046528   ;;  %s8245_s22 = smov 96   ;;  %vm3819_vm4 = vcmask 261120   ;;  %vm3934_vm5 = vcmask 523264   ;;  %vm4011_vm6 = vcmask 785408   ;;  %s11883_s1 = inlined_call_operand.vmem [shape: bf16[2,128,128], index: 1, kind: input, shape index: {}]   ;;  %s11884_s0 = inlined_call_operand.vmem [shape: bf16[2,22,24,128], index: 0, kind: input, shape index: {}]   ;;  %s11885_s2 = inlined_call_operand.vmem [shape: f32[1,128], index: 2, kind: input, shape index: {}]   ;;  %s11886_s3 = inlined_call_operand.vmem [shape: f32[1,128], index: 3, kind: input, shape index: {}]   ;;  %s11887_s4 = inlined_call_operand.vmem [shape: bf16[4,128,128], index: 4, kind: input, shape index: {}]   ;;  %s11888_s7 = inlined_call_operand.vmem [shape: bf16[3,192,128], index: 7, kind: input, shape index: {}]   ;;  %s11889_s5 = inlined_call_operand.vmem [shape: f32[1,128], index: 5, kind: input, shape index: {}]   ;;  %s11890_s6 = inlined_call_operand.vmem [shape: f32[1,128], index: 6, kind: input, shape index: {}]   ;;  %s11891_s8 = inlined_call_operand.vmem [shape: f32[1,128], index: 8, kind: input, shape index: {}]   ;;  %s11892_s9 = inlined_call_operand.vmem [shape: f32[1,128], index: 9, kind: input, shape index: {}]   ;;  %s11893_s10 = inlined_call_operand.vmem [shape: bf16[1024,128], index: 10, kind: input, shape index: {}]   ;;  %s11894_s11 = inlined_call_operand.vmem [shape: f32[1,128], index: 11, kind: input, shape index: {}]   ;;  %s11895_s13 = inlined_call_operand.vmem [shape: f32[1,128], index: 13, kind: input, shape index: {}]   ;;  %s11896_s12 = inlined_call_operand.vmem [shape: bf16[128,128], index: 12, kind: input, shape index: {}]   ;;  %s11897_s14 = inlined_call_operand.vmem [shape: s32[2,1], index: 14, kind: input, shape index: {}]   ;;  %s11898_s15 = inlined_call_operand.vmem [shape: f32[2,1], index: 15, kind: output, shape index: {}]  }
   0x1   :  { %v8072_v0 = vld [vmem:[%s11883_s1 + $0x78] sm:$0xff]  ;;  %v8071_v2 = vld [vmem:[%s11883_s1 + $0x70] sm:$0xff]  ;;  %v8070_v4 = vld [vmem:[%s11883_s1 + $0x68] sm:$0xff]  ;;  %vm4653_vm7 = vcmask 1045504   ;;  %vm4831_vm11 = vcmask 1043456   ;;  %vm5696_vm15 = vcmask 1041409  }
   0x2   :  { %v8001_v1 = vld [vmem:[%s11883_s1 + $0x38] sm:$0xff]  ;;  %763 = vmatpush.bf16.msra.mxu0 %v8072_v0  ;;  %v8000_v3 = vld [vmem:[%s11883_s1 + $0x30] sm:$0xff]  ;;  %8213 = vmatpush.bf16.msra.mxu3 %v8072_v0  ;;  %v7999_v5 = vld [vmem:[%s11883_s1 + $0x28] sm:$0xff] }
   0x3   :  { %1513 = vmatpush.bf16.msra.mxu1 %v8001_v1  ;;  %8221 = vmatpush.bf16.msra.mxu2 %v8001_v1  ;;  %v8069_v6 = vld [vmem:[%s11883_s1 + $0x60] sm:$0xff]  ;;  %v8068_v8 = vld [vmem:[%s11883_s1 + $0x58] sm:$0xff]  ;;  %v8067_v10 = vld [vmem:[%s11883_s1 + $0x50] sm:$0xff] }
   0x4   :  { %v7998_v7 = vld [vmem:[%s11883_s1 + $0x20] sm:$0xff]  ;;  %v7997_v9 = vld [vmem:[%s11883_s1 + $0x18] sm:$0xff]  ;;  %v7996_v11 = vld [vmem:[%s11883_s1 + $0x10] sm:$0xff] }
   0x5   :  { %v8066_v12 = vld [vmem:[%s11883_s1 + $0x48] sm:$0xff]  ;;  %v8065_v14 = vld [vmem:[%s11883_s1 + $0x40] sm:$0xff]  ;;  %v8003_v18 = vld [vmem:[%s11884_s0 + $0x14] sm:$0xff] }
   0x6   :  { %764 = vmatpush.bf16.msra.mxu0 %v8071_v2  ;;  %8214 = vmatpush.bf16.msra.mxu3 %v8071_v2  ;;  %v7995_v13 = vld [vmem:[%s11883_s1 + $0x8] sm:$0xff]  ;;  %v7994_v15 = vld [vmem:[%s11883_s1] sm:$0xff]  ;;  %v7933_v21 = vld [vmem:[%s11884_s0 + $0x10] sm:$0xff]  ;;  %s8244_s1 = smov 32  }
   0x7   :  { %1514 = vmatpush.bf16.msra.mxu1 %v8000_v3  ;;  %8222 = vmatpush.bf16.msra.mxu2 %v8000_v3  ;;  %v8002_v16 = vld [vmem:[%s11884_s0 + $0xc] sm:$0xff]  ;;  %v7931_v17 = vld [vmem:[%s11884_s0] sm:$0xff]  ;;  %v7934_v23 = vld [vmem:[%s11884_s0 + $0x18] sm:$0xff] }
   0x8   :  { %v7932_v19 = vld [vmem:[%s11884_s0 + $0x8] sm:$0xff]  ;;  %v8004_v20 = vld [vmem:[%s11884_s0 + $0x1c] sm:$0xff]  ;;  %v8007_v26 = vld [vmem:[%s11884_s0 + $0x34] sm:$0xff] }
   0x9   :  { %v8005_v22 = vld [vmem:[%s11884_s0 + $0x24] sm:$0xff]  ;;  %v8006_v24 = vld [vmem:[%s11884_s0 + $0x2c] sm:$0xff]  ;;  %v8008_v28 = vld [vmem:[%s11884_s0 + $0x3c] sm:$0xff] }
   0xa   :  { %765 = vmatpush.bf16.msra.mxu0 %v8070_v4  ;;  %8215 = vmatpush.bf16.msra.mxu3 %v8070_v4  ;;  %v7935_v25 = vld [vmem:[%s11884_s0 + $0x20] sm:$0xff]  ;;  %v7936_v27 = vld [vmem:[%s11884_s0 + $0x28] sm:$0xff]  ;;  %v7937_v29 = vld [vmem:[%s11884_s0 + $0x30] sm:$0xff] }
   0xb   :  { %1515 = vmatpush.bf16.msra.mxu1 %v7999_v5  ;;  %8223 = vmatpush.bf16.msra.mxu2 %v7999_v5  ;;  %v8009_v30 = vld [vmem:[%s11884_s0 + $0x44] sm:$0xff]  ;;  %v7938_v31 = vld [vmem:[%s11884_s0 + $0x38] sm:$0xff]  ;;  %v8010_v32 = vld [vmem:[%s11884_s0 + $0x4c] sm:$0xff] }
   0xc   :  { %v7939_v33 = vld [vmem:[%s11884_s0 + $0x40] sm:$0xff]  ;;  %v8011_v40 = vld [vmem:[%s11884_s0 + $0x54] sm:$0xff]  ;;  %v7940_v41 = vld [vmem:[%s11884_s0 + $0x48] sm:$0xff] }
   0xd   :  { %v8012_v48 = vld [vmem:[%s11884_s0 + $0x5c] sm:$0xff]  ;;  %v7941_v49 = vld [vmem:[%s11884_s0 + $0x50] sm:$0xff]  ;;  %v8013_v56 = vld [vmem:[%s11884_s0 + $0x64] sm:$0xff] }
   0xe   :  { %766 = vmatpush.bf16.msra.mxu0 %v8069_v6  ;;  %8216 = vmatpush.bf16.msra.mxu3 %v8069_v6  ;;  %v7942_v57 = vld [vmem:[%s11884_s0 + $0x58] sm:$0xff]  ;;  %v8014_v0 = vld [vmem:[%s11884_s0 + $0x6c] sm:$0xff]  ;;  %v7943_v1 = vld [vmem:[%s11884_s0 + $0x60] sm:$0xff] }
   0xf   :  { %1516 = vmatpush.bf16.msra.mxu1 %v7998_v7  ;;  %8224 = vmatpush.bf16.msra.mxu2 %v7998_v7 }
  0x12   :  { %767 = vmatpush.bf16.msra.mxu0 %v8068_v8  ;;  %8217 = vmatpush.bf16.msra.mxu3 %v8068_v8  ;;  %v8015_v8 = vld [vmem:[%s11884_s0 + $0x74] sm:$0xff] }
  0x13   :  { %1517 = vmatpush.bf16.msra.mxu1 %v7997_v9  ;;  %8225 = vmatpush.bf16.msra.mxu2 %v7997_v9  ;;  %v7944_v9 = vld [vmem:[%s11884_s0 + $0x68] sm:$0xff] }
  0x16   :  { %768 = vmatpush.bf16.msra.mxu0 %v8067_v10  ;;  %8218 = vmatpush.bf16.msra.mxu3 %v8067_v10 }
  0x17   :  { %1518 = vmatpush.bf16.msra.mxu1 %v7996_v11  ;;  %8226 = vmatpush.bf16.msra.mxu2 %v7996_v11 }
  0x1a   :  { %769 = vmatpush.bf16.msra.mxu0 %v8066_v12  ;;  %8219 = vmatpush.bf16.msra.mxu3 %v8066_v12 }
  0x1b   :  { %1519 = vmatpush.bf16.msra.mxu1 %v7995_v13  ;;  %8227 = vmatpush.bf16.msra.mxu2 %v7995_v13 }
  0x1e   :  { %770 = vmatpush.bf16.msra.mxu0 %v8065_v14  ;;  %8220 = vmatpush.bf16.msra.mxu3 %v8065_v14 }
  0x1f   :  { %1520 = vmatpush.bf16.msra.mxu1 %v7994_v15  ;;  %8228 = vmatpush.bf16.msra.mxu2 %v7994_v15 }
  0x21   :  { %771 = vmatmul.bf16.vlgmr.msra.gmra.mxu0 %v8002_v16  ;;  %v8016_v16 = vld [vmem:[%s11884_s0 + $0x7c] sm:$0xff] }
  0x22   :  { %1521 = vmatmul.bf16.vlgmr.msra.gmra.mxu1 %v7931_v17  ;;  %v7945_v17 = vld [vmem:[%s11884_s0 + $0x70] sm:$0xff] }
  0x31   :  { %776 = vmatmul.bf16.gmra.mxu0 %v8003_v18 }
  0x32   :  { %1526 = vmatmul.bf16.gmra.mxu1 %v7932_v19 }
  0x41   :  { %781 = vmatmul.bf16.gmra.mxu0 %v8004_v20 }
  0x42   :  { %1531 = vmatmul.bf16.gmra.mxu1 %v7933_v21 }
  0x51   :  { %786 = vmatmul.bf16.gmra.mxu0 %v8005_v22 }
  0x52   :  { %1536 = vmatmul.bf16.gmra.mxu1 %v7934_v23 }
  0x61   :  { %791 = vmatmul.bf16.gmra.mxu0 %v8006_v24  ;;  %v8017_v24 = vld [vmem:[%s11884_s0 + $0x84] sm:$0xff] }
  0x62   :  { %1541 = vmatmul.bf16.gmra.mxu1 %v7935_v25  ;;  %v7946_v25 = vld [vmem:[%s11884_s0 + $0x78] sm:$0xff] }
  0x71   :  { %796 = vmatmul.bf16.gmra.mxu0 %v8007_v26 }
  0x72   :  { %1546 = vmatmul.bf16.gmra.mxu1 %v7936_v27 }
  0x81   :  { %801 = vmatmul.bf16.gmra.mxu0 %v8008_v28 }
  0x82   :  { %1551 = vmatmul.bf16.gmra.mxu1 %v7937_v29 }
  0x91   :  { %806 = vmatmul.bf16.gmra.mxu0 %v8009_v30 }
  0x92   :  { %1556 = vmatmul.bf16.gmra.mxu1 %v7938_v31 }
  0x9e   :  { %v772_v34 = vpop.f32.mrf.mxu0 }
  0x9f   :  { %v1522_v35 = vpop.f32.mrf.mxu1 }
  0xa0   :  { %v8429_v36 = vadd.f32 %v1522_v35, %v772_v34 }
  0xa1   :  { %811 = vmatmul.bf16.gmra.mxu0 %v8010_v32  ;;  %v8018_v32 = vld [vmem:[%s11884_s0 + $0x8c] sm:$0xff] }
  0xa2   :  { %12044 = vst [vmem:[#allocation2_spill] sm:$0xff] %v8429_v36  ;;  %1561 = vmatmul.bf16.gmra.mxu1 %v7939_v33  ;;  %v7947_v33 = vld [vmem:[%s11884_s0 + $0x80] sm:$0xff] }
  0xa6   :  { %v774_v37 = vpop.f32.mrf.mxu0 }
  0xa7   :  { %v1524_v38 = vpop.f32.mrf.mxu1 }
  0xa8   :  { %v8431_v39 = vadd.f32 %v1524_v38, %v774_v37 }
  0xaa   :  { %12045 = vst [vmem:[#allocation3_spill] sm:$0xff] %v8431_v39 }
  0xae   :  { %v777_v42 = vpop.f32.mrf.mxu0 }
  0xaf   :  { %v1527_v43 = vpop.f32.mrf.mxu1 }
  0xb0   :  { %v8439_v44 = vadd.f32 %v1527_v43, %v777_v42  ;;  %v8019_v42 = vld [vmem:[%s11884_s0 + $0x94] sm:$0xff]  ;;  %v7948_v43 = vld [vmem:[%s11884_s0 + $0x88] sm:$0xff] }
  0xb1   :  { %816 = vmatmul.bf16.gmra.mxu0 %v8011_v40 }
  0xb2   :  { %12046 = vst [vmem:[#allocation4_spill] sm:$0xff] %v8439_v44  ;;  %1566 = vmatmul.bf16.gmra.mxu1 %v7940_v41 }
  0xb6   :  { %v779_v45 = vpop.f32.mrf.mxu0 }
  0xb7   :  { %v1529_v46 = vpop.f32.mrf.mxu1 }
  0xb8   :  { %v8441_v47 = vadd.f32 %v1529_v46, %v779_v45 }
  0xba   :  { %12047 = vst [vmem:[#allocation5_spill] sm:$0xff] %v8441_v47 }
  0xbe   :  { %v782_v50 = vpop.f32.mrf.mxu0 }
  0xbf   :  { %v1532_v51 = vpop.f32.mrf.mxu1 }
  0xc0   :  { %v8449_v52 = vadd.f32 %v1532_v51, %v782_v50 }
  0xc1   :  { %821 = vmatmul.bf16.gmra.mxu0 %v8012_v48 }
  0xc2   :  { %12048 = vst [vmem:[#allocation6_spill] sm:$0xff] %v8449_v52  ;;  %1571 = vmatmul.bf16.gmra.mxu1 %v7941_v49 }
  0xc6   :  { %v784_v53 = vpop.f32.mrf.mxu0 }
  0xc7   :  { %v1534_v54 = vpop.f32.mrf.mxu1 }
  0xc8   :  { %v8451_v55 = vadd.f32 %v1534_v54, %v784_v53  ;;  %v8020_v53 = vld [vmem:[%s11884_s0 + $0x9c] sm:$0xff]  ;;  %v7949_v54 = vld [vmem:[%s11884_s0 + $0x90] sm:$0xff] }
  0xca   :  { %12049 = vst [vmem:[#allocation7_spill] sm:$0xff] %v8451_v55 }
  0xce   :  { %v787_v58 = vpop.f32.mrf.mxu0 }
  0xcf   :  { %v1537_v59 = vpop.f32.mrf.mxu1 }
  0xd0   :  { %v8459_v60 = vadd.f32 %v1537_v59, %v787_v58 }
  0xd1   :  { %826 = vmatmul.bf16.gmra.mxu0 %v8013_v56 }
  0xd2   :  { %12050 = vst [vmem:[#allocation8_spill] sm:$0xff] %v8459_v60  ;;  %1576 = vmatmul.bf16.gmra.mxu1 %v7942_v57 }
  0xd6   :  { %v789_v61 = vpop.f32.mrf.mxu0 }
  0xd7   :  { %v1539_v62 = vpop.f32.mrf.mxu1 }
  0xd8   :  { %v8461_v63 = vadd.f32 %v1539_v62, %v789_v61 }
  0xda   :  { %12051 = vst [vmem:[#allocation9_spill] sm:$0xff] %v8461_v63 }
  0xde   :  { %v792_v2 = vpop.f32.mrf.mxu0 }
  0xdf   :  { %v1542_v3 = vpop.f32.mrf.mxu1 }
  0xe0   :  { %v8469_v4 = vadd.f32 %v1542_v3, %v792_v2 }
  0xe1   :  { %831 = vmatmul.bf16.gmra.mxu0 %v8014_v0  ;;  %v8021_v0 = vld [vmem:[%s11884_s0 + $0xa4] sm:$0xff] }
  0xe2   :  { %12052 = vst [vmem:[#allocation10_spill] sm:$0xff] %v8469_v4  ;;  %1581 = vmatmul.bf16.gmra.mxu1 %v7943_v1  ;;  %v7950_v1 = vld [vmem:[%s11884_s0 + $0x98] sm:$0xff] }
  0xe6   :  { %v794_v5 = vpop.f32.mrf.mxu0 }
  0xe7   :  { %v1544_v6 = vpop.f32.mrf.mxu1 }
  0xe8   :  { %v8471_v7 = vadd.f32 %v1544_v6, %v794_v5 }
  0xea   :  { %12053 = vst [vmem:[#allocation11_spill] sm:$0xff] %v8471_v7 }
  0xee   :  { %v797_v10 = vpop.f32.mrf.mxu0 }
  0xef   :  { %v1547_v11 = vpop.f32.mrf.mxu1 }
  0xf0   :  { %v8479_v12 = vadd.f32 %v1547_v11, %v797_v10  ;;  %v8022_v10 = vld [vmem:[%s11884_s0 + $0xac] sm:$0xff]  ;;  %v7951_v11 = vld [vmem:[%s11884_s0 + $0xa0] sm:$0xff] }
  0xf1   :  { %836 = vmatmul.bf16.gmra.mxu0 %v8015_v8 }
  0xf2   :  { %12054 = vst [vmem:[#allocation12_spill] sm:$0xff] %v8479_v12  ;;  %1586 = vmatmul.bf16.gmra.mxu1 %v7944_v9 }
  0xf6   :  { %v799_v13 = vpop.f32.mrf.mxu0 }
  0xf7   :  { %v1549_v14 = vpop.f32.mrf.mxu1 }
  0xf8   :  { %v8481_v15 = vadd.f32 %v1549_v14, %v799_v13 }
  0xfa   :  { %12055 = vst [vmem:[#allocation13_spill] sm:$0xff] %v8481_v15 }
  0xfe   :  { %v802_v18 = vpop.f32.mrf.mxu0 }
  0xff   :  { %v1552_v19 = vpop.f32.mrf.mxu1 }
 0x100   :  { %v8489_v20 = vadd.f32 %v1552_v19, %v802_v18 }
 0x101   :  { %841 = vmatmul.bf16.gmra.mxu0 %v8016_v16 }
 0x102   :  { %12056 = vst [vmem:[#allocation14_spill] sm:$0xff] %v8489_v20  ;;  %1591 = vmatmul.bf16.gmra.mxu1 %v7945_v17 }
 0x106   :  { %v804_v21 = vpop.f32.mrf.mxu0 }
 0x107   :  { %v1554_v22 = vpop.f32.mrf.mxu1 }
 0x108   :  { %v8491_v23 = vadd.f32 %v1554_v22, %v804_v21  ;;  %v8023_v21 = vld [vmem:[%s11884_s0 + $0xb4] sm:$0xff]  ;;  %v7952_v22 = vld [vmem:[%s11884_s0 + $0xa8] sm:$0xff] }
 0x10a   :  { %12057 = vst [vmem:[#allocation15_spill] sm:$0xff] %v8491_v23 }
 0x10e   :  { %v807_v26 = vpop.f32.mrf.mxu0 }
 0x10f   :  { %v1557_v27 = vpop.f32.mrf.mxu1 }
 0x110   :  { %v8499_v28 = vadd.f32 %v1557_v27, %v807_v26 }
 0x111   :  { %846 = vmatmul.bf16.gmra.mxu0 %v8017_v24 }
 0x112   :  { %12058 = vst [vmem:[#allocation16_spill] sm:$0xff] %v8499_v28  ;;  %1596 = vmatmul.bf16.gmra.mxu1 %v7946_v25 }
 0x116   :  { %v809_v29 = vpop.f32.mrf.mxu0 }
 0x117   :  { %v1559_v30 = vpop.f32.mrf.mxu1 }
 0x118   :  { %v8501_v31 = vadd.f32 %v1559_v30, %v809_v29 }
 0x11a   :  { %12059 = vst [vmem:[#allocation17_spill] sm:$0xff] %v8501_v31 }
 0x11e   :  { %v812_v34 = vpop.f32.mrf.mxu0 }
 0x11f   :  { %v1562_v35 = vpop.f32.mrf.mxu1 }
 0x120   :  { %v8509_v37 = vadd.f32 %v1562_v35, %v812_v34 }
 0x121   :  { %851 = vmatmul.bf16.gmra.mxu0 %v8018_v32  ;;  %v8024_v32 = vld [vmem:[%s11884_s0 + $0xbc] sm:$0xff] }
 0x122   :  { %12060 = vst [vmem:[#allocation18_spill] sm:$0xff] %v8509_v37  ;;  %1601 = vmatmul.bf16.gmra.mxu1 %v7947_v33  ;;  %v7953_v33 = vld [vmem:[%s11884_s0 + $0xb0] sm:$0xff] }
 0x126   :  { %v814_v38 = vpop.f32.mrf.mxu0 }
 0x127   :  { %v1564_v40 = vpop.f32.mrf.mxu1 }
 0x128   :  { %v8511_v41 = vadd.f32 %v1564_v40, %v814_v38 }
 0x12a   :  { %12061 = vst [vmem:[#allocation19_spill] sm:$0xff] %v8511_v41 }
 0x12e   :  { %v817_v45 = vpop.f32.mrf.mxu0 }
 0x12f   :  { %v1567_v46 = vpop.f32.mrf.mxu1 }
 0x130   :  { %v8519_v48 = vadd.f32 %v1567_v46, %v817_v45  ;;  %v8025_v45 = vld [vmem:[%s11884_s0 + $0xc4] sm:$0xff]  ;;  %v7954_v46 = vld [vmem:[%s11884_s0 + $0xb8] sm:$0xff] }
 0x131   :  { %856 = vmatmul.bf16.gmra.mxu0 %v8019_v42 }
 0x132   :  { %12062 = vst [vmem:[#allocation20_spill] sm:$0xff] %v8519_v48  ;;  %1606 = vmatmul.bf16.gmra.mxu1 %v7948_v43 }
 0x136   :  { %v819_v49 = vpop.f32.mrf.mxu0 }
 0x137   :  { %v1569_v50 = vpop.f32.mrf.mxu1 }
 0x138   :  { %v8521_v51 = vadd.f32 %v1569_v50, %v819_v49 }
 0x13a   :  { %12063 = vst [vmem:[#allocation21_spill] sm:$0xff] %v8521_v51 }
 0x13e   :  { %v822_v56 = vpop.f32.mrf.mxu0 }
 0x13f   :  { %v1572_v57 = vpop.f32.mrf.mxu1 }
 0x140   :  { %v8529_v58 = vadd.f32 %v1572_v57, %v822_v56 }
 0x141   :  { %861 = vmatmul.bf16.gmra.mxu0 %v8020_v53 }
 0x142   :  { %12064 = vst [vmem:[#allocation22_spill] sm:$0xff] %v8529_v58  ;;  %1611 = vmatmul.bf16.gmra.mxu1 %v7949_v54 }
 0x146   :  { %v824_v59 = vpop.f32.mrf.mxu0 }
 0x147   :  { %v1574_v61 = vpop.f32.mrf.mxu1 }
 0x148   :  { %v8531_v62 = vadd.f32 %v1574_v61, %v824_v59  ;;  %v8026_v59 = vld [vmem:[%s11884_s0 + $0xcc] sm:$0xff]  ;;  %v7955_v61 = vld [vmem:[%s11884_s0 + $0xc0] sm:$0xff] }
 0x14a   :  { %12065 = vst [vmem:[#allocation23_spill] sm:$0xff] %v8531_v62 }
 0x14e   :  { %v827_v2 = vpop.f32.mrf.mxu0 }
 0x14f   :  { %v1577_v3 = vpop.f32.mrf.mxu1 }
 0x150   :  { %v8539_v5 = vadd.f32 %v1577_v3, %v827_v2 }
 0x151   :  { %866 = vmatmul.bf16.gmra.mxu0 %v8021_v0 }
 0x152   :  { %12066 = vst [vmem:[#allocation24_spill] sm:$0xff] %v8539_v5  ;;  %1616 = vmatmul.bf16.gmra.mxu1 %v7950_v1 }
 0x156   :  { %v829_v6 = vpop.f32.mrf.mxu0 }
 0x157   :  { %v1579_v8 = vpop.f32.mrf.mxu1 }
 0x158   :  { %v8541_v9 = vadd.f32 %v1579_v8, %v829_v6 }
 0x15a   :  { %12067 = vst [vmem:[#allocation25_spill] sm:$0xff] %v8541_v9 }
 0x15e   :  { %v832_v13 = vpop.f32.mrf.mxu0 }
 0x15f   :  { %v1582_v14 = vpop.f32.mrf.mxu1 }
 0x160   :  { %v8549_v16 = vadd.f32 %v1582_v14, %v832_v13 }
 0x161   :  { %871 = vmatmul.bf16.gmra.mxu0 %v8022_v10  ;;  %v8027_v10 = vld [vmem:[%s11884_s0 + $0xd4] sm:$0xff] }
 0x162   :  { %12068 = vst [vmem:[#allocation26_spill] sm:$0xff] %v8549_v16  ;;  %1621 = vmatmul.bf16.gmra.mxu1 %v7951_v11  ;;  %v7956_v11 = vld [vmem:[%s11884_s0 + $0xc8] sm:$0xff] }
 0x166   :  { %v834_v17 = vpop.f32.mrf.mxu0 }
 0x167   :  { %v1584_v18 = vpop.f32.mrf.mxu1 }
 0x168   :  { %v8551_v19 = vadd.f32 %v1584_v18, %v834_v17 }
 0x16a   :  { %12069 = vst [vmem:[#allocation27_spill] sm:$0xff] %v8551_v19 }
 0x16e   :  { %v837_v24 = vpop.f32.mrf.mxu0 }
 0x16f   :  { %v1587_v25 = vpop.f32.mrf.mxu1 }
 0x170   :  { %v8559_v26 = vadd.f32 %v1587_v25, %v837_v24  ;;  %v8028_v24 = vld [vmem:[%s11884_s0 + $0xdc] sm:$0xff]  ;;  %v7957_v25 = vld [vmem:[%s11884_s0 + $0xd0] sm:$0xff] }
 0x171   :  { %876 = vmatmul.bf16.gmra.mxu0 %v8023_v21 }
 0x172   :  { %12070 = vst [vmem:[#allocation28_spill] sm:$0xff] %v8559_v26  ;;  %1626 = vmatmul.bf16.gmra.mxu1 %v7952_v22 }
 0x176   :  { %v839_v27 = vpop.f32.mrf.mxu0 }
 0x177   :  { %v1589_v29 = vpop.f32.mrf.mxu1 }
 0x178   :  { %v8561_v30 = vadd.f32 %v1589_v29, %v839_v27 }
 0x17a   :  { %12071 = vst [vmem:[#allocation29_spill] sm:$0xff] %v8561_v30 }
 0x17e   :  { %v842_v34 = vpop.f32.mrf.mxu0 }
 0x17f   :  { %v1592_v35 = vpop.f32.mrf.mxu1 }
 0x180   :  { %v8569_v38 = vadd.f32 %v1592_v35, %v842_v34 }
 0x181   :  { %881 = vmatmul.bf16.gmra.mxu0 %v8024_v32 }
 0x182   :  { %12072 = vst [vmem:[#allocation30_spill] sm:$0xff] %v8569_v38  ;;  %1631 = vmatmul.bf16.gmra.mxu1 %v7953_v33 }
 0x186   :  { %v844_v40 = vpop.f32.mrf.mxu0 }
 0x187   :  { %v1594_v42 = vpop.f32.mrf.mxu1 }
 0x188   :  { %v8571_v43 = vadd.f32 %v1594_v42, %v844_v40  ;;  %v8029_v40 = vld [vmem:[%s11884_s0 + $0xe4] sm:$0xff]  ;;  %v7958_v42 = vld [vmem:[%s11884_s0 + $0xd8] sm:$0xff] }
 0x18a   :  { %12073 = vst [vmem:[#allocation31_spill] sm:$0xff] %v8571_v43 }
 0x18e   :  { %v847_v49 = vpop.f32.mrf.mxu0 }
 0x18f   :  { %v1597_v50 = vpop.f32.mrf.mxu1 }
 0x190   :  { %v8579_v53 = vadd.f32 %v1597_v50, %v847_v49 }
 0x191   :  { %886 = vmatmul.bf16.gmra.mxu0 %v8025_v45 }
 0x192   :  { %12074 = vst [vmem:[#allocation32_spill] sm:$0xff] %v8579_v53  ;;  %1636 = vmatmul.bf16.gmra.mxu1 %v7954_v46 }
 0x196   :  { %v849_v54 = vpop.f32.mrf.mxu0 }
 0x197   :  { %v1599_v56 = vpop.f32.mrf.mxu1 }
 0x198   :  { %v8581_v57 = vadd.f32 %v1599_v56, %v849_v54 }
 0x19a   :  { %12075 = vst [vmem:[#allocation33_spill] sm:$0xff] %v8581_v57 }
 0x19e   :  { %v852_v0 = vpop.f32.mrf.mxu0 }
 0x19f   :  { %v1602_v1 = vpop.f32.mrf.mxu1 }
 0x1a0   :  { %v8589_v2 = vadd.f32 %v1602_v1, %v852_v0 }
 0x1a1   :  { %891 = vmatmul.bf16.gmra.mxu0 %v8026_v59  ;;  %v8030_v59 = vld [vmem:[%s11884_s0 + $0xec] sm:$0xff] }
 0x1a2   :  { %12076 = vst [vmem:[#allocation34_spill] sm:$0xff] %v8589_v2  ;;  %1641 = vmatmul.bf16.gmra.mxu1 %v7955_v61  ;;  %v7959_v61 = vld [vmem:[%s11884_s0 + $0xe0] sm:$0xff] }
 0x1a6   :  { %v854_v3 = vpop.f32.mrf.mxu0 }
 0x1a7   :  { %v1604_v6 = vpop.f32.mrf.mxu1 }
 0x1a8   :  { %v8591_v8 = vadd.f32 %v1604_v6, %v854_v3 }
 0x1aa   :  { %12077 = vst [vmem:[#allocation35_spill] sm:$0xff] %v8591_v8 }
 0x1ae   :  { %v857_v13 = vpop.f32.mrf.mxu0 }
 0x1af   :  { %v1607_v14 = vpop.f32.mrf.mxu1 }
 0x1b0   :  { %v8599_v17 = vadd.f32 %v1607_v14, %v857_v13  ;;  %v8031_v13 = vld [vmem:[%s11884_s0 + $0xf4] sm:$0xff]  ;;  %v7960_v14 = vld [vmem:[%s11884_s0 + $0xe8] sm:$0xff] }
 0x1b1   :  { %896 = vmatmul.bf16.gmra.mxu0 %v8027_v10 }
 0x1b2   :  { %12078 = vst [vmem:[#allocation36_spill] sm:$0xff] %v8599_v17  ;;  %1646 = vmatmul.bf16.gmra.mxu1 %v7956_v11 }
 0x1b6   :  { %v859_v18 = vpop.f32.mrf.mxu0 }
 0x1b7   :  { %v1609_v21 = vpop.f32.mrf.mxu1 }
 0x1b8   :  { %v8601_v22 = vadd.f32 %v1609_v21, %v859_v18 }
 0x1ba   :  { %12079 = vst [vmem:[#allocation37_spill] sm:$0xff] %v8601_v22 }
 0x1be   :  { %v862_v27 = vpop.f32.mrf.mxu0 }
 0x1bf   :  { %v1612_v29 = vpop.f32.mrf.mxu1 }
 0x1c0   :  { %v8609_v32 = vadd.f32 %v1612_v29, %v862_v27 }
 0x1c1   :  { %901 = vmatmul.bf16.gmra.mxu0 %v8028_v24 }
 0x1c2   :  { %12080 = vst [vmem:[#allocation38_spill] sm:$0xff] %v8609_v32  ;;  %1651 = vmatmul.bf16.gmra.mxu1 %v7957_v25 }
 0x1c6   :  { %v864_v33 = vpop.f32.mrf.mxu0 }
 0x1c7   :  { %v1614_v34 = vpop.f32.mrf.mxu1 }
 0x1c8   :  { %v8611_v35 = vadd.f32 %v1614_v34, %v864_v33  ;;  %v8032_v33 = vld [vmem:[%s11884_s0 + $0xfc] sm:$0xff]  ;;  %v7961_v34 = vld [vmem:[%s11884_s0 + $0xf0] sm:$0xff] }
 0x1ca   :  { %12081 = vst [vmem:[#allocation39_spill] sm:$0xff] %v8611_v35 }
 0x1ce   :  { %v867_v45 = vpop.f32.mrf.mxu0 }
 0x1cf   :  { %v1617_v46 = vpop.f32.mrf.mxu1 }
 0x1d0   :  { %v8619_v49 = vadd.f32 %v1617_v46, %v867_v45 }
 0x1d1   :  { %906 = vmatmul.bf16.gmra.mxu0 %v8029_v40 }
 0x1d2   :  { %12082 = vst [vmem:[#allocation40_spill] sm:$0xff] %v8619_v49  ;;  %1656 = vmatmul.bf16.gmra.mxu1 %v7958_v42 }
 0x1d6   :  { %v869_v50 = vpop.f32.mrf.mxu0 }
 0x1d7   :  { %v1619_v54 = vpop.f32.mrf.mxu1 }
 0x1d8   :  { %v8621_v56 = vadd.f32 %v1619_v54, %v869_v50 }
 0x1da   :  { %12083 = vst [vmem:[#allocation41_spill] sm:$0xff] %v8621_v56 }
 0x1de   :  { %v872_v0 = vpop.f32.mrf.mxu0 }
 0x1df   :  { %v1622_v1 = vpop.f32.mrf.mxu1 }
 0x1e0   :  { %v8629_v3 = vadd.f32 %v1622_v1, %v872_v0  ;;  %v7097_v0 = vld [vmem:[%s11884_s0 + $0xf8] sm:$0xf]  ;;  %v7962_v1 = vld [vmem:[%s11884_s0 + $0x104] sm:$0xf0] }
 0x1e1   :  { %911 = vmatmul.bf16.gmra.mxu0 %v8030_v59  ;;  %v6813_v59 = vld [vmem:[%s11884_s0 + $0x104] sm:$0xf] }
 0x1e2   :  { %12084 = vst [vmem:[#allocation42_spill] sm:$0xff] %v8629_v3  ;;  %1661 = vmatmul.bf16.gmra.mxu1 %v7959_v61  ;;  %v8033_v61 = vld [vmem:[%s11884_s0 + $0x110] sm:$0xf0] }
 0x1e6   :  { %v874_v6 = vpop.f32.mrf.mxu0 }
 0x1e7   :  { %v1624_v10 = vpop.f32.mrf.mxu1 }
 0x1e8   :  { %v8631_v11 = vadd.f32 %v1624_v10, %v874_v6  ;;  %v6814_v6 = vor.u32 %v8033_v61, %v6813_v59  ;;  %v7098_v10 = vor.u32 %v7962_v1, %v7097_v0  ;;  %v8051_v61 = vld [vmem:[%s11884_s0 + $0x1a0] sm:$0xff]  ;;  %v7980_v0 = vld [vmem:[%s11884_s0 + $0x194] sm:$0xff] }
 0x1ea   :  { %12085 = vst [vmem:[#allocation43_spill] sm:$0xff] %v8631_v11 }
 0x1ee   :  { %v877_v18 = vpop.f32.mrf.mxu0 }
 0x1ef   :  { %v1627_v21 = vpop.f32.mrf.mxu1 }
 0x1f0   :  { %v8639_v24 = vadd.f32 %v1627_v21, %v877_v18  ;;  %v8050_v21 = vld [vmem:[%s11884_s0 + $0x198] sm:$0xff] }
 0x1f1   :  { %916 = vmatmul.bf16.gmra.mxu0 %v8031_v13  ;;  %1011 = vmatmul.bf16.vlgmr.msra.gmra.mxu3 %v8050_v21 }
 0x1f2   :  { %12086 = vst [vmem:[#allocation44_spill] sm:$0xff] %v8639_v24  ;;  %1666 = vmatmul.bf16.gmra.mxu1 %v7960_v14  ;;  %v2374_v24 = vmul.f32 %v8481_v15, %v8481_v15 }
 0x1f6   :  { %v879_v25 = vpop.f32.mrf.mxu0 }
 0x1f7   :  { %v1629_v27 = vpop.f32.mrf.mxu1 }
 0x1f8   :  { %v8641_v29 = vadd.f32 %v1629_v27, %v879_v25  ;;  %v7979_v25 = vld [vmem:[%s11884_s0 + $0x18c] sm:$0xff] }
 0x1f9   :  { %1761 = vmatmul.bf16.vlgmr.msra.gmra.mxu2 %v7979_v25 }
 0x1fa   :  { %12087 = vst [vmem:[#allocation45_spill] sm:$0xff] %v8641_v29 }
 0x1fe   :  { %v882_v40 = vpop.f32.mrf.mxu0 }
 0x1ff   :  { %v1632_v42 = vpop.f32.mrf.mxu1 }
 0x200   :  { %v8649_v45 = vadd.f32 %v1632_v42, %v882_v40  ;;  %v8034_v40 = vld [vmem:[%s11884_s0 + $0x118] sm:$0xff]  ;;  %v7963_v42 = vld [vmem:[%s11884_s0 + $0x10c] sm:$0xff] }
 0x201   :  { %921 = vmatmul.bf16.gmra.mxu0 %v8032_v33  ;;  %1016 = vmatmul.bf16.gmra.mxu3 %v8051_v61  ;;  %v8036_v61 = vld [vmem:[%s11884_s0 + $0x128] sm:$0xff] }
 0x202   :  { %12088 = vst [vmem:[#allocation46_spill] sm:$0xff] %v8649_v45  ;;  %1671 = vmatmul.bf16.gmra.mxu1 %v7961_v34 }
 0x206   :  { %v884_v46 = vpop.f32.mrf.mxu0 }
 0x207   :  { %v1634_v50 = vpop.f32.mrf.mxu1 }
 0x208   :  { %v8651_v54 = vadd.f32 %v1634_v50, %v884_v46 }
 0x209   :  { %1766 = vmatmul.bf16.gmra.mxu2 %v7980_v0  ;;  %v7965_v0 = vld [vmem:[%s11884_s0 + $0x11c] sm:$0xff] }
 0x20a   :  { %12089 = vst [vmem:[#allocation47_spill] sm:$0xff] %v8651_v54 }
 0x20e   :  { %v887_v13 = vpop.f32.mrf.mxu0 }
 0x20f   :  { %v1637_v14 = vpop.f32.mrf.mxu1 }
 0x210   :  { %v8665_v18 = vadd.f32 %v1637_v14, %v887_v13  ;;  %v8035_v13 = vld [vmem:[%s11884_s0 + $0x120] sm:$0xff]  ;;  %v7964_v14 = vld [vmem:[%s11884_s0 + $0x114] sm:$0xff] }
 0x211   :  { %926 = vmatmul.bf16.gmra.mxu0 %v6814_v6 }
 0x212   :  { %12090 = vst [vmem:[#allocation48_spill] sm:$0xff] %v8665_v18  ;;  %1676 = vmatmul.bf16.gmra.mxu1 %v7098_v10 }
 0x216   :  { %v889_v27 = vpop.f32.mrf.mxu0 }
 0x217   :  { %v1639_v33 = vpop.f32.mrf.mxu1 }
 0x218   :  { %v8673_v34 = vadd.f32 %v1639_v33, %v889_v27  ;;  %v8052_v33 = vld [vmem:[%s11884_s0 + $0x1a8] sm:$0xff] }
 0x219   :  { %1021 = vmatmul.bf16.gmra.mxu3 %v8052_v33  ;;  %v2371_v33 = vmul.f32 %v8439_v44, %v8439_v44 }
 0x21a   :  { %12091 = vst [vmem:[#allocation49_spill] sm:$0xff] %v8673_v34  ;;  %v2060_v34 = vsel %vm1839_vm0, %v8431_v39, 0.0 }
 0x21e   :  { %v892_v46 = vpop.f32.mrf.mxu0 }
 0x21f   :  { %v1642_v50 = vpop.f32.mrf.mxu1 }
 0x220   :  { %v8681_v59 = vadd.f32 %v1642_v50, %v892_v46 }
 0x221   :  { %931 = vmatmul.bf16.gmra.mxu0 %v8034_v40  ;;  %v7981_v40 = vld [vmem:[%s11884_s0 + $0x19c] sm:$0xff] }
 0x222   :  { %12092 = vst [vmem:[#allocation50_spill] sm:$0xff] %v8681_v59  ;;  %1681 = vmatmul.bf16.gmra.mxu1 %v7963_v42  ;;  %1771 = vmatmul.bf16.gmra.mxu2 %v7981_v40  ;;  %v1841_v40 = vsel %vm1839_vm0, %v8441_v47, 0.0  ;;  %v2152_v59 = vmul.f32 %v8479_v12, %v8479_v12 }
 0x226   :  { %v894_v1 = vpop.f32.mrf.mxu0 }
 0x227   :  { %v1644_v6 = vpop.f32.mrf.mxu1 }
 0x228   :  { %v8689_v10 = vadd.f32 %v1644_v6, %v894_v1  ;;  %v1929_v1 = vmul.f32 %v8429_v36, %v8429_v36 }
 0x22a   :  { %12093 = vst [vmem:[#allocation51_spill] sm:$0xff] %v8689_v10  ;;  %v2151_v10 = vmul.f32 %v8461_v63, %v8461_v63 }
 0x22c   :  { %v2194_v18 = vsel %vm1839_vm0, %v2151_v10, 0.0  ;;  %v1845_v10 = vsel %vm1839_vm0, %v8471_v7, 0.0 }
 0x22e   :  { %v897_v21 = vpop.f32.mrf.mxu0 }
 0x22f   :  { %v1647_v25 = vpop.f32.mrf.mxu1 }
 0x230   :  { %v8697_v27 = vadd.f32 %v1647_v25, %v897_v21  ;;  %v1930_v21 = vmul.f32 %v8441_v47, %v8441_v47 }
 0x231   :  { %936 = vmatmul.bf16.gmra.mxu0 %v8035_v13 }
 0x232   :  { %12094 = vst [vmem:[#allocation52_spill] sm:$0xff] %v8697_v27  ;;  %1686 = vmatmul.bf16.gmra.mxu1 %v7964_v14  ;;  %v2149_v14 = vmul.f32 %v8431_v39, %v8431_v39  ;;  %v1840_v27 = vsel %vm1839_vm0, %v8429_v36, 0.0  ;;  %v2283_v39 = vsel %vm1839_vm0, %v8451_v55, 0.0 }
 0x233   :  { %v1842_v36 = vadd.f32 %v1841_v40, %v1840_v27  ;;  %v7982_v27 = vld [vmem:[%s11884_s0 + $0x1a4] sm:$0xff]  ;;  %v1843_v40 = vsel %vm1839_vm0, %v8459_v60, 0.0 }
 0x234   :  { %v2191_v47 = vsel %vm1839_vm0, %v2149_v14, 0.0  ;;  %1776 = vmatmul.bf16.gmra.mxu2 %v7982_v27 }
 0x235   :  { %v1844_v11 = vadd.f32 %v1843_v40, %v1842_v36  ;;  %v2287_v36 = vsel %vm1839_vm0, %v8481_v15, 0.0 }
 0x236   :  { %v899_v42 = vpop.f32.mrf.mxu0 }
 0x237   :  { %v1649_v46 = vpop.f32.mrf.mxu1 }
 0x238   :  { %v8705_v50 = vadd.f32 %v1649_v46, %v899_v42  ;;  %v2150_v42 = vmul.f32 %v8449_v52, %v8449_v52  ;;  %v2372_v46 = vmul.f32 %v8451_v55, %v8451_v55 }
 0x23a   :  { %12095 = vst [vmem:[#allocation53_spill] sm:$0xff] %v8705_v50  ;;  %v2192_v45 = vsel %vm1839_vm0, %v2150_v42, 0.0  ;;  %v2414_v14 = vsel %vm1839_vm0, %v2372_v46, 0.0  ;;  %v2063_v46 = vsel %vm1839_vm0, %v8461_v63, 0.0  ;;  %v1932_v50 = vmul.f32 %v8471_v7, %v8471_v7 }
 0x23b   :  { %v2285_v63 = vsel %vm1839_vm0, %v8469_v4, 0.0 }
 0x23e   :  { %v902_v6 = vpop.f32.mrf.mxu0 }
 0x23f   :  { %v1652_v13 = vpop.f32.mrf.mxu1 }
 0x240   :  { %v8719_v25 = vadd.f32 %v1652_v13, %v902_v6  ;;  %v1971_v6 = vsel %vm1839_vm0, %v1929_v1, 0.0  ;;  %v1931_v13 = vmul.f32 %v8459_v60, %v8459_v60  ;;  %v2061_v1 = vsel %vm1839_vm0, %v8449_v52, 0.0 }
 0x241   :  { %941 = vmatmul.bf16.gmra.mxu0 %v8036_v61  ;;  %v2282_v61 = vsel %vm1839_vm0, %v8439_v44, 0.0  ;;  %v8053_v44 = vld [vmem:[%s11884_s0 + $0x1b0] sm:$0xff] }
 0x242   :  { %12096 = vst [vmem:[#allocation54_spill] sm:$0xff] %v8719_v25  ;;  %1691 = vmatmul.bf16.gmra.mxu1 %v7965_v0  ;;  %v1972_v25 = vsel %vm1839_vm0, %v1930_v21, 0.0  ;;  %v2413_v0 = vsel %vm1839_vm0, %v2371_v33, 0.0  ;;  %v2373_v21 = vmul.f32 %v8469_v4, %v8469_v4  ;;  %v1974_v42 = vsel %vm1839_vm0, %v1931_v13, 0.0  ;;  %1026 = vmatmul.bf16.gmra.mxu3 %v8053_v44 }
 0x243   :  { %v1973_v33 = vadd.f32 %v1972_v25, %v1971_v6  ;;  %v2062_v25 = vadd.f32 %v2061_v1, %v2060_v34  ;;  %v2193_v6 = vadd.f32 %v2192_v45, %v2191_v47  ;;  %v2284_v13 = vadd.f32 %v2283_v39, %v2282_v61 }
 0x244   :  { %v2415_v60 = vadd.f32 %v2414_v14, %v2413_v0  ;;  %v2416_v54 = vsel %vm1839_vm0, %v2373_v21, 0.0  ;;  %v1976_v34 = vsel %vm1839_vm0, %v1932_v50, 0.0  ;;  %v2065_v39 = vsel %vm1839_vm0, %v8479_v12, 0.0 }
 0x245   :  { %v2195_v44 = vadd.f32 %v2194_v18, %v2193_v6  ;;  %v2196_v47 = vsel %vm1839_vm0, %v2152_v59, 0.0  ;;  %v1933_v45 = vmul.f32 %v8489_v20, %v8489_v20  ;;  %v2286_v61 = vadd.f32 %v2285_v63, %v2284_v13  ;;  %v8037_v63 = vld [vmem:[%s11884_s0 + $0x130] sm:$0xff] }
 0x246   :  { %v904_v52 = vpop.f32.mrf.mxu0  ;;  %v2417_v0 = vadd.f32 %v2416_v54, %v2415_v60  ;;  %v1846_v1 = vadd.f32 %v1845_v10, %v1844_v11  ;;  %v2153_v14 = vmul.f32 %v8491_v23, %v8491_v23  ;;  %v2418_v18 = vsel %vm1839_vm0, %v2374_v24, 0.0  ;;  %v7966_v60 = vld [vmem:[%s11884_s0 + $0x124] sm:$0xff] }
 0x247   :  { %v1654_v55 = vpop.f32.mrf.mxu1  ;;  %v1847_v50 = vsel %vm1839_vm0, %v8489_v20, 0.0  ;;  %v2375_v59 = vmul.f32 %v8499_v28, %v8499_v28  ;;  %v2197_v21 = vadd.f32 %v2196_v47, %v2195_v44  ;;  %v1934_v24 = vmul.f32 %v8501_v31, %v8501_v31  ;;  %v7977_v20 = vld [vmem:[%s11884_s0 + $0x17c] sm:$0xff] }
 0x248   :  { %v8767_v29 = vadd.f32 %v1654_v55, %v904_v52  ;;  %v1975_v52 = vadd.f32 %v1974_v42, %v1973_v33  ;;  %v2064_v55 = vadd.f32 %v2063_v46, %v2062_v25  ;;  %v1978_v40 = vsel %vm1839_vm0, %v1933_v45, 0.0 }
 0x249   :  { %v2067_v42 = vsel %vm1839_vm0, %v8491_v23, 0.0  ;;  %v2154_v46 = vmul.f32 %v8509_v37, %v8509_v37  ;;  %v2288_v6 = vadd.f32 %v2287_v36, %v2286_v61  ;;  %v2419_v13 = vadd.f32 %v2418_v18, %v2417_v0 }
 0x24a   :  { %12097 = vst [vmem:[#allocation55_spill] sm:$0xff] %v8767_v29  ;;  %v1977_v11 = vadd.f32 %v1976_v34, %v1975_v52  ;;  %v2066_v54 = vadd.f32 %v2065_v39, %v2064_v55  ;;  %v1848_v10 = vadd.f32 %v1847_v50, %v1846_v1  ;;  %v2198_v52 = vsel %vm1839_vm0, %v2153_v14, 0.0 }
 0x24b   :  { %v2289_v55 = vsel %vm1839_vm0, %v8499_v28, 0.0  ;;  %v2420_v44 = vsel %vm1839_vm0, %v2375_v59, 0.0  ;;  %v1849_v34 = vsel %vm1839_vm0, %v8501_v31, 0.0  ;;  %v2376_v39 = vmul.f32 %v8511_v41, %v8511_v41 }
 0x24c   :  { %v1979_v47 = vadd.f32 %v1978_v40, %v1977_v11  ;;  %v2068_v45 = vadd.f32 %v2067_v42, %v2066_v54  ;;  %v1980_v61 = vsel %vm1839_vm0, %v1934_v24, 0.0  ;;  %v1935_v0 = vmul.f32 %v8519_v48, %v8519_v48 }
 0x24d   :  { %v2199_v1 = vadd.f32 %v2198_v52, %v2197_v21  ;;  %v2069_v14 = vsel %vm1839_vm0, %v8509_v37, 0.0  ;;  %v2200_v36 = vsel %vm1839_vm0, %v2154_v46, 0.0  ;;  %v2155_v18 = vmul.f32 %v8521_v51, %v8521_v51 }
 0x24e   :  { %v907_v27 = vpop.f32.mrf.mxu0  ;;  %v2290_v50 = vadd.f32 %v2289_v55, %v2288_v6  ;;  %v2421_v59 = vadd.f32 %v2420_v44, %v2419_v13  ;;  %v1981_v11 = vadd.f32 %v1980_v61, %v1979_v47  ;;  %v2291_v54 = vsel %vm1839_vm0, %v8511_v41, 0.0 }
 0x24f   :  { %v1657_v33 = vpop.f32.mrf.mxu1  ;;  %v2422_v21 = vsel %vm1839_vm0, %v2376_v39, 0.0  ;;  %v1936_v24 = vmul.f32 %v8531_v62, %v8531_v62  ;;  %v2070_v40 = vadd.f32 %v2069_v14, %v2068_v45  ;;  %v2201_v42 = vadd.f32 %v2200_v36, %v2199_v1 }
 0x250   :  { %v8804_v25 = vadd.f32 %v1657_v33, %v907_v27  ;;  %v8054_v27 = vld [vmem:[%s11884_s0 + $0x1b8] sm:$0xff]  ;;  %v7983_v33 = vld [vmem:[%s11884_s0 + $0x1ac] sm:$0xff]  ;;  %v1851_v46 = vsel %vm1839_vm0, %v8519_v48, 0.0  ;;  %v1982_v6 = vsel %vm1839_vm0, %v1935_v0, 0.0  ;;  %v2071_v52 = vsel %vm1839_vm0, %v8521_v51, 0.0 }
 0x251   :  { %946 = vmatmul.bf16.gmra.mxu0 %v8037_v63  ;;  %v1850_v63 = vadd.f32 %v1849_v34, %v1848_v10  ;;  %v2202_v55 = vsel %vm1839_vm0, %v2155_v18, 0.0  ;;  %v2156_v44 = vmul.f32 %v8539_v5, %v8539_v5  ;;  %1781 = vmatmul.bf16.gmra.mxu2 %v7983_v33  ;;  %v2292_v39 = vadd.f32 %v2291_v54, %v2290_v50 }
 0x252   :  { %12098 = vst [vmem:[#allocation56_spill] sm:$0xff] %v8804_v25  ;;  %1696 = vmatmul.bf16.gmra.mxu1 %v7966_v60  ;;  %v2377_v60 = vmul.f32 %v8529_v58, %v8529_v58  ;;  %1031 = vmatmul.bf16.gmra.mxu3 %v8054_v27  ;;  %v2423_v47 = vadd.f32 %v2422_v21, %v2421_v59  ;;  %v2293_v45 = vsel %vm1839_vm0, %v8529_v58, 0.0  ;;  %v1853_v0 = vsel %vm1839_vm0, %v8531_v62, 0.0 }
 0x253   :  { %v1984_v1 = vsel %vm1839_vm0, %v1936_v24, 0.0  ;;  %v2378_v14 = vmul.f32 %v8541_v9, %v8541_v9  ;;  %v1937_v36 = vmul.f32 %v8549_v16, %v8549_v16  ;;  %v1852_v18 = vadd.f32 %v1851_v46, %v1850_v63  ;;  %v8038_v46 = vld [vmem:[%s11884_s0 + $0x138] sm:$0xff] }
 0x254   :  { %v2424_v61 = vsel %vm1839_vm0, %v2377_v60, 0.0  ;;  %v1983_v27 = vadd.f32 %v1982_v6, %v1981_v11  ;;  %v2072_v50 = vadd.f32 %v2071_v52, %v2070_v40  ;;  %v2203_v59 = vadd.f32 %v2202_v55, %v2201_v42  ;;  %v7967_v6 = vld [vmem:[%s11884_s0 + $0x12c] sm:$0xff] }
 0x255   :  { %v2294_v54 = vadd.f32 %v2293_v45, %v2292_v39  ;;  %v2073_v21 = vsel %vm1839_vm0, %v8539_v5, 0.0  ;;  %v2204_v60 = vsel %vm1839_vm0, %v2156_v44, 0.0  ;;  %v2157_v33 = vmul.f32 %v8551_v19, %v8551_v19 }
 0x256   :  { %v909_v13 = vpop.f32.mrf.mxu0  ;;  %v2425_v24 = vadd.f32 %v2424_v61, %v2423_v47  ;;  %v2295_v41 = vsel %vm1839_vm0, %v8541_v9, 0.0  ;;  %v2426_v63 = vsel %vm1839_vm0, %v2378_v14, 0.0  ;;  %v1855_v11 = vsel %vm1839_vm0, %v8549_v16, 0.0 }
 0x257   :  { %v1659_v10 = vpop.f32.mrf.mxu1  ;;  %v1986_v40 = vsel %vm1839_vm0, %v1937_v36, 0.0  ;;  %v2379_v42 = vmul.f32 %v8559_v26, %v8559_v26  ;;  %v2074_v52 = vadd.f32 %v2073_v21, %v2072_v50  ;;  %v2205_v55 = vadd.f32 %v2204_v60, %v2203_v59 }
 0x258   :  { %v8843_v34 = vadd.f32 %v1659_v10, %v909_v13  ;;  %v1854_v13 = vadd.f32 %v1853_v0, %v1852_v18  ;;  %v1985_v10 = vadd.f32 %v1984_v1, %v1983_v27  ;;  %v2075_v44 = vsel %vm1839_vm0, %v8551_v19, 0.0 }
 0x259   :  { %v1938_v39 = vmul.f32 %v8561_v30, %v8561_v30  ;;  %v2206_v61 = vsel %vm1839_vm0, %v2157_v33, 0.0  ;;  %v2158_v0 = vmul.f32 %v8569_v38, %v8569_v38  ;;  %v2380_v1 = vmul.f32 %v8571_v43, %v8571_v43 }
 0x25a   :  { %12099 = vst [vmem:[#allocation57_spill] sm:$0xff] %v8843_v34  ;;  %v2296_v36 = vadd.f32 %v2295_v41, %v2294_v54  ;;  %v2427_v18 = vadd.f32 %v2426_v63, %v2425_v24  ;;  %v1856_v27 = vadd.f32 %v1855_v11, %v1854_v13  ;;  %v1987_v50 = vadd.f32 %v1986_v40, %v1985_v10 }
 0x25b   :  { %v2076_v59 = vadd.f32 %v2075_v44, %v2074_v52  ;;  %v2297_v21 = vsel %vm1839_vm0, %v8559_v26, 0.0  ;;  %v2428_v60 = vsel %vm1839_vm0, %v2379_v42, 0.0  ;;  %v1857_v33 = vsel %vm1839_vm0, %v8561_v30, 0.0 }
 0x25c   :  { %v2207_v16 = vadd.f32 %v2206_v61, %v2205_v55  ;;  %v1988_v19 = vsel %vm1839_vm0, %v1938_v39, 0.0  ;;  %v2077_v41 = vsel %vm1839_vm0, %v8569_v38, 0.0  ;;  %v1939_v54 = vmul.f32 %v8579_v53, %v8579_v53  ;;  %v8055_v39 = vld [vmem:[%s11884_s0 + $0x1c0] sm:$0xff] }
 0x25d   :  { %v2208_v24 = vsel %vm1839_vm0, %v2158_v0, 0.0  ;;  %v2299_v13 = vsel %vm1839_vm0, %v8571_v43, 0.0  ;;  %v2430_v10 = vsel %vm1839_vm0, %v2380_v1, 0.0  ;;  %v2159_v63 = vmul.f32 %v8581_v57, %v8581_v57 }
 0x25e   :  { %v912_v47 = vpop.f32.mrf.mxu0  ;;  %v2298_v11 = vadd.f32 %v2297_v21, %v2296_v36  ;;  %v2429_v40 = vadd.f32 %v2428_v60, %v2427_v18  ;;  %v1858_v42 = vadd.f32 %v1857_v33, %v1856_v27  ;;  %v2078_v52 = vadd.f32 %v2077_v41, %v2076_v59 }
 0x25f   :  { %v1662_v45 = vpop.f32.mrf.mxu1  ;;  %v1859_v55 = vsel %vm1839_vm0, %v8579_v53, 0.0  ;;  %v1940_v44 = vmul.f32 %v8591_v8, %v8591_v8  ;;  %v2079_v18 = vsel %vm1839_vm0, %v8581_v57, 0.0  ;;  %v2210_v27 = vsel %vm1839_vm0, %v2159_v63, 0.0 }
 0x260   :  { %v8883_v14 = vadd.f32 %v1662_v45, %v912_v47  ;;  %v7984_v47 = vld [vmem:[%s11884_s0 + $0x1b4] sm:$0xff]  ;;  %v2209_v45 = vadd.f32 %v2208_v24, %v2207_v16  ;;  %v2300_v61 = vadd.f32 %v2299_v13, %v2298_v11  ;;  %v2431_v0 = vadd.f32 %v2430_v10, %v2429_v40 }
 0x261   :  { %951 = vmatmul.bf16.gmra.mxu0 %v8038_v46  ;;  %v2381_v46 = vmul.f32 %v8589_v2, %v8589_v2  ;;  %1786 = vmatmul.bf16.gmra.mxu2 %v7984_v47  ;;  %v1860_v21 = vadd.f32 %v1859_v55, %v1858_v42  ;;  %v2301_v16 = vsel %vm1839_vm0, %v8589_v2, 0.0  ;;  %v1861_v33 = vsel %vm1839_vm0, %v8591_v8, 0.0 }
 0x262   :  { %12100 = vst [vmem:[#allocation58_spill] sm:$0xff] %v8883_v14  ;;  %1701 = vmatmul.bf16.gmra.mxu1 %v7967_v6  ;;  %v1989_v6 = vadd.f32 %v1988_v19, %v1987_v50  ;;  %v1990_v19 = vsel %vm1839_vm0, %v1939_v54, 0.0  ;;  %v2160_v50 = vmul.f32 %v8599_v17, %v8599_v17  ;;  %1036 = vmatmul.bf16.gmra.mxu3 %v8055_v39  ;;  %v1992_v41 = vsel %vm1839_vm0, %v1940_v44, 0.0 }
 0x263   :  { %v2432_v60 = vsel %vm1839_vm0, %v2381_v46, 0.0  ;;  %v2081_v54 = vsel %vm1839_vm0, %v8599_v17, 0.0  ;;  %v2382_v24 = vmul.f32 %v8601_v22, %v8601_v22  ;;  %v1941_v13 = vmul.f32 %v8609_v32, %v8609_v32 }
 0x264   :  { %v1991_v10 = vadd.f32 %v1990_v19, %v1989_v6  ;;  %v2080_v63 = vadd.f32 %v2079_v18, %v2078_v52  ;;  %v2211_v11 = vadd.f32 %v2210_v27, %v2209_v45  ;;  %v2161_v40 = vmul.f32 %v8611_v35, %v8611_v35  ;;  %v8039_v19 = vld [vmem:[%s11884_s0 + $0x140] sm:$0xff] }
 0x265   :  { %v2302_v42 = vadd.f32 %v2301_v16, %v2300_v61  ;;  %v2212_v46 = vsel %vm1839_vm0, %v2160_v50, 0.0  ;;  %v2303_v55 = vsel %vm1839_vm0, %v8601_v22, 0.0  ;;  %v2383_v44 = vmul.f32 %v8619_v49, %v8619_v49 }
 0x266   :  { %v914_v1 = vpop.f32.mrf.mxu0  ;;  %v2433_v39 = vadd.f32 %v2432_v60, %v2431_v0  ;;  %v1862_v47 = vadd.f32 %v1861_v33, %v1860_v21  ;;  %v2434_v6 = vsel %vm1839_vm0, %v2382_v24, 0.0  ;;  %v1863_v52 = vsel %vm1839_vm0, %v8609_v32, 0.0  ;;  %v7968_v0 = vld [vmem:[%s11884_s0 + $0x134] sm:$0xff] }
 0x267   :  { %v1664_v36 = vpop.f32.mrf.mxu1  ;;  %v1994_v45 = vsel %vm1839_vm0, %v1941_v13, 0.0  ;;  %v1942_v61 = vmul.f32 %v8621_v56, %v8621_v56  ;;  %v2213_v18 = vadd.f32 %v2212_v46, %v2211_v11  ;;  %v2304_v27 = vadd.f32 %v2303_v55, %v2302_v42  ;;  %v12101_v46 = vld [vmem:[#allocation43_spill] sm:$0xff]  ;;  %v7976_v32 = vld [vmem:[%s11884_s0 + $0x174] sm:$0xff] }
 0x268   :  { %v8919_v59 = vadd.f32 %v1664_v36, %v914_v1  ;;  %v1993_v1 = vadd.f32 %v1992_v41, %v1991_v10  ;;  %v2082_v36 = vadd.f32 %v2081_v54, %v2080_v63  ;;  %v2083_v50 = vsel %vm1839_vm0, %v8611_v35, 0.0 }
 0x269   :  { %v2214_v21 = vsel %vm1839_vm0, %v2161_v40, 0.0  ;;  %v2305_v33 = vsel %vm1839_vm0, %v8619_v49, 0.0  ;;  %v2436_v41 = vsel %vm1839_vm0, %v2383_v44, 0.0  ;;  %v2162_v54 = vmul.f32 %v8629_v3, %v8629_v3  ;;  %v12102_v44 = vld [vmem:[#allocation44_spill] sm:$0xff] }
 0x26a   :  { %v2435_v13 = vadd.f32 %v2434_v6, %v2433_v39  ;;  %v1864_v10 = vadd.f32 %v1863_v52, %v1862_v47  ;;  %v1995_v63 = vadd.f32 %v1994_v45, %v1993_v1  ;;  %v1865_v11 = vsel %vm1839_vm0, %v8621_v56, 0.0 }
 0x26b   :  { %v1996_v40 = vsel %vm1839_vm0, %v1942_v61, 0.0  ;;  %v2085_v42 = vsel %vm1839_vm0, %v8629_v3, 0.0  ;;  %v2384_v55 = vmul.f32 %v12101_v46, %v12101_v46  ;;  %v1943_v22 = vmul.f32 %v12102_v44, %v12102_v44  ;;  %v12103_v61 = vld [vmem:[#allocation47_spill] sm:$0xff] }
 0x26c   :  { %v2215_v39 = vadd.f32 %v2214_v21, %v2213_v18  ;;  %v2306_v47 = vadd.f32 %v2305_v33, %v2304_v27  ;;  %v2437_v1 = vadd.f32 %v2436_v41, %v2435_v13  ;;  %v2216_v6 = vsel %vm1839_vm0, %v2162_v54, 0.0  ;;  %v8056_v33 = vld [vmem:[%s11884_s0 + $0x1c8] sm:$0xff]  ;;  %v7985_v41 = vld [vmem:[%s11884_s0 + $0x1bc] sm:$0xff] }
 0x26d   :  { %v2307_v52 = vsel %vm1839_vm0, %v12101_v46, 0.0  ;;  %v1867_v45 = vsel %vm1839_vm0, %v12102_v44, 0.0  ;;  %v1866_v8 = vadd.f32 %v1865_v11, %v1864_v10  ;;  %v1997_v26 = vadd.f32 %v1996_v40, %v1995_v63  ;;  %v8049_v46 = vld [vmem:[%s11884_s0 + $0x190] sm:$0xff] }
 0x26e   :  { %v917_v16 = vpop.f32.mrf.mxu0  ;;  %v1998_v18 = vsel %vm1839_vm0, %v1943_v22, 0.0  ;;  %v1869_v27 = vsel %vm1839_vm0, %v12103_v61, 0.0  ;;  %v2217_v54 = vadd.f32 %v2216_v6, %v2215_v39  ;;  %v8992_v13 = vadd.f32 %v2307_v52, %v2306_v47  ;;  %v12107_v52 = vld [vmem:[#allocation48_spill] sm:$0xff] }
 0x26f   :  { %v1667_v60 = vpop.f32.mrf.mxu1  ;;  %v1868_v10 = vadd.f32 %v1867_v45, %v1866_v8  ;;  %v1999_v8 = vadd.f32 %v1998_v18, %v1997_v26  ;;  %v2164_v45 = vmul.f32 %v12107_v52, %v12107_v52 }
 0x270   :  { %v8960_v24 = vadd.f32 %v1667_v60, %v917_v16  ;;  %v2084_v16 = vadd.f32 %v2083_v50, %v2082_v36  ;;  %v1944_v60 = vmul.f32 %v12103_v61, %v12103_v61  ;;  %v12105_v50 = vld [vmem:[#allocation50_spill] sm:$0xff] }
 0x271   :  { %956 = vmatmul.bf16.gmra.mxu0 %v8039_v19  ;;  %v12104_v19 = vld [vmem:[#allocation45_spill] sm:$0xff]  ;;  %v1945_v21 = vmul.f32 %v12105_v50, %v12105_v50  ;;  %1791 = vmatmul.bf16.gmra.mxu2 %v7985_v41  ;;  %v1870_v6 = vadd.f32 %v1869_v27, %v1868_v10  ;;  %v1875_v27 = vsel %vm1839_vm0, %v8804_v25, 0.0 }
 0x272   :  { %1706 = vmatmul.bf16.gmra.mxu1 %v7968_v0  ;;  %v2086_v31 = vadd.f32 %v2085_v42, %v2084_v16  ;;  %v2163_v36 = vmul.f32 %v12104_v19, %v12104_v19  ;;  %v2438_v0 = vsel %vm1839_vm0, %v2384_v55, 0.0  ;;  %v2087_v22 = vsel %vm1839_vm0, %v12104_v19, 0.0  ;;  %v12106_v55 = vld [vmem:[#allocation53_spill] sm:$0xff]  ;;  %1041 = vmatmul.bf16.gmra.mxu3 %v8056_v33  ;;  %v12108_v33 = vld [vmem:[#allocation46_spill] sm:$0xff] }
 0x273   :  { %v2000_v40 = vsel %vm1839_vm0, %v1944_v60, 0.0  ;;  %v1871_v42 = vsel %vm1839_vm0, %v12105_v50, 0.0  ;;  %v1946_v16 = vmul.f32 %v12106_v55, %v12106_v55  ;;  %v9003_v39 = vadd.f32 %v2438_v0, %v2437_v1 }
 0x274   :  { %v2218_v47 = vsel %vm1839_vm0, %v2163_v36, 0.0  ;;  %v2002_v60 = vsel %vm1839_vm0, %v1945_v21, 0.0  ;;  %v1873_v19 = vsel %vm1839_vm0, %v12106_v55, 0.0  ;;  %v2385_v1 = vmul.f32 %v12108_v33, %v12108_v33  ;;  %v12109_v55 = vld [vmem:[#allocation51_spill] sm:$0xff] }
 0x275   :  { %v2001_v0 = vadd.f32 %v2000_v40, %v1999_v8  ;;  %v1872_v26 = vadd.f32 %v1871_v42, %v1870_v6  ;;  %v2089_v36 = vsel %vm1839_vm0, %v12107_v52, 0.0  ;;  %v2004_v18 = vsel %vm1839_vm0, %v1946_v16, 0.0  ;;  %v8040_v6 = vld [vmem:[%s11884_s0 + $0x148] sm:$0xff] }
 0x276   :  { %v919_v63 = vpop.f32.mrf.mxu0  ;;  %v1948_v21 = vmul.f32 %v8919_v59, %v8919_v59  ;;  %v2219_v41 = vadd.f32 %v2218_v47, %v2217_v54  ;;  %v2309_v40 = vsel %vm1839_vm0, %v12108_v33, 0.0  ;;  %v2220_v42 = vsel %vm1839_vm0, %v2164_v45, 0.0  ;;  %v7969_v54 = vld [vmem:[%s11884_s0 + $0x13c] sm:$0xff] }
 0x277   :  { %v1669_v11 = vpop.f32.mrf.mxu1  ;;  %v2003_v10 = vadd.f32 %v2002_v60, %v2001_v0  ;;  %v1877_v16 = vsel %vm1839_vm0, %v8919_v59, 0.0 }
 0x278   :  { %v9001_v44 = vadd.f32 %v1669_v11, %v919_v63  ;;  %v1947_v63 = vmul.f32 %v8804_v25, %v8804_v25  ;;  %v2088_v11 = vadd.f32 %v2087_v22, %v2086_v31  ;;  %v2165_v31 = vmul.f32 %v12109_v55, %v12109_v55  ;;  %v12110_v25 = vld [vmem:[#allocation54_spill] sm:$0xff] }
 0x279   :  { %v1874_v22 = vadd.f32 %v1873_v19, %v1872_v26  ;;  %v2440_v19 = vsel %vm1839_vm0, %v2385_v1, 0.0  ;;  %v2005_v60 = vadd.f32 %v2004_v18, %v2003_v10  ;;  %v2166_v59 = vmul.f32 %v12110_v25, %v12110_v25 }
 0x27a   :  { %v2006_v8 = vsel %vm1839_vm0, %v1947_v63, 0.0  ;;  %v2090_v47 = vadd.f32 %v2089_v36, %v2088_v11  ;;  %v2091_v63 = vsel %vm1839_vm0, %v12109_v55, 0.0  ;;  %v2008_v33 = vsel %vm1839_vm0, %v1948_v21, 0.0 }
 0x27b   :  { %v1876_v0 = vadd.f32 %v1875_v27, %v1874_v22  ;;  %v2221_v4 = vadd.f32 %v2220_v42, %v2219_v41  ;;  %v2222_v61 = vsel %vm1839_vm0, %v2165_v31, 0.0  ;;  %v2007_v37 = vadd.f32 %v2006_v8, %v2005_v60  ;;  %v12111_v27 = vld [vmem:[#allocation49_spill] sm:$0xff] }
 0x27c   :  { %v2093_v11 = vsel %vm1839_vm0, %v12110_v25, 0.0  ;;  %v2167_v1 = vmul.f32 %v8843_v34, %v8843_v34  ;;  %v2386_v21 = vmul.f32 %v12111_v27, %v12111_v27  ;;  %v2092_v10 = vadd.f32 %v2091_v63, %v2090_v47 }
 0x27d   :  { %v1878_v56 = vadd.f32 %v1877_v16, %v1876_v0  ;;  %v2009_v41 = vadd.f32 %v2008_v33, %v2007_v37  ;;  %v2224_v31 = vsel %vm1839_vm0, %v2166_v59, 0.0  ;;  %v2095_v42 = vsel %vm1839_vm0, %v8843_v34, 0.0 }
 0x27e   :  { %v922_v26 = vpop.f32.mrf.mxu0  ;;  %v2168_v8 = vmul.f32 %v8960_v24, %v8960_v24  ;;  %v2094_v60 = vadd.f32 %v2093_v11, %v2092_v10  ;;  %v2310_v37 = vadd.f32 %v2309_v40, %v8992_v13  ;;  %v2226_v33 = vsel %vm1839_vm0, %v2167_v1, 0.0 }
 0x27f   :  { %v1672_v45 = vpop.f32.mrf.mxu1  ;;  %v2097_v47 = vsel %vm1839_vm0, %v8960_v24, 0.0  ;;  %v2442_v13 = vsel %vm1839_vm0, %v2386_v21, 0.0  ;;  %v2388_v24 = vmul.f32 %v8767_v29, %v8767_v29  ;;  %v2315_v10 = vsel %vm1839_vm0, %v8767_v29, 0.0 }
 0x280   :  { %v1673_v17 = vadd.f32 %v1672_v45, %v922_v26  ;;  %v2441_v26 = vadd.f32 %v2440_v19, %v9003_v39  ;;  %v2096_v45 = vadd.f32 %v2095_v42, %v2094_v60  ;;  %v2228_v1 = vsel %vm1839_vm0, %v2168_v8, 0.0 }
 0x281   :  { %961 = vmatmul.bf16.gmra.mxu0 %v8040_v6  ;;  %v12112_v6 = vld [vmem:[#allocation52_spill] sm:$0xff] }
 0x282   :  { %v1879_v36 = vsel %vm1839_vm0, %v1673_v17, 0.0  ;;  %v1949_v18 = vmul.f32 %v1673_v17, %v1673_v17  ;;  %1711 = vmatmul.bf16.gmra.mxu1 %v7969_v54  ;;  %v2223_v17 = vadd.f32 %v2222_v61, %v2221_v4  ;;  %v2387_v54 = vmul.f32 %v12112_v6, %v12112_v6  ;;  %v8057_v4 = vld [vmem:[%s11884_s0 + $0x1d0] sm:$0xff]  ;;  %v7986_v61 = vld [vmem:[%s11884_s0 + $0x1c4] sm:$0xff] }
 0x283   :  { %v9050_v22 = vadd.f32 %v1879_v36, %v1878_v56  ;;  %v2311_v56 = vsel %vm1839_vm0, %v12111_v27, 0.0  ;;  %v2313_v11 = vsel %vm1839_vm0, %v12112_v6, 0.0  ;;  %1046 = vmatmul.bf16.gmra.mxu3 %v8057_v4  ;;  %1796 = vmatmul.bf16.gmra.mxu2 %v7986_v61  ;;  %v2098_v19 = vadd.f32 %v2097_v47, %v2096_v45  ;;  %v7970_v45 = vld [vmem:[%s11884_s0 + $0x144] sm:$0xff] }
 0x284   :  { %v2010_v16 = vsel %vm1839_vm0, %v1949_v18, 0.0  ;;  %v2225_v40 = vadd.f32 %v2224_v31, %v2223_v17  ;;  %v2312_v18 = vadd.f32 %v2311_v56, %v2310_v37  ;;  %v2444_v39 = vsel %vm1839_vm0, %v2387_v54, 0.0 }
 0x285   :  { %v9060_v0 = vadd.f32 %v2010_v16, %v2009_v41  ;;  %v2389_v41 = vmul.f32 %v8883_v14, %v8883_v14  ;;  %v2443_v16 = vadd.f32 %v2442_v13, %v2441_v26  ;;  %v2446_v37 = vsel %vm1839_vm0, %v2388_v24, 0.0 }
 0x286   :  { %v924_v63 = vpop.f32.mrf.mxu0  ;;  %v2227_v21 = vadd.f32 %v2226_v33, %v2225_v40  ;;  %v2314_v17 = vadd.f32 %v2313_v11, %v2312_v18  ;;  %v2317_v54 = vsel %vm1839_vm0, %v8883_v14, 0.0  ;;  %v2390_v56 = vmul.f32 %v9001_v44, %v9001_v44  ;;  %v8041_v40 = vld [vmem:[%s11884_s0 + $0x150] sm:$0xff] }
 0x287   :  { %v1674_v59 = vpop.f32.mrf.mxu1  ;;  %v2445_v47 = vadd.f32 %v2444_v39, %v2443_v16  ;;  %v2448_v26 = vsel %vm1839_vm0, %v2389_v41, 0.0  ;;  %v2319_v13 = vsel %vm1839_vm0, %v9001_v44, 0.0  ;;  %v7987_v16 = vld [vmem:[%s11884_s0 + $0x1cc] sm:$0xff] }
 0x288   :  { %v1675_v36 = vadd.f32 %v1674_v59, %v924_v63  ;;  %v2229_v8 = vadd.f32 %v2228_v1, %v2227_v21  ;;  %v2316_v4 = vadd.f32 %v2315_v10, %v2314_v17  ;;  %v2450_v1 = vsel %vm1839_vm0, %v2390_v56, 0.0  ;;  %v1762_v56 = vpop.f32.mrf.mxu2  ;;  %v7975_v14 = vld [vmem:[%s11884_s0 + $0x16c] sm:$0xff] }
 0x289   :  { %v2447_v63 = vadd.f32 %v2446_v37, %v2445_v47  ;;  %v8042_v47 = vld [vmem:[%s11884_s0 + $0x158] sm:$0xff] }
 0x28a   :  { %v2099_v31 = vsel %vm1839_vm0, %v1675_v36, 0.0  ;;  %v2169_v42 = vmul.f32 %v1675_v36, %v1675_v36  ;;  %v2318_v59 = vadd.f32 %v2317_v54, %v2316_v4  ;;  %v1012_v54 = vpop.f32.mrf.mxu3  ;;  %v7971_v4 = vld [vmem:[%s11884_s0 + $0x14c] sm:$0xff] }
 0x28b   :  { %v9087_v60 = vadd.f32 %v2099_v31, %v2098_v19  ;;  %v2449_v18 = vadd.f32 %v2448_v26, %v2447_v63 }
 0x28c   :  { %v2230_v33 = vsel %vm1839_vm0, %v2169_v42, 0.0  ;;  %v2320_v39 = vadd.f32 %v2319_v13, %v2318_v59  ;;  %v8058_v42 = vld [vmem:[%s11884_s0 + $0x1d8] sm:$0xff] }
 0x28d   :  { %v9095_v61 = vadd.f32 %v2230_v33, %v2229_v8  ;;  %v2451_v21 = vadd.f32 %v2450_v1, %v2449_v18  ;;  %v9121_v33 = vadd.f32 %v1762_v56, %v1012_v54 }
 0x28e   :  { %v927_v11 = vpop.f32.mrf.mxu0 }
 0x28f   :  { %v1677_v24 = vpop.f32.mrf.mxu1  ;;  %12114 = vst [vmem:[#allocation60_spill] sm:$0xff] %v9121_v33 }
 0x290   :  { %v1678_v36 = vadd.f32 %v1677_v24, %v927_v11  ;;  %v1764_v63 = vpop.f32.mrf.mxu2  ;;  %v8059_v11 = vld [vmem:[%s11884_s0 + $0x1e0] sm:$0xff]  ;;  %v7988_v24 = vld [vmem:[%s11884_s0 + $0x1d4] sm:$0xff] }
 0x291   :  { %966 = vmatmul.bf16.gmra.mxu0 %v8041_v40 }
 0x292   :  { %v2321_v19 = vsel %vm1839_vm0, %v1678_v36, 0.0  ;;  %v2391_v44 = vmul.f32 %v1678_v36, %v1678_v36  ;;  %1716 = vmatmul.bf16.gmra.mxu1 %v7970_v45  ;;  %v1014_v45 = vpop.f32.mrf.mxu3 }
 0x293   :  { %v9108_v10 = vadd.f32 %v2321_v19, %v2320_v39  ;;  %1051 = vmatmul.bf16.gmra.mxu3 %v8058_v42  ;;  %1801 = vmatmul.bf16.gmra.mxu2 %v7987_v16  ;;  %v9131_v59 = vadd.f32 %v1764_v63, %v1014_v45 }
 0x294   :  { %v2452_v41 = vsel %vm1839_vm0, %v2391_v44, 0.0 }
 0x295   :  { %v9111_v31 = vadd.f32 %v2452_v41, %v2451_v21  ;;  %12116 = vst [vmem:[#allocation62_spill] sm:$0xff] %v9131_v59  ;;  %v8043_v21 = vld [vmem:[%s11884_s0 + $0x160] sm:$0xff]  ;;  %v7972_v41 = vld [vmem:[%s11884_s0 + $0x154] sm:$0xff] }
 0x296   :  { %v929_v17 = vpop.f32.mrf.mxu0 }
 0x297   :  { %v1679_v8 = vpop.f32.mrf.mxu1 }
 0x298   :  { %v9119_v37 = vadd.f32 %v1679_v8, %v929_v17  ;;  %v1767_v19 = vpop.f32.mrf.mxu2 }
 0x29a   :  { %12113 = vst [vmem:[#allocation59_spill] sm:$0xff] %v9119_v37  ;;  %v1017_v39 = vpop.f32.mrf.mxu3 }
 0x29b   :  { %v9141_v44 = vadd.f32 %v1767_v19, %v1017_v39 }
 0x29d   :  { %12118 = vst [vmem:[#allocation64_spill] sm:$0xff] %v9141_v44 }
 0x29e   :  { %v932_v26 = vpop.f32.mrf.mxu0 }
 0x29f   :  { %v1682_v13 = vpop.f32.mrf.mxu1 }
 0x2a0   :  { %v9129_v40 = vadd.f32 %v1682_v13, %v932_v26  ;;  %v1769_v54 = vpop.f32.mrf.mxu2 }
 0x2a1   :  { %971 = vmatmul.bf16.gmra.mxu0 %v8042_v47  ;;  %v8060_v47 = vld [vmem:[%s11884_s0 + $0x1e8] sm:$0xff] }
 0x2a2   :  { %12115 = vst [vmem:[#allocation61_spill] sm:$0xff] %v9129_v40  ;;  %1721 = vmatmul.bf16.gmra.mxu1 %v7971_v4  ;;  %v1019_v8 = vpop.f32.mrf.mxu3  ;;  %v7989_v4 = vld [vmem:[%s11884_s0 + $0x1dc] sm:$0xff] }
 0x2a3   :  { %1056 = vmatmul.bf16.gmra.mxu3 %v8059_v11  ;;  %1806 = vmatmul.bf16.gmra.mxu2 %v7988_v24  ;;  %v9151_v56 = vadd.f32 %v1769_v54, %v1019_v8  ;;  %v8061_v8 = vld [vmem:[%s11884_s0 + $0x1f0] sm:$0xff]  ;;  %v7990_v54 = vld [vmem:[%s11884_s0 + $0x1e4] sm:$0xff] }
 0x2a5   :  { %12120 = vst [vmem:[#allocation66_spill] sm:$0xff] %v9151_v56 }
 0x2a6   :  { %v934_v1 = vpop.f32.mrf.mxu0 }
 0x2a7   :  { %v1684_v36 = vpop.f32.mrf.mxu1 }
 0x2a8   :  { %v9139_v18 = vadd.f32 %v1684_v36, %v934_v1  ;;  %v1772_v11 = vpop.f32.mrf.mxu2  ;;  %v8044_v1 = vld [vmem:[%s11884_s0 + $0x168] sm:$0xff]  ;;  %v7973_v36 = vld [vmem:[%s11884_s0 + $0x15c] sm:$0xff] }
 0x2aa   :  { %12117 = vst [vmem:[#allocation63_spill] sm:$0xff] %v9139_v18  ;;  %v1022_v63 = vpop.f32.mrf.mxu3 }
 0x2ab   :  { %v9161_v24 = vadd.f32 %v1772_v11, %v1022_v63 }
 0x2ad   :  { %12122 = vst [vmem:[#allocation68_spill] sm:$0xff] %v9161_v24 }
 0x2ae   :  { %v937_v42 = vpop.f32.mrf.mxu0 }
 0x2af   :  { %v1687_v16 = vpop.f32.mrf.mxu1 }
 0x2b0   :  { %v9149_v17 = vadd.f32 %v1687_v16, %v937_v42  ;;  %v1774_v42 = vpop.f32.mrf.mxu2 }
 0x2b1   :  { %976 = vmatmul.bf16.gmra.mxu0 %v8043_v21 }
 0x2b2   :  { %12119 = vst [vmem:[#allocation65_spill] sm:$0xff] %v9149_v17  ;;  %1726 = vmatmul.bf16.gmra.mxu1 %v7972_v41  ;;  %v1024_v41 = vpop.f32.mrf.mxu3 }
 0x2b3   :  { %1061 = vmatmul.bf16.gmra.mxu3 %v8060_v47  ;;  %1811 = vmatmul.bf16.gmra.mxu2 %v7989_v4  ;;  %v9171_v16 = vadd.f32 %v1774_v42, %v1024_v41 }
 0x2b5   :  { %12124 = vst [vmem:[#allocation70_spill] sm:$0xff] %v9171_v16 }
 0x2b6   :  { %v939_v26 = vpop.f32.mrf.mxu0 }
 0x2b7   :  { %v1689_v13 = vpop.f32.mrf.mxu1 }
 0x2b8   :  { %v9159_v45 = vadd.f32 %v1689_v13, %v939_v26  ;;  %v1777_v63 = vpop.f32.mrf.mxu2 }
 0x2ba   :  { %12121 = vst [vmem:[#allocation67_spill] sm:$0xff] %v9159_v45 }
 0x2be   :  { %v942_v39 = vpop.f32.mrf.mxu0 }
 0x2bf   :  { %v1692_v19 = vpop.f32.mrf.mxu1 }
 0x2c0   :  { %v9169_v21 = vadd.f32 %v1692_v19, %v942_v39 }
 0x2c1   :  { %981 = vmatmul.bf16.gmra.mxu0 %v8044_v1  ;;  %v8045_v1 = vld [vmem:[%s11884_s0 + $0x170] sm:$0xff] }
 0x2c2   :  { %12123 = vst [vmem:[#allocation69_spill] sm:$0xff] %v9169_v21  ;;  %1731 = vmatmul.bf16.gmra.mxu1 %v7973_v36  ;;  %v7974_v36 = vld [vmem:[%s11884_s0 + $0x164] sm:$0xff] }
 0x2c3   :  { %1066 = vmatmul.bf16.gmra.mxu3 %v8061_v8  ;;  %1816 = vmatmul.bf16.gmra.mxu2 %v7990_v54  ;;  %v9193_v8 = vpop.f32.mrf.mxu2  ;;  %v8062_v54 = vld [vmem:[%s11884_s0 + $0x1f8] sm:$0xff] }
 0x2c5   :  { %v1027_v13 = vpop.f32.mrf.mxu3 }
 0x2c6   :  { %v944_v47 = vpop.f32.mrf.mxu0  ;;  %v9181_v11 = vadd.f32 %v1777_v63, %v1027_v13 }
 0x2c7   :  { %v1694_v4 = vpop.f32.mrf.mxu1 }
 0x2c8   :  { %v9179_v26 = vadd.f32 %v1694_v4, %v944_v47  ;;  %12126 = vst [vmem:[#allocation72_spill] sm:$0xff] %v9181_v11  ;;  %v7991_v47 = vld [vmem:[%s11884_s0 + $0x1ec] sm:$0xff] }
 0x2ca   :  { %12125 = vst [vmem:[#allocation71_spill] sm:$0xff] %v9179_v26 }
 0x2cd   :  { %v9191_v42 = vpop.f32.mrf.mxu3 }
 0x2ce   :  { %v947_v39 = vpop.f32.mrf.mxu0 }
 0x2cf   :  { %v1697_v19 = vpop.f32.mrf.mxu1 }
 0x2d0   :  { %v9189_v41 = vadd.f32 %v1697_v19, %v947_v39  ;;  %v8046_v19 = vld [vmem:[%s11884_s0 + $0x178] sm:$0xff] }
 0x2d1   :  { %986 = vmatmul.bf16.gmra.mxu0 %v8045_v1 }
 0x2d2   :  { %12127 = vst [vmem:[#allocation73_spill] sm:$0xff] %v9189_v41  ;;  %1736 = vmatmul.bf16.gmra.mxu1 %v7974_v36 }
 0x2d3   :  { %1071 = vmatmul.bf16.gmra.mxu3 %v8062_v54  ;;  %1821 = vmatmul.bf16.gmra.mxu2 %v7991_v47 }
 0x2d4   :  { %v1782_v36 = vpop.f32.mrf.mxu2 }
 0x2d5   :  { %v1032_v1 = vpop.f32.mrf.mxu3 }
 0x2d6   :  { %v949_v4 = vpop.f32.mrf.mxu0  ;;  %v9203_v39 = vadd.f32 %v1782_v36, %v1032_v1 }
 0x2d7   :  { %v1699_v13 = vpop.f32.mrf.mxu1 }
 0x2d8   :  { %v9201_v63 = vadd.f32 %v1699_v13, %v949_v4  ;;  %12129 = vst [vmem:[#allocation75_spill] sm:$0xff] %v9203_v39  ;;  %v8063_v4 = vld [vmem:[%s11884_s0 + $0x200] sm:$0xff]  ;;  %v7992_v13 = vld [vmem:[%s11884_s0 + $0x1f4] sm:$0xff] }
 0x2da   :  { %12128 = vst [vmem:[#allocation74_spill] sm:$0xff] %v9201_v63 }
 0x2dc   :  { %v9215_v47 = vpop.f32.mrf.mxu2 }
 0x2dd   :  { %v9213_v54 = vpop.f32.mrf.mxu3 }
 0x2de   :  { %v952_v34 = vpop.f32.mrf.mxu0 }
 0x2df   :  { %v1702_v29 = vpop.f32.mrf.mxu1 }
 0x2e0   :  { %v9211_v25 = vadd.f32 %v1702_v29, %v952_v34 }
 0x2e1   :  { %991 = vmatmul.bf16.gmra.mxu0 %v8046_v19  ;;  %v8047_v19 = vld [vmem:[%s11884_s0 + $0x180] sm:$0xff] }
 0x2e2   :  { %12130 = vst [vmem:[#allocation76_spill] sm:$0xff] %v9211_v25  ;;  %1741 = vmatmul.bf16.gmra.mxu1 %v7975_v14 }
 0x2e3   :  { %1076 = vmatmul.bf16.gmra.mxu3 %v8063_v4  ;;  %1826 = vmatmul.bf16.gmra.mxu2 %v7992_v13 }
 0x2e4   :  { %v1787_v34 = vpop.f32.mrf.mxu2 }
 0x2e5   :  { %v1037_v29 = vpop.f32.mrf.mxu3 }
 0x2e6   :  { %v954_v1 = vpop.f32.mrf.mxu0  ;;  %v9225_v14 = vadd.f32 %v1787_v34, %v1037_v29 }
 0x2e7   :  { %v1704_v36 = vpop.f32.mrf.mxu1 }
 0x2e8   :  { %v9223_v30 = vadd.f32 %v1704_v36, %v954_v1  ;;  %12132 = vst [vmem:[#allocation78_spill] sm:$0xff] %v9225_v14  ;;  %v8064_v1 = vld [vmem:[%s11884_s0 + $0x208] sm:$0xff]  ;;  %v7993_v36 = vld [vmem:[%s11884_s0 + $0x1fc] sm:$0xff] }
 0x2ea   :  { %12131 = vst [vmem:[#allocation77_spill] sm:$0xff] %v9223_v30 }
 0x2ec   :  { %v9237_v13 = vpop.f32.mrf.mxu2 }
 0x2ed   :  { %v9235_v4 = vpop.f32.mrf.mxu3 }
 0x2ee   :  { %v957_v62 = vpop.f32.mrf.mxu0 }
 0x2ef   :  { %v1707_v50 = vpop.f32.mrf.mxu1 }
 0x2f0   :  { %v9233_v48 = vadd.f32 %v1707_v50, %v957_v62 }
 0x2f1   :  { %996 = vmatmul.bf16.gmra.mxu0 %v8047_v19  ;;  %v8048_v19 = vld [vmem:[%s11884_s0 + $0x188] sm:$0xff] }
 0x2f2   :  { %12133 = vst [vmem:[#allocation79_spill] sm:$0xff] %v9233_v48  ;;  %1746 = vmatmul.bf16.gmra.mxu1 %v7976_v32 }
 0x2f3   :  { %1081 = vmatmul.bf16.gmra.mxu3 %v8064_v1  ;;  %1831 = vmatmul.bf16.gmra.mxu2 %v7993_v36 }
 0x2f4   :  { %v1792_v32 = vpop.f32.mrf.mxu2 }
 0x2f5   :  { %v1042_v62 = vpop.f32.mrf.mxu3 }
 0x2f6   :  { %v959_v29 = vpop.f32.mrf.mxu0  ;;  %v9247_v50 = vadd.f32 %v1792_v32, %v1042_v62 }
 0x2f7   :  { %v1709_v34 = vpop.f32.mrf.mxu1 }
 0x2f8   :  { %v9245_v53 = vadd.f32 %v1709_v34, %v959_v29  ;;  %12135 = vst [vmem:[#allocation81_spill] sm:$0xff] %v9247_v50 }
 0x2fa   :  { %12134 = vst [vmem:[#allocation80_spill] sm:$0xff] %v9245_v53 }
 0x2fc   :  { %v9259_v36 = vpop.f32.mrf.mxu2 }
 0x2fd   :  { %v9257_v1 = vpop.f32.mrf.mxu3 }
 0x2fe   :  { %v962_v27 = vpop.f32.mrf.mxu0 }
 0x2ff   :  { %v1712_v49 = vpop.f32.mrf.mxu1 }
 0x300   :  { %v9255_v6 = vadd.f32 %v1712_v49, %v962_v27 }
 0x301   :  { %1001 = vmatmul.bf16.gmra.mxu0 %v8048_v19 }
 0x302   :  { %12136 = vst [vmem:[#allocation82_spill] sm:$0xff] %v9255_v6  ;;  %1751 = vmatmul.bf16.gmra.mxu1 %v7977_v20  ;;  %v7978_v20 = vld [vmem:[%s11884_s0 + $0x184] sm:$0xff] }
 0x306   :  { %v964_v29 = vpop.f32.mrf.mxu0  ;;  %v1047_v32 = vpop.f32.mrf.mxu3 }
 0x307   :  { %v1714_v34 = vpop.f32.mrf.mxu1  ;;  %v1797_v7 = vpop.f32.mrf.mxu2 }
 0x308   :  { %v9261_v62 = vadd.f32 %v1714_v34, %v964_v29  ;;  %v9263_v52 = vadd.f32 %v1797_v7, %v1047_v32 }
 0x30a   :  { %12137 = vst [vmem:[#allocation83_spill] sm:$0xff] %v9261_v62 }
 0x30b   :  { %12138 = vst [vmem:[#allocation84_spill] sm:$0xff] %v9263_v52 }
 0x30e   :  { %v967_v49 = vpop.f32.mrf.mxu0  ;;  %v9273_v29 = vpop.f32.mrf.mxu3 }
 0x30f   :  { %v1717_v27 = vpop.f32.mrf.mxu1  ;;  %v9275_v34 = vpop.f32.mrf.mxu2 }
 0x310   :  { %v9271_v19 = vadd.f32 %v1717_v27, %v967_v49 }
 0x311   :  { %1006 = vmatmul.bf16.gmra.mxu0 %v8049_v46 }
 0x312   :  { %12139 = vst [vmem:[#allocation85_spill] sm:$0xff] %v9271_v19  ;;  %1756 = vmatmul.bf16.gmra.mxu1 %v7978_v20 }
 0x316   :  { %v969_v7 = vpop.f32.mrf.mxu0  ;;  %v1052_v35 = vpop.f32.mrf.mxu3 }
 0x317   :  { %v1719_v32 = vpop.f32.mrf.mxu1  ;;  %v1802_v43 = vpop.f32.mrf.mxu2 }
 0x318   :  { %v9277_v3 = vadd.f32 %v1719_v32, %v969_v7  ;;  %v9279_v58 = vadd.f32 %v1802_v43, %v1052_v35 }
 0x31a   :  { %12140 = vst [vmem:[#allocation86_spill] sm:$0xff] %v9277_v3 }
 0x31b   :  { %12141 = vst [vmem:[#allocation87_spill] sm:$0xff] %v9279_v58 }
 0x31e   :  { %v972_v55 = vpop.f32.mrf.mxu0  ;;  %v9283_v49 = vpop.f32.mrf.mxu3 }
 0x31f   :  { %v1722_v2 = vpop.f32.mrf.mxu1  ;;  %v9285_v46 = vpop.f32.mrf.mxu2 }
 0x320   :  { %v9281_v38 = vadd.f32 %v1722_v2, %v972_v55 }
 0x322   :  { %12142 = vst [vmem:[#allocation88_spill] sm:$0xff] %v9281_v38 }
 0x326   :  { %v974_v20 = vpop.f32.mrf.mxu0  ;;  %v1057_v51 = vpop.f32.mrf.mxu3 }
 0x327   :  { %v1724_v27 = vpop.f32.mrf.mxu1  ;;  %v1807_v5 = vpop.f32.mrf.mxu2 }
 0x328   :  { %v9287_v9 = vadd.f32 %v1724_v27, %v974_v20  ;;  %v9289_v7 = vadd.f32 %v1807_v5, %v1057_v51 }
 0x32a   :  { %12143 = vst [vmem:[#allocation89_spill] sm:$0xff] %v9287_v9 }
 0x32b   :  { %12144 = vst [vmem:[#allocation90_spill] sm:$0xff] %v9289_v7 }
 0x32e   :  { %v977_v32 = vpop.f32.mrf.mxu0  ;;  %v9293_v35 = vpop.f32.mrf.mxu3 }
 0x32f   :  { %v1727_v57 = vpop.f32.mrf.mxu1  ;;  %12146 = vst [vmem:[#allocation92_spill] sm:$0xff] %v9293_v35  ;;  %v9295_v2 = vpop.f32.mrf.mxu2 }
 0x330   :  { %v9291_v43 = vadd.f32 %v1727_v57, %v977_v32 }
 0x332   :  { %12145 = vst [vmem:[#allocation91_spill] sm:$0xff] %v9291_v43 }
 0x336   :  { %v979_v55 = vpop.f32.mrf.mxu0  ;;  %v1062_v23 = vpop.f32.mrf.mxu3 }
 0x337   :  { %v1729_v15 = vpop.f32.mrf.mxu1  ;;  %v1812_v12 = vpop.f32.mrf.mxu2 }
 0x338   :  { %v9297_v28 = vadd.f32 %v1729_v15, %v979_v55  ;;  %v9299_v20 = vadd.f32 %v1812_v12, %v1062_v23  ;;  %v1950_v15 = vmul.f32 %v9119_v37, %v9119_v37  ;;  %v2170_v12 = vmul.f32 %v9129_v40, %v9129_v40 }
 0x339   :  { %v1881_v23 = vsel %vm1839_vm0, %v9119_v37, 0.0  ;;  %v1951_v37 = vmul.f32 %v9149_v17, %v9149_v17 }
 0x33a   :  { %12147 = vst [vmem:[#allocation93_spill] sm:$0xff] %v9297_v28 }
 0x33b   :  { %12148 = vst [vmem:[#allocation94_spill] sm:$0xff] %v9299_v20 }
 0x33e   :  { %v982_v27 = vpop.f32.mrf.mxu0  ;;  %v9309_v55 = vpop.f32.mrf.mxu3 }
 0x33f   :  { %v1732_v9 = vpop.f32.mrf.mxu1  ;;  %12152 = vst [vmem:[#allocation98_spill] sm:$0xff] %v9309_v55  ;;  %v9311_v28 = vpop.f32.mrf.mxu2  ;;  %v2323_v55 = vsel %vm1839_vm0, %v9139_v18, 0.0 }
 0x340   :  { %v9301_v51 = vadd.f32 %v1732_v9, %v982_v27  ;;  %12153 = vst [vmem:[#allocation99_spill] sm:$0xff] %v9311_v28  ;;  %v2012_v9 = vsel %vm1839_vm0, %v1950_v15, 0.0  ;;  %v1882_v15 = vadd.f32 %v1881_v23, %v9050_v22  ;;  %v2181_v28 = vmul.f32 %v9131_v59, %v9131_v59 }
 0x341   :  { %v2013_v20 = vadd.f32 %v2012_v9, %v9060_v0  ;;  %v2403_v22 = vmul.f32 %v9141_v44, %v9141_v44 }
 0x342   :  { %12149 = vst [vmem:[#allocation95_spill] sm:$0xff] %v9301_v51 }
 0x346   :  { %v984_v5 = vpop.f32.mrf.mxu0 }
 0x347   :  { %v1734_v7 = vpop.f32.mrf.mxu1 }
 0x348   :  { %v9303_v57 = vadd.f32 %v1734_v7, %v984_v5  ;;  %v2392_v7 = vmul.f32 %v9139_v18, %v9139_v18  ;;  %v1961_v5 = vmul.f32 %v9121_v33, %v9121_v33  ;;  %v2014_v18 = vsel %vm1839_vm0, %v1951_v37, 0.0  ;;  %v9373_v37 = vpop.f32.mrf.mxu2 }
 0x34a   :  { %12150 = vst [vmem:[#allocation96_spill] sm:$0xff] %v9303_v57  ;;  %v9335_v57 = vsel %vm1839_vm0, %v9121_v33, 0.0  ;;  %v9349_v9 = vsel %vm1839_vm0, %v1961_v5, 0.0  ;;  %v9353_v33 = vsel %vm1839_vm0, %v9131_v59, 0.0  ;;  %v9365_v5 = vsel %vm1839_vm0, %v2181_v28, 0.0  ;;  %v9371_v59 = vpop.f32.mrf.mxu3 }
 0x34b   :  { %12154 = vst [vmem:[#allocation100_spill] sm:$0xff] %v9335_v57  ;;  %v2393_v57 = vmul.f32 %v9169_v21, %v9169_v21  ;;  %v2182_v28 = vmul.f32 %v9161_v24, %v9161_v24 }
 0x34c   :  { %12155 = vst [vmem:[#allocation101_spill] sm:$0xff] %v9353_v33 }
 0x34d   :  { %12156 = vst [vmem:[#allocation102_spill] sm:$0xff] %v9365_v5  ;;  %v9401_v5 = vadd.f32 %v9193_v8, %v9191_v42 }
 0x34e   :  { %v987_v32 = vpop.f32.mrf.mxu0 }
 0x34f   :  { %v1737_v35 = vpop.f32.mrf.mxu1  ;;  %12159 = vst [vmem:[#allocation105_spill] sm:$0xff] %v9401_v5 }
 0x350   :  { %v9305_v43 = vadd.f32 %v1737_v35, %v987_v32  ;;  %v2101_v32 = vsel %vm1839_vm0, %v9129_v40, 0.0  ;;  %v2454_v40 = vsel %vm1839_vm0, %v2392_v7, 0.0  ;;  %v1883_v7 = vsel %vm1839_vm0, %v9149_v17, 0.0 }
 0x351   :  { %v2102_v0 = vadd.f32 %v2101_v32, %v9087_v60  ;;  %v1962_v60 = vmul.f32 %v9151_v56, %v9151_v56  ;;  %v9369_v32 = vsel %vm1839_vm0, %v9141_v44, 0.0  ;;  %v2103_v17 = vsel %vm1839_vm0, %v9159_v45, 0.0 }
 0x352   :  { %12151 = vst [vmem:[#allocation97_spill] sm:$0xff] %v9305_v43  ;;  %v2232_v43 = vsel %vm1839_vm0, %v2170_v12, 0.0  ;;  %v2171_v12 = vmul.f32 %v9159_v45, %v9159_v45  ;;  %v2015_v44 = vadd.f32 %v2014_v18, %v2013_v20  ;;  %v9391_v45 = vsel %vm1839_vm0, %v9151_v56, 0.0 }
 0x353   :  { %v2233_v23 = vadd.f32 %v2232_v43, %v9095_v61  ;;  %v2324_v61 = vadd.f32 %v2323_v55, %v9108_v10  ;;  %v2455_v43 = vadd.f32 %v2454_v40, %v9111_v31  ;;  %12157 = vst [vmem:[#allocation103_spill] sm:$0xff] %v9369_v32  ;;  %v9379_v10 = vsel %vm1839_vm0, %v2403_v22, 0.0 }
 0x354   :  { %v2234_v33 = vsel %vm1839_vm0, %v2171_v12, 0.0  ;;  %12158 = vst [vmem:[#allocation104_spill] sm:$0xff] %v9379_v10  ;;  %v1884_v55 = vadd.f32 %v1883_v7, %v1882_v15  ;;  %v1952_v32 = vmul.f32 %v9179_v26, %v9179_v26  ;;  %v2325_v12 = vsel %vm1839_vm0, %v9169_v21, 0.0 }
 0x355   :  { %v2456_v22 = vsel %vm1839_vm0, %v2393_v57, 0.0  ;;  %v9397_v10 = vsel %vm1839_vm0, %v1962_v60, 0.0  ;;  %v2104_v18 = vadd.f32 %v2103_v17, %v2102_v0  ;;  %v2235_v20 = vadd.f32 %v2234_v33, %v2233_v23 }
 0x356   :  { %v9320_v35 = vpop.f32.mrf.mxu0  ;;  %v2172_v15 = vmul.f32 %v9189_v41, %v9189_v41  ;;  %v2404_v7 = vmul.f32 %v9171_v16, %v9171_v16  ;;  %v1885_v56 = vsel %vm1839_vm0, %v9179_v26, 0.0  ;;  %v9411_v57 = vsel %vm1839_vm0, %v9161_v24, 0.0 }
 0x357   :  { %v9322_v27 = vpop.f32.mrf.mxu1  ;;  %v9414_v60 = vsel %vm1839_vm0, %v2182_v28, 0.0  ;;  %v1963_v17 = vmul.f32 %v9181_v11, %v9181_v11  ;;  %v2326_v33 = vadd.f32 %v2325_v12, %v2324_v61  ;;  %v2457_v42 = vadd.f32 %v2456_v22, %v2455_v43 }
 0x358   :  { %v2016_v8 = vsel %vm1839_vm0, %v1952_v32, 0.0  ;;  %v2394_v0 = vmul.f32 %v9201_v63, %v9201_v63  ;;  %v2105_v23 = vsel %vm1839_vm0, %v9189_v41, 0.0  ;;  %v9425_v26 = vsel %vm1839_vm0, %v9171_v16, 0.0 }
 0x359   :  { %v2183_v28 = vmul.f32 %v9401_v5, %v9401_v5  ;;  %v9431_v24 = vadd.f32 %v9215_v47, %v9213_v54  ;;  %v1886_v61 = vadd.f32 %v1885_v56, %v1884_v55  ;;  %v2236_v43 = vsel %vm1839_vm0, %v2172_v15, 0.0 }
 0x35a   :  { %v1953_v32 = vmul.f32 %v9211_v25, %v9211_v25  ;;  %v9437_v12 = vsel %vm1839_vm0, %v2404_v7, 0.0  ;;  %v2017_v22 = vadd.f32 %v2016_v8, %v2015_v44  ;;  %v9441_v41 = vsel %vm1839_vm0, %v9181_v11, 0.0  ;;  %v9457_v8 = vpop.f32.mrf.mxu3 }
 0x35b   :  { %12160 = vst [vmem:[#allocation106_spill] sm:$0xff] %v9431_v24  ;;  %v9444_v16 = vsel %vm1839_vm0, %v1963_v17, 0.0  ;;  %v2405_v54 = vmul.f32 %v9203_v39, %v9203_v39  ;;  %v2106_v55 = vadd.f32 %v2105_v23, %v2104_v18  ;;  %v2327_v15 = vsel %vm1839_vm0, %v9201_v63, 0.0  ;;  %v9459_v17 = vpop.f32.mrf.mxu2 }
 0x35c   :  { %12161 = vst [vmem:[#allocation107_spill] sm:$0xff] %v9437_v12  ;;  %v2458_v44 = vsel %vm1839_vm0, %v2394_v0, 0.0  ;;  %v2173_v7 = vmul.f32 %v9223_v30, %v9223_v30  ;;  %v2237_v11 = vadd.f32 %v2236_v43, %v2235_v20  ;;  %v9463_v21 = vsel %vm1839_vm0, %v9401_v5, 0.0 }
 0x35d   :  { %12162 = vst [vmem:[#allocation108_spill] sm:$0xff] %v9457_v8  ;;  %v9466_v12 = vsel %vm1839_vm0, %v2183_v28, 0.0  ;;  %v1964_v18 = vmul.f32 %v9431_v24, %v9431_v24  ;;  %v1887_v0 = vsel %vm1839_vm0, %v9211_v25, 0.0  ;;  %v2018_v23 = vsel %vm1839_vm0, %v1953_v32, 0.0 }
 0x35e   :  { %v9383_v31 = vpop.f32.mrf.mxu0  ;;  %12163 = vst [vmem:[#allocation109_spill] sm:$0xff] %v9459_v17  ;;  %v2395_v63 = vmul.f32 %v9233_v48, %v9233_v48  ;;  %v9477_v20 = vadd.f32 %v9237_v13, %v9235_v4  ;;  %v2328_v43 = vadd.f32 %v2327_v15, %v2326_v33  ;;  %v2459_v5 = vadd.f32 %v2458_v44, %v2457_v42 }
 0x35f   :  { %v9385_v40 = vpop.f32.mrf.mxu1  ;;  %v9481_v28 = vsel %vm1839_vm0, %v9203_v39, 0.0  ;;  %v9484_v17 = vsel %vm1839_vm0, %v2405_v54, 0.0  ;;  %v2107_v25 = vsel %vm1839_vm0, %v9223_v30, 0.0  ;;  %v2238_v32 = vsel %vm1839_vm0, %v2173_v7, 0.0 }
 0x360   :  { %12164 = vst [vmem:[#allocation110_spill] sm:$0xff] %v9477_v20  ;;  %v1954_v8 = vmul.f32 %v9245_v53, %v9245_v53  ;;  %v2184_v4 = vmul.f32 %v9225_v14, %v9225_v14  ;;  %v1888_v13 = vadd.f32 %v1887_v0, %v1886_v61  ;;  %v2019_v33 = vadd.f32 %v2018_v23, %v2017_v22 }
 0x361   :  { %12165 = vst [vmem:[#allocation111_spill] sm:$0xff] %v9481_v28  ;;  %v9495_v42 = vsel %vm1839_vm0, %v9431_v24, 0.0  ;;  %v9498_v54 = vsel %vm1839_vm0, %v1964_v18, 0.0  ;;  %v2329_v15 = vsel %vm1839_vm0, %v9233_v48, 0.0  ;;  %v2460_v44 = vsel %vm1839_vm0, %v2395_v63, 0.0 }
 0x362   :  { %12166 = vst [vmem:[#allocation112_spill] sm:$0xff] %v9484_v17  ;;  %v2174_v7 = vmul.f32 %v9255_v6, %v9255_v6  ;;  %v2406_v39 = vmul.f32 %v9477_v20, %v9477_v20  ;;  %v2108_v61 = vadd.f32 %v2107_v25, %v2106_v55  ;;  %v2239_v22 = vadd.f32 %v2238_v32, %v2237_v11 }
 0x363   :  { %v9509_v0 = vsel %vm1839_vm0, %v9225_v14, 0.0  ;;  %v9513_v18 = vadd.f32 %v9259_v36, %v9257_v1  ;;  %v1889_v63 = vsel %vm1839_vm0, %v9245_v53, 0.0  ;;  %v2020_v48 = vsel %vm1839_vm0, %v1954_v8, 0.0 }
 0x364   :  { %v2396_v25 = vmul.f32 %v9261_v62, %v9261_v62  ;;  %v9525_v11 = vsel %vm1839_vm0, %v2184_v4, 0.0  ;;  %v2330_v55 = vadd.f32 %v2329_v15, %v2328_v43  ;;  %v2461_v32 = vadd.f32 %v2460_v44, %v2459_v5  ;;  %v9541_v43 = vpop.f32.mrf.mxu3  ;;  %v9543_v5 = vpop.f32.mrf.mxu2 }
 0x365   :  { %12167 = vst [vmem:[#allocation113_spill] sm:$0xff] %v9513_v18  ;;  %v9529_v1 = vsel %vm1839_vm0, %v9477_v20, 0.0  ;;  %v1965_v36 = vmul.f32 %v9247_v50, %v9247_v50  ;;  %v2109_v14 = vsel %vm1839_vm0, %v9255_v6, 0.0  ;;  %v2240_v8 = vsel %vm1839_vm0, %v2174_v7, 0.0 }
 0x366   :  { %v9448_v56 = vpop.f32.mrf.mxu0  ;;  %12168 = vst [vmem:[#allocation114_spill] sm:$0xff] %v9529_v1  ;;  %v1955_v53 = vmul.f32 %v9271_v19, %v9271_v19  ;;  %v9539_v4 = vsel %vm1839_vm0, %v2406_v39, 0.0  ;;  %v1890_v15 = vadd.f32 %v1889_v63, %v1888_v13  ;;  %v2021_v44 = vadd.f32 %v2020_v48, %v2019_v33 }
 0x367   :  { %v9450_v47 = vpop.f32.mrf.mxu1  ;;  %12169 = vst [vmem:[#allocation115_spill] sm:$0xff] %v9539_v4  ;;  %v2185_v20 = vmul.f32 %v9513_v18, %v9513_v18  ;;  %v9549_v30 = vadd.f32 %v9275_v34, %v9273_v29  ;;  %v2331_v7 = vsel %vm1839_vm0, %v9261_v62, 0.0  ;;  %v2462_v6 = vsel %vm1839_vm0, %v2396_v25, 0.0 }
 0x368   :  { %v9556_v39 = vsel %vm1839_vm0, %v9247_v50, 0.0  ;;  %v2407_v13 = vmul.f32 %v9263_v52, %v9263_v52  ;;  %v2110_v48 = vadd.f32 %v2109_v14, %v2108_v61  ;;  %v2241_v33 = vadd.f32 %v2240_v8, %v2239_v22 }
 0x369   :  { %12170 = vst [vmem:[#allocation116_spill] sm:$0xff] %v9549_v30  ;;  %v2175_v63 = vmul.f32 %v9277_v3, %v9277_v3  ;;  %v9563_v29 = vsel %vm1839_vm0, %v1965_v36, 0.0  ;;  %v1891_v34 = vsel %vm1839_vm0, %v9271_v19, 0.0  ;;  %v2022_v25 = vsel %vm1839_vm0, %v1955_v53, 0.0 }
 0x36a   :  { %v2397_v50 = vmul.f32 %v9281_v38, %v9281_v38  ;;  %v9572_v62 = vsel %vm1839_vm0, %v9513_v18, 0.0  ;;  %v2332_v14 = vadd.f32 %v2331_v7, %v2330_v55  ;;  %v2463_v61 = vadd.f32 %v2462_v6, %v2461_v32 }
 0x36b   :  { %v9575_v22 = vsel %vm1839_vm0, %v2185_v20, 0.0  ;;  %v1966_v36 = vmul.f32 %v9549_v30, %v9549_v30  ;;  %v2111_v53 = vsel %vm1839_vm0, %v9277_v3, 0.0  ;;  %v9587_v4 = vsel %vm1839_vm0, %v9263_v52, 0.0 }
 0x36c   :  { %12171 = vst [vmem:[#allocation117_spill] sm:$0xff] %v9587_v4  ;;  %v9590_v55 = vsel %vm1839_vm0, %v2407_v13, 0.0  ;;  %v2186_v6 = vmul.f32 %v9279_v58, %v9279_v58  ;;  %v1892_v20 = vadd.f32 %v1891_v34, %v1890_v15  ;;  %v2023_v32 = vadd.f32 %v2022_v25, %v2021_v44  ;;  %v12174_v4 = vld [vmem:[#allocation89_spill] sm:$0xff]  ;;  %v12175_v44 = vld [vmem:[#allocation91_spill] sm:$0xff] }
 0x36d   :  { %12172 = vst [vmem:[#allocation118_spill] sm:$0xff] %v9590_v55  ;;  %v2242_v7 = vsel %vm1839_vm0, %v2175_v63, 0.0  ;;  %v9597_v18 = vadd.f32 %v9285_v46, %v9283_v49  ;;  %v2333_v3 = vsel %vm1839_vm0, %v9281_v38, 0.0  ;;  %v2464_v52 = vsel %vm1839_vm0, %v2397_v50, 0.0  ;;  %v12176_v49 = vld [vmem:[#allocation92_spill] sm:$0xff] }
 0x36e   :  { %v9515_v23 = vpop.f32.mrf.mxu0  ;;  %v1956_v13 = vmul.f32 %v12174_v4, %v12174_v4  ;;  %v9606_v55 = vsel %vm1839_vm0, %v9549_v30, 0.0  ;;  %v2112_v15 = vadd.f32 %v2111_v53, %v2110_v48  ;;  %v2176_v63 = vmul.f32 %v12175_v44, %v12175_v44  ;;  %v9626_v53 = vpop.f32.mrf.mxu3 }
 0x36f   :  { %v9517_v24 = vpop.f32.mrf.mxu1  ;;  %12173 = vst [vmem:[#allocation119_spill] sm:$0xff] %v9597_v18  ;;  %v9611_v34 = vsel %vm1839_vm0, %v1966_v36, 0.0  ;;  %v9615_v46 = vadd.f32 %v9295_v2, %v12176_v49  ;;  %v2243_v25 = vadd.f32 %v2242_v7, %v2241_v33  ;;  %v1893_v50 = vsel %vm1839_vm0, %v12174_v4, 0.0  ;;  %v9628_v30 = vpop.f32.mrf.mxu2  ;;  %v12181_v33 = vld [vmem:[#allocation90_spill] sm:$0xff] }
 0x370   :  { %v9621_v38 = vsel %vm1839_vm0, %v9279_v58, 0.0  ;;  %v9624_v48 = vsel %vm1839_vm0, %v2186_v6, 0.0  ;;  %v2334_v36 = vadd.f32 %v2333_v3, %v2332_v14  ;;  %v2465_v1 = vadd.f32 %v2464_v52, %v2463_v61  ;;  %v12182_v6 = vld [vmem:[#allocation93_spill] sm:$0xff] }
 0x371   :  { %12177 = vst [vmem:[#allocation92_spill] sm:$0xff] %v9615_v46  ;;  %v9632_v2 = vsel %vm1839_vm0, %v9597_v18, 0.0  ;;  %v1967_v7 = vmul.f32 %v12181_v33, %v12181_v33  ;;  %v2024_v49 = vsel %vm1839_vm0, %v1956_v13, 0.0  ;;  %v2113_v4 = vsel %vm1839_vm0, %v12175_v44, 0.0 }
 0x372   :  { %12178 = vst [vmem:[#allocation120_spill] sm:$0xff] %v9621_v38  ;;  %v2398_v58 = vmul.f32 %v12182_v6, %v12182_v6  ;;  %v9643_v17 = vadd.f32 %v9322_v27, %v9320_v35  ;;  %v1894_v3 = vadd.f32 %v1893_v50, %v1892_v20  ;;  %v2244_v52 = vsel %vm1839_vm0, %v2176_v63, 0.0  ;;  %v12185_v27 = vld [vmem:[#allocation98_spill] sm:$0xff]  ;;  %v12186_v20 = vld [vmem:[#allocation99_spill] sm:$0xff] }
 0x373   :  { %12179 = vst [vmem:[#allocation121_spill] sm:$0xff] %v9624_v48  ;;  %v9648_v14 = vmul.f32 %v9597_v18, %v9597_v18  ;;  %v2187_v61 = vmul.f32 %v9615_v46, %v9615_v46  ;;  %v1957_v35 = vmul.f32 %v9301_v51, %v9301_v51  ;;  %v9662_v63 = vadd.f32 %v12186_v20, %v12185_v27 }
 0x374   :  { %12180 = vst [vmem:[#allocation122_spill] sm:$0xff] %v9632_v2  ;;  %v2335_v2 = vsel %vm1839_vm0, %v12182_v6, 0.0  ;;  %v9666_v50 = vadd.f32 %v9517_v24, %v9515_v23  ;;  %v2025_v18 = vadd.f32 %v2024_v49, %v2023_v32  ;;  %v9670_v28 = vsel %vm1839_vm0, %v12181_v33, 0.0  ;;  %v12189_v23 = vld [vmem:[#allocation96_spill] sm:$0xff] }
 0x375   :  { %12183 = vst [vmem:[#allocation123_spill] sm:$0xff] %v9643_v17  ;;  %v9673_v48 = vsel %vm1839_vm0, %v1967_v7, 0.0  ;;  %v2245_v6 = vadd.f32 %v2244_v52, %v2243_v25  ;;  %v2466_v38 = vsel %vm1839_vm0, %v2398_v58, 0.0  ;;  %v1895_v27 = vsel %vm1839_vm0, %v9301_v51, 0.0  ;;  %v12190_v52 = vld [vmem:[#allocation94_spill] sm:$0xff] }
 0x376   :  { %v9579_v8 = vpop.f32.mrf.mxu0  ;;  %12184 = vst [vmem:[#allocation124_spill] sm:$0xff] %v9648_v14  ;;  %v2114_v14 = vadd.f32 %v2113_v4, %v2112_v15  ;;  %v1958_v20 = vmul.f32 %v9643_v17, %v9643_v17  ;;  %v2336_v24 = vadd.f32 %v2335_v2, %v2334_v36  ;;  %v2177_v4 = vmul.f32 %v12189_v23, %v12189_v23 }
 0x377   :  { %v9581_v19 = vpop.f32.mrf.mxu1  ;;  %12187 = vst [vmem:[#allocation98_spill] sm:$0xff] %v9662_v63  ;;  %v9684_v32 = vsel %vm1839_vm0, %v9615_v46, 0.0  ;;  %v9687_v15 = vsel %vm1839_vm0, %v2187_v61, 0.0  ;;  %v2026_v25 = vsel %vm1839_vm0, %v1957_v35, 0.0  ;;  %v1897_v58 = vsel %vm1839_vm0, %v9643_v17, 0.0 }
 0x378   :  { %12188 = vst [vmem:[#allocation99_spill] sm:$0xff] %v9666_v50  ;;  %v1968_v7 = vmul.f32 %v9662_v63, %v9662_v63  ;;  %v1959_v36 = vmul.f32 %v9666_v50, %v9666_v50  ;;  %v9696_v2 = vadd.f32 %v2466_v38, %v2465_v1  ;;  %v1896_v49 = vadd.f32 %v1895_v27, %v1894_v3  ;;  %v9715_v1 = vpop.f32.mrf.mxu3  ;;  %v9717_v3 = vpop.f32.mrf.mxu2 }
 0x379   :  { %v9700_v33 = vmul.f32 %v12190_v52, %v12190_v52  ;;  %v9704_v61 = vadd.f32 %v9373_v37, %v9371_v59  ;;  %v2115_v35 = vsel %vm1839_vm0, %v12189_v23, 0.0  ;;  %v2028_v46 = vsel %vm1839_vm0, %v1958_v20, 0.0 }
 0x37a   :  { %v9711_v17 = vadd.f32 %v9385_v40, %v9383_v31  ;;  %v1899_v38 = vsel %vm1839_vm0, %v9666_v50, 0.0  ;;  %v2027_v27 = vadd.f32 %v2026_v25, %v2025_v18  ;;  %v2246_v59 = vsel %vm1839_vm0, %v2177_v4, 0.0 }
 0x37b   :  { %12191 = vst [vmem:[#allocation125_spill] sm:$0xff] %v9700_v33  ;;  %v1898_v37 = vadd.f32 %v1897_v58, %v1896_v49  ;;  %v9722_v51 = vsel %vm1839_vm0, %v9662_v63, 0.0  ;;  %v9725_v31 = vsel %vm1839_vm0, %v1968_v7, 0.0  ;;  %v2030_v40 = vsel %vm1839_vm0, %v1959_v36, 0.0 }
 0x37c   :  { %12192 = vst [vmem:[#allocation126_spill] sm:$0xff] %v9704_v61  ;;  %v9730_v50 = vadd.f32 %v9581_v19, %v9579_v8  ;;  %v2116_v18 = vadd.f32 %v2115_v35, %v2114_v14  ;;  %v2029_v4 = vadd.f32 %v2028_v46, %v2027_v27  ;;  %v2188_v25 = vmul.f32 %v9704_v61, %v9704_v61  ;;  %v12194_v19 = vld [vmem:[#allocation97_spill] sm:$0xff] }
 0x37d   :  { %12193 = vst [vmem:[#allocation127_spill] sm:$0xff] %v9711_v17  ;;  %v1900_v58 = vadd.f32 %v1899_v38, %v1898_v37  ;;  %v2247_v49 = vadd.f32 %v2246_v59, %v2245_v6  ;;  %v2178_v63 = vmul.f32 %v9711_v17, %v9711_v17  ;;  %v2337_v8 = vsel %vm1839_vm0, %v12194_v19, 0.0 }
 0x37e   :  { %v9652_v13 = vpop.f32.mrf.mxu0  ;;  %v2399_v46 = vmul.f32 %v12194_v19, %v12194_v19  ;;  %v2031_v14 = vadd.f32 %v2030_v40, %v2029_v4  ;;  %v2117_v6 = vsel %vm1839_vm0, %v9711_v17, 0.0  ;;  %v9750_v35 = vadd.f32 %v9450_v47, %v9448_v56 }
 0x37f   :  { %v9654_v44 = vpop.f32.mrf.mxu1  ;;  %v2179_v38 = vmul.f32 %v9730_v50, %v9730_v50  ;;  %v9757_v59 = vsel %vm1839_vm0, %v9704_v61, 0.0  ;;  %v9760_v37 = vsel %vm1839_vm0, %v2188_v25, 0.0  ;;  %v2119_v56 = vsel %vm1839_vm0, %v9730_v50, 0.0 }
 0x380   :  { %12195 = vst [vmem:[#allocation97_spill] sm:$0xff] %v9750_v35  ;;  %v1823_v47 = vadd.f32 %v9543_v5, %v9541_v43  ;;  %v2118_v61 = vadd.f32 %v2117_v6, %v2116_v18  ;;  %v1829_v18 = vpop.f32.mrf.mxu2 }
 0x386   :  { %v1004_v20 = vpop.f32.mrf.mxu0 }
 0x387   :  { %v1754_v23 = vpop.f32.mrf.mxu1 }
 0x388   :  { %v9732_v33 = vadd.f32 %v1754_v23, %v1004_v20  ;;  %v12196_v20 = vld [vmem:[#allocation100_spill] sm:$0xff] }
 0x38a   :  { %v1901_v7 = vsel %vm1839_vm0, %v9732_v33, 0.0  ;;  %v1960_v36 = vmul.f32 %v9732_v33, %v9732_v33 }
 0x38b   :  { %v1902_v23 = vadd.f32 %v1901_v7, %v1900_v58  ;;  %v2248_v58 = vsel %vm1839_vm0, %v2178_v63, 0.0  ;;  %v9770_v7 = vadd.f32 %v9654_v44, %v9652_v13  ;;  %v2468_v63 = vsel %vm1839_vm0, %v2399_v46, 0.0 }
 0x38c   :  { %v2032_v27 = vsel %vm1839_vm0, %v1960_v36, 0.0  ;;  %v2338_v36 = vadd.f32 %v2337_v8, %v2336_v24  ;;  %v2249_v5 = vadd.f32 %v2248_v58, %v2247_v49  ;;  %v2120_v44 = vadd.f32 %v2119_v56, %v2118_v61  ;;  %v12197_v56 = vld [vmem:[#allocation101_spill] sm:$0xff] }
 0x38d   :  { %v1904_v40 = vadd.f32 %v12196_v20, %v1902_v23  ;;  %v2033_v4 = vadd.f32 %v2032_v27, %v2031_v14  ;;  %v2400_v27 = vmul.f32 %v9750_v35, %v9750_v35  ;;  %v2250_v20 = vsel %vm1839_vm0, %v2179_v38, 0.0 }
 0x38e   :  { %v1007_v23 = vpop.f32.mrf.mxu0  ;;  %v2401_v8 = vmul.f32 %v9770_v7, %v9770_v7  ;;  %v2251_v38 = vadd.f32 %v2250_v20, %v2249_v5  ;;  %v12198_v20 = vld [vmem:[#allocation102_spill] sm:$0xff] }
 0x38f   :  { %v1906_v25 = vadd.f32 %v9391_v45, %v1904_v40  ;;  %v2035_v17 = vadd.f32 %v9349_v9, %v2033_v4  ;;  %v1757_v14 = vpop.f32.mrf.mxu1  ;;  %v1079_v45 = vpop.f32.mrf.mxu3  ;;  %v1969_v9 = vmul.f32 %v1823_v47, %v1823_v47  ;;  %v2470_v40 = vsel %vm1839_vm0, %v2400_v27, 0.0 }
 0x390   :  { %v9778_v43 = vadd.f32 %v1757_v14, %v1007_v23 }
 0x391   :  { %v1908_v13 = vadd.f32 %v9441_v41, %v1906_v25  ;;  %v2037_v24 = vadd.f32 %v9397_v10, %v2035_v17  ;;  %v2469_v10 = vadd.f32 %v2468_v63, %v9696_v2  ;;  %v2339_v17 = vsel %vm1839_vm0, %v9750_v35, 0.0 }
 0x392   :  { %v2121_v46 = vsel %vm1839_vm0, %v9778_v43, 0.0  ;;  %v2180_v6 = vmul.f32 %v9778_v43, %v9778_v43  ;;  %v2341_v2 = vsel %vm1839_vm0, %v9770_v7, 0.0  ;;  %v2472_v63 = vsel %vm1839_vm0, %v2401_v8, 0.0 }
 0x393   :  { %v1910_v49 = vadd.f32 %v9495_v42, %v1908_v13  ;;  %v2039_v61 = vadd.f32 %v9444_v16, %v2037_v24  ;;  %v2122_v41 = vadd.f32 %v2121_v46, %v2120_v44  ;;  %v1919_v42 = vsel %vm1839_vm0, %v1823_v47, 0.0 }
 0x394   :  { %v2252_v4 = vsel %vm1839_vm0, %v2180_v6, 0.0  ;;  %v2050_v16 = vsel %vm1839_vm0, %v1969_v9, 0.0  ;;  %v2471_v46 = vadd.f32 %v2470_v40, %v2469_v10  ;;  %v1830_v47 = vadd.f32 %v1829_v18, %v1079_v45 }
 0x395   :  { %v2041_v58 = vadd.f32 %v9498_v54, %v2039_v61  ;;  %v2124_v25 = vadd.f32 %v12197_v56, %v2122_v41  ;;  %v2253_v23 = vadd.f32 %v2252_v4, %v2251_v38  ;;  %v1912_v14 = vadd.f32 %v9556_v39, %v1910_v49 }
 0x396   :  { %v1009_v13 = vpop.f32.mrf.mxu0  ;;  %v2340_v39 = vadd.f32 %v2339_v17, %v2338_v36  ;;  %v2473_v61 = vadd.f32 %v2472_v63, %v2471_v46  ;;  %v1970_v41 = vmul.f32 %v1830_v47, %v1830_v47  ;;  %v12207_v46 = vld [vmem:[#allocation111_spill] sm:$0xff] }
 0x397   :  { %v2126_v27 = vadd.f32 %v9411_v57, %v2124_v25  ;;  %v2255_v5 = vadd.f32 %v12198_v20, %v2253_v23  ;;  %v1914_v54 = vadd.f32 %v9606_v55, %v1912_v14  ;;  %v2043_v44 = vadd.f32 %v9563_v29, %v2041_v58  ;;  %v1759_v24 = vpop.f32.mrf.mxu1  ;;  %v1082_v18 = vpop.f32.mrf.mxu3 }
 0x398   :  { %v9807_v6 = vadd.f32 %v1759_v24, %v1009_v13  ;;  %v2342_v49 = vadd.f32 %v2341_v2, %v2340_v39  ;;  %v12203_v13 = vld [vmem:[#allocation121_spill] sm:$0xff] }
 0x399   :  { %v2128_v9 = vadd.f32 %v9463_v21, %v2126_v27  ;;  %v2257_v38 = vadd.f32 %v9414_v60, %v2255_v5  ;;  %v1916_v8 = vadd.f32 %v9670_v28, %v1914_v54  ;;  %v2045_v57 = vadd.f32 %v9611_v34, %v2043_v44  ;;  %v1832_v28 = vpop.f32.mrf.mxu2  ;;  %v12202_v54 = vld [vmem:[#allocation107_spill] sm:$0xff]  ;;  %v12205_v39 = vld [vmem:[#allocation109_spill] sm:$0xff] }
 0x39a   :  { %v2343_v29 = vsel %vm1839_vm0, %v9807_v6, 0.0  ;;  %v2402_v55 = vmul.f32 %v9807_v6, %v9807_v6  ;;  %v1825_v34 = vadd.f32 %v9628_v30, %v9626_v53  ;;  %v12200_v30 = vld [vmem:[#allocation104_spill] sm:$0xff] }
 0x39b   :  { %v2130_v36 = vadd.f32 %v9509_v0, %v2128_v9  ;;  %v2259_v45 = vadd.f32 %v9466_v12, %v2257_v38  ;;  %v1918_v21 = vadd.f32 %v9722_v51, %v1916_v8  ;;  %v2047_v60 = vadd.f32 %v9673_v48, %v2045_v57  ;;  %v12199_v51 = vld [vmem:[#allocation103_spill] sm:$0xff]  ;;  %v12208_v8 = vld [vmem:[#allocation112_spill] sm:$0xff] }
 0x39c   :  { %v2344_v10 = vadd.f32 %v2343_v29, %v2342_v49  ;;  %v2474_v17 = vsel %vm1839_vm0, %v2402_v55, 0.0  ;;  %v1921_v12 = vsel %vm1839_vm0, %v1830_v47, 0.0  ;;  %v1833_v48 = vadd.f32 %v1832_v28, %v1082_v18  ;;  %v12209_v55 = vld [vmem:[#allocation114_spill] sm:$0xff] }
 0x39d   :  { %v2261_v40 = vadd.f32 %v9525_v11, %v2259_v45  ;;  %v1920_v4 = vadd.f32 %v1919_v42, %v1918_v21  ;;  %v2049_v0 = vadd.f32 %v9725_v31, %v2047_v60  ;;  %v2475_v58 = vadd.f32 %v2474_v17, %v2473_v61  ;;  %v12201_v31 = vld [vmem:[#allocation120_spill] sm:$0xff]  ;;  %v12210_v60 = vld [vmem:[#allocation115_spill] sm:$0xff] }
 0x39e   :  { %v2346_v56 = vadd.f32 %v12199_v51, %v2344_v10  ;;  %v2132_v25 = vadd.f32 %v9572_v62, %v2130_v36  ;;  %v2189_v63 = vmul.f32 %v1825_v34, %v1825_v34  ;;  %v2052_v11 = vsel %vm1839_vm0, %v1970_v41, 0.0  ;;  %v12204_v62 = vld [vmem:[#allocation108_spill] sm:$0xff]  ;;  %v12213_v51 = vld [vmem:[#allocation118_spill] sm:$0xff] }
 0x39f   :  { %v1922_v23 = vadd.f32 %v1921_v12, %v1920_v4  ;;  %v2051_v14 = vadd.f32 %v2050_v16, %v2049_v0  ;;  %v2477_v53 = vadd.f32 %v12200_v30, %v2475_v58  ;;  %v2263_v2 = vadd.f32 %v9575_v22, %v2261_v40  ;;  %v12211_v40 = vld [vmem:[#allocation117_spill] sm:$0xff]  ;;  %v12212_v0 = vld [vmem:[#allocation124_spill] sm:$0xff] }
 0x3a0   :  { %v2348_v42 = vadd.f32 %v9425_v26, %v2346_v56  ;;  %v2134_v27 = vadd.f32 %v12201_v31, %v2132_v25  ;;  %v9838_v16 = vadd.f32 %v12205_v39, %v12204_v62  ;;  %v2190_v9 = vmul.f32 %v1833_v48, %v1833_v48 }
 0x3a1   :  { %v1923_v20 = vrot.slane %v1922_v23, 4  ;;  %v2053_v5 = vadd.f32 %v2052_v11, %v2051_v14  ;;  %v2479_v44 = vadd.f32 %v12202_v54, %v2477_v53  ;;  %v2265_v24 = vadd.f32 %v12203_v13, %v2263_v2  ;;  %v1834_v41 = vpop.f32.mrf.mxu2  ;;  %v12215_v2 = vld [vmem:[#allocation125_spill] sm:$0xff] }
 0x3a2   :  { %12206 = vst [vmem:[#allocation100_spill] sm:$0xff] %v9838_v16  ;;  %v2350_v47 = vadd.f32 %v12207_v46, %v2348_v42  ;;  %v2136_v22 = vadd.f32 %v9684_v32, %v2134_v27  ;;  %v2139_v38 = vsel %vm1839_vm0, %v1825_v34, 0.0  ;;  %v2270_v61 = vsel %vm1839_vm0, %v2189_v63, 0.0  ;;  %v1084_v34 = vpop.f32.mrf.mxu3 }
 0x3a3   :  { %v2054_v26 = vrot.slane %v2053_v5, 4  ;;  %v2481_v57 = vadd.f32 %v12208_v8, %v2479_v44  ;;  %v2267_v49 = vadd.f32 %v9687_v15, %v2265_v24  ;;  %v1924_v29 = vadd.f32 %v1923_v20, %v1922_v23  ;;  %v12214_v23 = vld [vmem:[#allocation122_spill] sm:$0xff] }
 0x3a4   :  { %v2352_v36 = vadd.f32 %v12209_v55, %v2350_v47  ;;  %v2138_v45 = vadd.f32 %v9757_v59, %v2136_v22  ;;  %v2141_v32 = vsel %vm1839_vm0, %v1833_v48, 0.0  ;;  %v1828_v10 = vadd.f32 %v9717_v3, %v9715_v1 }
 0x3a5   :  { %v2055_v21 = vadd.f32 %v2054_v26, %v2053_v5  ;;  %v2483_v18 = vadd.f32 %v12210_v60, %v2481_v57  ;;  %v2269_v28 = vadd.f32 %v9760_v37, %v2267_v49  ;;  %v2272_v17 = vsel %vm1839_vm0, %v2190_v9, 0.0 }
 0x3a6   :  { %v2140_v15 = vadd.f32 %v2139_v38, %v2138_v45  ;;  %v2354_v4 = vadd.f32 %v12211_v40, %v2352_v36  ;;  %v2486_v59 = vsel %vm1839_vm0, %v12212_v0, 0.0  ;;  %v2410_v58 = vmul.f32 %v9838_v16, %v9838_v16 }
 0x3a7   :  { %v2271_v12 = vadd.f32 %v2270_v61, %v2269_v28  ;;  %v2485_v56 = vadd.f32 %v12213_v51, %v2483_v18  ;;  %v1925_v37 = vrot.slane %v1924_v29, 2  ;;  %v1835_v25 = vadd.f32 %v1834_v41, %v1084_v34 }
 0x3a8   :  { %v2142_v48 = vadd.f32 %v2141_v32, %v2140_v15  ;;  %v2356_v14 = vadd.f32 %v12214_v23, %v2354_v4  ;;  %v2357_v1 = vsel %vm1839_vm0, %v12190_v52, 0.0  ;;  %v2056_v3 = vrot.slane %v2055_v21, 2 }
 0x3a9   :  { %v2273_v30 = vadd.f32 %v2272_v17, %v2271_v12  ;;  %v2487_v53 = vadd.f32 %v2486_v59, %v2485_v56  ;;  %v2488_v63 = vsel %vm1839_vm0, %v12215_v2, 0.0  ;;  %v2411_v11 = vmul.f32 %v1828_v10, %v1828_v10 }
 0x3aa   :  { %v2143_v42 = vrot.slane %v2142_v48, 4  ;;  %v2358_v31 = vadd.f32 %v2357_v1, %v2356_v14  ;;  %v2359_v27 = vsel %vm1839_vm0, %v9838_v16, 0.0  ;;  %v2490_v20 = vsel %vm1839_vm0, %v2410_v58, 0.0 }
 0x3ab   :  { %v2274_v5 = vrot.slane %v2273_v30, 4  ;;  %v2489_v54 = vadd.f32 %v2488_v63, %v2487_v53  ;;  %v1926_v44 = vadd.f32 %v1925_v37, %v1924_v29  ;;  %v2412_v62 = vmul.f32 %v1835_v25, %v1835_v25 }
 0x3ac   :  { %v2144_v13 = vadd.f32 %v2143_v42, %v2142_v48  ;;  %v2360_v24 = vadd.f32 %v2359_v27, %v2358_v31  ;;  %v2361_v39 = vsel %vm1839_vm0, %v1828_v10, 0.0  ;;  %v2057_v46 = vadd.f32 %v2056_v3, %v2055_v21 }
 0x3ad   :  { %v2275_v47 = vadd.f32 %v2274_v5, %v2273_v30  ;;  %v2491_v22 = vadd.f32 %v2490_v20, %v2489_v54  ;;  %v2492_v9 = vsel %vm1839_vm0, %v2411_v11, 0.0  ;;  %v2363_v57 = vsel %vm1839_vm0, %v1835_v25, 0.0  ;;  %v1837_v54 = vld [vmem:[%s11885_s2] sm:$0x1]  ;;  %s8243_s2 = smov 64  }
 0x3ae   :  { %v2145_v38 = vrot.slane %v2144_v13, 2  ;;  %v2362_v26 = vadd.f32 %v2361_v39, %v2360_v24  ;;  %v1927_v61 = vrot.slane %v1926_v44, 1  ;;  %v2494_v29 = vsel %vm1839_vm0, %v2412_v62, 0.0  ;;  %v1838_v39 = vld [vmem:[%s11886_s3] sm:$0x1] }
 0x3af   :  { %v2276_v8 = vrot.slane %v2275_v47, 2  ;;  %v2493_v49 = vadd.f32 %v2492_v9, %v2491_v22  ;;  %v2058_v45 = vrot.slane %v2057_v46, 1  ;;  %v12216_v9 = vld [vmem:[#allocation7_spill] sm:$0xff] }
 0x3b0   :  { %v2146_v55 = vadd.f32 %v2145_v38, %v2144_v13  ;;  %v2364_v36 = vadd.f32 %v2363_v57, %v2362_v26  ;;  %v1928_v41 = vadd.f32 %v1927_v61, %v1926_v44 }
 0x3b1   :  { %v2277_v60 = vadd.f32 %v2276_v8, %v2275_v47  ;;  %v2495_v18 = vadd.f32 %v2494_v29, %v2493_v49  ;;  %v2059_v17 = vadd.f32 %v2058_v45, %v2057_v46  ;;  %v8088_v29 = vld [vmem:[%s11887_s4 + $0x78] sm:$0xff] }
 0x3b2   :  { %v2147_v32 = vrot.slane %v2146_v55, 1  ;;  %v2365_v21 = vrot.slane %v2364_v36, 4  ;;  %v8080_v45 = vld [vmem:[%s11887_s4 + $0x38] sm:$0xff]  ;;  %4205 = vmatpush.bf16.msrb.mxu2 %v8088_v29 }
 0x3b3   :  { %v2278_v28 = vrot.slane %v2277_v60, 1  ;;  %v2496_v34 = vrot.slane %v2495_v18, 4  ;;  %4328 = vmatpush.bf16.msrb.mxu3 %v8080_v45 }
 0x3b4   :  { %v2148_v10 = vadd.f32 %v2147_v32, %v2146_v55  ;;  %v2366_v15 = vadd.f32 %v2365_v21, %v2364_v36  ;;  %v12217_v55 = vld [vmem:[#allocation6_spill] sm:$0xff] }
 0x3b5   :  { %v2279_v40 = vadd.f32 %v2278_v28, %v2277_v60  ;;  %v2497_v4 = vadd.f32 %v2496_v34, %v2495_v18  ;;  %v12218_v34 = vld [vmem:[#allocation3_spill] sm:$0xff] }
 0x3b6   :  { %v2280_v0 = vadd.f32 %v2148_v10, %v1928_v41  ;;  %v2367_v59 = vrot.slane %v2366_v15, 2 }
 0x3b7   :  { %v2281_v58 = vadd.f32 %v2279_v40, %v2059_v17  ;;  %v2498_v12 = vrot.slane %v2497_v4, 2  ;;  %v12219_v40 = vld [vmem:[#allocation12_spill] sm:$0xff] }
 0x3b8   :  { %v2368_v51 = vadd.f32 %v2367_v59, %v2366_v15 }
 0x3b9   :  { %v2499_v56 = vadd.f32 %v2498_v12, %v2497_v4 }
 0x3ba   :  { %v2369_v37 = vrot.slane %v2368_v51, 1 }
 0x3bb   :  { %v2500_v48 = vrot.slane %v2499_v56, 1 }
 0x3bc   :  { %v2370_v25 = vadd.f32 %v2369_v37, %v2368_v51  ;;  %v12221_v51 = vld [vmem:[#allocation16_spill] sm:$0xff] }
 0x3bd   :  { %v2501_v23 = vadd.f32 %v2500_v48, %v2499_v56  ;;  %v12222_v48 = vld [vmem:[#allocation4_spill] sm:$0xff] }
 0x3be   :  { %v2502_v14 = vadd.f32 %v2370_v25, %v2280_v0 }
 0x3bf   :  { %v2503_v1 = vadd.f32 %v2501_v23, %v2281_v58  ;;  %v12220_v58 = vld [vmem:[#allocation15_spill] sm:$0xff]  ;;  %v12223_v23 = vld [vmem:[#allocation13_spill] sm:$0xff] }
 0x3c0   :  { %v2504_v3 = vmul.f32 0.0011337869, %v2502_v14 }
 0x3c1   :  { %v2505_v30 = vmul.f32 0.0011337869, %v2503_v1  ;;  %v12224_v1 = vld [vmem:[#allocation33_spill] sm:$0xff] }
 0x3c2   :  { %v2506_v53 = vmul.f32 %v2504_v3, %v2504_v3 }
 0x3c4   :  { %v2507_v2 = vsub.f32 %v2505_v30, %v2506_v53 }
 0x3c6   :  { %v2508_v63 = vmax.f32 %v2507_v2, 0.0 }
 0x3c8   :  { %v2509_v11 = vadd.f32 1e-05, %v2508_v63 }
 0x3ca   :  { %8237 = vrsqrt.f32 %v2509_v11  ;;  %vm2516_vm2 = vweird.f32 %v2509_v11 }
 0x3d0   :  { %v8238_v42 = vpop.eup %8237 }
 0x3d1   :  { %v2511_v31 = vmul.f32 %v8238_v42, %v2509_v11  ;;  %vm2517_vm1 = vweird.f32 %v8238_v42 }
 0x3d2   :  { %vm2518_vm3 = vmor %vm2516_vm2, %vm2517_vm1  ;;  %vm6535_vm1 = vcmask 1041408   ;;  %vm6539_vm2 = vcmask 1024  }
 0x3d3   :  { %v2512_v27 = vmul.f32 %v8238_v42, %v2511_v31 }
 0x3d5   :  { %v2513_v20 = vmul.f32 0.5, %v2512_v27 }
 0x3d7   :  { %v2514_v5 = vsub.f32 1.5, %v2513_v20  ;;  %v12225_v20 = vld [vmem:[#allocation24_spill] sm:$0xff] }
 0x3d9   :  { %v2515_v44 = vmul.f32 %v8238_v42, %v2514_v5 }
 0x3db   :  { %v2519_v13 = vsel %vm2518_vm3, %v8238_v42, %v2515_v44 }
 0x3dc   :  { %v2520_v24 = vmul.f32 %v2519_v13, %v1837_v54 }
 0x3de   :  { %v2521_v62 = vmul.f32 %v2520_v24, %v2504_v3  ;;  %v9878_v47 = vperm.slane %v2520_v24, 0 }
 0x3e0   :  { %v2522_v46 = vsub.f32 %v1838_v39, %v2521_v62  ;;  %v2529_v38 = vmul.f32 %v9878_v47, %v12216_v9  ;;  %v2528_v36 = vmul.f32 %v9878_v47, %v12217_v55  ;;  %v2525_v41 = vmul.f32 %v9878_v47, %v12218_v34 }
 0x3e1   :  { %v2534_v4 = vmul.f32 %v9878_v47, %v12219_v40  ;;  %v2537_v12 = vmul.f32 %v9878_v47, %v12220_v58  ;;  %v2538_v56 = vmul.f32 %v9878_v47, %v12221_v51  ;;  %v2526_v25 = vmul.f32 %v9878_v47, %v12222_v48  ;;  %v12228_v58 = vld [vmem:[#allocation30_spill] sm:$0xff] }
 0x3e2   :  { %v9880_v22 = vperm.slane %v2522_v46, 0  ;;  %v2535_v14 = vmul.f32 %v9878_v47, %v12223_v23  ;;  %v2555_v3 = vmul.f32 %v9878_v47, %v12224_v1  ;;  %v2546_v5 = vmul.f32 %v9878_v47, %v12225_v20  ;;  %v12226_v46 = vld [vmem:[#allocation21_spill] sm:$0xff]  ;;  %v12229_v51 = vld [vmem:[#allocation34_spill] sm:$0xff] }
 0x3e3   :  { %v2543_v9 = vmul.f32 %v9878_v47, %v12226_v46 }
 0x3e4   :  { %v2646_v26 = vadd.f32 %v9880_v22, %v2529_v38  ;;  %v2645_v60 = vadd.f32 %v9880_v22, %v2528_v36  ;;  %v2642_v10 = vadd.f32 %v9880_v22, %v2525_v41  ;;  %v2651_v59 = vadd.f32 %v9880_v22, %v2534_v4  ;;  %v8087_v41 = vld [vmem:[%s11887_s4 + $0x70] sm:$0xff] }
 0x3e5   :  { %v2655_v30 = vadd.f32 %v9880_v22, %v2538_v56  ;;  %v2654_v53 = vadd.f32 %v9880_v22, %v2537_v12  ;;  %v2672_v63 = vadd.f32 %v9880_v22, %v2555_v3  ;;  %v2652_v11 = vadd.f32 %v9880_v22, %v2535_v14  ;;  %4206 = vmatpush.bf16.msrb.mxu2 %v8087_v41 }
 0x3e6   :  { %v2760_v8 = vmax.f32 %v2646_v26, 0.0  ;;  %v2759_v18 = vmax.f32 %v2645_v60, 0.0  ;;  %v2756_v15 = vmax.f32 %v2642_v10, 0.0  ;;  %v2765_v2 = vmax.f32 %v2651_v59, 0.0  ;;  %v8079_v10 = vld [vmem:[%s11887_s4 + $0x30] sm:$0xff] }
 0x3e7   :  { %v2643_v42 = vadd.f32 %v9880_v22, %v2526_v25  ;;  %v2769_v31 = vmax.f32 %v2655_v30, 0.0  ;;  %v2768_v27 = vmax.f32 %v2654_v53, 0.0  ;;  %v2786_v62 = vmax.f32 %v2672_v63, 0.0  ;;  %4329 = vmatpush.bf16.msrb.mxu3 %v8079_v10 }
 0x3e8   :  { %v2874_v57 = vpack.c.bf16 %v2760_v8, %v2760_v8  ;;  %v2873_v32 = vpack.c.bf16 %v2759_v18, %v2759_v18  ;;  %v2870_v17 = vpack.c.bf16 %v2756_v15, %v2756_v15  ;;  %v2879_v54 = vpack.c.bf16 %v2765_v2, %v2765_v2 }
 0x3e9   :  { %v2757_v44 = vmax.f32 %v2643_v42, 0.0  ;;  %v2883_v13 = vpack.c.bf16 %v2769_v31, %v2769_v31  ;;  %v2882_v24 = vpack.c.bf16 %v2768_v27, %v2768_v27  ;;  %v2766_v39 = vmax.f32 %v2652_v11, 0.0 }
 0x3ea   :  { %v3212_v49 = vunpack.c.l.b16 %v2874_v57  ;;  %v9895_v21 = vunpack.c.l.b16 %v2873_v32  ;;  %v9905_v0 = vunpack.c.l.b16 %v2870_v17  ;;  %v9930_v38 = vunpack.c.l.b16 %v2879_v54  ;;  %v12231_v54 = vld [vmem:[#allocation22_spill] sm:$0xff] }
 0x3eb   :  { %v2663_v26 = vadd.f32 %v9880_v22, %v2546_v5  ;;  %v3215_v8 = vunpack.c.l.b16 %v2883_v13  ;;  %v9933_v57 = vunpack.c.l.b16 %v2882_v24  ;;  %v2871_v36 = vpack.c.bf16 %v2757_v44, %v2757_v44  ;;  %v12232_v13 = vld [vmem:[#allocation31_spill] sm:$0xff] }
 0x3ec   :  { %v3250_v61 = vpack.c.b16 %v3212_v49, %v3212_v49  ;;  %v3060_v28 = vpack.c.b16 %v9895_v21, %v9895_v21  ;;  %v3059_v37 = vpack.c.b16 %v9905_v0, %v9905_v0  ;;  %v12227_v49 = vld [vmem:[#allocation25_spill] sm:$0xff]  ;;  %v3062_v55 = vpack.c.b16 %v9930_v38, %v9930_v38 }
 0x3ed   :  { %v2660_v29 = vadd.f32 %v9880_v22, %v2543_v9  ;;  %v3253_v45 = vpack.c.b16 %v3215_v8, %v3215_v8  ;;  %v3063_v60 = vpack.c.b16 %v9933_v57, %v9933_v57  ;;  %v2900_v18 = vpack.c.bf16 %v2786_v62, %v2786_v62  ;;  %v12233_v62 = vld [vmem:[#allocation39_spill] sm:$0xff] }
 0x3ee   :  { %3289 = vrot.lane.b32.xlu1 %v3250_v61, %s8243_s2  ;;  %3099 = vrot.lane.b32.xlu0 %v3060_v28, %s8244_s1  ;;  %v2547_v61 = vmul.f32 %v9878_v47, %v12227_v49  ;;  %v2880_v32 = vpack.c.bf16 %v2766_v39, %v2766_v39  ;;  %v2777_v34 = vmax.f32 %v2663_v26, 0.0  ;;  %v3211_v15 = vunpack.c.l.b16 %v2871_v36 }
 0x3ef   :  { %3097 = vrot.lane.b32.xlu2 %v3059_v37, %s8244_s1  ;;  %v2774_v17 = vmax.f32 %v2660_v29, 0.0  ;;  %v9952_v4 = vunpack.c.l.b16 %v2900_v18  ;;  %v2552_v12 = vmul.f32 %v9878_v47, %v12228_v58  ;;  %v2556_v56 = vmul.f32 %v9878_v47, %v12229_v51  ;;  %v12230_v37 = vld [vmem:[#allocation51_spill] sm:$0xff] }
 0x3f0   :  { %v2664_v28 = vadd.f32 %v9880_v22, %v2547_v61  ;;  %v3214_v59 = vunpack.c.l.b16 %v2880_v32  ;;  %v2573_v48 = vmul.f32 %v9878_v47, %v12230_v37  ;;  %v2891_v25 = vpack.c.bf16 %v2777_v34, %v2777_v34 }
 0x3f1   :  { %v2669_v23 = vadd.f32 %v9880_v22, %v2552_v12  ;;  %v3249_v14 = vpack.c.b16 %v3211_v15, %v3211_v15  ;;  %v2888_v1 = vpack.c.bf16 %v2774_v17, %v2774_v17  ;;  %v3069_v30 = vpack.c.b16 %v9952_v4, %v9952_v4  ;;  %v12235_v15 = vld [vmem:[#allocation43_spill] sm:$0xff] }
 0x3f2   :  { %v2778_v40 = vmax.f32 %v2664_v28, 0.0  ;;  %v3252_v53 = vpack.c.b16 %v3214_v59, %v3214_v59  ;;  %v2690_v2 = vadd.f32 %v9880_v22, %v2573_v48  ;;  %v2673_v63 = vadd.f32 %v9880_v22, %v2556_v56 }
 0x3f3   :  { %v9968_v11 = vunpack.c.l.b16 %v2891_v25  ;;  %v9970_v42 = vunpack.c.l.b16 %v2888_v1  ;;  %v2783_v27 = vmax.f32 %v2669_v23, 0.0  ;;  %v2544_v44 = vmul.f32 %v9878_v47, %v12231_v54  ;;  %v8086_v1 = vld [vmem:[%s11887_s4 + $0x68] sm:$0xff] }
 0x3f4   :  { %v2892_v3 = vpack.c.bf16 %v2778_v40, %v2778_v40  ;;  %v2804_v20 = vmax.f32 %v2690_v2, 0.0  ;;  %v2787_v5 = vmax.f32 %v2673_v63, 0.0  ;;  %v2553_v24 = vmul.f32 %v9878_v47, %v12232_v13  ;;  %v12236_v40 = vld [vmem:[#allocation82_spill] sm:$0xff]  ;;  %4207 = vmatpush.bf16.msrb.mxu2 %v8086_v1 }
 0x3f5   :  { %v2561_v39 = vmul.f32 %v9878_v47, %v12233_v62  ;;  %v3066_v46 = vpack.c.b16 %v9968_v11, %v9968_v11  ;;  %v3065_v9 = vpack.c.b16 %v9970_v42, %v9970_v42  ;;  %v2897_v8 = vpack.c.bf16 %v2783_v27, %v2783_v27 }
 0x3f6   :  { %3295 = vrot.lane.b32.xlu1 %v3253_v45, %s8243_s2  ;;  %3105 = vrot.lane.b32.xlu0 %v3063_v60, %s8244_s1  ;;  %v3218_v31 = vunpack.c.l.b16 %v2892_v3  ;;  %v2661_v49 = vadd.f32 %v9880_v22, %v2544_v44  ;;  %v2918_v61 = vpack.c.bf16 %v2804_v20, %v2804_v20  ;;  %v2670_v29 = vadd.f32 %v9880_v22, %v2553_v24  ;;  %v12234_v45 = vld [vmem:[#allocation42_spill] sm:$0xff]  ;;  %v12237_v3 = vld [vmem:[#allocation48_spill] sm:$0xff]  ;;  %v12239_v44 = vld [vmem:[#allocation11_spill] sm:$0xff] }
 0x3f7   :  { %3103 = vrot.lane.b32.xlu2 %v3062_v55, %s8244_s1  ;;  %v2901_v55 = vpack.c.bf16 %v2787_v5, %v2787_v5  ;;  %v2678_v36 = vadd.f32 %v9880_v22, %v2561_v39  ;;  %v2564_v60 = vmul.f32 %v9878_v47, %v12234_v45  ;;  %v9990_v18 = vunpack.c.l.b16 %v2897_v8  ;;  %v12240_v24 = vld [vmem:[#allocation52_spill] sm:$0xff] }
 0x3f8   :  { %v3256_v26 = vpack.c.b16 %v3218_v31, %v3218_v31  ;;  %v2775_v32 = vmax.f32 %v2661_v49, 0.0  ;;  %v9992_v28 = vunpack.c.l.b16 %v2918_v61  ;;  %v2784_v10 = vmax.f32 %v2670_v29, 0.0  ;;  %v12238_v31 = vld [vmem:[#allocation61_spill] sm:$0xff] }
 0x3f9   :  { %v3221_v34 = vunpack.c.l.b16 %v2901_v55  ;;  %v2792_v41 = vmax.f32 %v2678_v36, 0.0  ;;  %v2565_v17 = vmul.f32 %v9878_v47, %v12235_v15  ;;  %v2594_v59 = vmul.f32 %v9878_v47, %v12236_v40 }
 0x3fa   :  { %v2681_v58 = vadd.f32 %v9880_v22, %v2564_v60  ;;  %v3068_v51 = vpack.c.b16 %v9990_v18, %v9990_v18  ;;  %v2889_v56 = vpack.c.bf16 %v2775_v32, %v2775_v32  ;;  %v3075_v48 = vpack.c.b16 %v9992_v28, %v9992_v28  ;;  %v8078_v60 = vld [vmem:[%s11887_s4 + $0x28] sm:$0xff] }
 0x3fb   :  { %v2711_v12 = vadd.f32 %v9880_v22, %v2594_v59  ;;  %v2682_v37 = vadd.f32 %v9880_v22, %v2565_v17  ;;  %v3259_v25 = vpack.c.b16 %v3221_v34, %v3221_v34  ;;  %v2906_v23 = vpack.c.bf16 %v2792_v41, %v2792_v41  ;;  %4330 = vmatpush.bf16.msrb.mxu3 %v8078_v60  ;;  %v12246_v60 = vld [vmem:[#allocation14_spill] sm:$0xff] }
 0x3fc   :  { %v2582_v27 = vmul.f32 %v9878_v47, %v12238_v31  ;;  %v2795_v54 = vmax.f32 %v2681_v58, 0.0  ;;  %v2533_v13 = vmul.f32 %v9878_v47, %v12239_v44  ;;  %v2574_v62 = vmul.f32 %v9878_v47, %v12240_v24  ;;  %v12241_v58 = vld [vmem:[#allocation40_spill] sm:$0xff] }
 0x3fd   :  { %v2825_v2 = vmax.f32 %v2711_v12, 0.0  ;;  %v2796_v63 = vmax.f32 %v2682_v37, 0.0  ;;  %v10015_v20 = vunpack.c.l.b16 %v2906_v23  ;;  %v2612_v15 = vmul.f32 %v9878_v47, %v9778_v43 }
 0x3fe   :  { %3117 = vrot.lane.b32.xlu1 %v3069_v30, %s8244_s1  ;;  %3293 = vrot.lane.b32.xlu0 %v3252_v53, %s8243_s2  ;;  %v2570_v30 = vmul.f32 %v9878_v47, %v12237_v3  ;;  %v3217_v53 = vunpack.c.l.b16 %v2889_v56  ;;  %v2650_v49 = vadd.f32 %v9880_v22, %v2533_v13  ;;  %v2909_v36 = vpack.c.bf16 %v2795_v54, %v2795_v54  ;;  %v12242_v56 = vld [vmem:[#allocation49_spill] sm:$0xff] }
 0x3ff   :  { %3287 = vrot.lane.b32.xlu2 %v3249_v14, %s8243_s2  ;;  %v2898_v14 = vpack.c.bf16 %v2784_v10, %v2784_v10  ;;  %v2910_v8 = vpack.c.bf16 %v2796_v63, %v2796_v63  ;;  %v3071_v61 = vpack.c.b16 %v10015_v20, %v10015_v20  ;;  %v2691_v29 = vadd.f32 %v9880_v22, %v2574_v62  ;;  %v12244_v62 = vld [vmem:[#allocation69_spill] sm:$0xff] }
 0x400   :  { %v2687_v39 = vadd.f32 %v9880_v22, %v2570_v30  ;;  %v2764_v45 = vmax.f32 %v2650_v49, 0.0  ;;  %v10039_v17 = vunpack.c.l.b16 %v2909_v36  ;;  %v2562_v12 = vmul.f32 %v9878_v47, %v12241_v58 }
 0x401   :  { %v3220_v5 = vunpack.c.l.b16 %v2898_v14  ;;  %v3224_v34 = vunpack.c.l.b16 %v2910_v8  ;;  %v2805_v59 = vmax.f32 %v2691_v29, 0.0  ;;  %v2571_v37 = vmul.f32 %v9878_v47, %v12242_v56 }
 0x402   :  { %v2801_v41 = vmax.f32 %v2687_v39, 0.0  ;;  %v10035_v10 = vpack.c.bf16 %v2764_v45, %v2764_v45  ;;  %v2679_v14 = vadd.f32 %v9880_v22, %v2562_v12  ;;  %v3072_v1 = vpack.c.b16 %v10039_v17, %v10039_v17 }
 0x403   :  { %v3258_v55 = vpack.c.b16 %v3220_v5, %v3220_v5  ;;  %v3262_v23 = vpack.c.b16 %v3224_v34, %v3224_v34  ;;  %v2919_v30 = vpack.c.bf16 %v2805_v59, %v2805_v59  ;;  %v12243_v5 = vld [vmem:[#allocation91_spill] sm:$0xff]  ;;  %v2586_v39 = vmul.f32 %v9878_v47, %v12244_v62 }
 0x404   :  { %v2915_v43 = vpack.c.bf16 %v2801_v41, %v2801_v41  ;;  %v2600_v54 = vmul.f32 %v9878_v47, %v12243_v5  ;;  %v2536_v34 = vmul.f32 %v9878_v47, %v12246_v60  ;;  %v12247_v41 = vld [vmem:[#allocation77_spill] sm:$0xff]  ;;  %v12252_v60 = vld [vmem:[#allocation79_spill] sm:$0xff] }
 0x405   :  { %v3227_v13 = vunpack.c.l.b16 %v2919_v30 }
 0x406   :  { %3109 = vrot.lane.b32.xlu1 %v3065_v9, %s8244_s1  ;;  %3111 = vrot.lane.b32.xlu0 %v3066_v46, %s8244_s1  ;;  %v2699_v46 = vadd.f32 %v9880_v22, %v2582_v27  ;;  %v3255_v9 = vpack.c.b16 %v3217_v53, %v3217_v53  ;;  %v2688_v53 = vadd.f32 %v9880_v22, %v2571_v37  ;;  %v10059_v63 = vunpack.c.l.b16 %v2915_v43 }
 0x407   :  { %3301 = vrot.lane.b32.xlu2 %v3256_v26, %s8243_s2  ;;  %v2939_v26 = vpack.c.bf16 %v2825_v2, %v2825_v2  ;;  %v2793_v27 = vmax.f32 %v2679_v14, 0.0  ;;  %v3265_v36 = vpack.c.b16 %v3227_v13, %v3227_v13  ;;  %v12250_v14 = vld [vmem:[#allocation83_spill] sm:$0xff] }
 0x408   :  { %v2813_v40 = vmax.f32 %v2699_v46, 0.0  ;;  %v2802_v24 = vmax.f32 %v2688_v53, 0.0 }
 0x409   :  { %v10033_v32 = vunpack.c.l.b16 %v2939_v26  ;;  %v3074_v26 = vpack.c.b16 %v10059_v63, %v10059_v63  ;;  %v2907_v49 = vpack.c.bf16 %v2793_v27, %v2793_v27 }
 0x40a   :  { %v2927_v3 = vpack.c.bf16 %v2813_v40, %v2813_v40  ;;  %v2916_v29 = vpack.c.bf16 %v2802_v24, %v2802_v24  ;;  %v2653_v40 = vadd.f32 %v9880_v22, %v2536_v34  ;;  %v2592_v34 = vmul.f32 %v9878_v47, %v12252_v60 }
 0x40b   :  { %v3223_v58 = vunpack.c.l.b16 %v2907_v49  ;;  %v2609_v60 = vmul.f32 %v9878_v47, %v9730_v50 }
 0x40c   :  { %v10063_v44 = vunpack.c.l.b16 %v2927_v3  ;;  %v3226_v37 = vunpack.c.l.b16 %v2916_v29  ;;  %v2767_v53 = vmax.f32 %v2653_v40, 0.0  ;;  %v12251_v29 = vld [vmem:[#allocation63_spill] sm:$0xff] }
 0x40d   :  { %v3261_v27 = vpack.c.b16 %v3223_v58, %v3223_v58 }
 0x40e   :  { %3129 = vrot.lane.b32.xlu1 %v3075_v48, %s8244_s1  ;;  %3307 = vrot.lane.b32.xlu0 %v3259_v25, %s8243_s2  ;;  %v2729_v48 = vadd.f32 %v9880_v22, %v2612_v15  ;;  %v3082_v25 = vpack.c.b16 %v10033_v32, %v10033_v32  ;;  %v2591_v15 = vmul.f32 %v9878_v47, %v12247_v41 }
 0x40f   :  { %3115 = vrot.lane.b32.xlu2 %v3068_v51, %s8244_s1  ;;  %v3404_v51 = vunpack.c.l.b16 %v10035_v10 }
 0x410   :  { %v2843_v31 = vmax.f32 %v2729_v48, 0.0  ;;  %v2708_v3 = vadd.f32 %v9880_v22, %v2591_v15 }
 0x411   :  { %v10055_v2 = vpack.c.b16 %v9930_v38, %v3404_v51  ;;  %v12245_v38 = vld [vmem:[#allocation67_spill] sm:$0xff] }
 0x412   :  { %v2585_v46 = vmul.f32 %v9878_v47, %v12245_v38  ;;  %v2957_v8 = vpack.c.bf16 %v2843_v31, %v2843_v31  ;;  %v12248_v51 = vld [vmem:[#allocation87_spill] sm:$0xff] }
 0x413   :  { %v2630_v56 = vmul.f32 %v9878_v47, %v12248_v51 }
 0x414   :  { %v2702_v45 = vadd.f32 %v9880_v22, %v2585_v46  ;;  %v10084_v59 = vunpack.c.l.b16 %v2957_v8  ;;  %v10101_v46 = vpack.c.bf16 %v2767_v53, %v2767_v53 }
 0x415   :  { %v2747_v30 = vadd.f32 %v9880_v22, %v2630_v56 }
 0x416   :  { %3121 = vrot.lane.b32.xlu1 %v3071_v61, %s8244_s1  ;;  %3305 = vrot.lane.b32.xlu0 %v3258_v55, %s8243_s2  ;;  %v2703_v61 = vadd.f32 %v9880_v22, %v2586_v39  ;;  %v3078_v55 = vpack.c.b16 %v10063_v44, %v10063_v44  ;;  %v3088_v31 = vpack.c.b16 %v10084_v59, %v10084_v59 }
 0x417   :  { %3299 = vrot.lane.b32.xlu2 %v3255_v9, %s8243_s2  ;;  %v2717_v9 = vadd.f32 %v9880_v22, %v2600_v54  ;;  %v3264_v54 = vpack.c.b16 %v3226_v37, %v3226_v37  ;;  %v2861_v38 = vmax.f32 %v2747_v30, 0.0 }
 0x418   :  { %v2817_v12 = vmax.f32 %v2703_v61, 0.0 }
 0x419   :  { %v2831_v48 = vmax.f32 %v2717_v9, 0.0  ;;  %v2975_v15 = vpack.c.bf16 %v2861_v38, %v2861_v38 }
 0x41a   :  { %v2931_v5 = vpack.c.bf16 %v2817_v12, %v2817_v12  ;;  %v3405_v12 = vunpack.c.l.b16 %v10101_v46 }
 0x41b   :  { %v2945_v13 = vpack.c.bf16 %v2831_v48, %v2831_v48 }
 0x41c   :  { %v3231_v9 = vunpack.c.l.b16 %v2931_v5  ;;  %v3443_v30 = vpack.c.b16 %v9933_v57, %v3405_v12  ;;  %v2604_v5 = vmul.f32 %v9878_v47, %v12194_v19  ;;  %v12256_v12 = vld [vmem:[#allocation20_spill] sm:$0xff] }
 0x41d   :  { %v10103_v8 = vunpack.c.l.b16 %v2945_v13 }
 0x41e   :  { %3143 = vrot.lane.b32.xlu1 %v3082_v25, %s8244_s1  ;;  %3123 = vrot.lane.b32.xlu0 %v3072_v1, %s8244_s1  ;;  %v2816_v25 = vmax.f32 %v2702_v45, 0.0  ;;  %v2595_v1 = vmul.f32 %v9878_v47, %v12250_v14  ;;  %v2583_v45 = vmul.f32 %v9878_v47, %v12251_v29  ;;  %v3269_v40 = vpack.c.b16 %v3231_v9, %v3231_v9 }
 0x41f   :  { %3313 = vrot.lane.b32.xlu2 %v3262_v23, %s8243_s2  ;;  %v12249_v23 = vld [vmem:[#allocation2_spill] sm:$0xff]  ;;  %v3084_v56 = vpack.c.b16 %v10103_v8, %v10103_v8  ;;  %v3508_v9 = vshll.u32 %v3443_v30, 16 }
 0x420   :  { %v2524_v43 = vmul.f32 %v9878_v47, %v12249_v23  ;;  %v2930_v24 = vpack.c.bf16 %v2816_v25, %v2816_v25  ;;  %v2712_v62 = vadd.f32 %v9880_v22, %v2595_v1  ;;  %v2700_v51 = vadd.f32 %v9880_v22, %v2583_v45 }
 0x421   :  { %v2709_v25 = vadd.f32 %v9880_v22, %v2592_v34  ;;  %v10131_v1 = vunpack.c.l.b16 %v2975_v15  ;;  %v3510_v34 = vrot.slane %v3508_v9, 1 }
 0x422   :  { %v2641_v39 = vadd.f32 %v9880_v22, %v2524_v43  ;;  %v10105_v49 = vunpack.c.l.b16 %v2930_v24  ;;  %v2826_v61 = vmax.f32 %v2712_v62, 0.0  ;;  %v2814_v14 = vmax.f32 %v2700_v51, 0.0  ;;  %v12257_v51 = vld [vmem:[#allocation68_spill] sm:$0xff] }
 0x423   :  { %v2823_v53 = vmax.f32 %v2709_v25, 0.0  ;;  %v3094_v57 = vpack.c.b16 %v10131_v1, %v10131_v1  ;;  %v3506_v25 = vshrl.u32 %v3443_v30, 16 }
 0x424   :  { %v2755_v41 = vmax.f32 %v2641_v39, 0.0  ;;  %v3079_v37 = vpack.c.b16 %v10105_v49, %v10105_v49  ;;  %v2940_v48 = vpack.c.bf16 %v2826_v61, %v2826_v61  ;;  %v2928_v62 = vpack.c.bf16 %v2814_v14, %v2814_v14  ;;  %v12254_v61 = vld [vmem:[#allocation32_spill] sm:$0xff] }
 0x425   :  { %v2721_v39 = vadd.f32 %v9880_v22, %v2604_v5 }
 0x426   :  { %3135 = vrot.lane.b32.xlu1 %v3078_v55, %s8244_s1  ;;  %3319 = vrot.lane.b32.xlu0 %v3265_v36, %s8243_s2  ;;  %v8085_v55 = vld [vmem:[%s11887_s4 + $0x60] sm:$0xff]  ;;  %v10125_v23 = vpack.c.bf16 %v2755_v41, %v2755_v41  ;;  %v3230_v29 = vunpack.c.l.b16 %v2928_v62 }
 0x427   :  { %3127 = vrot.lane.b32.xlu2 %v3074_v26, %s8244_s1  ;;  %v2822_v26 = vmax.f32 %v2708_v3, 0.0  ;;  %v8077_v36 = vld [vmem:[%s11887_s4 + $0x20] sm:$0xff]  ;;  %4208 = vmatpush.bf16.msrb.mxu2 %v8085_v55  ;;  %v3234_v3 = vunpack.c.l.b16 %v2940_v48  ;;  %v2554_v55 = vmul.f32 %v9878_v47, %v12254_v61  ;;  %v2835_v45 = vmax.f32 %v2721_v39, 0.0 }
 0x428   :  { %4331 = vmatpush.bf16.msrb.mxu3 %v8077_v36  ;;  %v2726_v48 = vadd.f32 %v9880_v22, %v2609_v60  ;;  %v12259_v60 = vld [vmem:[#allocation50_spill] sm:$0xff] }
 0x429   :  { %v2936_v58 = vpack.c.bf16 %v2822_v26, %v2822_v26  ;;  %v3272_v38 = vpack.c.b16 %v3234_v3, %v3234_v3  ;;  %v2937_v26 = vpack.c.bf16 %v2823_v53, %v2823_v53  ;;  %v2671_v36 = vadd.f32 %v9880_v22, %v2554_v55 }
 0x42a   :  { %v3268_v53 = vpack.c.b16 %v3230_v29, %v3230_v29 }
 0x42b   :  { %v10129_v43 = vunpack.c.l.b16 %v2936_v58  ;;  %v3233_v41 = vunpack.c.l.b16 %v2937_v26  ;;  %v2785_v3 = vmax.f32 %v2671_v36, 0.0  ;;  %v12258_v36 = vld [vmem:[#allocation93_spill] sm:$0xff] }
 0x42c   :  { %v2601_v29 = vmul.f32 %v9878_v47, %v12258_v36 }
 0x42d   :  { %v3081_v24 = vpack.c.b16 %v10129_v43, %v10129_v43  ;;  %v3271_v5 = vpack.c.b16 %v3233_v41, %v3233_v41  ;;  %v10170_v39 = vpack.c.bf16 %v2785_v3, %v2785_v3 }
 0x42e   :  { %3155 = vrot.lane.b32.xlu1 %v3088_v31, %s8244_s1  ;;  %3317 = vrot.lane.b32.xlu0 %v3264_v54, %s8243_s2  ;;  %v12253_v31 = vld [vmem:[#allocation96_spill] sm:$0xff]  ;;  %v3401_v54 = vunpack.c.l.b16 %v10125_v23 }
 0x42f   :  { %3311 = vrot.lane.b32.xlu2 %v3261_v27, %s8243_s2  ;;  %v2603_v27 = vmul.f32 %v9878_v47, %v12253_v31  ;;  %v2949_v31 = vpack.c.bf16 %v2835_v45, %v2835_v45  ;;  %v2610_v45 = vmul.f32 %v9878_v47, %v9770_v7 }
 0x430   :  { %v3439_v19 = vpack.c.b16 %v9905_v0, %v3401_v54  ;;  %v2542_v0 = vmul.f32 %v9878_v47, %v12256_v12 }
 0x431   :  { %v2720_v13 = vadd.f32 %v9880_v22, %v2603_v27  ;;  %v3511_v27 = vor.u32 %v3510_v34, %v3506_v25  ;;  %v2572_v34 = vmul.f32 %v9878_v47, %v12259_v60 }
 0x432   :  { %v3480_v14 = vshll.u32 %v3439_v19, 16  ;;  %v3478_v26 = vshrl.u32 %v3439_v19, 16  ;;  %v2718_v19 = vadd.f32 %v9880_v22, %v2601_v29 }
 0x433   :  { %v2834_v15 = vmax.f32 %v2720_v13, 0.0  ;;  %v2689_v7 = vadd.f32 %v9880_v22, %v2572_v34 }
 0x434   :  { %v3482_v62 = vrot.slane %v3480_v14, 1 }
 0x435   :  { %v2948_v54 = vpack.c.bf16 %v2834_v15, %v2834_v15 }
 0x436   :  { %3147 = vrot.lane.b32.xlu1 %v3084_v56, %s8244_s1  ;;  %3137 = vrot.lane.b32.xlu0 %v3079_v37, %s8244_s1  ;;  %v2618_v56 = vmul.f32 %v9878_v47, %v12257_v51  ;;  %v2613_v37 = vmul.f32 %v9878_v47, %v9807_v6  ;;  %v2659_v6 = vadd.f32 %v9880_v22, %v2542_v0 }
 0x437   :  { %3327 = vrot.lane.b32.xlu2 %v3269_v40, %s8243_s2  ;;  %v12255_v40 = vld [vmem:[#allocation5_spill] sm:$0xff]  ;;  %v10172_v9 = vunpack.c.l.b16 %v2948_v54  ;;  %v2727_v0 = vadd.f32 %v9880_v22, %v2610_v45 }
 0x438   :  { %v2527_v58 = vmul.f32 %v9878_v47, %v12255_v40  ;;  %v2735_v50 = vadd.f32 %v9880_v22, %v2618_v56  ;;  %v2730_v13 = vadd.f32 %v9880_v22, %v2613_v37  ;;  %v2773_v15 = vmax.f32 %v2659_v6, 0.0  ;;  %v8076_v6 = vld [vmem:[%s11887_s4 + $0x18] sm:$0xff] }
 0x439   :  { %v3483_v40 = vor.u32 %v3482_v62, %v3478_v26  ;;  %v3085_v51 = vpack.c.b16 %v10172_v9, %v10172_v9  ;;  %v12260_v62 = vld [vmem:[#allocation23_spill] sm:$0xff]  ;;  %4332 = vmatpush.bf16.msrb.mxu3 %v8076_v6 }
 0x43a   :  { %v2844_v61 = vmax.f32 %v2730_v13, 0.0  ;;  %v2849_v55 = vmax.f32 %v2735_v50, 0.0  ;;  %v10189_v14 = vpack.c.bf16 %v2773_v15, %v2773_v15 }
 0x43c   :  { %v2958_v56 = vpack.c.bf16 %v2844_v61, %v2844_v61  ;;  %v2963_v37 = vpack.c.bf16 %v2849_v55, %v2849_v55  ;;  %v2803_v61 = vmax.f32 %v2689_v7, 0.0  ;;  %v3407_v34 = vunpack.c.l.b16 %v10189_v14 }
 0x43e   :  { %3167 = vrot.lane.b32.xlu1 %v3094_v57, %s8244_s1  ;;  %3333 = vrot.lane.b32.xlu0 %v3272_v38, %s8243_s2  ;;  %v3237_v57 = vunpack.c.l.b16 %v2949_v31  ;;  %v2840_v38 = vmax.f32 %v2726_v48, 0.0  ;;  %v3411_v48 = vunpack.c.l.b16 %v10170_v39  ;;  %v2832_v31 = vmax.f32 %v2718_v19, 0.0 }
 0x43f   :  { %3141 = vrot.lane.b32.xlu2 %v3081_v24, %s8244_s1  ;;  %v2644_v24 = vadd.f32 %v9880_v22, %v2527_v58  ;;  %v10199_v54 = vunpack.c.l.b16 %v2963_v37 }
 0x440   :  { %v3275_v58 = vpack.c.b16 %v3237_v57, %v3237_v57  ;;  %v2954_v12 = vpack.c.bf16 %v2840_v38, %v2840_v38  ;;  %v3449_v13 = vpack.c.b16 %v9952_v4, %v3411_v48  ;;  %v2545_v57 = vmul.f32 %v9878_v47, %v12260_v62  ;;  %v12261_v38 = vld [vmem:[#allocation38_spill] sm:$0xff] }
 0x441   :  { %v2758_v41 = vmax.f32 %v2644_v24, 0.0  ;;  %v8084_v24 = vld [vmem:[%s11887_s4 + $0x58] sm:$0xff]  ;;  %v2946_v36 = vpack.c.bf16 %v2832_v31, %v2832_v31  ;;  %v3090_v45 = vpack.c.b16 %v10199_v54, %v10199_v54  ;;  %v10229_v48 = vpack.c.bf16 %v2803_v61, %v2803_v61 }
 0x442   :  { %v10193_v3 = vunpack.c.l.b16 %v2954_v12  ;;  %4209 = vmatpush.bf16.msrb.mxu2 %v8084_v24  ;;  %v3550_v60 = vshll.u32 %v3449_v13, 16  ;;  %v3548_v6 = vshrl.u32 %v3449_v13, 16 }
 0x443   :  { %v10187_v25 = vpack.c.bf16 %v2758_v41, %v2758_v41  ;;  %v12262_v41 = vld [vmem:[#allocation29_spill] sm:$0xff] }
 0x444   :  { %v3087_v4 = vpack.c.b16 %v10193_v3, %v10193_v3  ;;  %v2551_v15 = vmul.f32 %v9878_v47, %v12262_v41 }
 0x445   :  { %v3402_v26 = vunpack.c.l.b16 %v10187_v25 }
 0x446   :  { %3751 = vrot.lane.b32.xlu1 %v3511_v27, %s8245_s22  ;;  %3331 = vrot.lane.b32.xlu0 %v3271_v5, %s8243_s2  ;;  %v3240_v5 = vunpack.c.l.b16 %v2958_v56  ;;  %v3236_v56 = vunpack.c.l.b16 %v2946_v36  ;;  %v2668_v37 = vadd.f32 %v9880_v22, %v2551_v15  ;;  %v3417_v36 = vunpack.c.l.b16 %v10229_v48 }
 0x447   :  { %3325 = vrot.lane.b32.xlu2 %v3268_v53, %s8243_s2  ;;  %v2841_v53 = vmax.f32 %v2727_v0, 0.0  ;;  %v3440_v12 = vpack.c.b16 %v9895_v21, %v3402_v26  ;;  %v3445_v21 = vpack.c.b16 %v9970_v42, %v3407_v34 }
 0x448   :  { %v3278_v29 = vpack.c.b16 %v3240_v5, %v3240_v5  ;;  %v12264_v5 = vld [vmem:[#allocation75_spill] sm:$0xff]  ;;  %v2782_v26 = vmax.f32 %v2668_v37, 0.0  ;;  %v3499_v37 = vshrl.u32 %v10055_v2, 16 }
 0x449   :  { %v3098_v30 = vpop.permute.xlu2 %3097  ;;  %v2955_v55 = vpack.c.bf16 %v2841_v53, %v2841_v53  ;;  %v12263_v53 = vld [vmem:[#allocation105_spill] sm:$0xff]  ;;  %v2622_v24 = vmul.f32 %v9878_v47, %v12264_v5  ;;  %v3487_v62 = vshll.u32 %v3440_v12, 16 }
 0x44a   :  { %v3822_v0 = vsel %vm3819_vm4, %v10125_v23, %v3098_v30  ;;  %v2621_v31 = vmul.f32 %v9878_v47, %v12263_v53  ;;  %v10254_v15 = vpack.c.bf16 %v2782_v26, %v2782_v26 }
 0x44b   :  { %v2739_v61 = vadd.f32 %v9880_v22, %v2622_v24  ;;  %v3489_v34 = vrot.slane %v3487_v62, 1 }
 0x44c   :  { %v2738_v42 = vadd.f32 %v9880_v22, %v2621_v31  ;;  %v3520_v31 = vshrl.u32 %v3445_v21, 16 }
 0x44e   :  { %3149 = vrot.lane.b32.xlu0 %v3085_v51, %s8244_s1  ;;  %3743 = vrot.lane.b32.xlu1 %v3483_v40, %s8245_s22  ;;  %v2662_v40 = vadd.f32 %v9880_v22, %v2545_v57  ;;  %v3239_v51 = vunpack.c.l.b16 %v2955_v55  ;;  %v3501_v57 = vshll.u32 %v10055_v2, 16  ;;  %v3522_v55 = vshll.u32 %v3445_v21, 16  ;;  %v12269_v2 = vld [vmem:[#allocation47_spill] sm:$0xff]  ;;  %v12270_v21 = vld [vmem:[#allocation80_spill] sm:$0xff] }
 0x44f   :  { %3339 = vrot.lane.b32.xlu2 %v3275_v58, %s8243_s2  ;;  %v2569_v26 = vmul.f32 %v9878_v47, %v12269_v2 }
 0x450   :  { %v2776_v23 = vmax.f32 %v2662_v40, 0.0  ;;  %v3503_v41 = vrot.slane %v3501_v57, 1  ;;  %v2853_v40 = vmax.f32 %v2739_v61, 0.0  ;;  %v2593_v61 = vmul.f32 %v9878_v47, %v12270_v21 }
 0x451   :  { %v3104_v50 = vpop.permute.xlu2 %3103 }
 0x452   :  { %v10197_v27 = vsel %vm3819_vm4, %v10035_v10, %v3104_v50  ;;  %v2560_v10 = vmul.f32 %v9878_v47, %v12261_v38  ;;  %v3552_v50 = vrot.slane %v3550_v60, 1  ;;  %v3277_v38 = vpack.c.b16 %v3239_v51, %v3239_v51 }
 0x453   :  { %v3455_v51 = vpack.c.b16 %v9992_v28, %v3417_v36  ;;  %v2967_v62 = vpack.c.bf16 %v2853_v40, %v2853_v40  ;;  %v12268_v28 = vld [vmem:[#allocation18_spill] sm:$0xff] }
 0x454   :  { %v2677_v58 = vadd.f32 %v9880_v22, %v2560_v10  ;;  %v3274_v10 = vpack.c.b16 %v3236_v56, %v3236_v56  ;;  %v3485_v56 = vshrl.u32 %v3440_v12, 16  ;;  %v2540_v12 = vmul.f32 %v9878_v47, %v12268_v28 }
 0x456   :  { %3345 = vrot.lane.b32.xlu0 %v3278_v29, %s8243_s2  ;;  %3159 = vrot.lane.b32.xlu1 %v3090_v45, %s8244_s1  ;;  %v2791_v30 = vmax.f32 %v2677_v58, 0.0  ;;  %v10244_v29 = vpack.c.bf16 %v2776_v23, %v2776_v23  ;;  %v3490_v24 = vor.u32 %v3489_v34, %v3485_v56  ;;  %v3504_v23 = vor.u32 %v3503_v41, %v3499_v37 }
 0x457   :  { %3153 = vrot.lane.b32.xlu2 %v3087_v4, %s8244_s1  ;;  %v3553_v4 = vor.u32 %v3552_v50, %v3548_v6  ;;  %v12267_v50 = vld [vmem:[#allocation41_spill] sm:$0xff]  ;;  %v3410_v6 = vunpack.c.l.b16 %v10254_v15  ;;  %v3243_v41 = vunpack.c.l.b16 %v2967_v62  ;;  %v3590_v62 = vshrl.u32 %v3455_v51, 16 }
 0x458   :  { %12265 = vst [vmem:[#allocation101_spill] sm:$0xff] %v10244_v29  ;;  %v10256_v58 = vpack.c.bf16 %v2791_v30, %v2791_v30  ;;  %v2563_v53 = vmul.f32 %v9878_v47, %v12267_v50  ;;  %v3408_v5 = vunpack.c.l.b16 %v10244_v29 }
 0x459   :  { %v3288_v19 = vpop.permute.xlu2 %3287  ;;  %v3448_v40 = vpack.c.b16 %v9990_v18, %v3410_v6  ;;  %v2657_v18 = vadd.f32 %v9880_v22, %v2540_v12  ;;  %v3281_v2 = vpack.c.b16 %v3243_v41, %v3243_v41 }
 0x45a   :  { %v10232_v7 = vsel %vm3934_vm5, %v3822_v0, %v3288_v19  ;;  %v3524_v0 = vrot.slane %v3522_v55, 1  ;;  %v2852_v19 = vmax.f32 %v2738_v42, 0.0  ;;  %v3446_v55 = vpack.c.b16 %v9968_v11, %v3408_v5  ;;  %v12271_v42 = vld [vmem:[#allocation119_spill] sm:$0xff] }
 0x45b   :  { %v2631_v36 = vmul.f32 %v9878_v47, %v12271_v42  ;;  %v12274_v42 = vld [vmem:[#allocation65_spill] sm:$0xff] }
 0x45c   :  { %v3525_v30 = vor.u32 %v3524_v0, %v3520_v31  ;;  %v2966_v57 = vpack.c.bf16 %v2852_v19, %v2852_v19  ;;  %v2686_v0 = vadd.f32 %v9880_v22, %v2569_v26  ;;  %v2710_v19 = vadd.f32 %v9880_v22, %v2593_v61  ;;  %v12272_v31 = vld [vmem:[#allocation59_spill] sm:$0xff] }
 0x45d   :  { %v2581_v5 = vmul.f32 %v9878_v47, %v12272_v31  ;;  %v2748_v28 = vadd.f32 %v9880_v22, %v2631_v36  ;;  %v3543_v26 = vshll.u32 %v3448_v40, 16  ;;  %v2584_v12 = vmul.f32 %v9878_v47, %v12274_v42  ;;  %v8083_v36 = vld [vmem:[%s11887_s4 + $0x50] sm:$0xff] }
 0x45e   :  { %3343 = vrot.lane.b32.xlu0 %v3277_v38, %s8243_s2  ;;  %3763 = vrot.lane.b32.xlu1 %v3553_v4, %s8245_s22  ;;  %v3592_v38 = vshll.u32 %v3455_v51, 16  ;;  %v2680_v4 = vadd.f32 %v9880_v22, %v2563_v53  ;;  %v10287_v50 = vunpack.c.l.b16 %v2966_v57  ;;  %v2824_v21 = vmax.f32 %v2710_v19, 0.0 }
 0x45f   :  { %3337 = vrot.lane.b32.xlu2 %v3274_v10, %s8243_s2  ;;  %v3413_v10 = vunpack.c.l.b16 %v10256_v58  ;;  %v2698_v51 = vadd.f32 %v9880_v22, %v2581_v5  ;;  %v3545_v19 = vrot.slane %v3543_v26, 1  ;;  %4210 = vmatpush.bf16.msrb.mxu2 %v8083_v36  ;;  %v3527_v26 = vshrl.u32 %v3446_v55, 16 }
 0x460   :  { %v10248_v13 = vpop.permute.xlu1 %3289  ;;  %v10250_v45 = vpop.permute.xlu0 %3099  ;;  %v3594_v53 = vrot.slane %v3592_v38, 1  ;;  %v2794_v6 = vmax.f32 %v2680_v4, 0.0  ;;  %v2800_v38 = vmax.f32 %v2686_v0, 0.0  ;;  %v2862_v4 = vmax.f32 %v2748_v28, 0.0 }
 0x461   :  { %v10252_v60 = vpop.permute.xlu2 %3301  ;;  %v3451_v11 = vpack.c.b16 %v10015_v20, %v3413_v10  ;;  %v3091_v20 = vpack.c.b16 %v10287_v50, %v10287_v50  ;;  %v2771_v28 = vmax.f32 %v2657_v18, 0.0  ;;  %v2701_v52 = vadd.f32 %v9880_v22, %v2584_v12 }
 0x462   :  { %12266 = vst [vmem:[#allocation102_spill] sm:$0xff] %v10252_v60  ;;  %v3595_v10 = vor.u32 %v3594_v53, %v3590_v62  ;;  %v10310_v31 = vpack.c.bf16 %v2800_v38, %v2800_v38  ;;  %v2611_v38 = vmul.f32 %v9878_v47, %v9732_v33  ;;  %v2976_v18 = vpack.c.bf16 %v2862_v4, %v2862_v4 }
 0x463   :  { %v3564_v61 = vshll.u32 %v3451_v11, 16 }
 0x466   :  { %3745 = vrot.lane.b32.xlu0 %v3490_v24, %s8245_s22  ;;  %3755 = vrot.lane.b32.xlu1 %v3525_v30, %s8245_s22  ;;  %v12273_v24 = vld [vmem:[#allocation113_spill] sm:$0xff]  ;;  %v3529_v30 = vshll.u32 %v3446_v55, 16 }
 0x467   :  { %3749 = vrot.lane.b32.xlu2 %v3504_v23, %s8245_s22  ;;  %v2627_v23 = vmul.f32 %v9878_v47, %v12273_v24  ;;  %v10312_v24 = vpack.c.bf16 %v2794_v6, %v2794_v6  ;;  %v8075_v6 = vld [vmem:[%s11887_s4 + $0x10] sm:$0xff] }
 0x468   :  { %v10283_v56 = vpop.permute.xlu1 %3295  ;;  %v10285_v37 = vpop.permute.xlu0 %3105  ;;  %v3531_v0 = vrot.slane %v3529_v30, 1  ;;  %4333 = vmatpush.bf16.msrb.mxu3 %v8075_v6 }
 0x469   :  { %v10278_v34 = vpop.permute.xlu2 %3115  ;;  %v2744_v57 = vadd.f32 %v9880_v22, %v2627_v23  ;;  %12276 = vst [vmem:[#allocation104_spill] sm:$0xff] %v10312_v24  ;;  %v10314_v23 = vpack.c.bf16 %v2824_v21, %v2824_v21  ;;  %v2812_v21 = vmax.f32 %v2698_v51, 0.0  ;;  %v3414_v55 = vunpack.c.l.b16 %v10312_v24  ;;  %v12278_v51 = vld [vmem:[#allocation84_spill] sm:$0xff] }
 0x46a   :  { %v3532_v42 = vor.u32 %v3531_v0, %v3527_v26  ;;  %v2628_v4 = vmul.f32 %v9878_v47, %v12278_v51 }
 0x46b   :  { %v2858_v53 = vmax.f32 %v2744_v57, 0.0  ;;  %v3541_v57 = vshrl.u32 %v3448_v40, 16  ;;  %v3424_v40 = vunpack.c.l.b16 %v10314_v23 }
 0x46d   :  { %v3546_v36 = vor.u32 %v3545_v19, %v3541_v57  ;;  %v2972_v16 = vpack.c.bf16 %v2858_v53, %v2858_v53  ;;  %v3246_v19 = vunpack.c.l.b16 %v2976_v18  ;;  %v3452_v57 = vpack.c.b16 %v10039_v17, %v3414_v55  ;;  %v12282_v18 = vld [vmem:[#allocation70_spill] sm:$0xff] }
 0x46e   :  { %3161 = vrot.lane.b32.xlu0 %v3091_v20, %s8244_s1  ;;  %3775 = vrot.lane.b32.xlu1 %v3595_v10, %s8245_s22  ;;  %v12277_v20 = vld [vmem:[#allocation76_spill] sm:$0xff]  ;;  %v3462_v6 = vpack.c.b16 %v10033_v32, %v3424_v40 }
 0x46f   :  { %3351 = vrot.lane.b32.xlu2 %v3281_v2, %s8243_s2  ;;  %v3566_v2 = vrot.slane %v3564_v61, 1  ;;  %v2590_v10 = vmul.f32 %v9878_v47, %v12277_v20  ;;  %v3562_v61 = vshrl.u32 %v3451_v11, 16  ;;  %v3416_v20 = vunpack.c.l.b16 %v10310_v31 }
 0x470   :  { %v10316_v5 = vpop.permute.xlu1 %3117  ;;  %v3294_v62 = vpop.permute.xlu0 %3293  ;;  %v2728_v11 = vadd.f32 %v9880_v22, %v2611_v38  ;;  %v10342_v53 = vunpack.c.l.b16 %v2972_v16  ;;  %v12281_v38 = vld [vmem:[#allocation89_spill] sm:$0xff]  ;;  %v2619_v16 = vmul.f32 %v9878_v47, %v12282_v18  ;;  %v3571_v55 = vshll.u32 %v3452_v57, 16 }
 0x471   :  { %v10308_v41 = vpop.permute.xlu2 %3299  ;;  %v10322_v30 = vsel %vm3934_vm5, %v10197_v27, %v3294_v62  ;;  %v3567_v27 = vor.u32 %v3566_v2, %v3562_v61  ;;  %v2885_v62 = vpack.c.bf16 %v2771_v28, %v2771_v28  ;;  %v2707_v33 = vadd.f32 %v9880_v22, %v2590_v10 }
 0x472   :  { %12275 = vst [vmem:[#allocation103_spill] sm:$0xff] %v10308_v41  ;;  %v3454_v2 = vpack.c.b16 %v10059_v63, %v3416_v20  ;;  %v10345_v28 = vpack.c.bf16 %v2812_v21, %v2812_v21  ;;  %v2599_v61 = vmul.f32 %v9878_v47, %v12281_v38  ;;  %v2842_v21 = vmax.f32 %v2728_v11, 0.0 }
 0x473   :  { %v10351_v26 = vunpack.c.l.b16 %v2885_v62  ;;  %v2821_v63 = vmax.f32 %v2707_v33, 0.0  ;;  %v3284_v20 = vpack.c.b16 %v3246_v19, %v3246_v19  ;;  %v2736_v17 = vadd.f32 %v9880_v22, %v2619_v16 }
 0x474   :  { %v3585_v62 = vshll.u32 %v3454_v2, 16  ;;  %v3641_v40 = vshll.u32 %v3462_v6, 16  ;;  %v3420_v51 = vunpack.c.l.b16 %v10345_v28  ;;  %v10374_v19 = vpack.c.bf16 %v2842_v21, %v2842_v21  ;;  %v12285_v21 = vld [vmem:[#allocation99_spill] sm:$0xff] }
 0x475   :  { %v3064_v32 = vpack.c.b16 %v10351_v26, %v10351_v26  ;;  %v2850_v16 = vmax.f32 %v2736_v17, 0.0  ;;  %v2608_v24 = vmul.f32 %v9878_v47, %v12285_v21  ;;  %v3583_v17 = vshrl.u32 %v3454_v2, 16  ;;  %v12286_v2 = vld [vmem:[#allocation9_spill] sm:$0xff] }
 0x476   :  { %3757 = vrot.lane.b32.xlu0 %v3532_v42, %s8245_s22  ;;  %3767 = vrot.lane.b32.xlu1 %v3567_v27, %s8245_s22  ;;  %v2815_v42 = vmax.f32 %v2701_v52, 0.0  ;;  %v3093_v27 = vpack.c.b16 %v10342_v53, %v10342_v53  ;;  %v2716_v52 = vadd.f32 %v9880_v22, %v2599_v61  ;;  %v3587_v18 = vrot.slane %v3585_v62, 1 }
 0x477   :  { %3761 = vrot.lane.b32.xlu2 %v3546_v36, %s8245_s22  ;;  %v2745_v36 = vadd.f32 %v9880_v22, %v2628_v4  ;;  %v10372_v4 = vpack.c.bf16 %v2821_v63, %v2821_v63  ;;  %v3569_v29 = vshrl.u32 %v3452_v57, 16  ;;  %v2964_v35 = vpack.c.bf16 %v2850_v16, %v2850_v16 }
 0x478   :  { %v10347_v12 = vpop.permute.xlu1 %3109  ;;  %v10349_v10 = vpop.permute.xlu0 %3111  ;;  %v10368_v33 = vpack.c.bf16 %v2815_v42, %v2815_v42  ;;  %v2830_v60 = vmax.f32 %v2716_v52, 0.0  ;;  %v3430_v41 = vunpack.c.l.b16 %v10374_v19  ;;  %v2531_v57 = vmul.f32 %v9878_v47, %v12286_v2 }
 0x479   :  { %v10340_v0 = vpop.permute.xlu2 %3313  ;;  %12280 = vst [vmem:[#allocation107_spill] sm:$0xff] %v10349_v10  ;;  %v2859_v11 = vmax.f32 %v2745_v36, 0.0  ;;  %v12284_v36 = vld [vmem:[#allocation95_spill] sm:$0xff]  ;;  %v3588_v10 = vor.u32 %v3587_v18, %v3583_v17  ;;  %v3242_v18 = vunpack.c.l.b16 %v2964_v35 }
 0x47a   :  { %12279 = vst [vmem:[#allocation120_spill] sm:$0xff] %v10340_v0  ;;  %v3573_v0 = vrot.slane %v3571_v55, 1  ;;  %v2602_v63 = vmul.f32 %v9878_v47, %v12284_v36  ;;  %v3421_v55 = vunpack.c.l.b16 %v10368_v33  ;;  %v3468_v17 = vpack.c.b16 %v10084_v59, %v3430_v41 }
 0x47b   :  { %12283 = vst [vmem:[#allocation121_spill] sm:$0xff] %v10368_v33  ;;  %v3280_v41 = vpack.c.b16 %v3242_v18, %v3242_v18 }
 0x47c   :  { %v2719_v21 = vadd.f32 %v9880_v22, %v2602_v63  ;;  %v3459_v16 = vpack.c.b16 %v10105_v49, %v3421_v55 }
 0x47e   :  { %3357 = vrot.lane.b32.xlu0 %v3284_v20, %s8243_s2  ;;  %3107 = vrot.lane.b32.xlu1 %v3064_v32, %s8244_s1  ;;  %v3643_v20 = vrot.slane %v3641_v40, 1  ;;  %v3458_v32 = vpack.c.b16 %v10063_v44, %v3420_v51  ;;  %v3423_v44 = vunpack.c.l.b16 %v10372_v4  ;;  %v3574_v40 = vor.u32 %v3573_v0, %v3569_v29 }
 0x47f   :  { %3165 = vrot.lane.b32.xlu2 %v3093_v27, %s8244_s1  ;;  %v3852_v27 = vsel %vm3819_vm4, %v10170_v39, %v10316_v5  ;;  %v3639_v39 = vshrl.u32 %v3462_v6, 16  ;;  %v2973_v5 = vpack.c.bf16 %v2859_v11, %v2859_v11  ;;  %v2725_v6 = vadd.f32 %v9880_v22, %v2608_v24  ;;  %v12287_v11 = vld [vmem:[#allocation10_spill] sm:$0xff] }
 0x480   :  { %v10381_v61 = vpop.permute.xlu1 %3129  ;;  %v3308_v42 = vpop.permute.xlu0 %3307  ;;  %v3613_v36 = vshll.u32 %v3458_v32, 16  ;;  %v2532_v29 = vmul.f32 %v9878_v47, %v12287_v11  ;;  %v3849_v24 = vsel %vm3819_vm4, %v10254_v15, %v10278_v34  ;;  %v3611_v59 = vshrl.u32 %v3458_v32, 16  ;;  %v8074_v32 = vld [vmem:[%s11887_s4 + $0x8] sm:$0xff] }
 0x481   :  { %v10376_v38 = vpop.permute.xlu2 %3127  ;;  %v10389_v62 = vsel %vm3934_vm5, %v3852_v27, %v3308_v42  ;;  %v3644_v51 = vor.u32 %v3643_v20, %v3639_v39  ;;  %v3245_v52 = vunpack.c.l.b16 %v2973_v5  ;;  %v3461_v27 = vpack.c.b16 %v10129_v43, %v3423_v44  ;;  %v12288_v39 = vld [vmem:[#allocation116_spill] sm:$0xff]  ;;  %v8082_v43 = vld [vmem:[%s11887_s4 + $0x48] sm:$0xff]  ;;  %4334 = vmatpush.bf16.msrb.mxu3 %v8074_v32 }
 0x482   :  { %v3615_v63 = vrot.slane %v3613_v36, 1  ;;  %v2629_v5 = vmul.f32 %v9878_v47, %v12288_v39  ;;  %v3620_v55 = vshll.u32 %v3459_v16, 16  ;;  %4211 = vmatpush.bf16.msrb.mxu2 %v8082_v43  ;;  %v3683_v36 = vshll.u32 %v3468_v17, 16  ;;  %v12292_v43 = vld [vmem:[#allocation66_spill] sm:$0xff] }
 0x483   :  { %v3283_v34 = vpack.c.b16 %v3245_v52, %v3245_v52  ;;  %v3634_v44 = vshll.u32 %v3461_v27, 16 }
 0x484   :  { %v2746_v52 = vadd.f32 %v9880_v22, %v2629_v5  ;;  %v3685_v39 = vrot.slane %v3683_v36, 1 }
 0x485   :  { %v3636_v18 = vrot.slane %v3634_v44, 1  ;;  %v3632_v44 = vshrl.u32 %v3461_v27, 16 }
 0x486   :  { %3769 = vrot.lane.b32.xlu0 %v3574_v40, %s8245_s22  ;;  %3789 = vrot.lane.b32.xlu1 %v3644_v51, %s8245_s22  ;;  %v2833_v40 = vmax.f32 %v2719_v21, 0.0  ;;  %v2649_v51 = vadd.f32 %v9880_v22, %v2532_v29  ;;  %v2648_v21 = vadd.f32 %v9880_v22, %v2531_v57 }
 0x487   :  { %3773 = vrot.lane.b32.xlu2 %v3588_v10, %s8245_s22  ;;  %v10405_v10 = vpack.c.bf16 %v2830_v60, %v2830_v60  ;;  %v2839_v60 = vmax.f32 %v2725_v6, 0.0  ;;  %v12289_v6 = vld [vmem:[#allocation36_spill] sm:$0xff]  ;;  %v3637_v36 = vor.u32 %v3636_v18, %v3632_v44 }
 0x488   :  { %v3122_v42 = vpop.permute.xlu1 %3121  ;;  %v3306_v20 = vpop.permute.xlu0 %3305  ;;  %v2558_v11 = vmul.f32 %v9878_v47, %v12289_v6  ;;  %v10436_v29 = vpack.c.bf16 %v2833_v40, %v2833_v40  ;;  %v2762_v5 = vmax.f32 %v2648_v21, 0.0  ;;  %v2617_v40 = vmul.f32 %v9878_v47, %v12292_v43 }
 0x489   :  { %v3312_v0 = vpop.permute.xlu2 %3311  ;;  %v3858_v35 = vsel %vm3819_vm4, %v10256_v58, %v3122_v42  ;;  %v10416_v49 = vsel %vm3934_vm5, %v3849_v24, %v3306_v20  ;;  %v3616_v58 = vor.u32 %v3615_v63, %v3611_v59  ;;  %v3426_v2 = vunpack.c.l.b16 %v10405_v10  ;;  %v12294_v59 = vld [vmem:[#allocation81_spill] sm:$0xff] }
 0x48a   :  { %v10422_v15 = vsel %vm3934_vm5, %v3858_v35, %v3312_v0  ;;  %v10438_v57 = vpack.c.bf16 %v2839_v60, %v2839_v60  ;;  %v2763_v24 = vmax.f32 %v2649_v51, 0.0  ;;  %v3622_v63 = vrot.slane %v3620_v55, 1 }
 0x48b   :  { %v3464_v35 = vpack.c.b16 %v10103_v8, %v3426_v2  ;;  %v2675_v51 = vadd.f32 %v9880_v22, %v2558_v11  ;;  %v3618_v6 = vshrl.u32 %v3459_v16, 16  ;;  %v3681_v55 = vshrl.u32 %v3468_v17, 16  ;;  %v12296_v17 = vld [vmem:[#allocation17_spill] sm:$0xff] }
 0x48c   :  { %v2877_v21 = vpack.c.bf16 %v2763_v24, %v2763_v24  ;;  %v3427_v8 = vunpack.c.l.b16 %v10436_v29  ;;  %v3429_v2 = vunpack.c.l.b16 %v10438_v57  ;;  %v2734_v27 = vadd.f32 %v9880_v22, %v2617_v40 }
 0x48d   :  { %v3623_v32 = vor.u32 %v3622_v63, %v3618_v6  ;;  %v3686_v43 = vor.u32 %v3685_v39, %v3681_v55  ;;  %v3655_v33 = vshll.u32 %v3464_v35, 16  ;;  %v3834_v16 = vsel %vm3819_vm4, %v10101_v46, %v10285_v37  ;;  %v12298_v55 = vld [vmem:[#allocation28_spill] sm:$0xff] }
 0x48e   :  { %3355 = vrot.lane.b32.xlu0 %v3283_v34, %s8243_s2  ;;  %3781 = vrot.lane.b32.xlu1 %v3616_v58, %s8245_s22  ;;  %v12293_v34 = vld [vmem:[#allocation72_spill] sm:$0xff]  ;;  %v2860_v58 = vmax.f32 %v2746_v52, 0.0  ;;  %v2539_v11 = vmul.f32 %v9878_v47, %v12296_v17  ;;  %v2789_v24 = vmax.f32 %v2675_v51, 0.0  ;;  %v3465_v46 = vpack.c.b16 %v10172_v9, %v3427_v8 }
 0x48f   :  { %3349 = vrot.lane.b32.xlu2 %v3280_v41, %s8243_s2  ;;  %v2620_v60 = vmul.f32 %v9878_v47, %v12293_v34  ;;  %v2626_v41 = vmul.f32 %v9878_v47, %v12294_v59  ;;  %v12295_v34 = vld [vmem:[#allocation8_spill] sm:$0xff]  ;;  %v3467_v37 = vpack.c.b16 %v10193_v3, %v3429_v2  ;;  %v3870_v40 = vsel %vm3819_vm4, %v10229_v48, %v10381_v61 }
 0x490   :  { %v10442_v42 = vpop.permute.xlu1 %3143  ;;  %v10444_v20 = vpop.permute.xlu0 %3123  ;;  %v10469_v63 = vpack.c.bf16 %v2860_v58, %v2860_v58  ;;  %v3657_v44 = vrot.slane %v3655_v33, 1  ;;  %v10482_v51 = vsel %vm3934_vm5, %v3834_v16, %v10283_v56  ;;  %v12297_v58 = vld [vmem:[#allocation19_spill] sm:$0xff]  ;;  %v2550_v9 = vmul.f32 %v9878_v47, %v12298_v55 }
 0x491   :  { %v10440_v0 = vpop.permute.xlu2 %3327  ;;  %12291 = vst [vmem:[#allocation109_spill] sm:$0xff] %v10444_v20  ;;  %v2530_v20 = vmul.f32 %v9878_v47, %v12295_v34  ;;  %v2737_v52 = vadd.f32 %v9880_v22, %v2620_v60  ;;  %v2743_v18 = vadd.f32 %v9880_v22, %v2626_v41  ;;  %v2541_v6 = vmul.f32 %v9878_v47, %v12297_v58 }
 0x492   :  { %12290 = vst [vmem:[#allocation108_spill] sm:$0xff] %v10440_v0  ;;  %v2876_v0 = vpack.c.bf16 %v2762_v5, %v2762_v5  ;;  %v3213_v5 = vunpack.c.l.b16 %v2877_v21  ;;  %v2848_v3 = vmax.f32 %v2734_v27, 0.0  ;;  %v3653_v21 = vshrl.u32 %v3464_v35, 16 }
 0x493   :  { %v2851_v48 = vmax.f32 %v2737_v52, 0.0  ;;  %v2857_v61 = vmax.f32 %v2743_v18, 0.0  ;;  %v3662_v33 = vshll.u32 %v3465_v46, 16  ;;  %v3676_v2 = vshll.u32 %v3467_v37, 16 }
 0x494   :  { %v10478_v41 = vunpack.c.l.b16 %v2876_v0  ;;  %v2903_v0 = vpack.c.bf16 %v2789_v24, %v2789_v24  ;;  %v3251_v8 = vpack.c.b16 %v3213_v5, %v3213_v5  ;;  %v2667_v56 = vadd.f32 %v9880_v22, %v2550_v9 }
 0x495   :  { %v2658_v34 = vadd.f32 %v9880_v22, %v2541_v6  ;;  %v3436_v27 = vunpack.c.l.b16 %v10469_v63  ;;  %v2647_v16 = vadd.f32 %v9880_v22, %v2530_v20  ;;  %v2656_v17 = vadd.f32 %v9880_v22, %v2539_v11 }
 0x496   :  { %3783 = vrot.lane.b32.xlu0 %v3623_v32, %s8245_s22  ;;  %3801 = vrot.lane.b32.xlu1 %v3686_v43, %s8245_s22  ;;  %v3061_v32 = vpack.c.b16 %v10478_v41, %v10478_v41  ;;  %v3658_v43 = vor.u32 %v3657_v44, %v3653_v21  ;;  %v10499_v35 = vpack.c.bf16 %v2848_v3, %v2848_v3  ;;  %v10507_v24 = vunpack.c.l.b16 %v2903_v0 }
 0x497   :  { %3787 = vrot.lane.b32.xlu2 %v3637_v36, %s8245_s22  ;;  %v10501_v52 = vpack.c.bf16 %v2851_v48, %v2851_v48  ;;  %v10503_v18 = vpack.c.bf16 %v2857_v61, %v2857_v61  ;;  %v3678_v11 = vrot.slane %v3676_v2, 1  ;;  %v3867_v44 = vsel %vm3819_vm4, %v10310_v31, %v10376_v38 }
 0x498   :  { %v3136_v60 = vpop.permute.xlu1 %3135  ;;  %v3320_v59 = vpop.permute.xlu0 %3319  ;;  %v2772_v9 = vmax.f32 %v2658_v34, 0.0  ;;  %v3474_v3 = vpack.c.b16 %v10131_v1, %v3436_v27  ;;  %v2770_v61 = vmax.f32 %v2656_v17, 0.0  ;;  %v3660_v21 = vshrl.u32 %v3465_v46, 16 }
 0x499   :  { %v10471_v39 = vpop.permute.xlu2 %3141  ;;  %v10489_v36 = vsel %vm3934_vm5, %v3870_v40, %v3320_v59  ;;  %v3879_v5 = vsel %vm3819_vm4, %v10345_v28, %v3136_v60  ;;  %v3664_v40 = vrot.slane %v3662_v33, 1  ;;  %v2781_v59 = vmax.f32 %v2667_v56, 0.0 }
 0x49a   :  { %v3674_v28 = vshrl.u32 %v3467_v37, 16  ;;  %v2761_v60 = vmax.f32 %v2647_v16, 0.0  ;;  %v3433_v0 = vunpack.c.l.b16 %v10501_v52  ;;  %v3070_v31 = vpack.c.b16 %v10507_v24, %v10507_v24  ;;  %v8073_v37 = vld [vmem:[%s11887_s4] sm:$0xff] }
 0x49b   :  { %v2895_v38 = vpack.c.bf16 %v2781_v59, %v2781_v59  ;;  %v3435_v33 = vunpack.c.l.b16 %v10503_v18  ;;  %v3665_v2 = vor.u32 %v3664_v40, %v3660_v21  ;;  %v2886_v56 = vpack.c.bf16 %v2772_v9, %v2772_v9  ;;  %4335 = vmatpush.bf16.msrb.mxu3 %v8073_v37  ;;  %v12302_v9 = vld [vmem:[#allocation26_spill] sm:$0xff] }
 0x49c   :  { %v3432_v1 = vunpack.c.l.b16 %v10499_v35  ;;  %v3471_v46 = vpack.c.b16 %v10287_v50, %v3433_v0  ;;  %v10540_v17 = vpack.c.bf16 %v2761_v60, %v2761_v60 }
 0x49d   :  { %v3219_v27 = vunpack.c.l.b16 %v2895_v38  ;;  %v3473_v16 = vpack.c.b16 %v10342_v53, %v3435_v33  ;;  %v3216_v40 = vunpack.c.l.b16 %v2886_v56  ;;  %v2548_v53 = vmul.f32 %v9878_v47, %v12302_v9 }
 0x49e   :  { %3101 = vrot.lane.b32.xlu0 %v3061_v32, %s8244_s1  ;;  %3793 = vrot.lane.b32.xlu1 %v3658_v43, %s8245_s22  ;;  %v3725_v32 = vshll.u32 %v3474_v3, 16  ;;  %v10535_v43 = vpack.c.bf16 %v2770_v61, %v2770_v61  ;;  %12300 = vst [vmem:[#allocation112_spill] sm:$0xff] %v10540_v17  ;;  %v3470_v59 = vpack.c.b16 %v10199_v54, %v3432_v1  ;;  %v3704_v60 = vshll.u32 %v3471_v46, 16  ;;  %v12305_v1 = vld [vmem:[#allocation54_spill] sm:$0xff] }
 0x49f   :  { %3291 = vrot.lane.b32.xlu2 %v3251_v8, %s8243_s2  ;;  %v3679_v8 = vor.u32 %v3678_v11, %v3674_v28  ;;  %v3723_v28 = vshrl.u32 %v3474_v3, 16  ;;  %v3257_v61 = vpack.c.b16 %v3219_v27, %v3219_v27  ;;  %v3718_v21 = vshll.u32 %v3473_v16, 16 }
 0x4a0   :  { %v10514_v58 = vpop.permute.xlu1 %3155  ;;  %v3318_v6 = vpop.permute.xlu0 %3317  ;;  %12299 = vst [vmem:[#allocation111_spill] sm:$0xff] %v10535_v43  ;;  %v3727_v11 = vrot.slane %v3725_v32, 1  ;;  %v3254_v54 = vpack.c.b16 %v3216_v40, %v3216_v40  ;;  %v3697_v38 = vshll.u32 %v3470_v59, 16  ;;  %v3403_v33 = vunpack.c.l.b16 %v10540_v17  ;;  %v12304_v32 = vld [vmem:[#allocation46_spill] sm:$0xff] }
 0x4a1   :  { %v3326_v20 = vpop.permute.xlu2 %3325  ;;  %v10521_v48 = vsel %vm3934_vm5, %v3867_v44, %v3318_v6  ;;  %v12301_v44 = vld [vmem:[#allocation27_spill] sm:$0xff]  ;;  %v8081_v6 = vld [vmem:[%s11887_s4 + $0x40] sm:$0xff]  ;;  %v2568_v3 = vmul.f32 %v9878_v47, %v12304_v32  ;;  %v2576_v37 = vmul.f32 %v9878_v47, %v12305_v1  ;;  %v2665_v27 = vadd.f32 %v9880_v22, %v2548_v53 }
 0x4a2   :  { %v10517_v55 = vsel %vm3934_vm5, %v3879_v5, %v3326_v20  ;;  %v2549_v50 = vmul.f32 %v9878_v47, %v12301_v44  ;;  %4212 = vmatpush.bf16.msrb.mxu2 %v8081_v6  ;;  %v3720_v44 = vrot.slane %v3718_v21, 1  ;;  %v3891_v9 = vsel %vm3819_vm4, %v10314_v23, %v10442_v42 }
 0x4a3   :  { %v3706_v53 = vrot.slane %v3704_v60, 1  ;;  %v2693_v32 = vadd.f32 %v9880_v22, %v2576_v37  ;;  %v3695_v1 = vshrl.u32 %v3470_v59, 16  ;;  %v2685_v23 = vadd.f32 %v9880_v22, %v2568_v3 }
 0x4a4   :  { %v2666_v0 = vadd.f32 %v9880_v22, %v2549_v50 }
 0x4a6   :  { %3795 = vrot.lane.b32.xlu0 %v3665_v2, %s8245_s22  ;;  %3119 = vrot.lane.b32.xlu1 %v3070_v31, %s8244_s1  ;;  %v3728_v31 = vor.u32 %v3727_v11, %v3723_v28  ;;  %v12303_v2 = vld [vmem:[#allocation35_spill] sm:$0xff]  ;;  %v2780_v50 = vmax.f32 %v2666_v0, 0.0  ;;  %v2779_v0 = vmax.f32 %v2665_v27, 0.0 }
 0x4a7   :  { %3799 = vrot.lane.b32.xlu2 %v3679_v8, %s8245_s22  ;;  %v3406_v8 = vunpack.c.l.b16 %v10535_v43  ;;  %v2557_v56 = vmul.f32 %v9878_v47, %v12303_v2  ;;  %v3699_v2 = vrot.slane %v3697_v38, 1 }
 0x4a8   :  { %v3148_v5 = vpop.permute.xlu1 %3147  ;;  %v10542_v20 = vpop.permute.xlu0 %3137  ;;  %v2894_v60 = vpack.c.bf16 %v2780_v50, %v2780_v50  ;;  %v10584_v37 = vpack.c.bf16 %v2779_v0, %v2779_v0 }
 0x4a9   :  { %v10537_v34 = vpop.permute.xlu2 %3339  ;;  %v2674_v40 = vadd.f32 %v9880_v22, %v2557_v56  ;;  %v3444_v6 = vpack.c.b16 %v10351_v26, %v3406_v8  ;;  %v3716_v26 = vshrl.u32 %v3473_v16, 16  ;;  %v3702_v8 = vshrl.u32 %v3471_v46, 16 }
 0x4aa   :  { %v2799_v46 = vmax.f32 %v2685_v23, 0.0  ;;  %v2807_v16 = vmax.f32 %v2693_v32, 0.0  ;;  %v3897_v3 = vsel %vm3819_vm4, %v10405_v10, %v3148_v5 }
 0x4ab   :  { %v2788_v42 = vmax.f32 %v2674_v40, 0.0  ;;  %v3721_v43 = vor.u32 %v3720_v44, %v3716_v26  ;;  %v3515_v38 = vshll.u32 %v3444_v6, 16  ;;  %v3707_v17 = vor.u32 %v3706_v53, %v3702_v8  ;;  %v12309_v8 = vld [vmem:[#allocation44_spill] sm:$0xff] }
 0x4ac   :  { %v3029_v40 = vunpack.c.l.b16 %v2894_v60  ;;  %v3513_v5 = vshrl.u32 %v3444_v6, 16  ;;  %v2913_v26 = vpack.c.bf16 %v2799_v46, %v2799_v46  ;;  %v2921_v0 = vpack.c.bf16 %v2807_v16, %v2807_v16 }
 0x4ad   :  { %v10588_v59 = vpack.c.bf16 %v2788_v42, %v2788_v42  ;;  %v3517_v44 = vrot.slane %v3515_v38, 1 }
 0x4ae   :  { %3297 = vrot.lane.b32.xlu0 %v3254_v54, %s8243_s2  ;;  %3813 = vrot.lane.b32.xlu1 %v3728_v31, %s8245_s22  ;;  %v3441_v54 = vpack.c.b16 %v10478_v41, %v3403_v33  ;;  %v12306_v31 = vld [vmem:[#allocation37_spill] sm:$0xff]  ;;  %v3700_v41 = vor.u32 %v3699_v2, %v3695_v1  ;;  %v3067_v42 = vpack.c.b16 %v3029_v40, %v3029_v40 }
 0x4af   :  { %3303 = vrot.lane.b32.xlu2 %v3257_v61, %s8243_s2  ;;  %v2559_v56 = vmul.f32 %v9878_v47, %v12306_v31  ;;  %12307 = vst [vmem:[#allocation114_spill] sm:$0xff] %v10588_v59  ;;  %v12308_v2 = vld [vmem:[#allocation45_spill] sm:$0xff]  ;;  %v3412_v23 = vunpack.c.l.b16 %v10588_v59 }
 0x4b0   :  { %v10572_v28 = vpop.permute.xlu1 %3167  ;;  %v3334_v61 = vpop.permute.xlu0 %3333  ;;  %v3494_v33 = vshll.u32 %v3441_v54, 16  ;;  %v3492_v32 = vshrl.u32 %v3441_v54, 16  ;;  %v3225_v54 = vunpack.c.l.b16 %v2913_v26  ;;  %v12313_v26 = vld [vmem:[#allocation74_spill] sm:$0xff] }
 0x4b1   :  { %v10566_v11 = vpop.permute.xlu2 %3153  ;;  %v10579_v21 = vsel %vm3934_vm5, %v3891_v9, %v3334_v61  ;;  %v2676_v31 = vadd.f32 %v9880_v22, %v2559_v56  ;;  %v2567_v56 = vmul.f32 %v9878_v47, %v12308_v2 }
 0x4b2   :  { %v3496_v61 = vrot.slane %v3494_v33, 1  ;;  %v10614_v33 = vunpack.c.l.b16 %v2921_v0  ;;  %v2589_v0 = vmul.f32 %v9878_v47, %v12313_v26 }
 0x4b3   :  { %v2790_v53 = vmax.f32 %v2676_v31, 0.0  ;;  %v2684_v1 = vadd.f32 %v9880_v22, %v2567_v56  ;;  %v12310_v31 = vld [vmem:[#allocation55_spill] sm:$0xff] }
 0x4b4   :  { %v3497_v60 = vor.u32 %v3496_v61, %v3492_v32  ;;  %v2577_v46 = vmul.f32 %v9878_v47, %v12310_v31 }
 0x4b5   :  { %v2904_v38 = vpack.c.bf16 %v2790_v53, %v2790_v53 }
 0x4b6   :  { %3807 = vrot.lane.b32.xlu0 %v3707_v17, %s8245_s22  ;;  %3805 = vrot.lane.b32.xlu1 %v3700_v41, %s8245_s22  ;;  %v3409_v41 = vunpack.c.l.b16 %v10584_v37 }
 0x4b7   :  { %3811 = vrot.lane.b32.xlu2 %v3721_v43, %s8245_s22  ;;  %v3888_v43 = vsel %vm3819_vm4, %v10372_v4, %v10471_v39  ;;  %v2566_v4 = vmul.f32 %v9878_v47, %v12309_v8  ;;  %v3518_v39 = vor.u32 %v3517_v44, %v3513_v5  ;;  %v12311_v44 = vld [vmem:[#allocation56_spill] sm:$0xff]  ;;  %v3222_v2 = vunpack.c.l.b16 %v2904_v38  ;;  %v12312_v5 = vld [vmem:[#allocation57_spill] sm:$0xff] }
 0x4b8   :  { %v10595_v50 = vpop.permute.xlu1 %3751  ;;  %v3332_v9 = vpop.permute.xlu0 %3331  ;;  %v3447_v56 = vpack.c.b16 %v3029_v40, %v3409_v41  ;;  %v2579_v32 = vmul.f32 %v9878_v47, %v12312_v5  ;;  %v2694_v40 = vadd.f32 %v9880_v22, %v2577_v46  ;;  %v12317_v46 = vld [vmem:[#allocation73_spill] sm:$0xff] }
 0x4b9   :  { %v3338_v27 = vpop.permute.xlu2 %3337  ;;  %v10603_v10 = vsel %vm3934_vm5, %v3888_v43, %v3332_v9  ;;  %v2683_v6 = vadd.f32 %v9880_v22, %v2566_v4  ;;  %v2578_v43 = vmul.f32 %v9878_v47, %v12311_v44  ;;  %v3260_v41 = vpack.c.b16 %v3222_v2, %v3222_v2 }
 0x4ba   :  { %v10598_v17 = vsel %vm3934_vm5, %v3897_v3, %v3338_v27  ;;  %v2798_v3 = vmax.f32 %v2684_v1, 0.0  ;;  %v3450_v27 = vpack.c.b16 %v10507_v24, %v3412_v23  ;;  %v3263_v1 = vpack.c.b16 %v3225_v54, %v3225_v54  ;;  %v12315_v54 = vld [vmem:[#allocation58_spill] sm:$0xff] }
 0x4bb   :  { %v2797_v4 = vmax.f32 %v2683_v6, 0.0  ;;  %v3536_v31 = vshll.u32 %v3447_v56, 16  ;;  %v2580_v44 = vmul.f32 %v9878_v47, %v12315_v54  ;;  %v2588_v5 = vmul.f32 %v9878_v47, %v12317_v46  ;;  %v12319_v46 = vld [vmem:[#allocation85_spill] sm:$0xff] }
 0x4bc   :  { %v2912_v23 = vpack.c.bf16 %v2798_v3, %v2798_v3  ;;  %v2695_v26 = vadd.f32 %v9880_v22, %v2578_v43  ;;  %v3909_v54 = vsel %vm3819_vm4, %v10374_v19, %v10514_v58  ;;  %v8096_v58 = vld [vmem:[%s11887_s4 + $0xb8] sm:$0xff] }
 0x4bd   :  { %v10651_v2 = vpack.c.bf16 %v2797_v4, %v2797_v4  ;;  %4468 = vmatpush.bf16.msra.mxu2 %v8096_v58 }
 0x4be   :  { %3113 = vrot.lane.b32.xlu0 %v3067_v42, %s8244_s1  ;;  %3747 = vrot.lane.b32.xlu1 %v3497_v60, %s8245_s22  ;;  %v3557_v42 = vshll.u32 %v3450_v27, 16  ;;  %v2706_v60 = vadd.f32 %v9880_v22, %v2589_v0  ;;  %v3035_v0 = vunpack.c.l.b16 %v2912_v23 }
 0x4bf   :  { %3753 = vrot.lane.b32.xlu2 %v3518_v39, %s8245_s22  ;;  %12318 = vst [vmem:[#allocation115_spill] sm:$0xff] %v10651_v2  ;;  %v3415_v19 = vunpack.c.l.b16 %v10651_v2 }
 0x4c0   :  { %v10621_v9 = vpop.permute.xlu0 %3149  ;;  %v3744_v53 = vpop.permute.xlu1 %3743 }
 0x4c1   :  { %v3750_v16 = vpop.permute.xlu2 %3749  ;;  %v4013_v8 = vsel %vm4011_vm6, %v10232_v7, %v3744_v53  ;;  %v12314_v7 = vld [vmem:[#allocation53_spill] sm:$0xff]  ;;  %v12316_v53 = vld [vmem:[#allocation71_spill] sm:$0xff] }
 0x4c2   :  { %v10625_v61 = vsel %vm4011_vm6, %v10322_v30, %v3750_v16  ;;  %v4256_v39 = vunpack.c.l.b16 %v4013_v8  ;;  %v3076_v30 = vpack.c.b16 %v10614_v33, %v10614_v33  ;;  %v2696_v16 = vadd.f32 %v9880_v22, %v2579_v32 }
 0x4c3   :  { %v12031_v24 = vunpack.c.l.b16 %v10625_v61  ;;  %v2575_v6 = vmul.f32 %v9878_v47, %v12314_v7  ;;  %v2587_v3 = vmul.f32 %v9878_v47, %v12316_v53  ;;  %v3559_v8 = vrot.slane %v3557_v42, 1 }
 0x4c4   :  { %v2820_v7 = vmax.f32 %v2706_v60, 0.0  ;;  %v3538_v53 = vrot.slane %v3536_v31, 1  ;;  %v2705_v60 = vadd.f32 %v9880_v22, %v2588_v5  ;;  %v8104_v31 = vld [vmem:[%s11887_s4 + $0xf8] sm:$0xff]  ;;  %v2697_v5 = vadd.f32 %v9880_v22, %v2580_v44 }
 0x4c5   :  { %v4268_v38 = vpack.c.b16 %v12031_v24, %v4256_v39  ;;  %v2808_v39 = vmax.f32 %v2694_v40, 0.0  ;;  %v3555_v40 = vshrl.u32 %v3450_v27, 16  ;;  %v3534_v24 = vshrl.u32 %v3447_v56, 16  ;;  %4600 = vmatpush.bf16.msra.mxu3 %v8104_v31 }
 0x4c6   :  { %3309 = vrot.lane.b32.xlu0 %v3260_v41, %s8243_s2  ;;  %3131 = vrot.lane.b32.xlu1 %v3076_v30, %s8244_s1  ;;  %v2810_v41 = vmax.f32 %v2696_v16, 0.0  ;;  %v2596_v30 = vmul.f32 %v9878_v47, %v12319_v46  ;;  %v3073_v16 = vpack.c.b16 %v3035_v0, %v3035_v0  ;;  %v2704_v2 = vadd.f32 %v9880_v22, %v2587_v3 }
 0x4c7   :  { %3315 = vrot.lane.b32.xlu2 %v3263_v1, %s8243_s2  ;;  %4336 = vmatmul.bf16.vlgmr.msrb.gmra.mxu3 %v4268_v38  ;;  %v2692_v1 = vadd.f32 %v9880_v22, %v2575_v6  ;;  %v12320_v38 = vld [vmem:[#allocation86_spill] sm:$0xff]  ;;  %v2809_v6 = vmax.f32 %v2695_v26, 0.0  ;;  %v3560_v46 = vor.u32 %v3559_v8, %v3555_v40  ;;  %v3539_v27 = vor.u32 %v3538_v53, %v3534_v24 }
 0x4c8   :  { %v3346_v43 = vpop.permute.xlu0 %3345  ;;  %v10661_v4 = vpop.permute.xlu1 %3159  ;;  %v2597_v23 = vmul.f32 %v9878_v47, %v12320_v38  ;;  %v2922_v38 = vpack.c.bf16 %v2808_v39, %v2808_v39  ;;  %v2924_v59 = vpack.c.bf16 %v2810_v41, %v2810_v41  ;;  %v2713_v56 = vadd.f32 %v9880_v22, %v2596_v30 }
 0x4c9   :  { %v10655_v32 = vpop.permute.xlu2 %3351  ;;  %v10668_v42 = vsel %vm3934_vm5, %v3909_v54, %v3346_v43  ;;  %v2934_v54 = vpack.c.bf16 %v2820_v7, %v2820_v7  ;;  %v2806_v43 = vmax.f32 %v2692_v1, 0.0  ;;  %v2819_v8 = vmax.f32 %v2705_v60, 0.0  ;;  %v8095_v60 = vld [vmem:[%s11887_s4 + $0xb0] sm:$0xff] }
 0x4ca   :  { %v2714_v26 = vadd.f32 %v9880_v22, %v2597_v23  ;;  %v10685_v39 = vpack.c.bf16 %v2809_v6, %v2809_v6  ;;  %v3453_v44 = vpack.c.b16 %v3035_v0, %v3415_v19  ;;  %v3228_v30 = vunpack.c.l.b16 %v2922_v38  ;;  %v12323_v6 = vld [vmem:[#allocation88_spill] sm:$0xff]  ;;  %v12324_v19 = vld [vmem:[#allocation123_spill] sm:$0xff]  ;;  %4469 = vmatpush.bf16.msra.mxu2 %v8095_v60 }
 0x4cb   :  { %v3232_v7 = vunpack.c.l.b16 %v2934_v54  ;;  %v10687_v1 = vpack.c.bf16 %v2806_v43, %v2806_v43  ;;  %v3039_v23 = vunpack.c.l.b16 %v2924_v59  ;;  %v2811_v40 = vmax.f32 %v2697_v5, 0.0 }
 0x4cc   :  { %12321 = vst [vmem:[#allocation117_spill] sm:$0xff] %v10685_v39  ;;  %v2827_v3 = vmax.f32 %v2713_v56, 0.0  ;;  %v2828_v58 = vmax.f32 %v2714_v26, 0.0  ;;  %v2598_v31 = vmul.f32 %v9878_v47, %v12323_v6  ;;  %v2933_v0 = vpack.c.bf16 %v2819_v8, %v2819_v8  ;;  %v12326_v6 = vld [vmem:[#allocation60_spill] sm:$0xff] }
 0x4cd   :  { %12322 = vst [vmem:[#allocation124_spill] sm:$0xff] %v10687_v1  ;;  %v3270_v54 = vpack.c.b16 %v3232_v7, %v3232_v7  ;;  %v3578_v43 = vshll.u32 %v3453_v44, 16  ;;  %v3419_v38 = vunpack.c.l.b16 %v10685_v39  ;;  %v3266_v59 = vpack.c.b16 %v3228_v30, %v3228_v30 }
 0x4ce   :  { %3125 = vrot.lane.b32.xlu0 %v3073_v16, %s8244_s1  ;;  %3759 = vrot.lane.b32.xlu1 %v3539_v27, %s8245_s22  ;;  %v2818_v16 = vmax.f32 %v2704_v2, 0.0  ;;  %v3077_v27 = vpack.c.b16 %v3039_v23, %v3039_v23  ;;  %v2925_v5 = vpack.c.bf16 %v2811_v40, %v2811_v40  ;;  %v3418_v56 = vunpack.c.l.b16 %v10687_v1 }
 0x4cf   :  { %3765 = vrot.lane.b32.xlu2 %v3560_v46, %s8245_s22  ;;  %v2605_v46 = vmul.f32 %v9878_v47, %v12324_v19  ;;  %v10702_v26 = vpack.c.bf16 %v2827_v3, %v2827_v3  ;;  %v3825_v2 = vsel %vm3819_vm4, %v10187_v25, %v10250_v45  ;;  %v3840_v8 = vsel %vm3819_vm4, %v10189_v14, %v10347_v12  ;;  %v12328_v19 = vld [vmem:[#allocation103_spill] sm:$0xff] }
 0x4d0   :  { %v10689_v53 = vpop.permute.xlu0 %3343  ;;  %v10691_v41 = vpop.permute.xlu1 %3763  ;;  %v2942_v7 = vpack.c.bf16 %v2828_v58, %v2828_v58  ;;  %v2614_v30 = vmul.f32 %v9878_v47, %v12326_v6  ;;  %v10713_v60 = vpack.c.bf16 %v2818_v16, %v2818_v16  ;;  %v3042_v40 = vunpack.c.l.b16 %v2933_v0  ;;  %v8103_v16 = vld [vmem:[%s11887_s4 + $0xf0] sm:$0xff] }
 0x4d1   :  { %v3762_v24 = vpop.permute.xlu2 %3761  ;;  %12325 = vst [vmem:[#allocation118_spill] sm:$0xff] %v10702_v26  ;;  %v3576_v3 = vshrl.u32 %v3453_v44, 16  ;;  %v4021_v25 = vsel %vm4011_vm6, %v10482_v51, %v10595_v50  ;;  %v3580_v12 = vrot.slane %v3578_v43, 1  ;;  %v3457_v58 = vpack.c.b16 %v3039_v23, %v3419_v38  ;;  %4601 = vmatpush.bf16.msra.mxu3 %v8103_v16  ;;  %v12330_v16 = vld [vmem:[#allocation127_spill] sm:$0xff] }
 0x4d2   :  { %12327 = vst [vmem:[#allocation122_spill] sm:$0xff] %v10713_v60  ;;  %v10722_v14 = vsel %vm4011_vm6, %v10416_v49, %v3762_v24  ;;  %v3938_v0 = vsel %vm3934_vm5, %v3825_v2, %v10248_v13  ;;  %v3229_v50 = vunpack.c.l.b16 %v2925_v5  ;;  %v3456_v49 = vpack.c.b16 %v10614_v33, %v3418_v56 }
 0x4d3   :  { %v10736_v23 = vunpack.c.l.b16 %v2942_v7  ;;  %v3425_v38 = vunpack.c.l.b16 %v10702_v26  ;;  %v12034_v13 = vunpack.c.l.b16 %v10722_v14  ;;  %v3080_v6 = vpack.c.b16 %v3042_v40, %v3042_v40 }
 0x4d4   :  { %v2715_v5 = vadd.f32 %v9880_v22, %v2598_v31  ;;  %v12329_v56 = vunpack.c.l.b16 %v10625_v61  ;;  %v3422_v31 = vunpack.c.l.b16 %v10713_v60  ;;  %v2731_v61 = vadd.f32 %v9880_v22, %v2614_v30 }
 0x4d6   :  { %3321 = vrot.lane.b32.xlu0 %v3266_v59, %s8243_s2  ;;  %3133 = vrot.lane.b32.xlu1 %v3077_v27, %s8244_s1  ;;  %v4134_v59 = vunpack.c.l.b16 %v4021_v25  ;;  %v2606_v25 = vmul.f32 %v9878_v47, %v12330_v16  ;;  %v2829_v30 = vmax.f32 %v2715_v5, 0.0 }
 0x4d7   :  { %3329 = vrot.lane.b32.xlu2 %v3270_v54, %s8243_s2  ;;  %v3948_v54 = vsel %vm3934_vm5, %v3840_v8, %v12328_v19  ;;  %v3581_v8 = vor.u32 %v3580_v12, %v3576_v3  ;;  %v3606_v19 = vshll.u32 %v3457_v58, 16  ;;  %v3267_v3 = vpack.c.b16 %v3229_v50, %v3229_v50 }
 0x4d8   :  { %v3746_v44 = vpop.permute.xlu0 %3745  ;;  %v3756_v51 = vpop.permute.xlu1 %3755  ;;  %v2722_v12 = vadd.f32 %v9880_v22, %v2605_v46  ;;  %v2723_v50 = vadd.f32 %v9880_v22, %v2606_v25  ;;  %v8102_v25 = vld [vmem:[%s11887_s4 + $0xe8] sm:$0xff] }
 0x4d9   :  { %v10724_v45 = vpop.permute.xlu2 %3165  ;;  %v4015_v24 = vsel %vm4011_vm6, %v3938_v0, %v3746_v44  ;;  %v4025_v43 = vsel %vm4011_vm6, %v3948_v54, %v3756_v51  ;;  %v3599_v44 = vshll.u32 %v3456_v49, 16  ;;  %v12331_v54 = vld [vmem:[#allocation62_spill] sm:$0xff]  ;;  %4602 = vmatpush.bf16.msra.mxu3 %v8102_v25 }
 0x4da   :  { %v4133_v27 = vunpack.c.l.b16 %v4015_v24  ;;  %v4258_v2 = vunpack.c.l.b16 %v4025_v43  ;;  %v2615_v51 = vmul.f32 %v9878_v47, %v12331_v54  ;;  %v3463_v24 = vpack.c.b16 %v10736_v23, %v3425_v38 }
 0x4db   :  { %v3601_v46 = vrot.slane %v3599_v44, 1  ;;  %v3460_v38 = vpack.c.b16 %v3042_v40, %v3422_v31  ;;  %v2836_v16 = vmax.f32 %v2722_v12, 0.0  ;;  %v2845_v54 = vmax.f32 %v2731_v61, 0.0  ;;  %v12333_v40 = vld [vmem:[#allocation64_spill] sm:$0xff]  ;;  %v12334_v31 = vld [vmem:[#allocation107_spill] sm:$0xff]  ;;  %v12335_v12 = vld [vmem:[#allocation101_spill] sm:$0xff] }
 0x4dc   :  { %v4145_v33 = vpack.c.b16 %v4134_v59, %v4133_v27  ;;  %v10743_v0 = vpack.c.b16 %v4258_v2, %v12329_v56  ;;  %v4269_v7 = vpack.c.b16 %v12034_v13, %v4258_v2  ;;  %v3608_v59 = vrot.slane %v3606_v19, 1  ;;  %v12332_v56 = vld [vmem:[#allocation97_spill] sm:$0xff]  ;;  %v8094_v19 = vld [vmem:[%s11887_s4 + $0xa8] sm:$0xff] }
 0x4dd   :  { %v2732_v27 = vadd.f32 %v9880_v22, %v2615_v51  ;;  %4470 = vmatpush.bf16.msra.mxu2 %v8094_v19  ;;  %v3843_v61 = vsel %vm3819_vm4, %v12335_v12, %v12334_v31  ;;  %v3646_v31 = vshrl.u32 %v3463_v24, 16 }
 0x4de   :  { %3139 = vrot.lane.b32.xlu0 %v3080_v6, %s8244_s1  ;;  %4213 = vmatmul.bf16.vlgmr.msrb.gmra.mxu2 %v4145_v33  ;;  %v2607_v6 = vmul.f32 %v9878_v47, %v12332_v56  ;;  %v3604_v33 = vshrl.u32 %v3457_v58, 16  ;;  %v2943_v56 = vpack.c.bf16 %v2829_v30, %v2829_v30  ;;  %v2837_v58 = vmax.f32 %v2723_v50, 0.0 }
 0x4df   :  { %3771 = vrot.lane.b32.xlu2 %v3581_v8, %s8245_s22  ;;  %3323 = vrot.lane.b32.xlu1 %v3267_v3, %s8243_s2  ;;  %v3648_v3 = vshll.u32 %v3463_v24, 16  ;;  %v2846_v44 = vmax.f32 %v2732_v27, 0.0  ;;  %v10785_v50 = vpack.c.bf16 %v2845_v54, %v2845_v54  ;;  %v12340_v54 = vld [vmem:[#allocation102_spill] sm:$0xff] }
 0x4e0   :  { %4341 = vmatmul.bf16.gmra.mxu3 %v4269_v7  ;;  %v10760_v2 = vpop.permute.xlu0 %3161  ;;  %v10762_v8 = vpop.permute.xlu1 %3775  ;;  %v3597_v7 = vshrl.u32 %v3456_v49, 16  ;;  %v3609_v51 = vor.u32 %v3608_v59, %v3604_v33  ;;  %v2724_v5 = vadd.f32 %v9880_v22, %v2607_v6  ;;  %v2616_v49 = vmul.f32 %v9878_v47, %v12333_v40  ;;  %v12336_v6 = vld [vmem:[#allocation78_spill] sm:$0xff] }
 0x4e1   :  { %v3774_v43 = vpop.permute.xlu2 %3773  ;;  %v3083_v59 = vpack.c.b16 %v10736_v23, %v10736_v23  ;;  %v3627_v33 = vshll.u32 %v3460_v38, 16  ;;  %v2624_v27 = vmul.f32 %v9878_v47, %v12336_v6  ;;  %12338 = vst [vmem:[#allocation7_spill] sm:$0xff] %v10785_v50  ;;  %v3650_v30 = vrot.slane %v3648_v3, 1 }
 0x4e2   :  { %v3602_v13 = vor.u32 %v3601_v46, %v3597_v7  ;;  %v10783_v46 = vpack.c.bf16 %v2836_v16, %v2836_v16  ;;  %v4033_v7 = vsel %vm4011_vm6, %v10389_v62, %v10691_v41  ;;  %v10793_v19 = vsel %vm4011_vm6, %v10521_v48, %v3774_v43 }
 0x4e3   :  { %12339 = vst [vmem:[#allocation6_spill] sm:$0xff] %v10793_v19  ;;  %v2838_v25 = vmax.f32 %v2724_v5, 0.0  ;;  %v2960_v16 = vpack.c.bf16 %v2846_v44, %v2846_v44  ;;  %v3950_v40 = vsel %vm3934_vm5, %v3843_v61, %v12340_v54  ;;  %v3235_v3 = vunpack.c.l.b16 %v2943_v56  ;;  %v8093_v56 = vld [vmem:[%s11887_s4 + $0xa0] sm:$0xff] }
 0x4e4   :  { %12337 = vst [vmem:[#allocation125_spill] sm:$0xff] %v10783_v46  ;;  %v2951_v12 = vpack.c.bf16 %v2837_v58, %v2837_v58  ;;  %v3625_v41 = vshrl.u32 %v3460_v38, 16  ;;  %v3629_v43 = vrot.slane %v3627_v33, 1  ;;  %v12035_v5 = vunpack.c.l.b16 %v10793_v19  ;;  %4471 = vmatpush.bf16.msra.mxu2 %v8093_v56 }
 0x4e5   :  { %v3651_v24 = vor.u32 %v3650_v30, %v3646_v31  ;;  %v2952_v58 = vpack.c.bf16 %v2838_v25, %v2838_v25  ;;  %v3051_v61 = vunpack.c.l.b16 %v2960_v16  ;;  %v3273_v54 = vpack.c.b16 %v3235_v3, %v3235_v3 }
 0x4e6   :  { %3777 = vrot.lane.b32.xlu0 %v3602_v13, %s8245_s22  ;;  %v2733_v33 = vadd.f32 %v9880_v22, %v2616_v49  ;;  %v3630_v30 = vor.u32 %v3629_v43, %v3625_v41  ;;  %v3048_v25 = vunpack.c.l.b16 %v2951_v12  ;;  %v3428_v16 = vunpack.c.l.b16 %v10783_v46  ;;  %v8101_v12 = vld [vmem:[%s11887_s4 + $0xe0] sm:$0xff] }
 0x4e7   :  { %3779 = vrot.lane.b32.xlu2 %v3609_v51, %s8245_s22  ;;  %3145 = vrot.lane.b32.xlu1 %v3083_v59, %s8244_s1  ;;  %v4136_v59 = vunpack.c.l.b16 %v4033_v7  ;;  %v12341_v7 = vld [vmem:[#allocation106_spill] sm:$0xff]  ;;  %v3238_v31 = vunpack.c.l.b16 %v2952_v58 }
 0x4e8   :  { %v3758_v51 = vpop.permute.xlu0 %3757  ;;  %v3768_v13 = vpop.permute.xlu1 %3767  ;;  %v3466_v56 = vpack.c.b16 %v3048_v25, %v3428_v16  ;;  %4603 = vmatpush.bf16.msra.mxu3 %v8101_v12  ;;  %v12346_v12 = vld [vmem:[#allocation109_spill] sm:$0xff]  ;;  %v12349_v46 = vld [vmem:[#allocation94_spill] sm:$0xff] }
 0x4e9   :  { %v10796_v23 = vpop.permute.xlu2 %3349  ;;  %v4027_v62 = vsel %vm4011_vm6, %v3950_v40, %v3758_v51  ;;  %v10803_v48 = vsel %vm4011_vm6, %v10422_v15, %v3768_v13  ;;  %v3431_v51 = vunpack.c.l.b16 %v10785_v50  ;;  %v2623_v40 = vmul.f32 %v9878_v47, %v12341_v7  ;;  %v12347_v50 = vld [vmem:[#allocation104_spill] sm:$0xff] }
 0x4ea   :  { %v4135_v44 = vunpack.c.l.b16 %v4027_v62  ;;  %v12036_v6 = vunpack.c.l.b16 %v10803_v48  ;;  %v2741_v13 = vadd.f32 %v9880_v22, %v2624_v27  ;;  %v2847_v27 = vmax.f32 %v2733_v33, 0.0 }
 0x4eb   :  { %v2740_v3 = vadd.f32 %v9880_v22, %v2623_v40  ;;  %v3469_v62 = vpack.c.b16 %v3051_v61, %v3431_v51  ;;  %v3276_v7 = vpack.c.b16 %v3238_v31, %v3238_v31  ;;  %v12348_v31 = vld [vmem:[#allocation90_spill] sm:$0xff]  ;;  %v3667_v1 = vshrl.u32 %v3466_v56, 16 }
 0x4ec   :  { %v4146_v15 = vpack.c.b16 %v4136_v59, %v4135_v44  ;;  %v4270_v38 = vpack.c.b16 %v12035_v5, %v12036_v6  ;;  %v12342_v59 = vld [vmem:[#allocation110_spill] sm:$0xff]  ;;  %v2855_v51 = vmax.f32 %v2741_v13, 0.0  ;;  %v2961_v16 = vpack.c.bf16 %v2847_v27, %v2847_v27 }
 0x4ed   :  { %v2625_v44 = vmul.f32 %v9878_v47, %v12342_v59  ;;  %v3690_v40 = vshll.u32 %v3469_v62, 16  ;;  %v12345_v5 = vld [vmem:[#allocation126_spill] sm:$0xff]  ;;  %v3086_v59 = vpack.c.b16 %v3048_v25, %v3048_v25  ;;  %v3669_v13 = vshll.u32 %v3466_v56, 16 }
 0x4ee   :  { %3335 = vrot.lane.b32.xlu0 %v3273_v54, %s8243_s2  ;;  %4218 = vmatmul.bf16.gmra.mxu2 %v4146_v15  ;;  %v12344_v15 = vld [vmem:[#allocation98_spill] sm:$0xff]  ;;  %v2636_v33 = vmul.f32 %v9878_v47, %v12345_v5  ;;  %v2634_v5 = vmul.f32 %v9878_v47, %v12349_v46  ;;  %v2969_v25 = vpack.c.bf16 %v2855_v51, %v2855_v51  ;;  %v3688_v60 = vshrl.u32 %v3469_v62, 16 }
 0x4ef   :  { %3791 = vrot.lane.b32.xlu2 %v3651_v24, %s8245_s22  ;;  %3785 = vrot.lane.b32.xlu1 %v3630_v30, %s8245_s22  ;;  %v12343_v24 = vld [vmem:[#allocation92_spill] sm:$0xff]  ;;  %v2635_v58 = vmul.f32 %v9878_v47, %v12344_v15  ;;  %v2742_v30 = vadd.f32 %v9880_v22, %v2625_v44  ;;  %v3089_v15 = vpack.c.b16 %v3051_v61, %v3051_v61  ;;  %v3671_v19 = vrot.slane %v3669_v13, 1 }
 0x4f0   :  { %4346 = vmatmul.bf16.gmra.mxu3 %v4270_v38  ;;  %v10829_v41 = vpop.permute.xlu0 %3357  ;;  %v10831_v43 = vpop.permute.xlu1 %3107  ;;  %v2633_v54 = vmul.f32 %v9878_v47, %v12343_v24  ;;  %v2854_v38 = vmax.f32 %v2740_v3, 0.0  ;;  %v3861_v24 = vsel %vm3819_vm4, %v12347_v50, %v12346_v12  ;;  %v2632_v44 = vmul.f32 %v9878_v47, %v12348_v31 }
 0x4f1   :  { %v10824_v49 = vpop.permute.xlu2 %3787  ;;  %v2752_v6 = vadd.f32 %v9880_v22, %v2635_v58  ;;  %v2753_v58 = vadd.f32 %v9880_v22, %v2636_v33  ;;  %v4045_v50 = vsel %vm4011_vm6, %v10489_v36, %v10762_v8  ;;  %v12350_v33 = vld [vmem:[#allocation120_spill] sm:$0xff]  ;;  %v3054_v39 = vunpack.c.l.b16 %v2969_v25 }
 0x4f2   :  { %v2750_v3 = vadd.f32 %v9880_v22, %v2633_v54  ;;  %v10854_v27 = vpack.c.bf16 %v2854_v38, %v2854_v38  ;;  %v3692_v54 = vrot.slane %v3690_v40, 1  ;;  %v2749_v12 = vadd.f32 %v9880_v22, %v2632_v44  ;;  %v8092_v40 = vld [vmem:[%s11887_s4 + $0x98] sm:$0xff] }
 0x4f3   :  { %v2866_v46 = vmax.f32 %v2752_v6, 0.0  ;;  %v3241_v38 = vunpack.c.l.b16 %v2961_v16  ;;  %v4138_v8 = vunpack.c.l.b16 %v4045_v50  ;;  %v8100_v6 = vld [vmem:[%s11887_s4 + $0xd8] sm:$0xff]  ;;  %v2867_v44 = vmax.f32 %v2753_v58, 0.0  ;;  %4472 = vmatpush.bf16.msra.mxu2 %v8092_v40 }
 0x4f4   :  { %v2864_v36 = vmax.f32 %v2750_v3, 0.0  ;;  %v3434_v16 = vunpack.c.l.b16 %v10854_v27  ;;  %v2863_v62 = vmax.f32 %v2749_v12, 0.0  ;;  %4604 = vmatpush.bf16.msra.mxu3 %v8100_v6  ;;  %v3672_v56 = vor.u32 %v3671_v19, %v3667_v1 }
 0x4f5   :  { %v3279_v13 = vpack.c.b16 %v3241_v38, %v3241_v38  ;;  %v10875_v50 = vpack.c.bf16 %v2866_v46, %v2866_v46 }
 0x4f6   :  { %3151 = vrot.lane.b32.xlu0 %v3086_v59, %s8244_s1  ;;  %v3962_v59 = vsel %vm3934_vm5, %v3861_v24, %v12350_v33  ;;  %v2978_v25 = vpack.c.bf16 %v2864_v36, %v2864_v36  ;;  %v10884_v12 = vpack.c.bf16 %v2863_v62, %v2863_v62  ;;  %v3092_v36 = vpack.c.b16 %v3054_v39, %v3054_v39 }
 0x4f7   :  { %3341 = vrot.lane.b32.xlu2 %v3276_v7, %s8243_s2  ;;  %3157 = vrot.lane.b32.xlu1 %v3089_v15, %s8244_s1  ;;  %v2856_v7 = vmax.f32 %v2742_v30, 0.0  ;;  %v3693_v30 = vor.u32 %v3692_v54, %v3688_v60  ;;  %v10881_v60 = vsel %vm4011_vm6, %v10603_v10, %v10824_v49  ;;  %v3472_v54 = vpack.c.b16 %v3054_v39, %v3434_v16 }
 0x4f8   :  { %v3770_v31 = vpop.permute.xlu0 %3769  ;;  %v3790_v51 = vpop.permute.xlu1 %3789  ;;  %v3057_v33 = vunpack.c.l.b16 %v2978_v25  ;;  %v4263_v49 = vunpack.c.l.b16 %v10881_v60  ;;  %v3438_v6 = vunpack.c.l.b16 %v10875_v50  ;;  %v3437_v16 = vunpack.c.l.b16 %v10884_v12 }
 0x4f9   :  { %v10860_v61 = vpop.permute.xlu2 %3291  ;;  %v4039_v26 = vsel %vm4011_vm6, %v3962_v59, %v3770_v31  ;;  %v2970_v24 = vpack.c.bf16 %v2856_v7, %v2856_v7  ;;  %v2981_v7 = vpack.c.bf16 %v2867_v44, %v2867_v44  ;;  %v12351_v59 = vld [vmem:[#allocation100_spill] sm:$0xff]  ;;  %v12352_v44 = vld [vmem:[#allocation121_spill] sm:$0xff] }
 0x4fa   :  { %v4137_v15 = vunpack.c.l.b16 %v4039_v26  ;;  %v2751_v26 = vadd.f32 %v9880_v22, %v2634_v5  ;;  %v2637_v10 = vmul.f32 %v9878_v47, %v12351_v59  ;;  %v3882_v62 = vsel %vm3819_vm4, %v12352_v44, %v10542_v20 }
 0x4fb   :  { %v3244_v5 = vunpack.c.l.b16 %v2970_v24  ;;  %v3058_v40 = vunpack.c.l.b16 %v2981_v7 }
 0x4fc   :  { %v4147_v3 = vpack.c.b16 %v4138_v8, %v4137_v15  ;;  %v2865_v46 = vmax.f32 %v2751_v26, 0.0  ;;  %v3711_v15 = vshll.u32 %v3472_v54, 16  ;;  %v2754_v39 = vadd.f32 %v9880_v22, %v2637_v10 }
 0x4fd   :  { %v3282_v8 = vpack.c.b16 %v3244_v5, %v3244_v5  ;;  %v4059_v26 = vsel %vm4011_vm6, %v10579_v21, %v3790_v51  ;;  %v3476_v20 = vpack.c.b16 %v3058_v40, %v3438_v6  ;;  %v12353_v5 = vld [vmem:[#allocation108_spill] sm:$0xff]  ;;  %v3709_v51 = vshrl.u32 %v3472_v54, 16 }
 0x4fe   :  { %3347 = vrot.lane.b32.xlu0 %v3279_v13, %s8243_s2  ;;  %4223 = vmatmul.bf16.gmra.mxu2 %v4147_v3  ;;  %v2979_v24 = vpack.c.bf16 %v2865_v46, %v2865_v46  ;;  %v3918_v13 = vsel %vm3819_vm4, %v10501_v52, %v10760_v2  ;;  %v3095_v3 = vpack.c.b16 %v3057_v33, %v3057_v33  ;;  %v4140_v59 = vunpack.c.l.b16 %v4059_v26 }
 0x4ff   :  { %3803 = vrot.lane.b32.xlu2 %v3693_v30, %s8245_s22  ;;  %3797 = vrot.lane.b32.xlu1 %v3672_v56, %s8245_s22  ;;  %v8091_v30 = vld [vmem:[%s11887_s4 + $0x90] sm:$0xff]  ;;  %v3713_v56 = vrot.slane %v3711_v15, 1  ;;  %v3976_v52 = vsel %vm3934_vm5, %v3882_v62, %v12353_v5  ;;  %v10921_v46 = vsel %vm3934_vm5, %v3918_v13, %v10655_v32 }
 0x500   :  { %v10886_v1 = vpop.permute.xlu0 %3355  ;;  %v3782_v19 = vpop.permute.xlu1 %3781  ;;  %4473 = vmatpush.bf16.msra.mxu2 %v8091_v30  ;;  %v3247_v7 = vunpack.c.l.b16 %v2979_v24  ;;  %v3906_v30 = vsel %vm3819_vm4, %v10438_v57, %v10566_v11 }
 0x501   :  { %v3800_v58 = vpop.permute.xlu2 %3799  ;;  %v4051_v31 = vsel %vm4011_vm6, %v10517_v55, %v3782_v19  ;;  %v8099_v55 = vld [vmem:[%s11887_s4 + $0xd0] sm:$0xff]  ;;  %v3475_v19 = vpack.c.b16 %v3057_v33, %v3437_v16  ;;  %v3096_v33 = vpack.c.b16 %v3058_v40, %v3058_v40 }
 0x502   :  { %v4262_v38 = vunpack.c.l.b16 %v4051_v31  ;;  %4605 = vmatpush.bf16.msra.mxu3 %v8099_v55  ;;  %v2868_v31 = vmax.f32 %v2754_v39, 0.0  ;;  %v3992_v55 = vsel %vm3934_vm5, %v3906_v30, %v10689_v53  ;;  %v3737_v39 = vshrl.u32 %v3476_v20, 16 }
 0x503   :  { %v3732_v6 = vshll.u32 %v3475_v19, 16  ;;  %v10932_v54 = vsel %vm4011_vm6, %v3992_v55, %v3800_v58  ;;  %v3730_v58 = vshrl.u32 %v3475_v19, 16 }
 0x504   :  { %v4271_v47 = vpack.c.b16 %v4263_v49, %v4262_v38  ;;  %v3714_v38 = vor.u32 %v3713_v56, %v3709_v51  ;;  %v2982_v32 = vpack.c.bf16 %v2868_v31, %v2868_v31  ;;  %v4265_v44 = vunpack.c.l.b16 %v10932_v54  ;;  %v8090_v56 = vld [vmem:[%s11887_s4 + $0x88] sm:$0xff]  ;;  %v8089_v31 = vld [vmem:[%s11887_s4 + $0x80] sm:$0xff] }
 0x505   :  { %v3734_v57 = vrot.slane %v3732_v6, 1  ;;  %4474 = vmatpush.bf16.msra.mxu2 %v8090_v56  ;;  %v3915_v6 = vsel %vm3819_vm4, %v10499_v35, %v10661_v4 }
 0x506   :  { %3163 = vrot.lane.b32.xlu0 %v3092_v36, %s8244_s1  ;;  %4351 = vmatmul.bf16.gmra.mxu3 %v4271_v47  ;;  %v3739_v36 = vshll.u32 %v3476_v20, 16  ;;  %v3248_v53 = vunpack.c.l.b16 %v2982_v32  ;;  %v3900_v20 = vsel %vm3819_vm4, %v10436_v29, %v10621_v9 }
 0x507   :  { %3353 = vrot.lane.b32.xlu2 %v3282_v8, %s8243_s2  ;;  %3169 = vrot.lane.b32.xlu1 %v3095_v3, %s8244_s1  ;;  %v3285_v8 = vpack.c.b16 %v3247_v7, %v3247_v7  ;;  %v3735_v3 = vor.u32 %v3734_v57, %v3730_v58  ;;  %v3988_v7 = vsel %vm3934_vm5, %v3900_v20, %v10537_v34  ;;  %v12354_v57 = vld [vmem:[#allocation112_spill] sm:$0xff] }
 0x508   :  { %v3784_v25 = vpop.permute.xlu0 %3783  ;;  %v3802_v2 = vpop.permute.xlu1 %3801  ;;  %v3741_v47 = vrot.slane %v3739_v36, 1 }
 0x509   :  { %v10915_v22 = vpop.permute.xlu2 %3303  ;;  %v4053_v21 = vsel %vm4011_vm6, %v3976_v52, %v3784_v25  ;;  %v3286_v25 = vpack.c.b16 %v3248_v53, %v3248_v53  ;;  %v4071_v5 = vsel %vm4011_vm6, %v10668_v42, %v3802_v2  ;;  %v8097_v42 = vld [vmem:[%s11887_s4 + $0xc0] sm:$0xff]  ;;  %4475 = vmatpush.bf16.msra.mxu2 %v8089_v31 }
 0x50a   :  { %v4139_v10 = vunpack.c.l.b16 %v4053_v21  ;;  %v3742_v13 = vor.u32 %v3741_v47, %v3737_v39  ;;  %v4142_v9 = vunpack.c.l.b16 %v4071_v5  ;;  %v12355_v39 = vld [vmem:[#allocation111_spill] sm:$0xff] }
 0x50b   :  { %v3837_v53 = vsel %vm3819_vm4, %v12355_v39, %v10831_v43 }
 0x50c   :  { %v4148_v15 = vpack.c.b16 %v4140_v59, %v4139_v10  ;;  %v3927_v10 = vsel %vm3819_vm4, %v10469_v63, %v10572_v28  ;;  %v3998_v28 = vsel %vm3934_vm5, %v3915_v6, %v10796_v23  ;;  %v12359_v6 = vld [vmem:[#allocation115_spill] sm:$0xff] }
 0x50e   :  { %3359 = vrot.lane.b32.xlu0 %v3285_v8, %s8243_s2  ;;  %4228 = vmatmul.bf16.gmra.mxu2 %v4148_v15  ;;  %v4006_v8 = vsel %vm3934_vm5, %v3927_v10, %v10829_v41 }
 0x50f   :  { %3809 = vrot.lane.b32.xlu2 %v3714_v38, %s8245_s22  ;;  %3171 = vrot.lane.b32.xlu1 %v3096_v33, %s8244_s1  ;;  %v3924_v38 = vsel %vm3819_vm4, %v10503_v18, %v10724_v45 }
 0x510   :  { %v10935_v24 = vpop.permute.xlu0 %3101  ;;  %v3794_v16 = vpop.permute.xlu1 %3793  ;;  %v4004_v15 = vsel %vm3934_vm5, %v3924_v38, %v10886_v1  ;;  %v12358_v38 = vunpack.c.l.b16 %v10803_v48  ;;  %v12361_v48 = vld [vmem:[#allocation124_spill] sm:$0xff] }
 0x511   :  { %v3812_v11 = vpop.permute.xlu2 %3811  ;;  %v10939_v40 = vsel %vm4011_vm6, %v10598_v17, %v3794_v16  ;;  %v8098_v17 = vld [vmem:[%s11887_s4 + $0xc8] sm:$0xff] }
 0x512   :  { %v4264_v62 = vunpack.c.l.b16 %v10939_v40  ;;  %4606 = vmatpush.bf16.msra.mxu3 %v8098_v17  ;;  %v10984_v30 = vsel %vm4011_vm6, %v4004_v15, %v3812_v11  ;;  %v3828_v11 = vsel %vm3819_vm4, %v12354_v57, %v10935_v24 }
 0x513   :  { %v4267_v1 = vunpack.c.l.b16 %v10984_v30 }
 0x514   :  { %v4272_v26 = vpack.c.b16 %v4265_v44, %v4264_v62 }
 0x516   :  { %3815 = vrot.lane.b32.xlu0 %v3735_v3, %s8245_s22  ;;  %4356 = vmatmul.bf16.gmra.mxu3 %v4272_v26 }
 0x517   :  { %3817 = vrot.lane.b32.xlu2 %v3742_v13, %s8245_s22  ;;  %3361 = vrot.lane.b32.xlu1 %v3286_v25, %s8243_s2  ;;  %v3940_v13 = vsel %vm3934_vm5, %v3828_v11, %v10860_v61 }
 0x518   :  { %v3796_v52 = vpop.permute.xlu0 %3795  ;;  %v3120_v19 = vpop.permute.xlu1 %3119  ;;  %4607 = vmatpush.bf16.msra.mxu3 %v8097_v42 }
 0x519   :  { %v4065_v29 = vsel %vm4011_vm6, %v3988_v7, %v3796_v52  ;;  %v3754_v51 = vpop.permute.xlu2 %3753 }
 0x51a   :  { %v4141_v21 = vunpack.c.l.b16 %v4065_v29  ;;  %v12356_v29 = vld [vmem:[#allocation114_spill] sm:$0xff] }
 0x51b   :  { %v3855_v61 = vsel %vm3819_vm4, %v12356_v29, %v3120_v19 }
 0x51c   :  { %v4149_v2 = vpack.c.b16 %v4142_v9, %v4141_v21 }
 0x51e   :  { %4233 = vmatmul.bf16.gmra.mxu2 %v4149_v2 }
 0x520   :  { %v3298_v34 = vpop.permute.xlu0 %3297  ;;  %v3814_v59 = vpop.permute.xlu1 %3813 }
 0x521   :  { %v3316_v36 = vpop.permute.xlu2 %3315  ;;  %v4083_v63 = vsel %vm4011_vm6, %v4006_v8, %v3814_v59  ;;  %v3946_v58 = vsel %vm3934_vm5, %v3837_v53, %v3298_v34 }
 0x522   :  { %v4144_v32 = vunpack.c.l.b16 %v4083_v63  ;;  %v4023_v26 = vsel %vm4011_vm6, %v3946_v58, %v3754_v51  ;;  %v12360_v63 = vld [vmem:[#allocation117_spill] sm:$0xff] }
 0x523   :  { %v4397_v25 = vunpack.c.l.b16 %v4023_v26 }
 0x528   :  { %v3808_v18 = vpop.permute.xlu0 %3807  ;;  %v3806_v45 = vpop.permute.xlu1 %3805 }
 0x529   :  { %v4077_v41 = vsel %vm4011_vm6, %v10921_v46, %v3808_v18  ;;  %v10992_v33 = vsel %vm4011_vm6, %v3998_v28, %v3806_v45  ;;  %v3766_v47 = vpop.permute.xlu2 %3765 }
 0x52a   :  { %v4143_v35 = vunpack.c.l.b16 %v4077_v41  ;;  %v4266_v4 = vunpack.c.l.b16 %v10992_v33 }
 0x52c   :  { %v4150_v55 = vpack.c.b16 %v4144_v32, %v4143_v35  ;;  %v4273_v23 = vpack.c.b16 %v4267_v1, %v4266_v4 }
 0x52e   :  { %4238 = vmatmul.bf16.gmra.mxu2 %v4150_v55  ;;  %4361 = vmatmul.bf16.gmra.mxu3 %v4273_v23 }
 0x530   :  { %v3114_v16 = vpop.permute.xlu0 %3113  ;;  %v3748_v46 = vpop.permute.xlu1 %3747 }
 0x531   :  { %v4017_v3 = vsel %vm4011_vm6, %v3940_v13, %v3748_v46  ;;  %v3330_v5 = vpop.permute.xlu2 %3329  ;;  %v3846_v7 = vsel %vm3819_vm4, %v10584_v37, %v3114_v16  ;;  %v12357_v37 = vunpack.c.l.b16 %v10722_v14  ;;  %v12362_v13 = vld [vmem:[#allocation6_spill] sm:$0xff] }
 0x532   :  { %v4396_v56 = vunpack.c.l.b16 %v4017_v3  ;;  %v3952_v51 = vsel %vm3934_vm5, %v3846_v7, %v10915_v22  ;;  %v12363_v3 = vunpack.c.l.b16 %v12362_v13 }
 0x533   :  { %v4541_v19 = vpack.c.b16 %v12358_v38, %v12357_v37  ;;  %v4543_v38 = vpack.c.b16 %v4264_v62, %v4263_v49 }
 0x534   :  { %v4408_v52 = vpack.c.b16 %v4397_v25, %v4396_v56  ;;  %v12365_v25 = vld [vmem:[#allocation118_spill] sm:$0xff] }
 0x538   :  { %v3310_v17 = vpop.permute.xlu0 %3309  ;;  %v3132_v20 = vpop.permute.xlu1 %3131 }
 0x539   :  { %v3958_v9 = vsel %vm3934_vm5, %v3855_v61, %v3310_v17  ;;  %v3772_v21 = vpop.permute.xlu2 %3771  ;;  %v3873_v35 = vsel %vm3819_vm4, %v12361_v48, %v3132_v20  ;;  %v12364_v17 = vld [vmem:[#allocation122_spill] sm:$0xff] }
 0x53a   :  { %v4035_v42 = vsel %vm4011_vm6, %v3958_v9, %v3766_v47 }
 0x53b   :  { %v4399_v59 = vunpack.c.l.b16 %v4035_v42 }
 0x53e   :  { %4476 = vmatmul.bf16.vlgmr.msra.gmra.mxu2 %v4408_v52  ;;  %4608 = vmatmul.bf16.vlgmr.msra.gmra.mxu3 %v10743_v0 }
 0x540   :  { %v3126_v24 = vpop.permute.xlu0 %3125  ;;  %v3760_v43 = vpop.permute.xlu1 %3759 }
 0x541   :  { %v4029_v31 = vsel %vm4011_vm6, %v3952_v51, %v3760_v43  ;;  %v3780_v8 = vpop.permute.xlu2 %3779  ;;  %v3864_v22 = vsel %vm3819_vm4, %v12359_v6, %v3126_v24  ;;  %v12367_v6 = vld [vmem:[#allocation7_spill] sm:$0xff] }
 0x542   :  { %v4398_v2 = vunpack.c.l.b16 %v4029_v31  ;;  %v3964_v32 = vsel %vm3934_vm5, %v3864_v22, %v3316_v36 }
 0x543   :  { %v4041_v55 = vsel %vm4011_vm6, %v3964_v32, %v3772_v21 }
 0x544   :  { %v4409_v10 = vpack.c.b16 %v4399_v59, %v4398_v2  ;;  %v4400_v53 = vunpack.c.l.b16 %v4041_v55 }
 0x548   :  { %v3322_v0 = vpop.permute.xlu0 %3321  ;;  %v3134_v34 = vpop.permute.xlu1 %3133 }
 0x549   :  { %v3876_v28 = vsel %vm3819_vm4, %v12360_v63, %v3134_v34  ;;  %v3970_v23 = vsel %vm3934_vm5, %v3873_v35, %v3322_v0  ;;  %v3792_v47 = vpop.permute.xlu2 %3791 }
 0x54a   :  { %v4337_v45 = vpop.f32.mrf.mxu3 }
 0x54e   :  { %4481 = vmatmul.bf16.gmra.mxu2 %v4409_v10  ;;  %4613 = vmatmul.bf16.gmra.mxu3 %v4541_v19 }
 0x550   :  { %v3140_v15 = vpop.permute.xlu0 %3139 }
 0x551   :  { %v3324_v18 = vpop.permute.xlu1 %3323  ;;  %v3885_v20 = vsel %vm3819_vm4, %v12364_v17, %v3140_v15  ;;  %v3342_v7 = vpop.permute.xlu2 %3341 }
 0x552   :  { %v3972_v41 = vsel %vm3934_vm5, %v3876_v28, %v3324_v18  ;;  %v11037_v58 = vpop.f32.mrf.mxu3  ;;  %v3978_v9 = vsel %vm3934_vm5, %v3885_v20, %v3330_v5 }
 0x553   :  { %v4049_v14 = vsel %vm4011_vm6, %v3972_v41, %v3780_v8  ;;  %v12366_v8 = vld [vmem:[#allocation125_spill] sm:$0xff] }
 0x554   :  { %v4538_v16 = vunpack.c.l.b16 %v4049_v14 }
 0x556   :  { %v4542_v26 = vpack.c.b16 %v4538_v16, %v12363_v3 }
 0x558   :  { %v3778_v46 = vpop.permute.xlu0 %3777 }
 0x559   :  { %v4047_v57 = vsel %vm4011_vm6, %v3970_v23, %v3778_v46  ;;  %v3146_v11 = vpop.permute.xlu1 %3145  ;;  %v3804_v10 = vpop.permute.xlu2 %3803 }
 0x55a   :  { %v4401_v39 = vunpack.c.l.b16 %v4047_v57  ;;  %v3894_v52 = vsel %vm3819_vm4, %v12365_v25, %v3146_v11 }
 0x55c   :  { %v4410_v36 = vpack.c.b16 %v4401_v39, %v4400_v53 }
 0x55e   :  { %4486 = vmatmul.bf16.gmra.mxu2 %v4410_v36  ;;  %4618 = vmatmul.bf16.gmra.mxu3 %v4542_v26 }
 0x560   :  { %v3336_v56 = vpop.permute.xlu0 %3335 }
 0x561   :  { %v3786_v24 = vpop.permute.xlu1 %3785  ;;  %v4214_v43 = vpop.f32.mrf.mxu2  ;;  %v3984_v29 = vsel %vm3934_vm5, %v3894_v52, %v3336_v56 }
 0x562   :  { %v11046_v61 = vadd.f32 %v4337_v45, %v4214_v43  ;;  %v4061_v51 = vsel %vm4011_vm6, %v3984_v29, %v3792_v47  ;;  %v4055_v31 = vsel %vm4011_vm6, %v3978_v9, %v3786_v24  ;;  %v3354_v62 = vpop.permute.xlu2 %3353  ;;  %v4544_v47 = vpack.c.b16 %v4266_v4, %v4265_v44 }
 0x563   :  { %v4342_v21 = vpop.f32.mrf.mxu3  ;;  %v4403_v42 = vunpack.c.l.b16 %v4061_v51  ;;  %v4402_v2 = vunpack.c.l.b16 %v4055_v31 }
 0x565   :  { %v4411_v37 = vpack.c.b16 %v4403_v42, %v4402_v2 }
 0x568   :  { %v3152_v0 = vpop.permute.xlu0 %3151 }
 0x569   :  { %v3158_v34 = vpop.permute.xlu1 %3157  ;;  %v11051_v59 = vpop.f32.mrf.mxu2  ;;  %v3903_v15 = vsel %vm3819_vm4, %v12366_v8, %v3152_v0 }
 0x56a   :  { %v3912_v22 = vsel %vm3819_vm4, %v12367_v6, %v3158_v34  ;;  %v3990_v60 = vsel %vm3934_vm5, %v3903_v15, %v3342_v7  ;;  %v3810_v16 = vpop.permute.xlu2 %3809 }
 0x56b   :  { %v11057_v19 = vpop.f32.mrf.mxu3 }
 0x56e   :  { %4491 = vmatmul.bf16.gmra.mxu2 %v4411_v37  ;;  %4623 = vmatmul.bf16.gmra.mxu3 %v4543_v38 }
 0x570   :  { %v3348_v5 = vpop.permute.xlu0 %3347 }
 0x571   :  { %v3798_v63 = vpop.permute.xlu1 %3797  ;;  %v4219_v28 = vpop.f32.mrf.mxu2  ;;  %v3996_v18 = vsel %vm3934_vm5, %v3912_v22, %v3348_v5 }
 0x572   :  { %v11064_v45 = vadd.f32 %v4342_v21, %v4219_v28  ;;  %v4073_v49 = vsel %vm4011_vm6, %v3996_v18, %v3804_v10  ;;  %v4067_v40 = vsel %vm4011_vm6, %v3990_v60, %v3798_v63  ;;  %v3818_v17 = vpop.permute.xlu2 %3817 }
 0x573   :  { %v4405_v41 = vunpack.c.l.b16 %v4073_v49  ;;  %v4404_v32 = vunpack.c.l.b16 %v4067_v40  ;;  %v4347_v14 = vpop.f32.mrf.mxu3 }
 0x575   :  { %v4412_v23 = vpack.c.b16 %v4405_v41, %v4404_v32 }
 0x578   :  { %v3164_v48 = vpop.permute.xlu0 %3163 }
 0x579   :  { %v3170_v35 = vpop.permute.xlu1 %3169  ;;  %v11069_v55 = vpop.f32.mrf.mxu2  ;;  %v3921_v57 = vsel %vm3819_vm4, %v10854_v27, %v3164_v48 }
 0x57a   :  { %v4002_v13 = vsel %vm3934_vm5, %v3921_v57, %v3354_v62  ;;  %v3930_v3 = vsel %vm3819_vm4, %v10884_v12, %v3170_v35  ;;  %v4340_v35 = vadd.f32 %v11037_v58, %v11051_v59 }
 0x57b   :  { %v4349_v36 = vpop.f32.mrf.mxu3  ;;  %v4079_v54 = vsel %vm4011_vm6, %v4002_v13, %v3810_v16  ;;  %v4345_v16 = vadd.f32 %v11057_v19, %v11069_v55 }
 0x57c   :  { %v4406_v52 = vunpack.c.l.b16 %v4079_v54 }
 0x57e   :  { %4496 = vmatmul.bf16.gmra.mxu2 %v4412_v23  ;;  %4628 = vmatmul.bf16.gmra.mxu3 %v4544_v47 }
 0x580   :  { %v3360_v46 = vpop.permute.xlu0 %3359 }
 0x581   :  { %v3172_v11 = vpop.permute.xlu1 %3171  ;;  %v4224_v39 = vpop.f32.mrf.mxu2  ;;  %v4008_v44 = vsel %vm3934_vm5, %v3930_v3, %v3360_v46 }
 0x582   :  { %v4348_v53 = vadd.f32 %v4347_v14, %v4224_v39  ;;  %v3933_v4 = vsel %vm3819_vm4, %v10875_v50, %v3172_v11 }
 0x588   :  { %v3816_v33 = vpop.permute.xlu0 %3815 }
 0x589   :  { %v4085_v26 = vsel %vm4011_vm6, %v4008_v44, %v3816_v33  ;;  %v3362_v27 = vpop.permute.xlu1 %3361  ;;  %v4226_v56 = vpop.f32.mrf.mxu2 }
 0x58a   :  { %v4407_v20 = vunpack.c.l.b16 %v4085_v26  ;;  %v4010_v25 = vsel %vm3934_vm5, %v3933_v4, %v3362_v27  ;;  %v4352_v12 = vpop.f32.mrf.mxu3  ;;  %v4350_v13 = vadd.f32 %v4349_v36, %v4226_v56 }
 0x58b   :  { %v4087_v24 = vsel %vm4011_vm6, %v4010_v25, %v3818_v17 }
 0x58c   :  { %v4539_v43 = vunpack.c.l.b16 %v4087_v24  ;;  %v4413_v7 = vpack.c.b16 %v4407_v20, %v4406_v52 }
 0x58e   :  { %4501 = vmatmul.bf16.gmra.mxu2 %v4413_v7  ;;  %v4545_v29 = vpack.c.b16 %v4539_v43, %v4267_v1 }
 0x590   :  { %4633 = vmatmul.bf16.gmra.mxu3 %v4545_v29 }
 0x591   :  { %v4229_v50 = vpop.f32.mrf.mxu2 }
 0x592   :  { %v4353_v9 = vadd.f32 %v4352_v12, %v4229_v50  ;;  %v4354_v21 = vpop.f32.mrf.mxu3 }
 0x599   :  { %v4231_v51 = vpop.f32.mrf.mxu2 }
 0x59a   :  { %v4357_v31 = vpop.f32.mrf.mxu3  ;;  %v4355_v33 = vadd.f32 %v4354_v21, %v4231_v51 }
 0x5a1   :  { %v4234_v42 = vpop.f32.mrf.mxu2 }
 0x5a2   :  { %v4358_v2 = vadd.f32 %v4357_v31, %v4234_v42  ;;  %v4359_v0 = vpop.f32.mrf.mxu3 }
 0x5a9   :  { %v4236_v34 = vpop.f32.mrf.mxu2 }
 0x5b1   :  { %v4239_v10 = vpop.f32.mrf.mxu2  ;;  %v4362_v37 = vpop.f32.mrf.mxu3 }
 0x5b2   :  { %v11089_v38 = vadd.f32 %v4362_v37, %v4239_v10 }
 0x5b9   :  { %v11091_v5 = vpop.f32.mrf.mxu2  ;;  %v11093_v8 = vpop.f32.mrf.mxu3 }
 0x5c1   :  { %v4477_v30 = vpop.f32.mrf.mxu2  ;;  %v4609_v1 = vpop.f32.mrf.mxu3 }
 0x5c2   :  { %v4507_v15 = vadd.f32 %v4477_v30, %v11046_v61 }
 0x5c4   :  { %v11096_v6 = vadd.f32 %v4609_v1, %v4507_v15 }
 0x5c6   :  { %v4683_v44 = vmul.f32 %v11096_v6, %v11096_v6  ;;  %v4654_v26 = vsel %vm4653_vm7, %v11096_v6, 0.0 }
 0x5c8   :  { %v4695_v52 = vsel %vm4653_vm7, %v4683_v44, 0.0 }
 0x5c9   :  { %v4479_v22 = vpop.f32.mrf.mxu2  ;;  %v4611_v63 = vpop.f32.mrf.mxu3 }
 0x5ca   :  { %v4508_v23 = vadd.f32 %v4479_v22, %v4340_v35 }
 0x5cc   :  { %v11103_v57 = vadd.f32 %v4611_v63, %v4508_v23 }
 0x5ce   :  { %v4684_v54 = vmul.f32 %v11103_v57, %v11103_v57 }
 0x5d0   :  { %v4696_v27 = vsel %vm4653_vm7, %v4684_v54, 0.0 }
 0x5d1   :  { %v4482_v28 = vpop.f32.mrf.mxu2  ;;  %v4614_v18 = vpop.f32.mrf.mxu3  ;;  %v4697_v21 = vadd.f32 %v4696_v27, %v4695_v52 }
 0x5d2   :  { %v4509_v46 = vadd.f32 %v4482_v28, %v11064_v45 }
 0x5d4   :  { %v11105_v3 = vadd.f32 %v4614_v18, %v4509_v46 }
 0x5d6   :  { %v4685_v36 = vmul.f32 %v11105_v3, %v11105_v3  ;;  %v4657_v56 = vsel %vm4653_vm7, %v11105_v3, 0.0 }
 0x5d8   :  { %v4698_v43 = vsel %vm4653_vm7, %v4685_v36, 0.0 }
 0x5d9   :  { %v4484_v60 = vpop.f32.mrf.mxu2  ;;  %v4616_v49 = vpop.f32.mrf.mxu3  ;;  %v4699_v30 = vadd.f32 %v4698_v43, %v4697_v21 }
 0x5da   :  { %v4510_v11 = vadd.f32 %v4484_v60, %v4345_v16 }
 0x5dc   :  { %v11109_v58 = vadd.f32 %v4616_v49, %v4510_v11 }
 0x5de   :  { %v4686_v17 = vmul.f32 %v11109_v58, %v11109_v58  ;;  %v4659_v7 = vsel %vm4653_vm7, %v11109_v58, 0.0 }
 0x5e0   :  { %v4700_v31 = vsel %vm4653_vm7, %v4686_v17, 0.0 }
 0x5e1   :  { %v4487_v40 = vpop.f32.mrf.mxu2  ;;  %v4619_v62 = vpop.f32.mrf.mxu3  ;;  %v4701_v18 = vadd.f32 %v4700_v31, %v4699_v30 }
 0x5e2   :  { %v4511_v39 = vadd.f32 %v4487_v40, %v4348_v53  ;;  %v4655_v53 = vsel %vm4653_vm7, %v11103_v57, 0.0 }
 0x5e3   :  { %v4656_v24 = vadd.f32 %v4655_v53, %v4654_v26 }
 0x5e4   :  { %v11113_v19 = vadd.f32 %v4619_v62, %v4511_v39 }
 0x5e5   :  { %v4658_v51 = vadd.f32 %v4657_v56, %v4656_v24 }
 0x5e6   :  { %v4687_v12 = vmul.f32 %v11113_v19, %v11113_v19  ;;  %v4661_v42 = vsel %vm4653_vm7, %v11113_v19, 0.0 }
 0x5e7   :  { %v4660_v1 = vadd.f32 %v4659_v7, %v4658_v51 }
 0x5e8   :  { %v4702_v15 = vsel %vm4653_vm7, %v4687_v12, 0.0 }
 0x5e9   :  { %v4489_v41 = vpop.f32.mrf.mxu2  ;;  %v4621_v32 = vpop.f32.mrf.mxu3  ;;  %v4662_v60 = vadd.f32 %v4661_v42, %v4660_v1 }
 0x5ea   :  { %v4512_v59 = vadd.f32 %v4489_v41, %v4350_v13 }
 0x5ec   :  { %v11126_v20 = vadd.f32 %v4621_v32, %v4512_v59  ;;  %v4703_v32 = vadd.f32 %v4702_v15, %v4701_v18 }
 0x5ee   :  { %v4688_v10 = vmul.f32 %v11126_v20, %v11126_v20 }
 0x5f0   :  { %v4704_v49 = vsel %vm4653_vm7, %v4688_v10, 0.0 }
 0x5f1   :  { %v4492_v14 = vpop.f32.mrf.mxu2  ;;  %v4624_v48 = vpop.f32.mrf.mxu3 }
 0x5f2   :  { %v4513_v4 = vadd.f32 %v4492_v14, %v4353_v9  ;;  %v4360_v9 = vadd.f32 %v4359_v0, %v4236_v34 }
 0x5f4   :  { %v11134_v29 = vadd.f32 %v4624_v48, %v4513_v4 }
 0x5f6   :  { %v4689_v0 = vmul.f32 %v11134_v29, %v11134_v29  ;;  %v4665_v40 = vsel %vm4653_vm7, %v11134_v29, 0.0 }
 0x5f8   :  { %v4706_v48 = vsel %vm4653_vm7, %v4689_v0, 0.0 }
 0x5f9   :  { %v4494_v47 = vpop.f32.mrf.mxu2  ;;  %v4626_v61 = vpop.f32.mrf.mxu3 }
 0x5fa   :  { %v4514_v25 = vadd.f32 %v4494_v47, %v4355_v33  ;;  %v4705_v47 = vadd.f32 %v4704_v49, %v4703_v32 }
 0x5fc   :  { %v11141_v37 = vadd.f32 %v4626_v61, %v4514_v25  ;;  %v4707_v39 = vadd.f32 %v4706_v48, %v4705_v47 }
 0x5fe   :  { %v4690_v62 = vmul.f32 %v11141_v37, %v11141_v37  ;;  %v4667_v35 = vsel %vm4653_vm7, %v11141_v37, 0.0 }
 0x600   :  { %v4708_v16 = vsel %vm4653_vm7, %v4690_v62, 0.0 }
 0x601   :  { %v4497_v45 = vpop.f32.mrf.mxu2  ;;  %v4629_v55 = vpop.f32.mrf.mxu3 }
 0x602   :  { %v4515_v50 = vadd.f32 %v4497_v45, %v4358_v2  ;;  %v4663_v2 = vsel %vm4653_vm7, %v11126_v20, 0.0 }
 0x603   :  { %v4664_v14 = vadd.f32 %v4663_v2, %v4662_v60 }
 0x604   :  { %v11148_v34 = vadd.f32 %v4629_v55, %v4515_v50  ;;  %v4709_v55 = vadd.f32 %v4708_v16, %v4707_v39  ;;  %v8126_v16 = vld [vmem:[%s11888_s7 + $0xa8] sm:$0xff]  ;;  %v8125_v39 = vld [vmem:[%s11888_s7 + $0xa0] sm:$0xff] }
 0x605   :  { %v4666_v61 = vadd.f32 %v4665_v40, %v4664_v14 }
 0x606   :  { %v4691_v23 = vmul.f32 %v11148_v34, %v11148_v34  ;;  %v4669_v46 = vsel %vm4653_vm7, %v11148_v34, 0.0 }
 0x607   :  { %v4668_v13 = vadd.f32 %v4667_v35, %v4666_v61  ;;  %v8128_v35 = vld [vmem:[%s11888_s7 + $0xb8] sm:$0xff] }
 0x608   :  { %v4710_v59 = vsel %vm4653_vm7, %v4691_v23, 0.0  ;;  %5220 = vmatpush.bf16.msrb.mxu3 %v8128_v35  ;;  %v8127_v23 = vld [vmem:[%s11888_s7 + $0xb0] sm:$0xff] }
 0x609   :  { %v4499_v22 = vpop.f32.mrf.mxu2  ;;  %v4631_v63 = vpop.f32.mrf.mxu3  ;;  %v4670_v33 = vadd.f32 %v4669_v46, %v4668_v13  ;;  %v4711_v26 = vadd.f32 %v4710_v59, %v4709_v55  ;;  %v4652_v55 = vld [vmem:[%s11890_s6] sm:$0x1] }
 0x60a   :  { %v4516_v28 = vadd.f32 %v4499_v22, %v4360_v9 }
 0x60c   :  { %v11155_v41 = vadd.f32 %v4631_v63, %v4516_v28  ;;  %5221 = vmatpush.bf16.msrb.mxu3 %v8127_v23 }
 0x60e   :  { %v4692_v11 = vmul.f32 %v11155_v41, %v11155_v41  ;;  %v4671_v44 = vsel %vm4653_vm7, %v11155_v41, 0.0 }
 0x60f   :  { %v4672_v27 = vadd.f32 %v4671_v44, %v4670_v33 }
 0x610   :  { %v4712_v36 = vsel %vm4653_vm7, %v4692_v11, 0.0  ;;  %5222 = vmatpush.bf16.msrb.mxu3 %v8126_v16 }
 0x611   :  { %v4502_v54 = vpop.f32.mrf.mxu2  ;;  %v4713_v25 = vadd.f32 %v4712_v36, %v4711_v26 }
 0x612   :  { %v4517_v45 = vadd.f32 %v4502_v54, %v11089_v38  ;;  %v4365_v38 = vadd.f32 %v11093_v8, %v11091_v5  ;;  %v4651_v54 = vld [vmem:[%s11889_s5] sm:$0x1] }
 0x613   :  { %v4634_v53 = vpop.f32.mrf.mxu3 }
 0x614   :  { %v11172_v4 = vadd.f32 %v4634_v53, %v4517_v45  ;;  %5223 = vmatpush.bf16.msrb.mxu3 %v8125_v39 }
 0x616   :  { %v4673_v56 = vsel %vm4653_vm7, %v11172_v4, 0.0  ;;  %v4693_v17 = vmul.f32 %v11172_v4, %v11172_v4 }
 0x617   :  { %v4674_v52 = vadd.f32 %v4673_v56, %v4672_v27 }
 0x618   :  { %v4714_v24 = vsel %vm4653_vm7, %v4693_v17, 0.0 }
 0x619   :  { %v4715_v12 = vadd.f32 %v4714_v24, %v4713_v25  ;;  %v4504_v43 = vpop.f32.mrf.mxu2 }
 0x61a   :  { %v4518_v7 = vadd.f32 %v4504_v43, %v4365_v38 }
 0x61b   :  { %v4636_v50 = vpop.f32.mrf.mxu3 }
 0x61c   :  { %v4650_v9 = vadd.f32 %v4636_v50, %v4518_v7 }
 0x61e   :  { %v4675_v21 = vsel %vm4653_vm7, %v4650_v9, 0.0  ;;  %v4694_v51 = vmul.f32 %v4650_v9, %v4650_v9 }
 0x61f   :  { %v4676_v31 = vadd.f32 %v4675_v21, %v4674_v52 }
 0x620   :  { %v4716_v42 = vsel %vm4653_vm7, %v4694_v51, 0.0 }
 0x621   :  { %v4677_v10 = vrot.slane %v4676_v31, 4  ;;  %v4717_v30 = vadd.f32 %v4716_v42, %v4715_v12 }
 0x623   :  { %v4678_v1 = vadd.f32 %v4677_v10, %v4676_v31  ;;  %v4718_v15 = vrot.slane %v4717_v30, 4 }
 0x625   :  { %v4679_v22 = vrot.slane %v4678_v1, 2  ;;  %v4719_v63 = vadd.f32 %v4718_v15, %v4717_v30 }
 0x627   :  { %v4680_v5 = vadd.f32 %v4679_v22, %v4678_v1  ;;  %v4720_v8 = vrot.slane %v4719_v63, 2 }
 0x629   :  { %v4681_v2 = vrot.slane %v4680_v5, 1  ;;  %v4721_v0 = vadd.f32 %v4720_v8, %v4719_v63 }
 0x62b   :  { %v4682_v28 = vadd.f32 %v4681_v2, %v4680_v5  ;;  %v4722_v18 = vrot.slane %v4721_v0, 1 }
 0x62d   :  { %v4723_v60 = vadd.f32 %v4722_v18, %v4721_v0  ;;  %v4724_v49 = vmul.f32 0.013888889, %v4682_v28 }
 0x62f   :  { %v4725_v40 = vmul.f32 0.013888889, %v4723_v60  ;;  %v4726_v62 = vmul.f32 %v4724_v49, %v4724_v49 }
 0x631   :  { %v4727_v32 = vsub.f32 %v4725_v40, %v4726_v62 }
 0x633   :  { %v4728_v14 = vmax.f32 %v4727_v32, 0.0 }
 0x635   :  { %v4729_v48 = vadd.f32 1e-05, %v4728_v14 }
 0x637   :  { %8239 = vrsqrt.f32 %v4729_v48  ;;  %vm4736_vm9 = vweird.f32 %v4729_v48 }
 0x63d   :  { %v8240_v47 = vpop.eup %8239 }
 0x63e   :  { %v4731_v61 = vmul.f32 %v8240_v47, %v4729_v48  ;;  %vm4737_vm8 = vweird.f32 %v8240_v47 }
 0x63f   :  { %vm4738_vm10 = vmor %vm4736_vm9, %vm4737_vm8 }
 0x640   :  { %v4732_v46 = vmul.f32 %v8240_v47, %v4731_v61 }
 0x642   :  { %v4733_v11 = vmul.f32 0.5, %v4732_v46 }
 0x644   :  { %v4734_v13 = vsub.f32 1.5, %v4733_v11 }
 0x646   :  { %v4735_v59 = vmul.f32 %v8240_v47, %v4734_v13 }
 0x648   :  { %v4739_v44 = vsel %vm4738_vm10, %v8240_v47, %v4735_v59 }
 0x649   :  { %v4740_v45 = vmul.f32 %v4739_v44, %v4651_v54 }
 0x64b   :  { %v4741_v33 = vmul.f32 %v4740_v45, %v4724_v49  ;;  %v11201_v53 = vperm.slane %v4740_v45, 0 }
 0x64d   :  { %v4742_v36 = vsub.f32 %v4652_v55, %v4741_v33  ;;  %v4755_v26 = vmul.f32 %v11201_v53, %v4650_v9  ;;  %v4747_v27 = vmul.f32 %v11201_v53, %v11109_v58  ;;  %v4752_v56 = vmul.f32 %v11201_v53, %v11148_v34 }
 0x64e   :  { %v4745_v25 = vmul.f32 %v11201_v53, %v11103_v57  ;;  %v4746_v52 = vmul.f32 %v11201_v53, %v11105_v3  ;;  %v4754_v38 = vmul.f32 %v11201_v53, %v11172_v4  ;;  %v4751_v24 = vmul.f32 %v11201_v53, %v11141_v37 }
 0x64f   :  { %v11208_v17 = vperm.slane %v4742_v36, 0  ;;  %v4748_v58 = vmul.f32 %v11201_v53, %v11113_v19 }
 0x651   :  { %v11221_v12 = vadd.f32 %v11208_v17, %v4755_v26  ;;  %v4762_v34 = vadd.f32 %v11208_v17, %v4747_v27  ;;  %v4761_v43 = vadd.f32 %v11208_v17, %v4746_v52  ;;  %v4760_v57 = vadd.f32 %v11208_v17, %v4745_v25 }
 0x652   :  { %v4767_v3 = vadd.f32 %v11208_v17, %v4752_v56  ;;  %v4766_v7 = vadd.f32 %v11208_v17, %v4751_v24  ;;  %v4763_v4 = vadd.f32 %v11208_v17, %v4748_v58  ;;  %v4769_v37 = vadd.f32 %v11208_v17, %v4754_v38 }
 0x653   :  { %v4774_v50 = vmax.f32 %v4762_v34, 0.0  ;;  %v4773_v9 = vmax.f32 %v4761_v43, 0.0  ;;  %v4772_v19 = vmax.f32 %v4760_v57, 0.0  ;;  %v4782_v52 = vmax.f32 %v11221_v12, 0.0 }
 0x654   :  { %v4779_v21 = vmax.f32 %v4767_v3, 0.0  ;;  %v4778_v51 = vmax.f32 %v4766_v7, 0.0  ;;  %v4775_v31 = vmax.f32 %v4763_v4, 0.0  ;;  %v4781_v42 = vmax.f32 %v4769_v37, 0.0 }
 0x655   :  { %v4786_v10 = vpack.c.bf16 %v4774_v50, %v4774_v50  ;;  %v4785_v30 = vpack.c.bf16 %v4773_v9, %v4773_v9  ;;  %v4784_v1 = vpack.c.bf16 %v4772_v19, %v4772_v19  ;;  %v4753_v12 = vmul.f32 %v11201_v53, %v11155_v41  ;;  %v8124_v50 = vld [vmem:[%s11888_s7 + $0x98] sm:$0xff] }
 0x656   :  { %v4791_v15 = vpack.c.bf16 %v4779_v21, %v4779_v21  ;;  %v4790_v22 = vpack.c.bf16 %v4778_v51, %v4778_v51  ;;  %v4787_v63 = vpack.c.bf16 %v4775_v31, %v4775_v31  ;;  %v4793_v5 = vpack.c.bf16 %v4781_v42, %v4781_v42  ;;  %5187 = vmatpush.bf16.msrb.mxu2 %v8124_v50 }
 0x657   :  { %v4810_v8 = vunpack.c.l.b16 %v4786_v10  ;;  %v4809_v2 = vunpack.c.l.b16 %v4785_v30  ;;  %v4808_v0 = vunpack.c.l.b16 %v4784_v1  ;;  %v4794_v9 = vpack.c.bf16 %v4782_v52, %v4782_v52 }
 0x658   :  { %v4815_v28 = vunpack.c.l.b16 %v4791_v15  ;;  %v4814_v18 = vunpack.c.l.b16 %v4790_v22  ;;  %v4811_v60 = vunpack.c.l.b16 %v4787_v63  ;;  %v4817_v49 = vunpack.c.l.b16 %v4793_v5 }
 0x659   :  { %v4822_v40 = vpack.c.b16 %v4810_v8, %v4810_v8  ;;  %v4821_v62 = vpack.c.b16 %v4809_v2, %v4809_v2  ;;  %v4820_v32 = vpack.c.b16 %v4808_v0, %v4808_v0  ;;  %v4768_v21 = vadd.f32 %v11208_v17, %v4753_v12 }
 0x65a   :  { %v4827_v14 = vpack.c.b16 %v4815_v28, %v4815_v28  ;;  %v4826_v48 = vpack.c.b16 %v4814_v18, %v4814_v18  ;;  %v4823_v61 = vpack.c.b16 %v4811_v60, %v4811_v60  ;;  %v4829_v39 = vpack.c.b16 %v4817_v49, %v4817_v49 }
 0x65b   :  { %v11231_v35 = vsel %vm4831_vm11, %v4786_v10, %v4822_v40  ;;  %v11234_v23 = vsel %vm4831_vm11, %v4785_v30, %v4821_v62  ;;  %v11237_v47 = vsel %vm4831_vm11, %v4784_v1, %v4820_v32  ;;  %v4744_v42 = vmul.f32 %v11201_v53, %v11096_v6  ;;  %v8123_v10 = vld [vmem:[%s11888_s7 + $0x90] sm:$0xff] }
 0x65c   :  { %v4886_v16 = vshrl.u32 %v11231_v35, 16  ;;  %v4888_v46 = vshll.u32 %v11231_v35, 16  ;;  %v4882_v11 = vshll.u32 %v11234_v23, 16  ;;  %v4880_v13 = vshrl.u32 %v11234_v23, 16  ;;  %5188 = vmatpush.bf16.msrb.mxu2 %v8123_v10 }
 0x65d   :  { %v4978_v54 = vrot.slane %v11234_v23, 1  ;;  %v4977_v59 = vrot.slane %v11237_v47, 1  ;;  %v4876_v44 = vshll.u32 %v11237_v47, 16  ;;  %v11247_v33 = vsel %vm4831_vm11, %v4791_v15, %v4827_v14 }
 0x65e   :  { %v4890_v45 = vrot.slane %v4888_v46, 1  ;;  %v4884_v55 = vrot.slane %v4882_v11, 1  ;;  %v11250_v36 = vsel %vm4831_vm11, %v4790_v22, %v4826_v48  ;;  %v4874_v56 = vshrl.u32 %v11237_v47, 16 }
 0x65f   :  { %v11252_v26 = vunpack.c.l.b16 %v4978_v54  ;;  %v11254_v27 = vunpack.c.l.b16 %v4977_v59  ;;  %v4878_v25 = vrot.slane %v4876_v44, 1  ;;  %v4918_v58 = vshll.u32 %v11247_v33, 16 }
 0x660   :  { %v4891_v38 = vor.u32 %v4890_v45, %v4886_v16  ;;  %v4885_v24 = vor.u32 %v4884_v55, %v4880_v13  ;;  %v4912_v57 = vshll.u32 %v11250_v36, 16  ;;  %v11263_v3 = vsel %vm4831_vm11, %v4787_v63, %v4823_v61 }
 0x661   :  { %v5092_v34 = vpack.c.b16 %v11252_v26, %v11254_v27  ;;  %v4879_v43 = vor.u32 %v4878_v25, %v4874_v56  ;;  %v4894_v7 = vshll.u32 %v11263_v3, 16  ;;  %v4920_v4 = vrot.slane %v4918_v58, 1 }
 0x662   :  { %4946 = vrot.lane.b32.xlu2 %v4891_v38, %s8243_s2  ;;  %4944 = vrot.lane.b32.xlu1 %v4885_v24, %s8243_s2  ;;  %v11273_v37 = vsel %vm4831_vm11, %v4793_v5, %v4829_v39  ;;  %v4914_v19 = vrot.slane %v4912_v57, 1  ;;  %v4916_v51 = vshrl.u32 %v11247_v33, 16  ;;  %v4910_v41 = vshrl.u32 %v11250_v36, 16 }
 0x663   :  { %7503 = vmatmul.msk.bf16.vlgmr.msrb.gmra.mxu3 %vm3934_vm5, %v5092_v34  ;;  %4942 = vrot.lane.b32.xlu0 %v4879_v43, %s8243_s2  ;;  %v4896_v31 = vrot.slane %v4894_v7, 1  ;;  %v4892_v30 = vshrl.u32 %v11263_v3, 16  ;;  %v4930_v1 = vshll.u32 %v11273_v37, 16  ;;  %v4780_v15 = vmax.f32 %v4768_v21, 0.0 }
 0x664   :  { %v4749_v22 = vmul.f32 %v11201_v53, %v11126_v20  ;;  %v4921_v63 = vor.u32 %v4920_v4, %v4916_v51  ;;  %v4979_v5 = vrot.slane %v11231_v35, 1  ;;  %v4759_v8 = vadd.f32 %v11208_v17, %v4744_v42 }
 0x665   :  { %v4750_v6 = vmul.f32 %v11201_v53, %v11134_v29  ;;  %v4915_v2 = vor.u32 %v4914_v19, %v4910_v41  ;;  %v4980_v0 = vrot.slane %v11263_v3, 1  ;;  %v4792_v28 = vpack.c.bf16 %v4780_v15, %v4780_v15  ;;  %v8116_v19 = vld [vmem:[%s11888_s7 + $0x58] sm:$0xff] }
 0x666   :  { %v4764_v18 = vadd.f32 %v11208_v17, %v4749_v22  ;;  %v4897_v60 = vor.u32 %v4896_v31, %v4892_v30  ;;  %v4771_v49 = vmax.f32 %v4759_v8, 0.0  ;;  %v4818_v32 = vunpack.c.l.b16 %v4794_v9  ;;  %v8122_v31 = vld [vmem:[%s11888_s7 + $0x88] sm:$0xff]  ;;  %5374 = vmatpush.bf16.msra.mxu3 %v8116_v19 }
 0x667   :  { %v4765_v40 = vadd.f32 %v11208_v17, %v4750_v6  ;;  %v4816_v20 = vunpack.c.l.b16 %v4792_v28  ;;  %v4932_v29 = vrot.slane %v4930_v1, 1  ;;  %v11300_v48 = vunpack.c.l.b16 %v4979_v5  ;;  %5189 = vmatpush.bf16.msrb.mxu2 %v8122_v31  ;;  %v8114_v6 = vld [vmem:[%s11888_s7 + $0x48] sm:$0xff] }
 0x668   :  { %v4776_v62 = vmax.f32 %v4764_v18, 0.0  ;;  %v4783_v53 = vpack.c.bf16 %v4771_v49, %v4771_v49  ;;  %v11302_v61 = vunpack.c.l.b16 %v4980_v0  ;;  %v4928_v39 = vshrl.u32 %v11273_v37, 16  ;;  %v8113_v49 = vld [vmem:[%s11888_s7 + $0x40] sm:$0xff] }
 0x669   :  { %v4777_v14 = vmax.f32 %v4765_v40, 0.0  ;;  %v4828_v16 = vpack.c.b16 %v4816_v20, %v4816_v20  ;;  %v4830_v59 = vpack.c.b16 %v4818_v32, %v4818_v32  ;;  %v4983_v5 = vrot.slane %v11250_v36, 1 }
 0x66a   :  { %4956 = vrot.lane.b32.xlu2 %v4921_v63, %s8243_s2  ;;  %4954 = vrot.lane.b32.xlu1 %v4915_v2, %s8243_s2  ;;  %v4788_v46 = vpack.c.bf16 %v4776_v62, %v4776_v62  ;;  %v4807_v17 = vunpack.c.l.b16 %v4783_v53  ;;  %v4933_v56 = vor.u32 %v4932_v29, %v4928_v39  ;;  %v5094_v25 = vpack.c.b16 %v11302_v61, %v11300_v48  ;;  %v8121_v62 = vld [vmem:[%s11888_s7 + $0x80] sm:$0xff] }
 0x66b   :  { %4948 = vrot.lane.b32.xlu0 %v4897_v60, %s8243_s2  ;;  %v4789_v11 = vpack.c.bf16 %v4777_v14, %v4777_v14  ;;  %v11306_v13 = vsel %vm4831_vm11, %v4792_v28, %v4828_v16  ;;  %v11326_v50 = vsel %vm4831_vm11, %v4794_v9, %v4830_v59  ;;  %v8115_v9 = vld [vmem:[%s11888_s7 + $0x50] sm:$0xff]  ;;  %v4984_v8 = vrot.slane %v11247_v33, 1  ;;  %5190 = vmatpush.bf16.msrb.mxu2 %v8121_v62  ;;  %v8140_v59 = vld [vmem:[%s11888_s7 + $0x118] sm:$0xff] }
 0x66c   :  { %v4812_v54 = vunpack.c.l.b16 %v4788_v46  ;;  %v4924_v44 = vshll.u32 %v11306_v13, 16  ;;  %v4819_v45 = vpack.c.b16 %v4807_v17, %v4807_v17  ;;  %v4922_v38 = vshrl.u32 %v11306_v13, 16  ;;  %5375 = vmatpush.bf16.msra.mxu3 %v8115_v9  ;;  %v8120_v17 = vld [vmem:[%s11888_s7 + $0x78] sm:$0xff] }
 0x66d   :  { %v4813_v55 = vunpack.c.l.b16 %v4789_v11  ;;  %v4936_v1 = vshll.u32 %v11326_v50, 16  ;;  %v4934_v28 = vshrl.u32 %v11326_v50, 16  ;;  %v5031_v18 = vunpack.c.l.b16 %v4983_v5  ;;  %v8107_v5 = vld [vmem:[%s11888_s7 + $0x10] sm:$0xff] }
 0x66e   :  { %v4824_v52 = vpack.c.b16 %v4812_v54, %v4812_v54  ;;  %v4926_v24 = vrot.slane %v4924_v44, 1  ;;  %v11313_v58 = vsel %vm4831_vm11, %v4783_v53, %v4819_v45  ;;  %v5033_v60 = vunpack.c.l.b16 %v4984_v8  ;;  %v8118_v54 = vld [vmem:[%s11888_s7 + $0x68] sm:$0xff]  ;;  %v8139_v45 = vld [vmem:[%s11888_s7 + $0x110] sm:$0xff] }
 0x66f   :  { %v4825_v34 = vpack.c.b16 %v4813_v55, %v4813_v55  ;;  %v4870_v43 = vshll.u32 %v11313_v58, 16  ;;  %v4868_v21 = vshrl.u32 %v11313_v58, 16  ;;  %v4938_v2 = vrot.slane %v4936_v1, 1  ;;  %5191 = vmatpush.bf16.msrb.mxu2 %v8120_v17  ;;  %v8108_v1 = vld [vmem:[%s11888_s7 + $0x18] sm:$0xff] }
 0x670   :  { %v11318_v57 = vsel %vm4831_vm11, %v4788_v46, %v4824_v52  ;;  %v4927_v7 = vor.u32 %v4926_v24, %v4922_v38  ;;  %5376 = vmatpush.bf16.msra.mxu3 %v8114_v6  ;;  %v5096_v20 = vpack.c.b16 %v5033_v60, %v5031_v18  ;;  %v5248_v32 = vpack.c.b16 %v11300_v48, %v11252_v26  ;;  %v8119_v48 = vld [vmem:[%s11888_s7 + $0x70] sm:$0xff]  ;;  %v8137_v52 = vld [vmem:[%s11888_s7 + $0x100] sm:$0xff]  ;;  %v8112_v38 = vld [vmem:[%s11888_s7 + $0x38] sm:$0xff] }
 0x671   :  { %v4900_v12 = vshll.u32 %v11318_v57, 16  ;;  %v11323_v4 = vsel %vm4831_vm11, %v4789_v11, %v4825_v34  ;;  %v4872_v51 = vrot.slane %v4870_v43, 1  ;;  %v4898_v30 = vshrl.u32 %v11318_v57, 16  ;;  %v8111_v34 = vld [vmem:[%s11888_s7 + $0x30] sm:$0xff] }
 0x672   :  { %4960 = vrot.lane.b32.xlu1 %v4933_v56, %s8243_s2  ;;  %v4906_v41 = vshll.u32 %v11323_v4, 16  ;;  %v4904_v63 = vshrl.u32 %v11323_v4, 16  ;;  %v4939_v40 = vor.u32 %v4938_v2, %v4934_v28  ;;  %v4985_v29 = vrot.slane %v11306_v13, 1  ;;  %v8138_v56 = vld [vmem:[%s11888_s7 + $0x108] sm:$0xff] }
 0x673   :  { %7504 = vmatmul.msk.bf16.gmra.mxu3 %vm3934_vm5, %v5094_v25  ;;  %4958 = vrot.lane.b32.xlu0 %v4927_v7, %s8243_s2  ;;  %v4902_v42 = vrot.slane %v4900_v12, 1  ;;  %v4873_v10 = vor.u32 %v4872_v51, %v4868_v21  ;;  %v4986_v53 = vrot.slane %v11273_v37, 1  ;;  %v4976_v11 = vrot.slane %v11313_v58, 1  ;;  %v8110_v51 = vld [vmem:[%s11888_s7 + $0x28] sm:$0xff] }
 0x674   :  { %v4908_v15 = vrot.slane %v4906_v41, 1  ;;  %5377 = vmatpush.bf16.msra.mxu3 %v8113_v49  ;;  %v5035_v14 = vunpack.c.l.b16 %v4985_v29  ;;  %5192 = vmatpush.bf16.msrb.mxu2 %v8119_v48  ;;  %v4982_v44 = vrot.slane %v11323_v4, 1  ;;  %v8136_v29 = vld [vmem:[%s11888_s7 + $0xf8] sm:$0xff]  ;;  %v8134_v48 = vld [vmem:[%s11888_s7 + $0xe8] sm:$0xff] }
 0x675   :  { %4940 = vrot.lane.b32.xlu2 %v4873_v10, %s8243_s2  ;;  %v4903_v22 = vor.u32 %v4902_v42, %v4898_v30  ;;  %v11364_v16 = vunpack.c.l.b16 %v4986_v53  ;;  %v5021_v26 = vunpack.c.l.b16 %v4976_v11  ;;  %v8109_v42 = vld [vmem:[%s11888_s7 + $0x20] sm:$0xff] }
 0x676   :  { %v4909_v0 = vor.u32 %v4908_v15, %v4904_v63  ;;  %v5029_v55 = vunpack.c.l.b16 %v4982_v44  ;;  %v5252_v24 = vpack.c.b16 %v5035_v14, %v5033_v60  ;;  %v4981_v63 = vrot.slane %v11318_v57, 1  ;;  %v8105_v60 = vld [vmem:[%s11888_s7] sm:$0xff] }
 0x677   :  { %v5098_v46 = vpack.c.b16 %v11364_v16, %v5035_v14  ;;  %v5246_v39 = vpack.c.b16 %v11254_v27, %v5021_v26  ;;  %v8117_v27 = vld [vmem:[%s11888_s7 + $0x60] sm:$0xff] }
 0x678   :  { %5193 = vmatpush.bf16.msrb.mxu2 %v8118_v54  ;;  %5547 = vmatpush.bf16.msrb.mxu3 %v8140_v59  ;;  %v5250_v25 = vpack.c.b16 %v5031_v18, %v5029_v55  ;;  %v8133_v59 = vld [vmem:[%s11888_s7 + $0xe0] sm:$0xff] }
 0x67a   :  { %4950 = vrot.lane.b32.xlu1 %v4903_v22, %s8243_s2 }
 0x67b   :  { %4952 = vrot.lane.b32.xlu0 %v4909_v0, %s8243_s2  ;;  %v8106_v0 = vld [vmem:[%s11888_s7 + $0x8] sm:$0xff] }
 0x67c   :  { %5194 = vmatpush.bf16.msrb.mxu2 %v8117_v27  ;;  %5548 = vmatpush.bf16.msrb.mxu3 %v8139_v45  ;;  %v8130_v45 = vld [vmem:[%s11888_s7 + $0xc8] sm:$0xff] }
 0x67d   :  { %4962 = vrot.lane.b32.xlu2 %v4939_v40, %s8243_s2 }
 0x680   :  { %5549 = vmatpush.bf16.msrb.mxu3 %v8138_v56  ;;  %5341 = vmatpush.bf16.msra.mxu2 %v8112_v38 }
 0x683   :  { %7505 = vmatmul.msk.bf16.gmra.mxu3 %vm3934_vm5, %v5096_v20 }
 0x684   :  { %5550 = vmatpush.bf16.msrb.mxu3 %v8137_v52  ;;  %5342 = vmatpush.bf16.msra.mxu2 %v8111_v34 }
 0x688   :  { %5343 = vmatpush.bf16.msra.mxu2 %v8110_v51 }
 0x68c   :  { %5344 = vmatpush.bf16.msra.mxu2 %v8109_v42 }
 0x690   :  { %5345 = vmatpush.bf16.msra.mxu2 %v8108_v1 }
 0x693   :  { %7506 = vmatmul.msk.bf16.gmra.mxu3 %vm3934_vm5, %v5098_v46 }
 0x694   :  { %5346 = vmatpush.bf16.msra.mxu2 %v8107_v5 }
 0x698   :  { %5347 = vmatpush.bf16.msra.mxu2 %v8106_v0 }
 0x69c   :  { %5348 = vmatpush.bf16.msra.mxu2 %v8105_v60 }
 0x6a3   :  { %7555 = vmatmul.msk.bf16.vlgmr.msra.gmra.mxu3 %vm3934_vm5, %v5246_v39 }
 0x6b3   :  { %7556 = vmatmul.msk.bf16.gmra.mxu3 %vm3934_vm5, %v5248_v32 }
 0x6c3   :  { %7557 = vmatmul.msk.bf16.gmra.mxu3 %vm3934_vm5, %v5250_v25  ;;  %v8129_v25 = vld [vmem:[%s11888_s7 + $0xc0] sm:$0xff] }
 0x6d3   :  { %7558 = vmatmul.msk.bf16.gmra.mxu3 %vm3934_vm5, %v5252_v24 }
 0x6d4   :  { %v4945_v43 = vpop.permute.xlu1 %4944 }
 0x6d5   :  { %v4993_v7 = vsel %vm3934_vm5, %v11234_v23, %v4945_v43  ;;  %v4943_v12 = vpop.permute.xlu0 %4942  ;;  %v4947_v23 = vpop.permute.xlu2 %4946 }
 0x6d6   :  { %v5024_v19 = vunpack.c.l.b16 %v4993_v7  ;;  %v4991_v21 = vsel %vm3934_vm5, %v11237_v47, %v4943_v12  ;;  %v4995_v47 = vsel %vm3934_vm5, %v11231_v35, %v4947_v23 }
 0x6d7   :  { %v5022_v41 = vunpack.c.l.b16 %v4991_v21  ;;  %v5026_v15 = vunpack.c.l.b16 %v4995_v47 }
 0x6d9   :  { %v5091_v31 = vpack.c.b16 %v5024_v19, %v5022_v41  ;;  %v5247_v53 = vpack.c.b16 %v5026_v15, %v5024_v19 }
 0x6db   :  { %5195 = vmatmul.bf16.vlgmr.msrb.gmra.mxu2 %v5091_v31 }
 0x6dc   :  { %v4955_v35 = vpop.permute.xlu1 %4954  ;;  %5514 = vmatpush.bf16.msrb.mxu2 %v8136_v29 }
 0x6dd   :  { %v4949_v9 = vpop.permute.xlu0 %4948  ;;  %v4957_v8 = vpop.permute.xlu2 %4956  ;;  %v5003_v2 = vsel %vm3934_vm5, %v11250_v36, %v4955_v35 }
 0x6de   :  { %v11417_v10 = vsel %vm3934_vm5, %v11263_v3, %v4949_v9  ;;  %v5402_v3 = vunpack.c.l.b16 %v4981_v63  ;;  %v5005_v28 = vsel %vm3934_vm5, %v11247_v33, %v4957_v8  ;;  %v5030_v18 = vunpack.c.l.b16 %v5003_v2 }
 0x6df   :  { %v5062_v30 = vunpack.c.l.b16 %v11417_v10  ;;  %v5032_v49 = vunpack.c.l.b16 %v5005_v28 }
 0x6e0   :  { %v5431_v6 = vpack.c.b16 %v5402_v3, %v11302_v61 }
 0x6e1   :  { %v5093_v22 = vpack.c.b16 %v5062_v30, %v5026_v15  ;;  %v5095_v61 = vpack.c.b16 %v5032_v49, %v5030_v18 }
 0x6e3   :  { %7631 = vmatmul.msk.bf16.vlgmr.msrb.gmra.mxu3 %vm3934_vm5, %v5248_v32 }
 0x6e4   :  { %v4961_v36 = vpop.permute.xlu1 %4960 }
 0x6e5   :  { %v4959_v40 = vpop.permute.xlu0 %4958  ;;  %v11446_v20 = vsel %vm3934_vm5, %v11273_v37, %v4961_v36  ;;  %v4987_v37 = vrot.slane %v11326_v50, 1  ;;  %v4941_v17 = vpop.permute.xlu2 %4940 }
 0x6e6   :  { %v5007_v62 = vsel %vm3934_vm5, %v11306_v13, %v4959_v40  ;;  %v5064_v33 = vunpack.c.l.b16 %v11446_v20  ;;  %v8135_v13 = vld [vmem:[%s11888_s7 + $0xf0] sm:$0xff]  ;;  %v4989_v26 = vsel %vm3934_vm5, %v11313_v58, %v4941_v17  ;;  %v5225_v27 = vpop.f32.mrf.mxu3 }
 0x6e7   :  { %v5034_v32 = vunpack.c.l.b16 %v5007_v62  ;;  %v5404_v46 = vunpack.c.l.b16 %v4987_v37  ;;  %5515 = vmatpush.bf16.msrb.mxu2 %v8135_v13  ;;  %v5020_v39 = vunpack.c.l.b16 %v4989_v26  ;;  %v8131_v58 = vld [vmem:[%s11888_s7 + $0xd0] sm:$0xff] }
 0x6e9   :  { %v5097_v14 = vpack.c.b16 %v5064_v33, %v5034_v32  ;;  %v5433_v11 = vpack.c.b16 %v5404_v46, %v11364_v16  ;;  %v5245_v54 = vpack.c.b16 %v5022_v41, %v5020_v39  ;;  %v8132_v16 = vld [vmem:[%s11888_s7 + $0xd8] sm:$0xff]  ;;  %v5251_v34 = vpack.c.b16 %v5034_v32, %v5032_v49 }
 0x6eb   :  { %5200 = vmatmul.bf16.gmra.mxu2 %v5093_v22 }
 0x6ec   :  { %5516 = vmatpush.bf16.msrb.mxu2 %v8134_v48  ;;  %v4951_v19 = vpop.permute.xlu1 %4950 }
 0x6ed   :  { %v4953_v44 = vpop.permute.xlu0 %4952  ;;  %v4963_v22 = vpop.permute.xlu2 %4962 }
 0x6ee   :  { %v5001_v55 = vsel %vm3934_vm5, %v11323_v4, %v4953_v44  ;;  %v5227_v38 = vpop.f32.mrf.mxu3  ;;  %v4999_v4 = vsel %vm3934_vm5, %v11318_v57, %v4951_v19  ;;  %v5011_v57 = vsel %vm3934_vm5, %v11326_v50, %v4963_v22 }
 0x6ef   :  { %v5028_v56 = vunpack.c.l.b16 %v5001_v55  ;;  %v5401_v51 = vunpack.c.l.b16 %v4999_v4  ;;  %v5403_v3 = vunpack.c.l.b16 %v5011_v57 }
 0x6f0   :  { %5517 = vmatpush.bf16.msrb.mxu2 %v8133_v59 }
 0x6f1   :  { %v5249_v52 = vpack.c.b16 %v5030_v18, %v5028_v56  ;;  %v5430_v31 = vpack.c.b16 %v5401_v51, %v5062_v30  ;;  %v5432_v10 = vpack.c.b16 %v5403_v3, %v5064_v33 }
 0x6f3   :  { %7632 = vmatmul.msk.bf16.gmra.mxu3 %vm3934_vm5, %v5431_v6 }
 0x6f4   :  { %5518 = vmatpush.bf16.msrb.mxu2 %v8132_v16 }
 0x6f8   :  { %5519 = vmatpush.bf16.msrb.mxu2 %v8131_v58 }
 0x6fb   :  { %5205 = vmatmul.bf16.gmra.mxu2 %v5095_v61 }
 0x6fc   :  { %5520 = vmatpush.bf16.msrb.mxu2 %v8130_v45 }
 0x700   :  { %5521 = vmatpush.bf16.msrb.mxu2 %v8129_v25 }
 0x703   :  { %7633 = vmatmul.msk.bf16.gmra.mxu3 %vm3934_vm5, %v5252_v24  ;;  %v5230_v24 = vpop.f32.mrf.mxu3 }
 0x70b   :  { %5210 = vmatmul.bf16.gmra.mxu2 %v5097_v14  ;;  %v5232_v43 = vpop.f32.mrf.mxu3 }
 0x713   :  { %7634 = vmatmul.msk.bf16.gmra.mxu3 %vm3934_vm5, %v5433_v11  ;;  %v5235_v7 = vpop.f32.mrf.mxu3 }
 0x71b   :  { %5349 = vmatmul.bf16.vlgmr.msra.gmra.mxu2 %v5245_v54  ;;  %v11487_v21 = vpop.f32.mrf.mxu3 }
 0x723   :  { %v5240_v42 = vpop.f32.mrf.mxu3 }
 0x72b   :  { %5354 = vmatmul.bf16.gmra.mxu2 %v5247_v53  ;;  %v11491_v23 = vpop.f32.mrf.mxu3 }
 0x733   :  { %v5379_v15 = vpop.f32.mrf.mxu3 }
 0x73b   :  { %5359 = vmatmul.bf16.gmra.mxu2 %v5249_v52  ;;  %v5381_v30 = vpop.f32.mrf.mxu3 }
 0x743   :  { %v5384_v35 = vpop.f32.mrf.mxu3 }
 0x74b   :  { %5364 = vmatmul.bf16.gmra.mxu2 %v5251_v34  ;;  %v5386_v2 = vpop.f32.mrf.mxu3 }
 0x753   :  { %v5389_v60 = vpop.f32.mrf.mxu3 }
 0x75b   :  { %5522 = vmatmul.bf16.vlgmr.msrb.gmra.mxu2 %v5247_v53  ;;  %v11501_v36 = vpop.f32.mrf.mxu3 }
 0x75e   :  { %v5196_v12 = vpop.f32.mrf.mxu2 }
 0x75f   :  { %v5226_v6 = vadd.f32 %v5225_v27, %v5196_v12 }
 0x763   :  { %v5394_v20 = vpop.f32.mrf.mxu3 }
 0x766   :  { %v5198_v41 = vpop.f32.mrf.mxu2 }
 0x767   :  { %v5228_v59 = vadd.f32 %v5227_v38, %v5198_v41 }
 0x76b   :  { %5527 = vmatmul.bf16.gmra.mxu2 %v5430_v31  ;;  %v11503_v29 = vpop.f32.mrf.mxu3 }
 0x76e   :  { %v5201_v9 = vpop.f32.mrf.mxu2 }
 0x76f   :  { %v5231_v49 = vadd.f32 %v5230_v24, %v5201_v9 }
 0x773   :  { %v5552_v13 = vpop.f32.mrf.mxu3 }
 0x776   :  { %v5203_v47 = vpop.f32.mrf.mxu2 }
 0x777   :  { %v5233_v27 = vadd.f32 %v5232_v43, %v5203_v47 }
 0x77b   :  { %5532 = vmatmul.bf16.gmra.mxu2 %v5251_v34  ;;  %v5554_v26 = vpop.f32.mrf.mxu3 }
 0x77e   :  { %v5206_v1 = vpop.f32.mrf.mxu2 }
 0x77f   :  { %v5236_v62 = vadd.f32 %v5235_v7, %v5206_v1 }
 0x783   :  { %v5557_v39 = vpop.f32.mrf.mxu3 }
 0x786   :  { %v11495_v63 = vpop.f32.mrf.mxu2 }
 0x78b   :  { %5537 = vmatmul.bf16.gmra.mxu2 %v5432_v10  ;;  %v5559_v16 = vpop.f32.mrf.mxu3 }
 0x78e   :  { %v5211_v5 = vpop.f32.mrf.mxu2 }
 0x78f   :  { %v5241_v14 = vadd.f32 %v5240_v42, %v5211_v5 }
 0x793   :  { %v5562_v41 = vpop.f32.mrf.mxu3 }
 0x796   :  { %v11499_v8 = vpop.f32.mrf.mxu2 }
 0x79e   :  { %v5350_v0 = vpop.f32.mrf.mxu2 }
 0x79f   :  { %v5351_v28 = vadd.f32 %v5350_v0, %v5226_v6 }
 0x7a1   :  { %v5380_v24 = vadd.f32 %v5379_v15, %v5351_v28 }
 0x7a6   :  { %v5352_v18 = vpop.f32.mrf.mxu2 }
 0x7a7   :  { %v5353_v44 = vadd.f32 %v5352_v18, %v5228_v59  ;;  %v5238_v18 = vadd.f32 %v11487_v21, %v11495_v63 }
 0x7a9   :  { %v5382_v55 = vadd.f32 %v5381_v30, %v5353_v44 }
 0x7ae   :  { %v5355_v50 = vpop.f32.mrf.mxu2 }
 0x7af   :  { %v5356_v61 = vadd.f32 %v5355_v50, %v5231_v49 }
 0x7b1   :  { %v5385_v34 = vadd.f32 %v5384_v35, %v5356_v61 }
 0x7b6   :  { %v5357_v40 = vpop.f32.mrf.mxu2 }
 0x7b7   :  { %v5358_v56 = vadd.f32 %v5357_v40, %v5233_v27  ;;  %v5243_v27 = vadd.f32 %v11491_v23, %v11499_v8 }
 0x7b9   :  { %v5387_v19 = vadd.f32 %v5386_v2, %v5358_v56 }
 0x7be   :  { %v5360_v33 = vpop.f32.mrf.mxu2 }
 0x7bf   :  { %v5361_v32 = vadd.f32 %v5360_v33, %v5236_v62 }
 0x7c1   :  { %v5390_v3 = vadd.f32 %v5389_v60, %v5361_v32  ;;  %v5564_v60 = vpop.f32.mrf.mxu3 }
 0x7c6   :  { %v5362_v53 = vpop.f32.mrf.mxu2 }
 0x7ce   :  { %v5365_v37 = vpop.f32.mrf.mxu2 }
 0x7cf   :  { %v5366_v46 = vadd.f32 %v5365_v37, %v5241_v14 }
 0x7d1   :  { %v11505_v17 = vadd.f32 %v5394_v20, %v5366_v46  ;;  %v5363_v20 = vadd.f32 %v5362_v53, %v5238_v18 }
 0x7d3   :  { %v5392_v63 = vadd.f32 %v11501_v36, %v5363_v20 }
 0x7d6   :  { %v11507_v11 = vpop.f32.mrf.mxu2 }
 0x7de   :  { %v5523_v48 = vpop.f32.mrf.mxu2 }
 0x7df   :  { %v5553_v25 = vadd.f32 %v5552_v13, %v5523_v48 }
 0x7e1   :  { %v11511_v4 = vadd.f32 %v5553_v25, %v5380_v24 }
 0x7e3   :  { %v5603_v42 = vmul.f32 %v11511_v4, %v11511_v4  ;;  %v5582_v1 = vsel %vm4831_vm11, %v11511_v4, 0.0 }
 0x7e5   :  { %v5611_v5 = vsel %vm4831_vm11, %v5603_v42, 0.0 }
 0x7e6   :  { %v5525_v54 = vpop.f32.mrf.mxu2 }
 0x7e7   :  { %v5555_v45 = vadd.f32 %v5554_v26, %v5525_v54 }
 0x7e9   :  { %v11509_v7 = vadd.f32 %v5555_v45, %v5382_v55  ;;  %v5368_v45 = vadd.f32 %v11507_v11, %v5243_v27 }
 0x7eb   :  { %v5604_v43 = vmul.f32 %v11509_v7, %v11509_v7  ;;  %v5583_v9 = vsel %vm4831_vm11, %v11509_v7, 0.0 }
 0x7ec   :  { %v5584_v10 = vadd.f32 %v5583_v9, %v5582_v1 }
 0x7ed   :  { %v5612_v15 = vsel %vm4831_vm11, %v5604_v43, 0.0 }
 0x7ee   :  { %v5528_v58 = vpop.f32.mrf.mxu2  ;;  %v5613_v0 = vadd.f32 %v5612_v15, %v5611_v5 }
 0x7ef   :  { %v5558_v52 = vadd.f32 %v5557_v39, %v5528_v58  ;;  %v5567_v39 = vpop.f32.mrf.mxu3 }
 0x7f1   :  { %v11513_v51 = vadd.f32 %v5558_v52, %v5385_v34 }
 0x7f3   :  { %v5605_v47 = vmul.f32 %v11513_v51, %v11513_v51  ;;  %v5585_v22 = vsel %vm4831_vm11, %v11513_v51, 0.0 }
 0x7f4   :  { %v5586_v28 = vadd.f32 %v5585_v22, %v5584_v10 }
 0x7f5   :  { %v5614_v35 = vsel %vm4831_vm11, %v5605_v47, 0.0 }
 0x7f6   :  { %v5530_v12 = vpop.f32.mrf.mxu2  ;;  %v5615_v61 = vadd.f32 %v5614_v35, %v5613_v0 }
 0x7f7   :  { %v5560_v38 = vadd.f32 %v5559_v16, %v5530_v12  ;;  %v5569_v24 = vpop.f32.mrf.mxu3 }
 0x7f9   :  { %v11517_v31 = vadd.f32 %v5560_v38, %v5387_v19  ;;  %v5397_v19 = vadd.f32 %v11503_v29, %v5368_v45 }
 0x7fb   :  { %v5606_v57 = vmul.f32 %v11517_v31, %v11517_v31  ;;  %v5587_v6 = vsel %vm4831_vm11, %v11517_v31, 0.0 }
 0x7fc   :  { %v5588_v40 = vadd.f32 %v5587_v6, %v5586_v28 }
 0x7fd   :  { %v5616_v49 = vsel %vm4831_vm11, %v5606_v57, 0.0 }
 0x7fe   :  { %v5533_v30 = vpop.f32.mrf.mxu2  ;;  %v5617_v32 = vadd.f32 %v5616_v49, %v5615_v61 }
 0x7ff   :  { %v5563_v2 = vadd.f32 %v5562_v41, %v5533_v30 }
 0x801   :  { %v11539_v50 = vadd.f32 %v5563_v2, %v5390_v3 }
 0x803   :  { %v5589_v62 = vsel %vm4831_vm11, %v11539_v50, 0.0  ;;  %v5607_v33 = vmul.f32 %v11539_v50, %v11539_v50 }
 0x804   :  { %v5590_v14 = vadd.f32 %v5589_v62, %v5588_v40  ;;  %v5580_v62 = vld [vmem:[%s11891_s8] sm:$0x1] }
 0x805   :  { %v5618_v37 = vsel %vm4831_vm11, %v5607_v33, 0.0 }
 0x806   :  { %v5619_v46 = vadd.f32 %v5618_v37, %v5617_v32  ;;  %v5535_v21 = vpop.f32.mrf.mxu2  ;;  %v5581_v37 = vld [vmem:[%s11892_s9] sm:$0x1] }
 0x807   :  { %v5565_v13 = vadd.f32 %v5564_v60, %v5535_v21 }
 0x809   :  { %v11547_v26 = vadd.f32 %v5565_v13, %v5392_v63 }
 0x80b   :  { %v5591_v53 = vsel %vm4831_vm11, %v11547_v26, 0.0  ;;  %v5608_v48 = vmul.f32 %v11547_v26, %v11547_v26 }
 0x80c   :  { %v5592_v54 = vadd.f32 %v5591_v53, %v5590_v14 }
 0x80d   :  { %v5620_v59 = vsel %vm4831_vm11, %v5608_v48, 0.0 }
 0x80e   :  { %v5621_v16 = vadd.f32 %v5620_v59, %v5619_v46  ;;  %v5538_v58 = vpop.f32.mrf.mxu2 }
 0x80f   :  { %v5568_v44 = vadd.f32 %v5567_v39, %v5538_v58 }
 0x811   :  { %v5578_v36 = vadd.f32 %v5568_v44, %v11505_v17 }
 0x813   :  { %v5593_v55 = vsel %vm4831_vm11, %v5578_v36, 0.0  ;;  %v5609_v56 = vmul.f32 %v5578_v36, %v5578_v36 }
 0x814   :  { %v5594_v25 = vadd.f32 %v5593_v55, %v5592_v54 }
 0x815   :  { %v5622_v52 = vsel %vm4831_vm11, %v5609_v56, 0.0 }
 0x816   :  { %v5623_v34 = vadd.f32 %v5622_v52, %v5621_v16  ;;  %v5540_v12 = vpop.f32.mrf.mxu2 }
 0x817   :  { %v5570_v38 = vadd.f32 %v5569_v24, %v5540_v12 }
 0x819   :  { %v5579_v41 = vadd.f32 %v5570_v38, %v5397_v19 }
 0x81b   :  { %v5595_v43 = vsel %vm4831_vm11, %v5579_v41, 0.0  ;;  %v5610_v23 = vmul.f32 %v5579_v41, %v5579_v41 }
 0x81c   :  { %v5596_v8 = vadd.f32 %v5595_v43, %v5594_v25 }
 0x81d   :  { %v5624_v17 = vsel %vm4831_vm11, %v5610_v23, 0.0 }
 0x81e   :  { %v5597_v11 = vrot.slane %v5596_v8, 4  ;;  %v5625_v42 = vadd.f32 %v5624_v17, %v5623_v34  ;;  %v8155_v34 = vld [vmem:[%s11893_s10 + $0x70] sm:$0xff] }
 0x820   :  { %v5598_v9 = vadd.f32 %v5597_v11, %v5596_v8  ;;  %v5626_v47 = vrot.slane %v5625_v42, 4 }
 0x822   :  { %v5599_v1 = vrot.slane %v5598_v9, 2  ;;  %v5627_v15 = vadd.f32 %v5626_v47, %v5625_v42 }
 0x824   :  { %v5600_v22 = vadd.f32 %v5599_v1, %v5598_v9  ;;  %v5628_v57 = vrot.slane %v5627_v15, 2 }
 0x826   :  { %v5601_v3 = vrot.slane %v5600_v22, 1  ;;  %v5629_v10 = vadd.f32 %v5628_v57, %v5627_v15  ;;  %v8146_v15 = vld [vmem:[%s11893_s10 + $0x28] sm:$0xff] }
 0x828   :  { %v5602_v30 = vadd.f32 %v5601_v3, %v5600_v22  ;;  %v5630_v29 = vrot.slane %v5629_v10, 1  ;;  %v8154_v22 = vld [vmem:[%s11893_s10 + $0x68] sm:$0xff] }
 0x82a   :  { %v5631_v5 = vadd.f32 %v5630_v29, %v5629_v10  ;;  %v5632_v35 = vmul.f32 0.03125, %v5602_v30 }
 0x82c   :  { %v5633_v6 = vmul.f32 0.03125, %v5631_v5  ;;  %v5634_v2 = vmul.f32 %v5632_v35, %v5632_v35 }
 0x82e   :  { %v5635_v0 = vsub.f32 %v5633_v6, %v5634_v2 }
 0x830   :  { %v5636_v28 = vmax.f32 %v5635_v0, 0.0 }
 0x832   :  { %v5637_v18 = vadd.f32 1e-05, %v5636_v28 }
 0x834   :  { %8241 = vrsqrt.f32 %v5637_v18  ;;  %vm5644_vm13 = vweird.f32 %v5637_v18 }
 0x83a   :  { %v8242_v49 = vpop.eup %8241 }
 0x83b   :  { %v5639_v60 = vmul.f32 %v8242_v49, %v5637_v18  ;;  %vm5645_vm12 = vweird.f32 %v8242_v49 }
 0x83c   :  { %vm5646_vm14 = vmor %vm5644_vm13, %vm5645_vm12 }
 0x83d   :  { %v5640_v61 = vmul.f32 %v8242_v49, %v5639_v60 }
 0x83f   :  { %v5641_v40 = vmul.f32 0.5, %v5640_v61  ;;  %v8145_v61 = vld [vmem:[%s11893_s10 + $0x20] sm:$0xff] }
 0x841   :  { %v5642_v20 = vsub.f32 1.5, %v5641_v40 }
 0x843   :  { %v5643_v33 = vmul.f32 %v8242_v49, %v5642_v20 }
 0x845   :  { %v5647_v32 = vsel %vm5646_vm14, %v8242_v49, %v5643_v33 }
 0x846   :  { %v5648_v14 = vmul.f32 %v5647_v32, %v5580_v62 }
 0x848   :  { %v5649_v46 = vmul.f32 %v5648_v14, %v5632_v35  ;;  %v5651_v21 = vperm.slane %v5648_v14, 0  ;;  %v8153_v14 = vld [vmem:[%s11893_s10 + $0x60] sm:$0xff] }
 0x84a   :  { %v5650_v63 = vsub.f32 %v5581_v37, %v5649_v46  ;;  %v5659_v13 = vmul.f32 %v5651_v21, %v5579_v41  ;;  %v5657_v53 = vmul.f32 %v5651_v21, %v11547_v26  ;;  %v5652_v48 = vmul.f32 %v5651_v21, %v11511_v4  ;;  %v8148_v26 = vld [vmem:[%s11893_s10 + $0x38] sm:$0xff] }
 0x84b   :  { %v5656_v39 = vmul.f32 %v5651_v21, %v11539_v50  ;;  %v5658_v54 = vmul.f32 %v5651_v21, %v5578_v36  ;;  %v5653_v16 = vmul.f32 %v5651_v21, %v11509_v7  ;;  %v5654_v58 = vmul.f32 %v5651_v21, %v11513_v51  ;;  %v8156_v4 = vld [vmem:[%s11893_s10 + $0x78] sm:$0xff]  ;;  %6340 = vmatpush.bf16.msra.mxu2 %v8148_v26 }
 0x84c   :  { %v5661_v59 = vperm.slane %v5650_v63, 0  ;;  %v5655_v44 = vmul.f32 %v5651_v21, %v11517_v31  ;;  %6353 = vmatpush.bf16.msra.mxu3 %v8156_v4  ;;  %v8147_v31 = vld [vmem:[%s11893_s10 + $0x30] sm:$0xff] }
 0x84d   :  { %v8151_v4 = vld [vmem:[%s11893_s10 + $0x50] sm:$0xff] }
 0x84e   :  { %v5670_v27 = vadd.f32 %v5661_v59, %v5659_v13  ;;  %v5664_v45 = vadd.f32 %v5661_v59, %v5653_v16  ;;  %v5668_v55 = vadd.f32 %v5661_v59, %v5657_v53  ;;  %v5663_v56 = vadd.f32 %v5661_v59, %v5652_v48 }
 0x84f   :  { %v5667_v50 = vadd.f32 %v5661_v59, %v5656_v39  ;;  %v5665_v36 = vadd.f32 %v5661_v59, %v5654_v58  ;;  %v5669_v25 = vadd.f32 %v5661_v59, %v5658_v54  ;;  %v5666_v7 = vadd.f32 %v5661_v59, %v5655_v44  ;;  %6341 = vmatpush.bf16.msra.mxu2 %v8147_v31  ;;  %v8144_v54 = vld [vmem:[%s11893_s10 + $0x18] sm:$0xff]  ;;  %v8150_v31 = vld [vmem:[%s11893_s10 + $0x48] sm:$0xff] }
 0x850   :  { %v5672_v52 = vmax.f32 %v5664_v45, 0.0  ;;  %v5676_v51 = vmax.f32 %v5668_v55, 0.0  ;;  %v5671_v24 = vmax.f32 %v5663_v56, 0.0  ;;  %6354 = vmatpush.bf16.msra.mxu3 %v8155_v34  ;;  %v5678_v57 = vmax.f32 %v5670_v27, 0.0  ;;  %v8152_v58 = vld [vmem:[%s11893_s10 + $0x58] sm:$0xff]  ;;  %v8143_v55 = vld [vmem:[%s11893_s10 + $0x10] sm:$0xff] }
 0x851   :  { %v5675_v12 = vmax.f32 %v5667_v50, 0.0  ;;  %v5673_v19 = vmax.f32 %v5665_v36, 0.0  ;;  %v5677_v38 = vmax.f32 %v5669_v25, 0.0  ;;  %v5674_v8 = vmax.f32 %v5666_v7, 0.0 }
 0x852   :  { %v5680_v41 = vpack.c.bf16 %v5672_v52, %v5672_v52  ;;  %v5684_v43 = vpack.c.bf16 %v5676_v51, %v5676_v51  ;;  %v5679_v23 = vpack.c.bf16 %v5671_v24, %v5671_v24  ;;  %v5686_v40 = vpack.c.bf16 %v5678_v57, %v5678_v57  ;;  %v8142_v52 = vld [vmem:[%s11893_s10 + $0x8] sm:$0xff]  ;;  %v8159_v57 = vld [vmem:[%s11893_s10 + $0x90] sm:$0xff] }
 0x853   :  { %v5683_v17 = vpack.c.bf16 %v5675_v12, %v5675_v12  ;;  %v5681_v11 = vpack.c.bf16 %v5673_v19, %v5673_v19  ;;  %v5685_v42 = vpack.c.bf16 %v5677_v38, %v5677_v38  ;;  %v5682_v35 = vpack.c.bf16 %v5674_v8, %v5674_v8  ;;  %6342 = vmatpush.bf16.msra.mxu2 %v8146_v15  ;;  %v8141_v12 = vld [vmem:[%s11893_s10] sm:$0xff]  ;;  %v8164_v38 = vld [vmem:[%s11893_s10 + $0xb8] sm:$0xff] }
 0x854   :  { %v5716_v9 = vunpack.c.l.b16 %v5680_v41  ;;  %v5717_v47 = vunpack.c.l.b16 %v5684_v43  ;;  %v5689_v1 = vunpack.c.l.b16 %v5679_v23  ;;  %6355 = vmatpush.bf16.msra.mxu3 %v8154_v22  ;;  %v5769_v59 = vunpack.c.l.b16 %v5686_v40  ;;  %v8149_v41 = vld [vmem:[%s11893_s10 + $0x40] sm:$0xff]  ;;  %v8172_v23 = vld [vmem:[%s11893_s10 + $0xf8] sm:$0xff] }
 0x855   :  { %v5690_v3 = vunpack.c.l.b16 %v5683_v17  ;;  %v5742_v10 = vunpack.c.l.b16 %v5681_v11  ;;  %v5743_v30 = vunpack.c.l.b16 %v5685_v42  ;;  %v5768_v32 = vunpack.c.l.b16 %v5682_v35  ;;  %v8163_v17 = vld [vmem:[%s11893_s10 + $0xb0] sm:$0xff]  ;;  %v8162_v42 = vld [vmem:[%s11893_s10 + $0xa8] sm:$0xff]  ;;  %v8160_v15 = vld [vmem:[%s11893_s10 + $0x98] sm:$0xff] }
 0x856   :  { %v11593_v29 = vunpack.i.l.s16 %v5716_v9  ;;  %v11595_v5 = vunpack.i.l.s16 %v5689_v1  ;;  %v11597_v6 = vunpack.i.l.s16 %v5717_v47  ;;  %v11641_v56 = vunpack.i.l.s16 %v5769_v59  ;;  %v8171_v11 = vld [vmem:[%s11893_s10 + $0xf0] sm:$0xff]  ;;  %v8170_v9 = vld [vmem:[%s11893_s10 + $0xe8] sm:$0xff]  ;;  %v8161_v47 = vld [vmem:[%s11893_s10 + $0xa0] sm:$0xff] }
 0x857   :  { %v11599_v2 = vunpack.i.l.s16 %v5690_v3  ;;  %v11601_v0 = vunpack.i.l.s16 %v5742_v10  ;;  %v11606_v60 = vunpack.i.l.s16 %v5743_v30  ;;  %6343 = vmatpush.bf16.msra.mxu2 %v8145_v61  ;;  %v11636_v45 = vunpack.i.l.s16 %v5768_v32  ;;  %v8169_v1 = vld [vmem:[%s11893_s10 + $0xe0] sm:$0xff]  ;;  %v8168_v22 = vld [vmem:[%s11893_s10 + $0xd8] sm:$0xff]  ;;  %v8167_v3 = vld [vmem:[%s11893_s10 + $0xd0] sm:$0xff] }
 0x858   :  { %v5725_v28 = vrot.slane %v11593_v29, 1  ;;  %v5708_v18 = vrot.slane %v11595_v5, 3  ;;  %v5699_v49 = vrot.slane %v11595_v5, 1  ;;  %v5734_v63 = vrot.slane %v11593_v29, 3  ;;  %6356 = vmatpush.bf16.msra.mxu3 %v8153_v14  ;;  %v8158_v10 = vld [vmem:[%s11893_s10 + $0x88] sm:$0xff]  ;;  %v8157_v35 = vld [vmem:[%s11893_s10 + $0x80] sm:$0xff] }
 0x859   :  { %v5709_v20 = vrot.slane %v11599_v2, 2  ;;  %v5760_v53 = vrot.slane %v11601_v0, 3  ;;  %v5761_v48 = vrot.slane %v11606_v60, 2  ;;  %v5735_v39 = vrot.slane %v11597_v6, 2  ;;  %v8166_v30 = vld [vmem:[%s11893_s10 + $0xc8] sm:$0xff]  ;;  %v8177_v59 = vld [vmem:[%s11893_s10 + $0x120] sm:$0xff] }
 0x85a   :  { %v5726_v62 = vsel %vm5696_vm15, %v11597_v6, %v5725_v28  ;;  %v5700_v33 = vsel %vm5696_vm15, %v11599_v2, %v5699_v49  ;;  %v5751_v16 = vrot.slane %v11601_v0, 1  ;;  %v5777_v7 = vrot.slane %v11636_v45, 1  ;;  %v8165_v28 = vld [vmem:[%s11893_s10 + $0xc0] sm:$0xff] }
 0x85b   :  { %v5727_v37 = vpack.c.b16 %v5726_v62, %v5726_v62  ;;  %v5710_v46 = vsel %vm5696_vm15, %v5709_v20, %v5708_v18  ;;  %v5701_v21 = vpack.c.b16 %v5700_v33, %v5700_v33  ;;  %v5762_v44 = vsel %vm5696_vm15, %v5761_v48, %v5760_v53  ;;  %6344 = vmatpush.bf16.msra.mxu2 %v8144_v54  ;;  %v8180_v33 = vld [vmem:[%s11893_s10 + $0x138] sm:$0xff]  ;;  %v8186_v48 = vld [vmem:[%s11893_s10 + $0x168] sm:$0xff] }
 0x85c   :  { %v5711_v13 = vpack.c.b16 %v5710_v46, %v5710_v46  ;;  %v5736_v27 = vsel %vm5696_vm15, %v5735_v39, %v5734_v63  ;;  %v5752_v26 = vsel %vm5696_vm15, %v11606_v60, %v5751_v16  ;;  %6357 = vmatpush.bf16.msra.mxu3 %v8152_v58  ;;  %v5763_v50 = vpack.c.b16 %v5762_v44, %v5762_v44  ;;  %v8187_v63 = vld [vmem:[%s11893_s10 + $0x170] sm:$0xff]  ;;  %v8185_v58 = vld [vmem:[%s11893_s10 + $0x160] sm:$0xff] }
 0x85d   :  { %5728 = vrot.lane.b32.xlu2 %v5727_v37, %s8243_s2  ;;  %5702 = vrot.lane.b32.xlu0 %v5701_v21, %s8243_s2  ;;  %v5737_v36 = vpack.c.b16 %v5736_v27, %v5736_v27  ;;  %v5753_v25 = vpack.c.b16 %v5752_v26, %v5752_v26  ;;  %v5786_v51 = vrot.slane %v11636_v45, 3  ;;  %v5787_v24 = vrot.slane %v11641_v56, 2  ;;  %v8188_v37 = vld [vmem:[%s11893_s10 + $0x178] sm:$0xff] }
 0x85e   :  { %5712 = vrot.lane.b32.xlu1 %v5711_v13, %s8243_s2  ;;  %v5778_v34 = vsel %vm5696_vm15, %v11641_v56, %v5777_v7  ;;  %v5695_v18 = vrot.slane %v11599_v2, 7  ;;  %v5705_v49 = vrot.slane %v11599_v2, 1  ;;  %v5704_v61 = vrot.slane %v11595_v5, 2  ;;  %v8178_v13 = vld [vmem:[%s11893_s10 + $0x128] sm:$0xff]  ;;  %v8183_v7 = vld [vmem:[%s11893_s10 + $0x150] sm:$0xff] }
 0x85f   :  { %6345 = vmatpush.bf16.msra.mxu2 %v8143_v55  ;;  %v5788_v19 = vsel %vm5696_vm15, %v5787_v24, %v5786_v51  ;;  %v5779_v43 = vpack.c.b16 %v5778_v34, %v5778_v34  ;;  %v5722_v53 = vrot.slane %v11597_v6, 7  ;;  %v5730_v39 = vrot.slane %v11593_v29, 2  ;;  %v8182_v24 = vld [vmem:[%s11893_s10 + $0x148] sm:$0xff] }
 0x860   :  { %6358 = vmatpush.bf16.msra.mxu3 %v8151_v4  ;;  %v5789_v8 = vpack.c.b16 %v5788_v19, %v5788_v19  ;;  %v5697_v40 = vsel %vm5696_vm15, %v5695_v18, %v11595_v5  ;;  %v5706_v20 = vsel %vm5696_vm15, %v5705_v49, %v5704_v61  ;;  %v8179_v5 = vld [vmem:[%s11893_s10 + $0x130] sm:$0xff]  ;;  %v5731_v54 = vrot.slane %v11597_v6, 1  ;;  %v8176_v6 = vld [vmem:[%s11893_s10 + $0x118] sm:$0xff]  ;;  %v8198_v49 = vld [vmem:[%s11893_s10 + $0x1c8] sm:$0xff] }
 0x861   :  { %v5698_v62 = vpack.c.b16 %v5697_v40, %v5697_v40  ;;  %v5707_v32 = vpack.c.b16 %v5706_v20, %v5706_v20  ;;  %v5723_v16 = vsel %vm5696_vm15, %v5722_v53, %v11593_v29  ;;  %v8184_v29 = vld [vmem:[%s11893_s10 + $0x158] sm:$0xff]  ;;  %v5748_v51 = vrot.slane %v11606_v60, 7  ;;  %v8189_v20 = vld [vmem:[%s11893_s10 + $0x180] sm:$0xff] }
 0x862   :  { %v5732_v44 = vsel %vm5696_vm15, %v5731_v54, %v5730_v39  ;;  %v5724_v55 = vpack.c.b16 %v5723_v16, %v5723_v16  ;;  %v5757_v34 = vrot.slane %v11606_v60, 1  ;;  %v8204_v60 = vld [vmem:[%s11893_s10 + $0x1f8] sm:$0xff]  ;;  %v5774_v18 = vrot.slane %v11641_v56, 7  ;;  %v8210_v39 = vld [vmem:[%s11896_s12 + $0x28] sm:$0xff]  ;;  %v8209_v54 = vld [vmem:[%s11896_s12 + $0x20] sm:$0xff] }
 0x863   :  { %6346 = vmatpush.bf16.msra.mxu2 %v8142_v52  ;;  %v5733_v4 = vpack.c.b16 %v5732_v44, %v5732_v44  ;;  %v8174_v52 = vld [vmem:[%s11893_s10 + $0x108] sm:$0xff]  ;;  %v5749_v19 = vsel %vm5696_vm15, %v5748_v51, %v11601_v0  ;;  %v5782_v61 = vrot.slane %v11636_v45, 2  ;;  %v5783_v40 = vrot.slane %v11641_v56, 1  ;;  %v8207_v44 = vld [vmem:[%s11896_s12 + $0x10] sm:$0xff] }
 0x864   :  { %6359 = vmatpush.bf16.msra.mxu3 %v8150_v31  ;;  %v5756_v31 = vrot.slane %v11601_v0, 2 }
 0x865   :  { %5764 = vrot.lane.b32.xlu2 %v5763_v50, %s8243_s2  ;;  %5738 = vrot.lane.b32.xlu0 %v5737_v36, %s8243_s2 }
 0x866   :  { %5754 = vrot.lane.b32.xlu1 %v5753_v25, %s8243_s2  ;;  %v8175_v25 = vld [vmem:[%s11893_s10 + $0x110] sm:$0xff] }
 0x867   :  { %6347 = vmatpush.bf16.msra.mxu2 %v8141_v12  ;;  %v8173_v12 = vld [vmem:[%s11893_s10 + $0x100] sm:$0xff] }
 0x868   :  { %6360 = vmatpush.bf16.msra.mxu3 %v8149_v41  ;;  %v8196_v41 = vld [vmem:[%s11893_s10 + $0x1b8] sm:$0xff] }
 0x86b   :  { %6366 = vmatpush.bf16.msrb.mxu2 %v8164_v38  ;;  %v8181_v38 = vld [vmem:[%s11893_s10 + $0x140] sm:$0xff] }
 0x86c   :  { %6379 = vmatpush.bf16.msrb.mxu3 %v8172_v23 }
 0x86d   :  { %5780 = vrot.lane.b32.xlu0 %v5779_v43, %s8243_s2  ;;  %v5758_v43 = vsel %vm5696_vm15, %v5757_v34, %v5756_v31 }
 0x86e   :  { %5790 = vrot.lane.b32.xlu1 %v5789_v8, %s8243_s2  ;;  %v5759_v0 = vpack.c.b16 %v5758_v43, %v5758_v43 }
 0x86f   :  { %6367 = vmatpush.bf16.msrb.mxu2 %v8163_v17  ;;  %v5750_v17 = vpack.c.b16 %v5749_v19, %v5749_v19 }
 0x870   :  { %6380 = vmatpush.bf16.msrb.mxu3 %v8171_v11  ;;  %v8195_v11 = vld [vmem:[%s11893_s10 + $0x1b0] sm:$0xff] }
 0x873   :  { %6368 = vmatpush.bf16.msrb.mxu2 %v8162_v42 }
 0x874   :  { %6381 = vmatpush.bf16.msrb.mxu3 %v8170_v9  ;;  %v8203_v9 = vld [vmem:[%s11893_s10 + $0x1f0] sm:$0xff] }
 0x877   :  { %6369 = vmatpush.bf16.msrb.mxu2 %v8161_v47 }
 0x878   :  { %6382 = vmatpush.bf16.msrb.mxu3 %v8169_v1  ;;  %v8194_v1 = vld [vmem:[%s11893_s10 + $0x1a8] sm:$0xff] }
 0x87b   :  { %6370 = vmatpush.bf16.msrb.mxu2 %v8160_v15  ;;  %v8202_v15 = vld [vmem:[%s11893_s10 + $0x1e8] sm:$0xff] }
 0x87c   :  { %6383 = vmatpush.bf16.msrb.mxu3 %v8168_v22  ;;  %v8193_v22 = vld [vmem:[%s11893_s10 + $0x1a0] sm:$0xff] }
 0x87f   :  { %6371 = vmatpush.bf16.msrb.mxu2 %v8159_v57  ;;  %v8201_v57 = vld [vmem:[%s11893_s10 + $0x1e0] sm:$0xff] }
 0x880   :  { %6384 = vmatpush.bf16.msrb.mxu3 %v8167_v3  ;;  %v8192_v3 = vld [vmem:[%s11893_s10 + $0x198] sm:$0xff] }
 0x883   :  { %6372 = vmatpush.bf16.msrb.mxu2 %v8158_v10  ;;  %v8200_v10 = vld [vmem:[%s11893_s10 + $0x1d8] sm:$0xff] }
 0x884   :  { %6385 = vmatpush.bf16.msrb.mxu3 %v8166_v30  ;;  %v8191_v30 = vld [vmem:[%s11893_s10 + $0x190] sm:$0xff] }
 0x887   :  { %6373 = vmatpush.bf16.msrb.mxu2 %v8157_v35  ;;  %v8199_v35 = vld [vmem:[%s11893_s10 + $0x1d0] sm:$0xff] }
 0x888   :  { %6386 = vmatpush.bf16.msrb.mxu3 %v8165_v28  ;;  %v8190_v28 = vld [vmem:[%s11893_s10 + $0x188] sm:$0xff] }
 0x8b7   :  { %v5729_v27 = vpop.permute.xlu2 %5728 }
 0x8b8   :  { %v5802_v50 = vsel %vm3934_vm5, %v5724_v55, %v5729_v27 }
 0x8bf   :  { %v5765_v8 = vpop.permute.xlu2 %5764 }
 0x8c0   :  { %v5814_v47 = vsel %vm3934_vm5, %v5759_v0, %v5765_v8 }
 0x8cf   :  { %v5703_v14 = vpop.permute.xlu0 %5702 }
 0x8d0   :  { %v5713_v46 = vpop.permute.xlu1 %5712  ;;  %v5794_v2 = vsel %vm3934_vm5, %v5698_v62, %v5703_v14  ;;  %v5775_v62 = vsel %vm5696_vm15, %v5774_v18, %v11636_v45 }
 0x8d1   :  { %v5798_v21 = vsel %vm3934_vm5, %v5707_v32, %v5713_v46  ;;  %6348 = vmatmul.bf16.vlgmr.msra.gmra.mxu2 %v5794_v2  ;;  %v5784_v32 = vsel %vm5696_vm15, %v5783_v40, %v5782_v61  ;;  %v5776_v46 = vpack.c.b16 %v5775_v62, %v5775_v62 }
 0x8d2   :  { %6361 = vmatmul.bf16.vlgmr.msra.gmra.mxu3 %v5798_v21  ;;  %6392 = vmatpush.bf16.msra.mxu2 %v8180_v33  ;;  %v8197_v33 = vld [vmem:[%s11893_s10 + $0x1c0] sm:$0xff]  ;;  %v5785_v56 = vpack.c.b16 %v5784_v32, %v5784_v32 }
 0x8d3   :  { %6405 = vmatpush.bf16.msra.mxu3 %v8188_v37 }
 0x8d6   :  { %6393 = vmatpush.bf16.msra.mxu2 %v8179_v5 }
 0x8d7   :  { %6406 = vmatpush.bf16.msra.mxu3 %v8187_v63  ;;  %v5739_v26 = vpop.permute.xlu0 %5738  ;;  %v8212_v63 = vld [vmem:[%s11896_s12 + $0x38] sm:$0xff] }
 0x8d8   :  { %v5806_v36 = vsel %vm3934_vm5, %v5733_v4, %v5739_v26  ;;  %v5755_v23 = vpop.permute.xlu1 %5754  ;;  %v8206_v4 = vld [vmem:[%s11896_s12 + $0x8] sm:$0xff] }
 0x8d9   :  { %v5810_v42 = vsel %vm3934_vm5, %v5750_v17, %v5755_v23 }
 0x8da   :  { %6394 = vmatpush.bf16.msra.mxu2 %v8178_v13 }
 0x8db   :  { %6407 = vmatpush.bf16.msra.mxu3 %v8186_v48  ;;  %v8211_v48 = vld [vmem:[%s11896_s12 + $0x30] sm:$0xff] }
 0x8de   :  { %6395 = vmatpush.bf16.msra.mxu2 %v8177_v59 }
 0x8df   :  { %6408 = vmatpush.bf16.msra.mxu3 %v8185_v58  ;;  %v5781_v14 = vpop.permute.xlu0 %5780  ;;  %v8208_v58 = vld [vmem:[%s11896_s12 + $0x18] sm:$0xff] }
 0x8e0   :  { %v5791_v37 = vpop.permute.xlu1 %5790  ;;  %v5818_v2 = vsel %vm3934_vm5, %v5776_v46, %v5781_v14 }
 0x8e1   :  { %6374 = vmatmul.bf16.vlgmr.msrb.gmra.mxu2 %v5802_v50  ;;  %v5822_v21 = vsel %vm3934_vm5, %v5785_v56, %v5791_v37  ;;  %v6529_v50 = vld [vmem:[%s11897_s14] sm:$0x3] }
 0x8e2   :  { %6387 = vmatmul.bf16.vlgmr.msrb.gmra.mxu3 %v5806_v36  ;;  %6396 = vmatpush.bf16.msra.mxu2 %v8176_v6  ;;  %v8246_v36 = vmov 0  }
 0x8e3   :  { %6409 = vmatpush.bf16.msra.mxu3 %v8184_v29  ;;  %v8205_v29 = vld [vmem:[%s11896_s12] sm:$0xff]  ;;  %8233 = vset.pattern.permute.xlu2 %v8246_v36 }
 0x8e4   :  { %8234 = vset.pattern.permute.xlu0 %v8246_v36  ;;  %6531 = vperm.xlu2 %8233, %v6529_v50  }
 0x8e6   :  { %6397 = vmatpush.bf16.msra.mxu2 %v8175_v25  ;;  %v8235_v25 = vld [vmem:[%s11894_s11] ss:$0 sm:$0xff] }
 0x8e7   :  { %6410 = vmatpush.bf16.msra.mxu3 %v8183_v7 }
 0x8ea   :  { %6398 = vmatpush.bf16.msra.mxu2 %v8174_v52 }
 0x8eb   :  { %6411 = vmatpush.bf16.msra.mxu3 %v8182_v24 }
 0x8ee   :  { %6399 = vmatpush.bf16.msra.mxu2 %v8173_v12 }
 0x8ef   :  { %6412 = vmatpush.bf16.msra.mxu3 %v8181_v38 }
 0x8f1   :  { %6400 = vmatmul.bf16.vlgmr.msra.gmra.mxu2 %v5810_v42 }
 0x8f2   :  { %6418 = vmatpush.bf16.msrb.mxu2 %v8196_v41  ;;  %6413 = vmatmul.bf16.vlgmr.msra.gmra.mxu3 %v5814_v47 }
 0x8f3   :  { %6431 = vmatpush.bf16.msrb.mxu3 %v8204_v60 }
 0x8f6   :  { %6419 = vmatpush.bf16.msrb.mxu2 %v8195_v11  ;;  %v6527_v11 = vlaneseq }
 0x8f7   :  { %6432 = vmatpush.bf16.msrb.mxu3 %v8203_v9  ;;  %v8236_v9 = vld [vmem:[%s11895_s13] ss:$0 sm:$0xff] }
 0x8f8   :  { %v6528_v42 = vand.u32 127, %v6527_v11 }
 0x8fa   :  { %6420 = vmatpush.bf16.msrb.mxu2 %v8194_v1 }
 0x8fb   :  { %6433 = vmatpush.bf16.msrb.mxu3 %v8202_v15 }
 0x8fe   :  { %6421 = vmatpush.bf16.msrb.mxu2 %v8193_v22 }
 0x8ff   :  { %6434 = vmatpush.bf16.msrb.mxu3 %v8201_v57 }
 0x902   :  { %6422 = vmatpush.bf16.msrb.mxu2 %v8192_v3 }
 0x903   :  { %6435 = vmatpush.bf16.msrb.mxu3 %v8200_v10 }
 0x906   :  { %6423 = vmatpush.bf16.msrb.mxu2 %v8191_v30 }
 0x907   :  { %6436 = vmatpush.bf16.msrb.mxu3 %v8199_v35 }
 0x90a   :  { %6424 = vmatpush.bf16.msrb.mxu2 %v8190_v28 }
 0x90b   :  { %6437 = vmatpush.bf16.msrb.mxu3 %v8198_v49 }
 0x90e   :  { %6425 = vmatpush.bf16.msrb.mxu2 %v8189_v20 }
 0x90f   :  { %6438 = vmatpush.bf16.msrb.mxu3 %v8197_v33 }
 0x911   :  { %6426 = vmatmul.bf16.vlgmr.msrb.gmra.mxu2 %v5818_v2 }
 0x912   :  { %6439 = vmatmul.bf16.vlgmr.msrb.gmra.mxu3 %v5822_v21  ;;  %6514 = vmatpush.bf16.msra.mxu2 %v8212_v63 }
 0x916   :  { %6515 = vmatpush.bf16.msra.mxu2 %v8211_v48 }
 0x91a   :  { %6516 = vmatpush.bf16.msra.mxu2 %v8210_v39 }
 0x91e   :  { %6517 = vmatpush.bf16.msra.mxu2 %v8209_v54 }
 0x922   :  { %6518 = vmatpush.bf16.msra.mxu2 %v8208_v58 }
 0x926   :  { %6519 = vmatpush.bf16.msra.mxu2 %v8207_v44 }
 0x92a   :  { %6520 = vmatpush.bf16.msra.mxu2 %v8206_v4 }
 0x92e   :  { %6521 = vmatpush.bf16.msra.mxu2 %v8205_v29 }
 0x93e   :  { %v6532_v47 = vpop.permute.xlu2 %6531 }
 0x93f   :  { %vm6533_vm0 = vcmp.eq.s32.totalorder %v6528_v42, %v6532_v47 }
 0x954   :  { %v6349_v45 = vpop.f32.mrf.mxu2 }
 0x955   :  { %v6362_v5 = vpop.f32.mrf.mxu3  ;;  %v6350_v51 = vadd.f32 %v8235_v25, %v6349_v45 }
 0x957   :  { %v6363_v24 = vadd.f32 %v6362_v5, %v6350_v51 }
 0x95c   :  { %v6351_v13 = vpop.f32.mrf.mxu2 }
 0x95d   :  { %v6364_v53 = vpop.f32.mrf.mxu3 }
 0x964   :  { %v6375_v59 = vpop.f32.mrf.mxu2 }
 0x965   :  { %v6388_v16 = vpop.f32.mrf.mxu3  ;;  %v6376_v31 = vadd.f32 %v6375_v59, %v6363_v24 }
 0x967   :  { %v6389_v34 = vadd.f32 %v6388_v16, %v6376_v31 }
 0x96c   :  { %v6377_v27 = vpop.f32.mrf.mxu2 }
 0x96d   :  { %v6390_v55 = vpop.f32.mrf.mxu3 }
 0x974   :  { %v6401_v26 = vpop.f32.mrf.mxu2 }
 0x975   :  { %v6414_v6 = vpop.f32.mrf.mxu3  ;;  %v6402_v12 = vadd.f32 %v6401_v26, %v6389_v34 }
 0x977   :  { %v6415_v19 = vadd.f32 %v6414_v6, %v6402_v12 }
 0x97c   :  { %v6403_v7 = vpop.f32.mrf.mxu2 }
 0x97d   :  { %v6416_v52 = vpop.f32.mrf.mxu3 }
 0x994   :  { %v6427_v38 = vpop.f32.mrf.mxu2 }
 0x995   :  { %v6428_v41 = vadd.f32 %v6427_v38, %v6415_v19  ;;  %v6440_v43 = vpop.f32.mrf.mxu3 }
 0x997   :  { %v6441_v60 = vadd.f32 %v6440_v43, %v6428_v41 }
 0x999   :  { %v6444_v23 = vmax.f32 %v6441_v60, 0.0 }
 0x99b   :  { %v6445_v8 = vpack.c.bf16 %v6444_v23, %v6444_v23 }
 0x99c   :  { %v6429_v17 = vpop.f32.mrf.mxu2 }
 0x99d   :  { %v6442_v0 = vpop.f32.mrf.mxu3  ;;  %6522 = vmatmul.bf16.vlgmr.msra.gmra.mxu2 %v6445_v8 }
 0xa20   :  { %v6523_v1 = vpop.f32.mrf.mxu2 }
 0xa21   :  { %v6524_v15 = vadd.f32 %v8236_v9, %v6523_v1 }
 0xa23   :  { %v6534_v22 = vsel %vm6533_vm0, %v6524_v15, 0.0 }
 0xa24   :  { %v6536_v57 = vsel %vm6535_vm1, %v6534_v22, 0.0 }
 0xa25   :  { %6537 = vadd.xlane.f32.xlu0 %v6536_v57 }
 0xa28   :  { %v6525_v3 = vpop.f32.mrf.mxu2 }
 0xa98   :  { %v6538_v10 = vpop.xlane.xlu0 %6537 }
 0xa99   :  { %6540 = vst.msk [vmem:[%s11898_s15] sm:$0x3] %vm6539_vm2, %v6538_v10 }

</bundles_post_ra>
